<compile_context>
chip_gen: v7x
topology: tpu7x:2x2x1
jax: 0.10.0
libtpu: 0.0.40
codegen_flags: <defaults>
</compile_context>

<pallas_src>
import functools

import jax
import jax.numpy as jnp
from jax import lax
from jax.experimental import pallas as pl
from jax.experimental.pallas import tpu as pltpu

_BN_EPS = 1e-5
_VMEM_LIMIT_BYTES = 32 * 1024 * 1024  # far above worst-case tile footprint


# ----------------------------------------------------------------------------
# tiling helpers
# ----------------------------------------------------------------------------
def _round_up(x, m):
    return ((x + m - 1) // m) * m


def _k_tiling(K):
    """Return (Kp, tk) with Kp % tk == 0.  Large K uses 512-deep K tiles."""
    Kp = _round_up(K, 128)
    if Kp <= 1024:
        return Kp, Kp
    return _round_up(K, 512), 512


def _n_tiling(N):
    Np = _round_up(N, 128)
    tn = 256 if Np % 256 == 0 else Np
    return Np, tn


def _m_tiling(M):
    Mp = _round_up(M, 8)
    if Mp <= 512:
        return Mp, Mp
    return _round_up(M, 512), 512


# ----------------------------------------------------------------------------
# data-movement glue (im2col patches, nearest upsample) -- stays in JAX
# ----------------------------------------------------------------------------
def _extract_patches(x, k, stride, pad):
    """x: (N,H,W,C) -> patches (N*Ho*Wo, k*k*C), Ho, Wo."""
    N, H, W, C = x.shape
    xp = jnp.pad(x, ((0, 0), (pad, pad), (pad, pad), (0, 0)))
    Ho = (H + 2 * pad - k) // stride + 1
    Wo = (W + 2 * pad - k) // stride + 1
    cols = []
    for dh in range(k):
        for dw in range(k):
            cols.append(xp[:, dh:dh + stride * (Ho - 1) + 1:stride,
                           dw:dw + stride * (Wo - 1) + 1:stride, :])
    patches = jnp.concatenate(cols, axis=-1)
    return patches.reshape(N * Ho * Wo, k * k * C), Ho, Wo


def _nearest_upsample(x, Hd, Wd):
    """PyTorch F.interpolate(mode='nearest'): src = floor(dst * Hs / Hd)."""
    _, Hs, Ws, _ = x.shape
    hi = (jnp.arange(Hd) * Hs) // Hd
    wi = (jnp.arange(Wd) * Ws) // Wd
    return x[:, hi][:, :, wi]


# ----------------------------------------------------------------------------
# Pallas kernel A: bf16 matmul, f32 accumulation into the output block,
# optional per-channel sum output (BN stats) or residual add epilogue.
# ----------------------------------------------------------------------------
def _make_matmul_kernel(use_res, compute_stats):
    def kernel(*refs):
        it = iter(refs)
        p_ref = next(it)                                # (tm, tk) bf16
        w_ref = next(it)                                # (tk, tn) bf16
        r_ref = next(it) if use_res else None           # (tm, tn) f32
        y_ref = next(it)                                # (tm, tn) f32
        s_ref = next(it) if compute_stats else None     # (1,  tn) f32

        i = pl.program_id(1)          # M-tile index
        kq = pl.program_id(2)         # K-tile index
        nk = pl.num_programs(2)

        @pl.when(kq == 0)
        def _():
            y_ref[...] = jnp.zeros_like(y_ref)

        if compute_stats:
            @pl.when(jnp.logical_and(i == 0, kq == 0))
            def _():
                s_ref[...] = jnp.zeros_like(s_ref)

        y_ref[...] += jnp.dot(p_ref[...], w_ref[...],
                              preferred_element_type=jnp.float32)

        if compute_stats or use_res:
            @pl.when(kq == nk - 1)
            def _():
                if compute_stats:
                    # padded patch rows are exactly zero -> contribute 0 here.
                    s_ref[...] += jnp.sum(y_ref[...], axis=0, keepdims=True)
                if use_res:
                    y_ref[...] += r_ref[...]

    return kernel


# ----------------------------------------------------------------------------
# Pallas kernel B: per-channel sum((y - mean)^2), padded rows masked out.
# ----------------------------------------------------------------------------
def _make_var_kernel(real_m, tm):
    inv_m = 1.0 / float(real_m)

    def kernel(y_ref, s1_ref, m2_ref):
        i = pl.program_id(1)

        @pl.when(i == 0)
        def _():
            m2_ref[...] = jnp.zeros_like(m2_ref)

        mean = s1_ref[...] * inv_m                      # (1, tn)
        d = y_ref[...] - mean                           # (tm, tn)
        rows = lax.broadcasted_iota(jnp.int32, d.shape, 0) + i * tm
        d = jnp.where(rows < real_m, d, 0.0)
        m2_ref[...] += jnp.sum(d * d, axis=0, keepdims=True)

    return kernel


# ----------------------------------------------------------------------------
# Pallas kernel C: normalize (training-mode BN, biased var), gamma/beta, ReLU.
# ----------------------------------------------------------------------------
def _make_bn_apply_kernel(real_m, eps):
    inv_m = 1.0 / float(real_m)

    def kernel(y_ref, s1_ref, m2_ref, g_ref, b_ref, o_ref):
        mean = s1_ref[...] * inv_m
        var = m2_ref[...] * inv_m
        scale = lax.rsqrt(var + eps) * g_ref[...]
        shift = b_ref[...] - mean * scale
        o_ref[...] = jnp.maximum(y_ref[...] * scale + shift, 0.0)

    return kernel


# ----------------------------------------------------------------------------
# pallas_call wrappers
# ----------------------------------------------------------------------------
def _channel_m2(y, s1, real_m, Mp, Np, tm, tn):
    gm, gn = Mp // tm, Np // tn
    return pl.pallas_call(
        _make_var_kernel(real_m, tm),
        out_shape=jax.ShapeDtypeStruct((1, Np), jnp.float32),
        grid_spec=pltpu.PrefetchScalarGridSpec(
            num_scalar_prefetch=0,
            grid=(gn, gm),
            in_specs=[pl.BlockSpec((tm, tn), lambda j, i: (i, j)),
                      pl.BlockSpec((1, tn), lambda j, i: (0, j))],
            out_specs=pl.BlockSpec((1, tn), lambda j, i: (0, j))),
        compiler_params=pltpu.CompilerParams(
            dimension_semantics=("parallel", "arbitrary"),
            vmem_limit_bytes=_VMEM_LIMIT_BYTES),
    )(y, s1)


def _bn_relu_apply(y, s1, m2, gamma, beta, real_m, Mp, Np, tm, tn):
    gm, gn = Mp // tm, Np // tn
    return pl.pallas_call(
        _make_bn_apply_kernel(real_m, _BN_EPS),
        out_shape=jax.ShapeDtypeStruct((Mp, Np), jnp.float32),
        grid_spec=pltpu.PrefetchScalarGridSpec(
            num_scalar_prefetch=0,
            grid=(gm, gn),
            in_specs=[pl.BlockSpec((tm, tn), lambda i, j: (i, j)),
                      pl.BlockSpec((1, tn), lambda i, j: (0, j)),
                      pl.BlockSpec((1, tn), lambda i, j: (0, j)),
                      pl.BlockSpec((1, tn), lambda i, j: (0, j)),
                      pl.BlockSpec((1, tn), lambda i, j: (0, j))],
            out_specs=pl.BlockSpec((tm, tn), lambda i, j: (i, j))),
        compiler_params=pltpu.CompilerParams(
            dimension_semantics=("parallel", "parallel"),
            vmem_limit_bytes=_VMEM_LIMIT_BYTES),
    )(y, s1, m2, gamma, beta)


def pallas_conv(x, lw, *, residual=None, bn_relu=False):
    """x: (N,H,W,Cin) f32.  lw: prepared layer dict.  Returns (N,Ho,Wo,Cout) f32."""
    N = x.shape[0]
    ksz, stride, pad, cout = lw['k'], lw['stride'], lw['pad'], lw['cout']

    patches, Ho, Wo = _extract_patches(x.astype(jnp.bfloat16), ksz, stride, pad)
    M, K = patches.shape
    Mp, tm = _m_tiling(M)
    Kp, tk, Np, tn = lw['Kp'], lw['tk'], lw['Np'], lw['tn']

    P = jnp.pad(patches, ((0, Mp - M), (0, Kp - K)))          # bf16, zero pad

    use_res = residual is not None
    in_arrays = [P, lw['w2d']]
    in_specs = [
        pl.BlockSpec((tm, tk), lambda j, i, q: (i, q)),
        pl.BlockSpec((tk, tn), lambda j, i, q: (q, j)),
    ]
    if use_res:
        R = jnp.pad(residual.astype(jnp.float32).reshape(M, cout),
                    ((0, Mp - M), (0, Np - cout)))
        in_arrays.append(R)
        in_specs.append(pl.BlockSpec((tm, tn), lambda j, i, q: (i, j)))

    out_shape = [jax.ShapeDtypeStruct((Mp, Np), jnp.float32)]
    out_specs = [pl.BlockSpec((tm, tn), lambda j, i, q: (i, j))]
    if bn_relu:
        out_shape.append(jax.ShapeDtypeStruct((1, Np), jnp.float32))
        out_specs.append(pl.BlockSpec((1, tn), lambda j, i, q: (0, j)))

    gm, gn, gk = Mp // tm, Np // tn, Kp // tk
    dims = (("parallel", "arbitrary", "arbitrary") if bn_relu
            else ("parallel", "parallel", "arbitrary"))

    outs = pl.pallas_call(
        _make_matmul_kernel(use_res, bn_relu),
        out_shape=tuple(out_shape),
        grid_spec=pltpu.PrefetchScalarGridSpec(
            num_scalar_prefetch=0,
            grid=(gn, gm, gk),
            in_specs=in_specs,
            out_specs=out_specs),
        compiler_params=pltpu.CompilerParams(
            dimension_semantics=dims,
            vmem_limit_bytes=_VMEM_LIMIT_BYTES),
    )(*in_arrays)

    y = outs[0]
    if bn_relu:
        s1 = outs[1]
        m2 = _channel_m2(y, s1, M, Mp, Np, tm, tn)
        y = _bn_relu_apply(y, s1, m2, lw['gamma'], lw['beta'], M, Mp, Np, tm, tn)

    return y[:M, :cout].reshape(N, Ho, Wo, cout)


# ----------------------------------------------------------------------------
# layer definitions / parameter preparation (hoisted out of the forward path)
# ----------------------------------------------------------------------------
_LAYER_DEFS = {
    # name:     (k, stride, pad, cin, cout, bn_name or None)
    'conv1':    (3, 1, 1, 1, 64, 'bn1'),
    'layer1':   (7, 2, 3, 64, 128, 'b1'),
    'layer2':   (7, 2, 3, 128, 256, 'b2'),
    'layer3':   (7, 2, 3, 256, 512, 'b3'),
    'layer4':   (7, 2, 3, 512, 1024, 'b4'),
    'toplayer': (1, 1, 0, 1024, 64, None),
    'lat1':     (1, 1, 0, 512, 64, None),
    'lat2':     (1, 1, 0, 256, 64, None),
    'lat3':     (1, 1, 0, 128, 64, None),
    'lat4':     (1, 1, 0, 64, 64, None),
    'fin1':     (3, 1, 1, 64, 3, None),
    'fin2':     (3, 1, 1, 64, 3, None),
    'fin3':     (3, 1, 1, 64, 3, None),
    'fin4':     (3, 1, 1, 64, 3, None),
}


def prepare_params(params):
    """Reshape/pad/bf16-cast weights once; pad BN gamma/beta to (1, Np)."""
    prep = {}
    for name, (k, s, p, cin, cout, bn) in _LAYER_DEFS.items():
        K = k * k * cin
        Kp, tk = _k_tiling(K)
        Np, tn = _n_tiling(cout)
        w2d = params[name].reshape(K, cout)
        w2d = jnp.pad(w2d, ((0, Kp - K), (0, Np - cout))).astype(jnp.bfloat16)
        lw = dict(k=k, stride=s, pad=p, cin=cin, cout=cout,
                  K=K, Kp=Kp, tk=tk, Np=Np, tn=tn, w2d=w2d)
        if bn is not None:
            g = params[bn + '_g'].reshape(1, cout).astype(jnp.float32)
            b = params[bn + '_b'].reshape(1, cout).astype(jnp.float32)
            lw['gamma'] = jnp.pad(g, ((0, 0), (0, Np - cout)))
            lw['beta'] = jnp.pad(b, ((0, 0), (0, Np - cout)))
        prep[name] = lw
    return prep


# ----------------------------------------------------------------------------
# FPN1 forward (Pallas)
# ----------------------------------------------------------------------------
def fpn1_forward(prep, x_nchw):
    x = jnp.transpose(x_nchw, (0, 2, 3, 1))  # NCHW -> NHWC

    c1 = pallas_conv(x, prep['conv1'], bn_relu=True)
    c2 = pallas_conv(c1, prep['layer1'], bn_relu=True)
    c3 = pallas_conv(c2, prep['layer2'], bn_relu=True)
    c4 = pallas_conv(c3, prep['layer3'], bn_relu=True)
    c5 = pallas_conv(c4, prep['layer4'], bn_relu=True)

    p5 = pallas_conv(c5, prep['toplayer'])
    p4 = pallas_conv(c4, prep['lat1'],
                     residual=_nearest_upsample(p5, c4.shape[1], c4.shape[2]))
    p3 = pallas_conv(c3, prep['lat2'],
                     residual=_nearest_upsample(p4, c3.shape[1], c3.shape[2]))
    p2 = pallas_conv(c2, prep['lat3'],
                     residual=_nearest_upsample(p3, c2.shape[1], c2.shape[2]))
    p1 = pallas_conv(c1, prep['lat4'],
                     residual=_nearest_upsample(p2, c1.shape[1], c1.shape[2]))

    o4 = pallas_conv(p4, prep['fin4'])
    o3 = pallas_conv(p3, prep['fin3'])
    o2 = pallas_conv(p2, prep['fin2'])
    o1 = pallas_conv(p1, prep['fin1'])

    to_nchw = lambda t: jnp.transpose(t, (0, 3, 1, 2))
    return tuple(to_nchw(t) for t in (o4, o3, o2, o1))


# ----------------------------------------------------------------------------
# pure-JAX reference (bf16 conv operands, f32 accumulation + f32 BN -- matches
# the deliberate bf16-MXU-feed choice of the Pallas path)
# ----------------------------------------------------------------------------
def _ref_conv(x, w, stride, pad):
    return lax.conv_general_dilated(
        x.astype(jnp.bfloat16), w.astype(jnp.bfloat16),
        (stride, stride), [(pad, pad), (pad, pad)],
        dimension_numbers=('NHWC', 'HWIO', 'NHWC'),
        preferred_element_type=jnp.float32)


def _ref_bn_relu(x, g, b):
    mean = jnp.mean(x, axis=(0, 1, 2), keepdims=True)
    var = jnp.var(x, axis=(0, 1, 2), keepdims=True)
    y = (x - mean) * lax.rsqrt(var + _BN_EPS) * g + b
    return jnp.maximum(y, 0.0)


def fpn1_reference(params, x_nchw):
    x = jnp.transpose(x_nchw, (0, 2, 3, 1))

    def cbr(inp, wname, bname, stride, pad):
        y = _ref_conv(inp, params[wname], stride, pad)
        return _ref_bn_relu(y, params[bname + '_g'], params[bname + '_b'])

    c1 = cbr(x, 'conv1', 'bn1', 1, 1)
    c2 = cbr(c1, 'layer1', 'b1', 2, 3)
    c3 = cbr(c2, 'layer2', 'b2', 2, 3)
    c4 = cbr(c3, 'layer3', 'b3', 2, 3)
    c5 = cbr(c4, 'layer4', 'b4', 2, 3)

    p5 = _ref_conv(c5, params['toplayer'], 1, 0)
    p4 = _nearest_upsample(p5, c4.shape[1], c4.shape[2]) + _ref_conv(c4, params['lat1'], 1, 0)
    p3 = _nearest_upsample(p4, c3.shape[1], c3.shape[2]) + _ref_conv(c3, params['lat2'], 1, 0)
    p2 = _nearest_upsample(p3, c2.shape[1], c2.shape[2]) + _ref_conv(c2, params['lat3'], 1, 0)
    p1 = _nearest_upsample(p2, c1.shape[1], c1.shape[2]) + _ref_conv(c1, params['lat4'], 1, 0)

    o4 = _ref_conv(p4, params['fin4'], 1, 1)
    o3 = _ref_conv(p3, params['fin3'], 1, 1)
    o2 = _ref_conv(p2, params['fin2'], 1, 1)
    o1 = _ref_conv(p1, params['fin1'], 1, 1)

    to_nchw = lambda t: jnp.transpose(t, (0, 3, 1, 2))
    return tuple(to_nchw(t) for t in (o4, o3, o2, o1))


# ----------------------------------------------------------------------------
# deterministic parameter init (module shapes; HWIO weight layout)
# ----------------------------------------------------------------------------
def init_params(key):
    ks = jax.random.split(key, 14)

    def w(k, ksz, cin, cout):
        return (jax.random.normal(k, (ksz, ksz, cin, cout), jnp.float32)
                * (2.0 / (ksz * ksz * cin)) ** 0.5)

    p = {
        'conv1':    w(ks[0], 3, 1, 64),
        'layer1':   w(ks[1], 7, 64, 128),
        'layer2':   w(ks[2], 7, 128, 256),
        'layer3':   w(ks[3], 7, 256, 512),
        'layer4':   w(ks[4], 7, 512, 1024),
        'toplayer': w(ks[5], 1, 1024, 64),
        'lat1':     w(ks[6], 1, 512, 64),
        'lat2':     w(ks[7], 1, 256, 64),
        'lat3':     w(ks[8], 1, 128, 64),
        'lat4':     w(ks[9], 1, 64, 64),
        'fin1':     w(ks[10], 3, 64, 3),
        'fin2':     w(ks[11], 3, 64, 3),
        'fin3':     w(ks[12], 3, 64, 3),
        'fin4':     w(ks[13], 3, 64, 3),
    }
    for name, c in (('bn1', 64), ('b1', 128), ('b2', 256), ('b3', 512), ('b4', 1024)):
        p[name + '_g'] = jnp.ones((c,), jnp.float32)   # PyTorch BN default weight
        p[name + '_b'] = jnp.zeros((c,), jnp.float32)  # PyTorch BN default bias
    return p


if __name__ == "__main__":
    key = jax.random.PRNGKey(0)
    pkey, xkey = jax.random.split(key)
    params = init_params(pkey)
    prep = prepare_params(params)   # weight pad/cast hoisted out of forward

    # module expects a single-channel input (conv1: 1 -> 64)
    x = jax.random.normal(xkey, (2, 1, 16, 16), jnp.float32)

    fwd = jax.jit(functools.partial(fpn1_forward, prep))
    outs = jax.block_until_ready(fwd(x))

    expected_shapes = [(2, 3, 2, 2), (2, 3, 4, 4), (2, 3, 8, 8), (2, 3, 16, 16)]
    refs = fpn1_reference(params, x)
    for o, r, es in zip(outs, refs, expected_shapes):
        assert o.shape == es, (o.shape, es)
        if not jnp.allclose(o, r, rtol=5e-2, atol=5e-2):
            raise AssertionError(
                "mismatch vs reference, max abs diff = %e" %
                float(jnp.max(jnp.abs(o - r))))

    print("KERNEL_OK")
</pallas_src>

<mosaic_0001>
module attributes {stable_mosaic.version = 11 : i64} {
  func.func @kernel(%arg0: i32, %arg1: i32, %arg2: i32, %arg3: memref<512x128xbf16, #tpu.memory_space<vmem>>, %arg4: memref<128x128xbf16, #tpu.memory_space<vmem>>, %arg5: memref<512x128xf32, #tpu.memory_space<vmem>>, %arg6: memref<1x128xf32, #tpu.memory_space<vmem>>) attributes {dimension_semantics = [#tpu.dimension_semantics<parallel>, #tpu.dimension_semantics<arbitrary>, #tpu.dimension_semantics<arbitrary>], iteration_bounds = array<i64: 1, 1, 1>, scalar_prefetch = 0 : i64, scratch_operands = 0 : i64, tpu.core_type = #tpu.core_type<tc>, window_params = [{transform_indices = @transform_0, window_bounds = array<i64: 512, 128>}, {transform_indices = @transform_1, window_bounds = array<i64: 128, 128>}, {transform_indices = @transform_2, window_bounds = array<i64: 512, 128>}, {transform_indices = @transform_3, window_bounds = array<i64: 1, 128>}]} {
    %c0_i32 = arith.constant 0 : i32
    %0 = arith.cmpi eq, %arg2, %c0_i32 : i32
    %1 = arith.extui %0 : i1 to i32
    %c0_i32_0 = arith.constant 0 : i32
    %2 = arith.cmpi ne, %1, %c0_i32_0 : i32
    scf.if %2 {
      %cst_13 = arith.constant 0.000000e+00 : f32
      %17 = vector.broadcast %cst_13 : f32 to vector<512x128xf32>
      %c0_14 = arith.constant 0 : index
      %c0_15 = arith.constant 0 : index
      %18 = vector.load %arg5[%c0_14, %c0_15] : memref<512x128xf32, #tpu.memory_space<vmem>>, vector<512x128xf32>
      tpu.vector_store %arg5[%c0_14, %c0_15], %17 {strides = array<i32>} : memref<512x128xf32, #tpu.memory_space<vmem>>, vector<512x128xf32>,
    } else {
    }
    %c0_i32_1 = arith.constant 0 : i32
    %3 = arith.cmpi eq, %arg1, %c0_i32_1 : i32
    %c0_i32_2 = arith.constant 0 : i32
    %4 = arith.cmpi eq, %arg2, %c0_i32_2 : i32
    %5 = arith.andi %3, %4 : i1
    %6 = arith.extui %5 : i1 to i32
    %c0_i32_3 = arith.constant 0 : i32
    %7 = arith.cmpi ne, %6, %c0_i32_3 : i32
    scf.if %7 {
      %cst_13 = arith.constant 0.000000e+00 : f32
      %17 = vector.broadcast %cst_13 : f32 to vector<1x128xf32>
      %c0_14 = arith.constant 0 : index
      %c0_15 = arith.constant 0 : index
      %18 = vector.load %arg6[%c0_14, %c0_15] : memref<1x128xf32, #tpu.memory_space<vmem>>, vector<1x128xf32>
      tpu.vector_store %arg6[%c0_14, %c0_15], %17 {strides = array<i32>} : memref<1x128xf32, #tpu.memory_space<vmem>>, vector<1x128xf32>,
    } else {
    }
    %c0 = arith.constant 0 : index
    %c0_4 = arith.constant 0 : index
    %8 = vector.load %arg5[%c0, %c0_4] : memref<512x128xf32, #tpu.memory_space<vmem>>, vector<512x128xf32>
    %c0_5 = arith.constant 0 : index
    %c0_6 = arith.constant 0 : index
    %9 = vector.load %arg3[%c0_5, %c0_6] : memref<512x128xbf16, #tpu.memory_space<vmem>>, vector<512x128xbf16>
    %c0_7 = arith.constant 0 : index
    %c0_8 = arith.constant 0 : index
    %10 = vector.load %arg4[%c0_7, %c0_8] : memref<128x128xbf16, #tpu.memory_space<vmem>>, vector<128x128xbf16>
    %cst = arith.constant dense<0.000000e+00> : vector<512x128xf32>
    %11 = tpu.matmul %9, %10, %cst {dimension_numbers = #tpu.dot_dimension_numbers<[1], [0], [0], [1], [0, 0, 1, 1], [], []>} : vector<512x128xbf16>, vector<128x128xbf16>, vector<512x128xf32> -> vector<512x128xf32>
    %12 = arith.addf %8, %11 : vector<512x128xf32>
    %c0_9 = arith.constant 0 : index
    %c0_10 = arith.constant 0 : index
    %13 = vector.load %arg5[%c0_9, %c0_10] : memref<512x128xf32, #tpu.memory_space<vmem>>, vector<512x128xf32>
    tpu.vector_store %arg5[%c0_9, %c0_10], %12 {strides = array<i32>} : memref<512x128xf32, #tpu.memory_space<vmem>>, vector<512x128xf32>,
    %c0_i32_11 = arith.constant 0 : i32
    %14 = arith.cmpi eq, %arg2, %c0_i32_11 : i32
    %15 = arith.extui %14 : i1 to i32
    %c0_i32_12 = arith.constant 0 : i32
    %16 = arith.cmpi ne, %15, %c0_i32_12 : i32
    scf.if %16 {
      %c0_13 = arith.constant 0 : index
      %c0_14 = arith.constant 0 : index
      %17 = vector.load %arg6[%c0_13, %c0_14] : memref<1x128xf32, #tpu.memory_space<vmem>>, vector<1x128xf32>
      %c0_15 = arith.constant 0 : index
      %c0_16 = arith.constant 0 : index
      %18 = vector.load %arg5[%c0_15, %c0_16] : memref<512x128xf32, #tpu.memory_space<vmem>>, vector<512x128xf32>
      %cst_17 = arith.constant dense<0.000000e+00> : vector<128xf32>
      %19 = vector.multi_reduction <add>, %18, %cst_17 [0] : vector<512x128xf32> to vector<128xf32>
      %20 = vector.shape_cast %19 : vector<128xf32> to vector<1x128xf32>
      %21 = arith.addf %17, %20 : vector<1x128xf32>
      %c0_18 = arith.constant 0 : index
      %c0_19 = arith.constant 0 : index
      %22 = vector.load %arg6[%c0_18, %c0_19] : memref<1x128xf32, #tpu.memory_space<vmem>>, vector<1x128xf32>
      tpu.vector_store %arg6[%c0_18, %c0_19], %21 {strides = array<i32>} : memref<1x128xf32, #tpu.memory_space<vmem>>, vector<1x128xf32>,
    } else {
    }
    return
  }
  func.func @transform_0(%arg0: i32, %arg1: i32, %arg2: i32) -> (i32, i32) {
    %c0_i32 = arith.constant 0 : i32
    return %arg1, %arg2 : i32, i32
  }
  func.func @transform_1(%arg0: i32, %arg1: i32, %arg2: i32) -> (i32, i32) {
    %c0_i32 = arith.constant 0 : i32
    return %arg2, %arg0 : i32, i32
  }
  func.func @transform_2(%arg0: i32, %arg1: i32, %arg2: i32) -> (i32, i32) {
    %c0_i32 = arith.constant 0 : i32
    return %arg1, %arg0 : i32, i32
  }
  func.func @transform_3(%arg0: i32, %arg1: i32, %arg2: i32) -> (i32, i32) {
    %c0_i32 = arith.constant 0 : i32
    %c0_i32_0 = arith.constant 0 : i32
    return %c0_i32, %arg0 : i32, i32
  }
}

module attributes {stable_mosaic.version = 11 : i64} {
  func.func @kernel(%arg0: i32, %arg1: i32, %arg2: memref<512x128xf32, #tpu.memory_space<vmem>>, %arg3: memref<1x128xf32, #tpu.memory_space<vmem>>, %arg4: memref<1x128xf32, #tpu.memory_space<vmem>>) attributes {dimension_semantics = [#tpu.dimension_semantics<parallel>, #tpu.dimension_semantics<arbitrary>], iteration_bounds = array<i64: 1, 1>, scalar_prefetch = 0 : i64, scratch_operands = 0 : i64, tpu.core_type = #tpu.core_type<tc>, window_params = [{transform_indices = @transform_0, window_bounds = array<i64: 512, 128>}, {transform_indices = @transform_1, window_bounds = array<i64: 1, 128>}, {transform_indices = @transform_2, window_bounds = array<i64: 1, 128>}]} {
    %c0_i32 = arith.constant 0 : i32
    %0 = arith.cmpi eq, %arg1, %c0_i32 : i32
    %1 = arith.extui %0 : i1 to i32
    %c0_i32_0 = arith.constant 0 : i32
    %2 = arith.cmpi ne, %1, %c0_i32_0 : i32
    scf.if %2 {
      %cst_11 = arith.constant 0.000000e+00 : f32
      %23 = vector.broadcast %cst_11 : f32 to vector<1x128xf32>
      %c0_12 = arith.constant 0 : index
      %c0_13 = arith.constant 0 : index
      %24 = vector.load %arg4[%c0_12, %c0_13] : memref<1x128xf32, #tpu.memory_space<vmem>>, vector<1x128xf32>
      tpu.vector_store %arg4[%c0_12, %c0_13], %23 {strides = array<i32>} : memref<1x128xf32, #tpu.memory_space<vmem>>, vector<1x128xf32>,
    } else {
    }
    %c0 = arith.constant 0 : index
    %c0_1 = arith.constant 0 : index
    %3 = vector.load %arg3[%c0, %c0_1] : memref<1x128xf32, #tpu.memory_space<vmem>>, vector<1x128xf32>
    %cst = arith.constant 0.001953125 : f32
    %4 = vector.broadcast %cst : f32 to vector<1x128xf32>
    %5 = arith.mulf %3, %4 : vector<1x128xf32>
    %c0_2 = arith.constant 0 : index
    %c0_3 = arith.constant 0 : index
    %6 = vector.load %arg2[%c0_2, %c0_3] : memref<512x128xf32, #tpu.memory_space<vmem>>, vector<512x128xf32>
    %7 = vector.broadcast %5 : vector<1x128xf32> to vector<512x128xf32>
    %8 = arith.subf %6, %7 : vector<512x128xf32>
    %9 = tpu.iota {dimensions = array<i32: 0>} : vector<512x128xi32>
    %c512_i32 = arith.constant 512 : i32
    %10 = arith.muli %arg1, %c512_i32 : i32
    %11 = vector.broadcast %10 : i32 to vector<512x128xi32>
    %12 = arith.addi %9, %11 : vector<512x128xi32>
    %c512_i32_4 = arith.constant 512 : i32
    %13 = vector.broadcast %c512_i32_4 : i32 to vector<512x128xi32>
    %14 = arith.cmpi slt, %12, %13 : vector<512x128xi32>
    %cst_5 = arith.constant 0.000000e+00 : f32
    %15 = vector.broadcast %cst_5 : f32 to vector<512x128xf32>
    %16 = arith.select %14, %8, %15 : vector<512x128xi1>, vector<512x128xf32>
    %c0_6 = arith.constant 0 : index
    %c0_7 = arith.constant 0 : index
    %17 = vector.load %arg4[%c0_6, %c0_7] : memref<1x128xf32, #tpu.memory_space<vmem>>, vector<1x128xf32>
    %18 = arith.mulf %16, %16 : vector<512x128xf32>
    %cst_8 = arith.constant dense<0.000000e+00> : vector<128xf32>
    %19 = vector.multi_reduction <add>, %18, %cst_8 [0] : vector<512x128xf32> to vector<128xf32>
    %20 = vector.shape_cast %19 : vector<128xf32> to vector<1x128xf32>
    %21 = arith.addf %17, %20 : vector<1x128xf32>
    %c0_9 = arith.constant 0 : index
    %c0_10 = arith.constant 0 : index
    %22 = vector.load %arg4[%c0_9, %c0_10] : memref<1x128xf32, #tpu.memory_space<vmem>>, vector<1x128xf32>
    tpu.vector_store %arg4[%c0_9, %c0_10], %21 {strides = array<i32>} : memref<1x128xf32, #tpu.memory_space<vmem>>, vector<1x128xf32>,
    return
  }
  func.func @transform_0(%arg0: i32, %arg1: i32) -> (i32, i32) {
    %c0_i32 = arith.constant 0 : i32
    return %arg1, %arg0 : i32, i32
  }
  func.func @transform_1(%arg0: i32, %arg1: i32) -> (i32, i32) {
    %c0_i32 = arith.constant 0 : i32
    %c0_i32_0 = arith.constant 0 : i32
    return %c0_i32, %arg0 : i32, i32
  }
  func.func @transform_2(%arg0: i32, %arg1: i32) -> (i32, i32) {
    %c0_i32 = arith.constant 0 : i32
    %c0_i32_0 = arith.constant 0 : i32
    return %c0_i32, %arg0 : i32, i32
  }
}

module attributes {stable_mosaic.version = 11 : i64} {
  func.func @kernel(%arg0: i32, %arg1: i32, %arg2: memref<512x128xf32, #tpu.memory_space<vmem>>, %arg3: memref<1x128xf32, #tpu.memory_space<vmem>>, %arg4: memref<1x128xf32, #tpu.memory_space<vmem>>, %arg5: memref<1x128xf32, #tpu.memory_space<vmem>>, %arg6: memref<1x128xf32, #tpu.memory_space<vmem>>, %arg7: memref<512x128xf32, #tpu.memory_space<vmem>>) attributes {dimension_semantics = [#tpu.dimension_semantics<parallel>, #tpu.dimension_semantics<parallel>], iteration_bounds = array<i64: 1, 1>, scalar_prefetch = 0 : i64, scratch_operands = 0 : i64, tpu.core_type = #tpu.core_type<tc>, window_params = [{transform_indices = @transform_0, window_bounds = array<i64: 512, 128>}, {transform_indices = @transform_1, window_bounds = array<i64: 1, 128>}, {transform_indices = @transform_2, window_bounds = array<i64: 1, 128>}, {transform_indices = @transform_3, window_bounds = array<i64: 1, 128>}, {transform_indices = @transform_4, window_bounds = array<i64: 1, 128>}, {transform_indices = @transform_5, window_bounds = array<i64: 512, 128>}]} {
    %c0 = arith.constant 0 : index
    %c0_0 = arith.constant 0 : index
    %0 = vector.load %arg3[%c0, %c0_0] : memref<1x128xf32, #tpu.memory_space<vmem>>, vector<1x128xf32>
    %cst = arith.constant 0.001953125 : f32
    %1 = vector.broadcast %cst : f32 to vector<1x128xf32>
    %2 = arith.mulf %0, %1 : vector<1x128xf32>
    %c0_1 = arith.constant 0 : index
    %c0_2 = arith.constant 0 : index
    %3 = vector.load %arg4[%c0_1, %c0_2] : memref<1x128xf32, #tpu.memory_space<vmem>>, vector<1x128xf32>
    %cst_3 = arith.constant 0.001953125 : f32
    %4 = vector.broadcast %cst_3 : f32 to vector<1x128xf32>
    %5 = arith.mulf %3, %4 : vector<1x128xf32>
    %cst_4 = arith.constant 9.99999974E-6 : f32
    %6 = vector.broadcast %cst_4 : f32 to vector<1x128xf32>
    %7 = arith.addf %5, %6 : vector<1x128xf32>
    %8 = math.rsqrt %7 : vector<1x128xf32>
    %c0_5 = arith.constant 0 : index
    %c0_6 = arith.constant 0 : index
    %9 = vector.load %arg5[%c0_5, %c0_6] : memref<1x128xf32, #tpu.memory_space<vmem>>, vector<1x128xf32>
    %10 = arith.mulf %8, %9 : vector<1x128xf32>
    %c0_7 = arith.constant 0 : index
    %c0_8 = arith.constant 0 : index
    %11 = vector.load %arg6[%c0_7, %c0_8] : memref<1x128xf32, #tpu.memory_space<vmem>>, vector<1x128xf32>
    %12 = arith.mulf %2, %10 : vector<1x128xf32>
    %13 = arith.subf %11, %12 : vector<1x128xf32>
    %c0_9 = arith.constant 0 : index
    %c0_10 = arith.constant 0 : index
    %14 = vector.load %arg2[%c0_9, %c0_10] : memref<512x128xf32, #tpu.memory_space<vmem>>, vector<512x128xf32>
    %15 = vector.broadcast %10 : vector<1x128xf32> to vector<512x128xf32>
    %16 = arith.mulf %14, %15 : vector<512x128xf32>
    %17 = vector.broadcast %13 : vector<1x128xf32> to vector<512x128xf32>
    %18 = arith.addf %16, %17 : vector<512x128xf32>
    %cst_11 = arith.constant 0.000000e+00 : f32
    %19 = vector.broadcast %cst_11 : f32 to vector<512x128xf32>
    %20 = arith.maximumf %18, %19 : vector<512x128xf32>
    %c0_12 = arith.constant 0 : index
    %c0_13 = arith.constant 0 : index
    %21 = vector.load %arg7[%c0_12, %c0_13] : memref<512x128xf32, #tpu.memory_space<vmem>>, vector<512x128xf32>
    tpu.vector_store %arg7[%c0_12, %c0_13], %20 {strides = array<i32>} : memref<512x128xf32, #tpu.memory_space<vmem>>, vector<512x128xf32>,
    return
  }
  func.func @transform_0(%arg0: i32, %arg1: i32) -> (i32, i32) {
    %c0_i32 = arith.constant 0 : i32
    return %arg0, %arg1 : i32, i32
  }
  func.func @transform_1(%arg0: i32, %arg1: i32) -> (i32, i32) {
    %c0_i32 = arith.constant 0 : i32
    %c0_i32_0 = arith.constant 0 : i32
    return %c0_i32, %arg1 : i32, i32
  }
  func.func @transform_2(%arg0: i32, %arg1: i32) -> (i32, i32) {
    %c0_i32 = arith.constant 0 : i32
    %c0_i32_0 = arith.constant 0 : i32
    return %c0_i32, %arg1 : i32, i32
  }
  func.func @transform_3(%arg0: i32, %arg1: i32) -> (i32, i32) {
    %c0_i32 = arith.constant 0 : i32
    %c0_i32_0 = arith.constant 0 : i32
    return %c0_i32, %arg1 : i32, i32
  }
  func.func @transform_4(%arg0: i32, %arg1: i32) -> (i32, i32) {
    %c0_i32 = arith.constant 0 : i32
    %c0_i32_0 = arith.constant 0 : i32
    return %c0_i32, %arg1 : i32, i32
  }
  func.func @transform_5(%arg0: i32, %arg1: i32) -> (i32, i32) {
    %c0_i32 = arith.constant 0 : i32
    return %arg0, %arg1 : i32, i32
  }
}

module attributes {stable_mosaic.version = 11 : i64} {
  func.func @kernel(%arg0: i32, %arg1: i32, %arg2: memref<128x128xf32, #tpu.memory_space<vmem>>, %arg3: memref<1x128xf32, #tpu.memory_space<vmem>>, %arg4: memref<1x128xf32, #tpu.memory_space<vmem>>) attributes {dimension_semantics = [#tpu.dimension_semantics<parallel>, #tpu.dimension_semantics<arbitrary>], iteration_bounds = array<i64: 1, 1>, scalar_prefetch = 0 : i64, scratch_operands = 0 : i64, tpu.core_type = #tpu.core_type<tc>, window_params = [{transform_indices = @transform_0, window_bounds = array<i64: 128, 128>}, {transform_indices = @transform_1, window_bounds = array<i64: 1, 128>}, {transform_indices = @transform_2, window_bounds = array<i64: 1, 128>}]} {
    %c0_i32 = arith.constant 0 : i32
    %0 = arith.cmpi eq, %arg1, %c0_i32 : i32
    %1 = arith.extui %0 : i1 to i32
    %c0_i32_0 = arith.constant 0 : i32
    %2 = arith.cmpi ne, %1, %c0_i32_0 : i32
    scf.if %2 {
      %cst_11 = arith.constant 0.000000e+00 : f32
      %23 = vector.broadcast %cst_11 : f32 to vector<1x128xf32>
      %c0_12 = arith.constant 0 : index
      %c0_13 = arith.constant 0 : index
      %24 = vector.load %arg4[%c0_12, %c0_13] : memref<1x128xf32, #tpu.memory_space<vmem>>, vector<1x128xf32>
      tpu.vector_store %arg4[%c0_12, %c0_13], %23 {strides = array<i32>} : memref<1x128xf32, #tpu.memory_space<vmem>>, vector<1x128xf32>,
    } else {
    }
    %c0 = arith.constant 0 : index
    %c0_1 = arith.constant 0 : index
    %3 = vector.load %arg3[%c0, %c0_1] : memref<1x128xf32, #tpu.memory_space<vmem>>, vector<1x128xf32>
    %cst = arith.constant 7.812500e-03 : f32
    %4 = vector.broadcast %cst : f32 to vector<1x128xf32>
    %5 = arith.mulf %3, %4 : vector<1x128xf32>
    %c0_2 = arith.constant 0 : index
    %c0_3 = arith.constant 0 : index
    %6 = vector.load %arg2[%c0_2, %c0_3] : memref<128x128xf32, #tpu.memory_space<vmem>>, vector<128x128xf32>
    %7 = vector.broadcast %5 : vector<1x128xf32> to vector<128x128xf32>
    %8 = arith.subf %6, %7 : vector<128x128xf32>
    %9 = tpu.iota {dimensions = array<i32: 0>} : vector<128x128xi32>
    %c128_i32 = arith.constant 128 : i32
    %10 = arith.muli %arg1, %c128_i32 : i32
    %11 = vector.broadcast %10 : i32 to vector<128x128xi32>
    %12 = arith.addi %9, %11 : vector<128x128xi32>
    %c128_i32_4 = arith.constant 128 : i32
    %13 = vector.broadcast %c128_i32_4 : i32 to vector<128x128xi32>
    %14 = arith.cmpi slt, %12, %13 : vector<128x128xi32>
    %cst_5 = arith.constant 0.000000e+00 : f32
    %15 = vector.broadcast %cst_5 : f32 to vector<128x128xf32>
    %16 = arith.select %14, %8, %15 : vector<128x128xi1>, vector<128x128xf32>
    %c0_6 = arith.constant 0 : index
    %c0_7 = arith.constant 0 : index
    %17 = vector.load %arg4[%c0_6, %c0_7] : memref<1x128xf32, #tpu.memory_space<vmem>>, vector<1x128xf32>
    %18 = arith.mulf %16, %16 : vector<128x128xf32>
    %cst_8 = arith.constant dense<0.000000e+00> : vector<128xf32>
    %19 = vector.multi_reduction <add>, %18, %cst_8 [0] : vector<128x128xf32> to vector<128xf32>
    %20 = vector.shape_cast %19 : vector<128xf32> to vector<1x128xf32>
    %21 = arith.addf %17, %20 : vector<1x128xf32>
    %c0_9 = arith.constant 0 : index
    %c0_10 = arith.constant 0 : index
    %22 = vector.load %arg4[%c0_9, %c0_10] : memref<1x128xf32, #tpu.memory_space<vmem>>, vector<1x128xf32>
    tpu.vector_store %arg4[%c0_9, %c0_10], %21 {strides = array<i32>} : memref<1x128xf32, #tpu.memory_space<vmem>>, vector<1x128xf32>,
    return
  }
  func.func @transform_0(%arg0: i32, %arg1: i32) -> (i32, i32) {
    %c0_i32 = arith.constant 0 : i32
    return %arg1, %arg0 : i32, i32
  }
  func.func @transform_1(%arg0: i32, %arg1: i32) -> (i32, i32) {
    %c0_i32 = arith.constant 0 : i32
    %c0_i32_0 = arith.constant 0 : i32
    return %c0_i32, %arg0 : i32, i32
  }
  func.func @transform_2(%arg0: i32, %arg1: i32) -> (i32, i32) {
    %c0_i32 = arith.constant 0 : i32
    %c0_i32_0 = arith.constant 0 : i32
    return %c0_i32, %arg0 : i32, i32
  }
}

module attributes {stable_mosaic.version = 11 : i64} {
  func.func @kernel(%arg0: i32, %arg1: i32, %arg2: i32, %arg3: memref<128x512xbf16, #tpu.memory_space<vmem>>, %arg4: memref<512x128xbf16, #tpu.memory_space<vmem>>, %arg5: memref<128x128xf32, #tpu.memory_space<vmem>>, %arg6: memref<1x128xf32, #tpu.memory_space<vmem>>) attributes {dimension_semantics = [#tpu.dimension_semantics<parallel>, #tpu.dimension_semantics<arbitrary>, #tpu.dimension_semantics<arbitrary>], iteration_bounds = array<i64: 1, 1, 7>, scalar_prefetch = 0 : i64, scratch_operands = 0 : i64, tpu.core_type = #tpu.core_type<tc>, window_params = [{transform_indices = @transform_0, window_bounds = array<i64: 128, 512>}, {transform_indices = @transform_1, window_bounds = array<i64: 512, 128>}, {transform_indices = @transform_2, window_bounds = array<i64: 128, 128>}, {transform_indices = @transform_3, window_bounds = array<i64: 1, 128>}]} {
    %c0_i32 = arith.constant 0 : i32
    %0 = arith.cmpi eq, %arg2, %c0_i32 : i32
    %1 = arith.extui %0 : i1 to i32
    %c0_i32_0 = arith.constant 0 : i32
    %2 = arith.cmpi ne, %1, %c0_i32_0 : i32
    scf.if %2 {
      %cst_12 = arith.constant 0.000000e+00 : f32
      %17 = vector.broadcast %cst_12 : f32 to vector<128x128xf32>
      %c0_13 = arith.constant 0 : index
      %c0_14 = arith.constant 0 : index
      %18 = vector.load %arg5[%c0_13, %c0_14] : memref<128x128xf32, #tpu.memory_space<vmem>>, vector<128x128xf32>
      tpu.vector_store %arg5[%c0_13, %c0_14], %17 {strides = array<i32>} : memref<128x128xf32, #tpu.memory_space<vmem>>, vector<128x128xf32>,
    } else {
    }
    %c0_i32_1 = arith.constant 0 : i32
    %3 = arith.cmpi eq, %arg1, %c0_i32_1 : i32
    %c0_i32_2 = arith.constant 0 : i32
    %4 = arith.cmpi eq, %arg2, %c0_i32_2 : i32
    %5 = arith.andi %3, %4 : i1
    %6 = arith.extui %5 : i1 to i32
    %c0_i32_3 = arith.constant 0 : i32
    %7 = arith.cmpi ne, %6, %c0_i32_3 : i32
    scf.if %7 {
      %cst_12 = arith.constant 0.000000e+00 : f32
      %17 = vector.broadcast %cst_12 : f32 to vector<1x128xf32>
      %c0_13 = arith.constant 0 : index
      %c0_14 = arith.constant 0 : index
      %18 = vector.load %arg6[%c0_13, %c0_14] : memref<1x128xf32, #tpu.memory_space<vmem>>, vector<1x128xf32>
      tpu.vector_store %arg6[%c0_13, %c0_14], %17 {strides = array<i32>} : memref<1x128xf32, #tpu.memory_space<vmem>>, vector<1x128xf32>,
    } else {
    }
    %c0 = arith.constant 0 : index
    %c0_4 = arith.constant 0 : index
    %8 = vector.load %arg5[%c0, %c0_4] : memref<128x128xf32, #tpu.memory_space<vmem>>, vector<128x128xf32>
    %c0_5 = arith.constant 0 : index
    %c0_6 = arith.constant 0 : index
    %9 = vector.load %arg3[%c0_5, %c0_6] : memref<128x512xbf16, #tpu.memory_space<vmem>>, vector<128x512xbf16>
    %c0_7 = arith.constant 0 : index
    %c0_8 = arith.constant 0 : index
    %10 = vector.load %arg4[%c0_7, %c0_8] : memref<512x128xbf16, #tpu.memory_space<vmem>>, vector<512x128xbf16>
    %cst = arith.constant dense<0.000000e+00> : vector<128x128xf32>
    %11 = tpu.matmul %9, %10, %cst {dimension_numbers = #tpu.dot_dimension_numbers<[1], [0], [0], [1], [0, 0, 1, 1], [], []>} : vector<128x512xbf16>, vector<512x128xbf16>, vector<128x128xf32> -> vector<128x128xf32>
    %12 = arith.addf %8, %11 : vector<128x128xf32>
    %c0_9 = arith.constant 0 : index
    %c0_10 = arith.constant 0 : index
    %13 = vector.load %arg5[%c0_9, %c0_10] : memref<128x128xf32, #tpu.memory_space<vmem>>, vector<128x128xf32>
    tpu.vector_store %arg5[%c0_9, %c0_10], %12 {strides = array<i32>} : memref<128x128xf32, #tpu.memory_space<vmem>>, vector<128x128xf32>,
    %c6_i32 = arith.constant 6 : i32
    %14 = arith.cmpi eq, %arg2, %c6_i32 : i32
    %15 = arith.extui %14 : i1 to i32
    %c0_i32_11 = arith.constant 0 : i32
    %16 = arith.cmpi ne, %15, %c0_i32_11 : i32
    scf.if %16 {
      %c0_12 = arith.constant 0 : index
      %c0_13 = arith.constant 0 : index
      %17 = vector.load %arg6[%c0_12, %c0_13] : memref<1x128xf32, #tpu.memory_space<vmem>>, vector<1x128xf32>
      %c0_14 = arith.constant 0 : index
      %c0_15 = arith.constant 0 : index
      %18 = vector.load %arg5[%c0_14, %c0_15] : memref<128x128xf32, #tpu.memory_space<vmem>>, vector<128x128xf32>
      %cst_16 = arith.constant dense<0.000000e+00> : vector<128xf32>
      %19 = vector.multi_reduction <add>, %18, %cst_16 [0] : vector<128x128xf32> to vector<128xf32>
      %20 = vector.shape_cast %19 : vector<128xf32> to vector<1x128xf32>
      %21 = arith.addf %17, %20 : vector<1x128xf32>
      %c0_17 = arith.constant 0 : index
      %c0_18 = arith.constant 0 : index
      %22 = vector.load %arg6[%c0_17, %c0_18] : memref<1x128xf32, #tpu.memory_space<vmem>>, vector<1x128xf32>
      tpu.vector_store %arg6[%c0_17, %c0_18], %21 {strides = array<i32>} : memref<1x128xf32, #tpu.memory_space<vmem>>, vector<1x128xf32>,
    } else {
    }
    return
  }
  func.func @transform_0(%arg0: i32, %arg1: i32, %arg2: i32) -> (i32, i32) {
    %c0_i32 = arith.constant 0 : i32
    return %arg1, %arg2 : i32, i32
  }
  func.func @transform_1(%arg0: i32, %arg1: i32, %arg2: i32) -> (i32, i32) {
    %c0_i32 = arith.constant 0 : i32
    return %arg2, %arg0 : i32, i32
  }
  func.func @transform_2(%arg0: i32, %arg1: i32, %arg2: i32) -> (i32, i32) {
    %c0_i32 = arith.constant 0 : i32
    return %arg1, %arg0 : i32, i32
  }
  func.func @transform_3(%arg0: i32, %arg1: i32, %arg2: i32) -> (i32, i32) {
    %c0_i32 = arith.constant 0 : i32
    %c0_i32_0 = arith.constant 0 : i32
    return %c0_i32, %arg0 : i32, i32
  }
}

module attributes {stable_mosaic.version = 11 : i64} {
  func.func @kernel(%arg0: i32, %arg1: i32, %arg2: memref<128x128xf32, #tpu.memory_space<vmem>>, %arg3: memref<1x128xf32, #tpu.memory_space<vmem>>, %arg4: memref<1x128xf32, #tpu.memory_space<vmem>>, %arg5: memref<1x128xf32, #tpu.memory_space<vmem>>, %arg6: memref<1x128xf32, #tpu.memory_space<vmem>>, %arg7: memref<128x128xf32, #tpu.memory_space<vmem>>) attributes {dimension_semantics = [#tpu.dimension_semantics<parallel>, #tpu.dimension_semantics<parallel>], iteration_bounds = array<i64: 1, 1>, scalar_prefetch = 0 : i64, scratch_operands = 0 : i64, tpu.core_type = #tpu.core_type<tc>, window_params = [{transform_indices = @transform_0, window_bounds = array<i64: 128, 128>}, {transform_indices = @transform_1, window_bounds = array<i64: 1, 128>}, {transform_indices = @transform_2, window_bounds = array<i64: 1, 128>}, {transform_indices = @transform_3, window_bounds = array<i64: 1, 128>}, {transform_indices = @transform_4, window_bounds = array<i64: 1, 128>}, {transform_indices = @transform_5, window_bounds = array<i64: 128, 128>}]} {
    %c0 = arith.constant 0 : index
    %c0_0 = arith.constant 0 : index
    %0 = vector.load %arg3[%c0, %c0_0] : memref<1x128xf32, #tpu.memory_space<vmem>>, vector<1x128xf32>
    %cst = arith.constant 7.812500e-03 : f32
    %1 = vector.broadcast %cst : f32 to vector<1x128xf32>
    %2 = arith.mulf %0, %1 : vector<1x128xf32>
    %c0_1 = arith.constant 0 : index
    %c0_2 = arith.constant 0 : index
    %3 = vector.load %arg4[%c0_1, %c0_2] : memref<1x128xf32, #tpu.memory_space<vmem>>, vector<1x128xf32>
    %cst_3 = arith.constant 7.812500e-03 : f32
    %4 = vector.broadcast %cst_3 : f32 to vector<1x128xf32>
    %5 = arith.mulf %3, %4 : vector<1x128xf32>
    %cst_4 = arith.constant 9.99999974E-6 : f32
    %6 = vector.broadcast %cst_4 : f32 to vector<1x128xf32>
    %7 = arith.addf %5, %6 : vector<1x128xf32>
    %8 = math.rsqrt %7 : vector<1x128xf32>
    %c0_5 = arith.constant 0 : index
    %c0_6 = arith.constant 0 : index
    %9 = vector.load %arg5[%c0_5, %c0_6] : memref<1x128xf32, #tpu.memory_space<vmem>>, vector<1x128xf32>
    %10 = arith.mulf %8, %9 : vector<1x128xf32>
    %c0_7 = arith.constant 0 : index
    %c0_8 = arith.constant 0 : index
    %11 = vector.load %arg6[%c0_7, %c0_8] : memref<1x128xf32, #tpu.memory_space<vmem>>, vector<1x128xf32>
    %12 = arith.mulf %2, %10 : vector<1x128xf32>
    %13 = arith.subf %11, %12 : vector<1x128xf32>
    %c0_9 = arith.constant 0 : index
    %c0_10 = arith.constant 0 : index
    %14 = vector.load %arg2[%c0_9, %c0_10] : memref<128x128xf32, #tpu.memory_space<vmem>>, vector<128x128xf32>
    %15 = vector.broadcast %10 : vector<1x128xf32> to vector<128x128xf32>
    %16 = arith.mulf %14, %15 : vector<128x128xf32>
    %17 = vector.broadcast %13 : vector<1x128xf32> to vector<128x128xf32>
    %18 = arith.addf %16, %17 : vector<128x128xf32>
    %cst_11 = arith.constant 0.000000e+00 : f32
    %19 = vector.broadcast %cst_11 : f32 to vector<128x128xf32>
    %20 = arith.maximumf %18, %19 : vector<128x128xf32>
    %c0_12 = arith.constant 0 : index
    %c0_13 = arith.constant 0 : index
    %21 = vector.load %arg7[%c0_12, %c0_13] : memref<128x128xf32, #tpu.memory_space<vmem>>, vector<128x128xf32>
    tpu.vector_store %arg7[%c0_12, %c0_13], %20 {strides = array<i32>} : memref<128x128xf32, #tpu.memory_space<vmem>>, vector<128x128xf32>,
    return
  }
  func.func @transform_0(%arg0: i32, %arg1: i32) -> (i32, i32) {
    %c0_i32 = arith.constant 0 : i32
    return %arg0, %arg1 : i32, i32
  }
  func.func @transform_1(%arg0: i32, %arg1: i32) -> (i32, i32) {
    %c0_i32 = arith.constant 0 : i32
    %c0_i32_0 = arith.constant 0 : i32
    return %c0_i32, %arg1 : i32, i32
  }
  func.func @transform_2(%arg0: i32, %arg1: i32) -> (i32, i32) {
    %c0_i32 = arith.constant 0 : i32
    %c0_i32_0 = arith.constant 0 : i32
    return %c0_i32, %arg1 : i32, i32
  }
  func.func @transform_3(%arg0: i32, %arg1: i32) -> (i32, i32) {
    %c0_i32 = arith.constant 0 : i32
    %c0_i32_0 = arith.constant 0 : i32
    return %c0_i32, %arg1 : i32, i32
  }
  func.func @transform_4(%arg0: i32, %arg1: i32) -> (i32, i32) {
    %c0_i32 = arith.constant 0 : i32
    %c0_i32_0 = arith.constant 0 : i32
    return %c0_i32, %arg1 : i32, i32
  }
  func.func @transform_5(%arg0: i32, %arg1: i32) -> (i32, i32) {
    %c0_i32 = arith.constant 0 : i32
    return %arg0, %arg1 : i32, i32
  }
}

module attributes {stable_mosaic.version = 11 : i64} {
  func.func @kernel(%arg0: i32, %arg1: i32, %arg2: i32, %arg3: memref<32x512xbf16, #tpu.memory_space<vmem>>, %arg4: memref<512x256xbf16, #tpu.memory_space<vmem>>, %arg5: memref<32x256xf32, #tpu.memory_space<vmem>>, %arg6: memref<1x256xf32, #tpu.memory_space<vmem>>) attributes {dimension_semantics = [#tpu.dimension_semantics<parallel>, #tpu.dimension_semantics<arbitrary>, #tpu.dimension_semantics<arbitrary>], iteration_bounds = array<i64: 1, 1, 13>, scalar_prefetch = 0 : i64, scratch_operands = 0 : i64, tpu.core_type = #tpu.core_type<tc>, window_params = [{transform_indices = @transform_0, window_bounds = array<i64: 32, 512>}, {transform_indices = @transform_1, window_bounds = array<i64: 512, 256>}, {transform_indices = @transform_2, window_bounds = array<i64: 32, 256>}, {transform_indices = @transform_3, window_bounds = array<i64: 1, 256>}]} {
    %c0_i32 = arith.constant 0 : i32
    %0 = arith.cmpi eq, %arg2, %c0_i32 : i32
    %1 = arith.extui %0 : i1 to i32
    %c0_i32_0 = arith.constant 0 : i32
    %2 = arith.cmpi ne, %1, %c0_i32_0 : i32
    scf.if %2 {
      %cst_12 = arith.constant 0.000000e+00 : f32
      %17 = vector.broadcast %cst_12 : f32 to vector<32x256xf32>
      %c0_13 = arith.constant 0 : index
      %c0_14 = arith.constant 0 : index
      %18 = vector.load %arg5[%c0_13, %c0_14] : memref<32x256xf32, #tpu.memory_space<vmem>>, vector<32x256xf32>
      tpu.vector_store %arg5[%c0_13, %c0_14], %17 {strides = array<i32>} : memref<32x256xf32, #tpu.memory_space<vmem>>, vector<32x256xf32>,
    } else {
    }
    %c0_i32_1 = arith.constant 0 : i32
    %3 = arith.cmpi eq, %arg1, %c0_i32_1 : i32
    %c0_i32_2 = arith.constant 0 : i32
    %4 = arith.cmpi eq, %arg2, %c0_i32_2 : i32
    %5 = arith.andi %3, %4 : i1
    %6 = arith.extui %5 : i1 to i32
    %c0_i32_3 = arith.constant 0 : i32
    %7 = arith.cmpi ne, %6, %c0_i32_3 : i32
    scf.if %7 {
      %cst_12 = arith.constant 0.000000e+00 : f32
      %17 = vector.broadcast %cst_12 : f32 to vector<1x256xf32>
      %c0_13 = arith.constant 0 : index
      %c0_14 = arith.constant 0 : index
      %18 = vector.load %arg6[%c0_13, %c0_14] : memref<1x256xf32, #tpu.memory_space<vmem>>, vector<1x256xf32>
      tpu.vector_store %arg6[%c0_13, %c0_14], %17 {strides = array<i32>} : memref<1x256xf32, #tpu.memory_space<vmem>>, vector<1x256xf32>,
    } else {
    }
    %c0 = arith.constant 0 : index
    %c0_4 = arith.constant 0 : index
    %8 = vector.load %arg5[%c0, %c0_4] : memref<32x256xf32, #tpu.memory_space<vmem>>, vector<32x256xf32>
    %c0_5 = arith.constant 0 : index
    %c0_6 = arith.constant 0 : index
    %9 = vector.load %arg3[%c0_5, %c0_6] : memref<32x512xbf16, #tpu.memory_space<vmem>>, vector<32x512xbf16>
    %c0_7 = arith.constant 0 : index
    %c0_8 = arith.constant 0 : index
    %10 = vector.load %arg4[%c0_7, %c0_8] : memref<512x256xbf16, #tpu.memory_space<vmem>>, vector<512x256xbf16>
    %cst = arith.constant dense<0.000000e+00> : vector<32x256xf32>
    %11 = tpu.matmul %9, %10, %cst {dimension_numbers = #tpu.dot_dimension_numbers<[1], [0], [0], [1], [0, 0, 1, 1], [], []>} : vector<32x512xbf16>, vector<512x256xbf16>, vector<32x256xf32> -> vector<32x256xf32>
    %12 = arith.addf %8, %11 : vector<32x256xf32>
    %c0_9 = arith.constant 0 : index
    %c0_10 = arith.constant 0 : index
    %13 = vector.load %arg5[%c0_9, %c0_10] : memref<32x256xf32, #tpu.memory_space<vmem>>, vector<32x256xf32>
    tpu.vector_store %arg5[%c0_9, %c0_10], %12 {strides = array<i32>} : memref<32x256xf32, #tpu.memory_space<vmem>>, vector<32x256xf32>,
    %c12_i32 = arith.constant 12 : i32
    %14 = arith.cmpi eq, %arg2, %c12_i32 : i32
    %15 = arith.extui %14 : i1 to i32
    %c0_i32_11 = arith.constant 0 : i32
    %16 = arith.cmpi ne, %15, %c0_i32_11 : i32
    scf.if %16 {
      %c0_12 = arith.constant 0 : index
      %c0_13 = arith.constant 0 : index
      %17 = vector.load %arg6[%c0_12, %c0_13] : memref<1x256xf32, #tpu.memory_space<vmem>>, vector<1x256xf32>
      %c0_14 = arith.constant 0 : index
      %c0_15 = arith.constant 0 : index
      %18 = vector.load %arg5[%c0_14, %c0_15] : memref<32x256xf32, #tpu.memory_space<vmem>>, vector<32x256xf32>
      %cst_16 = arith.constant dense<0.000000e+00> : vector<256xf32>
      %19 = vector.multi_reduction <add>, %18, %cst_16 [0] : vector<32x256xf32> to vector<256xf32>
      %20 = vector.shape_cast %19 : vector<256xf32> to vector<1x256xf32>
      %21 = arith.addf %17, %20 : vector<1x256xf32>
      %c0_17 = arith.constant 0 : index
      %c0_18 = arith.constant 0 : index
      %22 = vector.load %arg6[%c0_17, %c0_18] : memref<1x256xf32, #tpu.memory_space<vmem>>, vector<1x256xf32>
      tpu.vector_store %arg6[%c0_17, %c0_18], %21 {strides = array<i32>} : memref<1x256xf32, #tpu.memory_space<vmem>>, vector<1x256xf32>,
    } else {
    }
    return
  }
  func.func @transform_0(%arg0: i32, %arg1: i32, %arg2: i32) -> (i32, i32) {
    %c0_i32 = arith.constant 0 : i32
    return %arg1, %arg2 : i32, i32
  }
  func.func @transform_1(%arg0: i32, %arg1: i32, %arg2: i32) -> (i32, i32) {
    %c0_i32 = arith.constant 0 : i32
    return %arg2, %arg0 : i32, i32
  }
  func.func @transform_2(%arg0: i32, %arg1: i32, %arg2: i32) -> (i32, i32) {
    %c0_i32 = arith.constant 0 : i32
    return %arg1, %arg0 : i32, i32
  }
  func.func @transform_3(%arg0: i32, %arg1: i32, %arg2: i32) -> (i32, i32) {
    %c0_i32 = arith.constant 0 : i32
    %c0_i32_0 = arith.constant 0 : i32
    return %c0_i32, %arg0 : i32, i32
  }
}

module attributes {stable_mosaic.version = 11 : i64} {
  func.func @kernel(%arg0: i32, %arg1: i32, %arg2: memref<32x256xf32, #tpu.memory_space<vmem>>, %arg3: memref<1x256xf32, #tpu.memory_space<vmem>>, %arg4: memref<1x256xf32, #tpu.memory_space<vmem>>) attributes {dimension_semantics = [#tpu.dimension_semantics<parallel>, #tpu.dimension_semantics<arbitrary>], iteration_bounds = array<i64: 1, 1>, scalar_prefetch = 0 : i64, scratch_operands = 0 : i64, tpu.core_type = #tpu.core_type<tc>, window_params = [{transform_indices = @transform_0, window_bounds = array<i64: 32, 256>}, {transform_indices = @transform_1, window_bounds = array<i64: 1, 256>}, {transform_indices = @transform_2, window_bounds = array<i64: 1, 256>}]} {
    %c0_i32 = arith.constant 0 : i32
    %0 = arith.cmpi eq, %arg1, %c0_i32 : i32
    %1 = arith.extui %0 : i1 to i32
    %c0_i32_0 = arith.constant 0 : i32
    %2 = arith.cmpi ne, %1, %c0_i32_0 : i32
    scf.if %2 {
      %cst_11 = arith.constant 0.000000e+00 : f32
      %23 = vector.broadcast %cst_11 : f32 to vector<1x256xf32>
      %c0_12 = arith.constant 0 : index
      %c0_13 = arith.constant 0 : index
      %24 = vector.load %arg4[%c0_12, %c0_13] : memref<1x256xf32, #tpu.memory_space<vmem>>, vector<1x256xf32>
      tpu.vector_store %arg4[%c0_12, %c0_13], %23 {strides = array<i32>} : memref<1x256xf32, #tpu.memory_space<vmem>>, vector<1x256xf32>,
    } else {
    }
    %c0 = arith.constant 0 : index
    %c0_1 = arith.constant 0 : index
    %3 = vector.load %arg3[%c0, %c0_1] : memref<1x256xf32, #tpu.memory_space<vmem>>, vector<1x256xf32>
    %cst = arith.constant 3.125000e-02 : f32
    %4 = vector.broadcast %cst : f32 to vector<1x256xf32>
    %5 = arith.mulf %3, %4 : vector<1x256xf32>
    %c0_2 = arith.constant 0 : index
    %c0_3 = arith.constant 0 : index
    %6 = vector.load %arg2[%c0_2, %c0_3] : memref<32x256xf32, #tpu.memory_space<vmem>>, vector<32x256xf32>
    %7 = vector.broadcast %5 : vector<1x256xf32> to vector<32x256xf32>
    %8 = arith.subf %6, %7 : vector<32x256xf32>
    %9 = tpu.iota {dimensions = array<i32: 0>} : vector<32x256xi32>
    %c32_i32 = arith.constant 32 : i32
    %10 = arith.muli %arg1, %c32_i32 : i32
    %11 = vector.broadcast %10 : i32 to vector<32x256xi32>
    %12 = arith.addi %9, %11 : vector<32x256xi32>
    %c32_i32_4 = arith.constant 32 : i32
    %13 = vector.broadcast %c32_i32_4 : i32 to vector<32x256xi32>
    %14 = arith.cmpi slt, %12, %13 : vector<32x256xi32>
    %cst_5 = arith.constant 0.000000e+00 : f32
    %15 = vector.broadcast %cst_5 : f32 to vector<32x256xf32>
    %16 = arith.select %14, %8, %15 : vector<32x256xi1>, vector<32x256xf32>
    %c0_6 = arith.constant 0 : index
    %c0_7 = arith.constant 0 : index
    %17 = vector.load %arg4[%c0_6, %c0_7] : memref<1x256xf32, #tpu.memory_space<vmem>>, vector<1x256xf32>
    %18 = arith.mulf %16, %16 : vector<32x256xf32>
    %cst_8 = arith.constant dense<0.000000e+00> : vector<256xf32>
    %19 = vector.multi_reduction <add>, %18, %cst_8 [0] : vector<32x256xf32> to vector<256xf32>
    %20 = vector.shape_cast %19 : vector<256xf32> to vector<1x256xf32>
    %21 = arith.addf %17, %20 : vector<1x256xf32>
    %c0_9 = arith.constant 0 : index
    %c0_10 = arith.constant 0 : index
    %22 = vector.load %arg4[%c0_9, %c0_10] : memref<1x256xf32, #tpu.memory_space<vmem>>, vector<1x256xf32>
    tpu.vector_store %arg4[%c0_9, %c0_10], %21 {strides = array<i32>} : memref<1x256xf32, #tpu.memory_space<vmem>>, vector<1x256xf32>,
    return
  }
  func.func @transform_0(%arg0: i32, %arg1: i32) -> (i32, i32) {
    %c0_i32 = arith.constant 0 : i32
    return %arg1, %arg0 : i32, i32
  }
  func.func @transform_1(%arg0: i32, %arg1: i32) -> (i32, i32) {
    %c0_i32 = arith.constant 0 : i32
    %c0_i32_0 = arith.constant 0 : i32
    return %c0_i32, %arg0 : i32, i32
  }
  func.func @transform_2(%arg0: i32, %arg1: i32) -> (i32, i32) {
    %c0_i32 = arith.constant 0 : i32
    %c0_i32_0 = arith.constant 0 : i32
    return %c0_i32, %arg0 : i32, i32
  }
}

module attributes {stable_mosaic.version = 11 : i64} {
  func.func @kernel(%arg0: i32, %arg1: i32, %arg2: memref<32x256xf32, #tpu.memory_space<vmem>>, %arg3: memref<1x256xf32, #tpu.memory_space<vmem>>, %arg4: memref<1x256xf32, #tpu.memory_space<vmem>>, %arg5: memref<1x256xf32, #tpu.memory_space<vmem>>, %arg6: memref<1x256xf32, #tpu.memory_space<vmem>>, %arg7: memref<32x256xf32, #tpu.memory_space<vmem>>) attributes {dimension_semantics = [#tpu.dimension_semantics<parallel>, #tpu.dimension_semantics<parallel>], iteration_bounds = array<i64: 1, 1>, scalar_prefetch = 0 : i64, scratch_operands = 0 : i64, tpu.core_type = #tpu.core_type<tc>, window_params = [{transform_indices = @transform_0, window_bounds = array<i64: 32, 256>}, {transform_indices = @transform_1, window_bounds = array<i64: 1, 256>}, {transform_indices = @transform_2, window_bounds = array<i64: 1, 256>}, {transform_indices = @transform_3, window_bounds = array<i64: 1, 256>}, {transform_indices = @transform_4, window_bounds = array<i64: 1, 256>}, {transform_indices = @transform_5, window_bounds = array<i64: 32, 256>}]} {
    %c0 = arith.constant 0 : index
    %c0_0 = arith.constant 0 : index
    %0 = vector.load %arg3[%c0, %c0_0] : memref<1x256xf32, #tpu.memory_space<vmem>>, vector<1x256xf32>
    %cst = arith.constant 3.125000e-02 : f32
    %1 = vector.broadcast %cst : f32 to vector<1x256xf32>
    %2 = arith.mulf %0, %1 : vector<1x256xf32>
    %c0_1 = arith.constant 0 : index
    %c0_2 = arith.constant 0 : index
    %3 = vector.load %arg4[%c0_1, %c0_2] : memref<1x256xf32, #tpu.memory_space<vmem>>, vector<1x256xf32>
    %cst_3 = arith.constant 3.125000e-02 : f32
    %4 = vector.broadcast %cst_3 : f32 to vector<1x256xf32>
    %5 = arith.mulf %3, %4 : vector<1x256xf32>
    %cst_4 = arith.constant 9.99999974E-6 : f32
    %6 = vector.broadcast %cst_4 : f32 to vector<1x256xf32>
    %7 = arith.addf %5, %6 : vector<1x256xf32>
    %8 = math.rsqrt %7 : vector<1x256xf32>
    %c0_5 = arith.constant 0 : index
    %c0_6 = arith.constant 0 : index
    %9 = vector.load %arg5[%c0_5, %c0_6] : memref<1x256xf32, #tpu.memory_space<vmem>>, vector<1x256xf32>
    %10 = arith.mulf %8, %9 : vector<1x256xf32>
    %c0_7 = arith.constant 0 : index
    %c0_8 = arith.constant 0 : index
    %11 = vector.load %arg6[%c0_7, %c0_8] : memref<1x256xf32, #tpu.memory_space<vmem>>, vector<1x256xf32>
    %12 = arith.mulf %2, %10 : vector<1x256xf32>
    %13 = arith.subf %11, %12 : vector<1x256xf32>
    %c0_9 = arith.constant 0 : index
    %c0_10 = arith.constant 0 : index
    %14 = vector.load %arg2[%c0_9, %c0_10] : memref<32x256xf32, #tpu.memory_space<vmem>>, vector<32x256xf32>
    %15 = vector.broadcast %10 : vector<1x256xf32> to vector<32x256xf32>
    %16 = arith.mulf %14, %15 : vector<32x256xf32>
    %17 = vector.broadcast %13 : vector<1x256xf32> to vector<32x256xf32>
    %18 = arith.addf %16, %17 : vector<32x256xf32>
    %cst_11 = arith.constant 0.000000e+00 : f32
    %19 = vector.broadcast %cst_11 : f32 to vector<32x256xf32>
    %20 = arith.maximumf %18, %19 : vector<32x256xf32>
    %c0_12 = arith.constant 0 : index
    %c0_13 = arith.constant 0 : index
    %21 = vector.load %arg7[%c0_12, %c0_13] : memref<32x256xf32, #tpu.memory_space<vmem>>, vector<32x256xf32>
    tpu.vector_store %arg7[%c0_12, %c0_13], %20 {strides = array<i32>} : memref<32x256xf32, #tpu.memory_space<vmem>>, vector<32x256xf32>,
    return
  }
  func.func @transform_0(%arg0: i32, %arg1: i32) -> (i32, i32) {
    %c0_i32 = arith.constant 0 : i32
    return %arg0, %arg1 : i32, i32
  }
  func.func @transform_1(%arg0: i32, %arg1: i32) -> (i32, i32) {
    %c0_i32 = arith.constant 0 : i32
    %c0_i32_0 = arith.constant 0 : i32
    return %c0_i32, %arg1 : i32, i32
  }
  func.func @transform_2(%arg0: i32, %arg1: i32) -> (i32, i32) {
    %c0_i32 = arith.constant 0 : i32
    %c0_i32_0 = arith.constant 0 : i32
    return %c0_i32, %arg1 : i32, i32
  }
  func.func @transform_3(%arg0: i32, %arg1: i32) -> (i32, i32) {
    %c0_i32 = arith.constant 0 : i32
    %c0_i32_0 = arith.constant 0 : i32
    return %c0_i32, %arg1 : i32, i32
  }
  func.func @transform_4(%arg0: i32, %arg1: i32) -> (i32, i32) {
    %c0_i32 = arith.constant 0 : i32
    %c0_i32_0 = arith.constant 0 : i32
    return %c0_i32, %arg1 : i32, i32
  }
  func.func @transform_5(%arg0: i32, %arg1: i32) -> (i32, i32) {
    %c0_i32 = arith.constant 0 : i32
    return %arg0, %arg1 : i32, i32
  }
}

module attributes {stable_mosaic.version = 11 : i64} {
  func.func @kernel(%arg0: i32, %arg1: i32, %arg2: i32, %arg3: memref<8x512xbf16, #tpu.memory_space<vmem>>, %arg4: memref<512x256xbf16, #tpu.memory_space<vmem>>, %arg5: memref<8x256xf32, #tpu.memory_space<vmem>>, %arg6: memref<1x256xf32, #tpu.memory_space<vmem>>) attributes {dimension_semantics = [#tpu.dimension_semantics<parallel>, #tpu.dimension_semantics<arbitrary>, #tpu.dimension_semantics<arbitrary>], iteration_bounds = array<i64: 2, 1, 25>, scalar_prefetch = 0 : i64, scratch_operands = 0 : i64, tpu.core_type = #tpu.core_type<tc>, window_params = [{transform_indices = @transform_0, window_bounds = array<i64: 8, 512>}, {transform_indices = @transform_1, window_bounds = array<i64: 512, 256>}, {transform_indices = @transform_2, window_bounds = array<i64: 8, 256>}, {transform_indices = @transform_3, window_bounds = array<i64: 1, 256>}]} {
    %c0_i32 = arith.constant 0 : i32
    %0 = arith.cmpi eq, %arg2, %c0_i32 : i32
    %1 = arith.extui %0 : i1 to i32
    %c0_i32_0 = arith.constant 0 : i32
    %2 = arith.cmpi ne, %1, %c0_i32_0 : i32
    scf.if %2 {
      %cst_12 = arith.constant 0.000000e+00 : f32
      %17 = vector.broadcast %cst_12 : f32 to vector<8x256xf32>
      %c0_13 = arith.constant 0 : index
      %c0_14 = arith.constant 0 : index
      %18 = vector.load %arg5[%c0_13, %c0_14] : memref<8x256xf32, #tpu.memory_space<vmem>>, vector<8x256xf32>
      tpu.vector_store %arg5[%c0_13, %c0_14], %17 {strides = array<i32>} : memref<8x256xf32, #tpu.memory_space<vmem>>, vector<8x256xf32>,
    } else {
    }
    %c0_i32_1 = arith.constant 0 : i32
    %3 = arith.cmpi eq, %arg1, %c0_i32_1 : i32
    %c0_i32_2 = arith.constant 0 : i32
    %4 = arith.cmpi eq, %arg2, %c0_i32_2 : i32
    %5 = arith.andi %3, %4 : i1
    %6 = arith.extui %5 : i1 to i32
    %c0_i32_3 = arith.constant 0 : i32
    %7 = arith.cmpi ne, %6, %c0_i32_3 : i32
    scf.if %7 {
      %cst_12 = arith.constant 0.000000e+00 : f32
      %17 = vector.broadcast %cst_12 : f32 to vector<1x256xf32>
      %c0_13 = arith.constant 0 : index
      %c0_14 = arith.constant 0 : index
      %18 = vector.load %arg6[%c0_13, %c0_14] : memref<1x256xf32, #tpu.memory_space<vmem>>, vector<1x256xf32>
      tpu.vector_store %arg6[%c0_13, %c0_14], %17 {strides = array<i32>} : memref<1x256xf32, #tpu.memory_space<vmem>>, vector<1x256xf32>,
    } else {
    }
    %c0 = arith.constant 0 : index
    %c0_4 = arith.constant 0 : index
    %8 = vector.load %arg5[%c0, %c0_4] : memref<8x256xf32, #tpu.memory_space<vmem>>, vector<8x256xf32>
    %c0_5 = arith.constant 0 : index
    %c0_6 = arith.constant 0 : index
    %9 = vector.load %arg3[%c0_5, %c0_6] : memref<8x512xbf16, #tpu.memory_space<vmem>>, vector<8x512xbf16>
    %c0_7 = arith.constant 0 : index
    %c0_8 = arith.constant 0 : index
    %10 = vector.load %arg4[%c0_7, %c0_8] : memref<512x256xbf16, #tpu.memory_space<vmem>>, vector<512x256xbf16>
    %cst = arith.constant dense<0.000000e+00> : vector<8x256xf32>
    %11 = tpu.matmul %9, %10, %cst {dimension_numbers = #tpu.dot_dimension_numbers<[1], [0], [0], [1], [0, 0, 1, 1], [], []>} : vector<8x512xbf16>, vector<512x256xbf16>, vector<8x256xf32> -> vector<8x256xf32>
    %12 = arith.addf %8, %11 : vector<8x256xf32>
    %c0_9 = arith.constant 0 : index
    %c0_10 = arith.constant 0 : index
    %13 = vector.load %arg5[%c0_9, %c0_10] : memref<8x256xf32, #tpu.memory_space<vmem>>, vector<8x256xf32>
    tpu.vector_store %arg5[%c0_9, %c0_10], %12 {strides = array<i32>} : memref<8x256xf32, #tpu.memory_space<vmem>>, vector<8x256xf32>,
    %c24_i32 = arith.constant 24 : i32
    %14 = arith.cmpi eq, %arg2, %c24_i32 : i32
    %15 = arith.extui %14 : i1 to i32
    %c0_i32_11 = arith.constant 0 : i32
    %16 = arith.cmpi ne, %15, %c0_i32_11 : i32
    scf.if %16 {
      %c0_12 = arith.constant 0 : index
      %c0_13 = arith.constant 0 : index
      %17 = vector.load %arg6[%c0_12, %c0_13] : memref<1x256xf32, #tpu.memory_space<vmem>>, vector<1x256xf32>
      %c0_14 = arith.constant 0 : index
      %c0_15 = arith.constant 0 : index
      %18 = vector.load %arg5[%c0_14, %c0_15] : memref<8x256xf32, #tpu.memory_space<vmem>>, vector<8x256xf32>
      %cst_16 = arith.constant dense<0.000000e+00> : vector<256xf32>
      %19 = vector.multi_reduction <add>, %18, %cst_16 [0] : vector<8x256xf32> to vector<256xf32>
      %20 = vector.shape_cast %19 : vector<256xf32> to vector<1x256xf32>
      %21 = arith.addf %17, %20 : vector<1x256xf32>
      %c0_17 = arith.constant 0 : index
      %c0_18 = arith.constant 0 : index
      %22 = vector.load %arg6[%c0_17, %c0_18] : memref<1x256xf32, #tpu.memory_space<vmem>>, vector<1x256xf32>
      tpu.vector_store %arg6[%c0_17, %c0_18], %21 {strides = array<i32>} : memref<1x256xf32, #tpu.memory_space<vmem>>, vector<1x256xf32>,
    } else {
    }
    return
  }
  func.func @transform_0(%arg0: i32, %arg1: i32, %arg2: i32) -> (i32, i32) {
    %c0_i32 = arith.constant 0 : i32
    return %arg1, %arg2 : i32, i32
  }
  func.func @transform_1(%arg0: i32, %arg1: i32, %arg2: i32) -> (i32, i32) {
    %c0_i32 = arith.constant 0 : i32
    return %arg2, %arg0 : i32, i32
  }
  func.func @transform_2(%arg0: i32, %arg1: i32, %arg2: i32) -> (i32, i32) {
    %c0_i32 = arith.constant 0 : i32
    return %arg1, %arg0 : i32, i32
  }
  func.func @transform_3(%arg0: i32, %arg1: i32, %arg2: i32) -> (i32, i32) {
    %c0_i32 = arith.constant 0 : i32
    %c0_i32_0 = arith.constant 0 : i32
    return %c0_i32, %arg0 : i32, i32
  }
}

module attributes {stable_mosaic.version = 11 : i64} {
  func.func @kernel(%arg0: i32, %arg1: i32, %arg2: memref<8x256xf32, #tpu.memory_space<vmem>>, %arg3: memref<1x256xf32, #tpu.memory_space<vmem>>, %arg4: memref<1x256xf32, #tpu.memory_space<vmem>>) attributes {dimension_semantics = [#tpu.dimension_semantics<parallel>, #tpu.dimension_semantics<arbitrary>], iteration_bounds = array<i64: 2, 1>, scalar_prefetch = 0 : i64, scratch_operands = 0 : i64, tpu.core_type = #tpu.core_type<tc>, window_params = [{transform_indices = @transform_0, window_bounds = array<i64: 8, 256>}, {transform_indices = @transform_1, window_bounds = array<i64: 1, 256>}, {transform_indices = @transform_2, window_bounds = array<i64: 1, 256>}]} {
    %c0_i32 = arith.constant 0 : i32
    %0 = arith.cmpi eq, %arg1, %c0_i32 : i32
    %1 = arith.extui %0 : i1 to i32
    %c0_i32_0 = arith.constant 0 : i32
    %2 = arith.cmpi ne, %1, %c0_i32_0 : i32
    scf.if %2 {
      %cst_11 = arith.constant 0.000000e+00 : f32
      %23 = vector.broadcast %cst_11 : f32 to vector<1x256xf32>
      %c0_12 = arith.constant 0 : index
      %c0_13 = arith.constant 0 : index
      %24 = vector.load %arg4[%c0_12, %c0_13] : memref<1x256xf32, #tpu.memory_space<vmem>>, vector<1x256xf32>
      tpu.vector_store %arg4[%c0_12, %c0_13], %23 {strides = array<i32>} : memref<1x256xf32, #tpu.memory_space<vmem>>, vector<1x256xf32>,
    } else {
    }
    %c0 = arith.constant 0 : index
    %c0_1 = arith.constant 0 : index
    %3 = vector.load %arg3[%c0, %c0_1] : memref<1x256xf32, #tpu.memory_space<vmem>>, vector<1x256xf32>
    %cst = arith.constant 1.250000e-01 : f32
    %4 = vector.broadcast %cst : f32 to vector<1x256xf32>
    %5 = arith.mulf %3, %4 : vector<1x256xf32>
    %c0_2 = arith.constant 0 : index
    %c0_3 = arith.constant 0 : index
    %6 = vector.load %arg2[%c0_2, %c0_3] : memref<8x256xf32, #tpu.memory_space<vmem>>, vector<8x256xf32>
    %7 = vector.broadcast %5 : vector<1x256xf32> to vector<8x256xf32>
    %8 = arith.subf %6, %7 : vector<8x256xf32>
    %9 = tpu.iota {dimensions = array<i32: 0>} : vector<8x256xi32>
    %c8_i32 = arith.constant 8 : i32
    %10 = arith.muli %arg1, %c8_i32 : i32
    %11 = vector.broadcast %10 : i32 to vector<8x256xi32>
    %12 = arith.addi %9, %11 : vector<8x256xi32>
    %c8_i32_4 = arith.constant 8 : i32
    %13 = vector.broadcast %c8_i32_4 : i32 to vector<8x256xi32>
    %14 = arith.cmpi slt, %12, %13 : vector<8x256xi32>
    %cst_5 = arith.constant 0.000000e+00 : f32
    %15 = vector.broadcast %cst_5 : f32 to vector<8x256xf32>
    %16 = arith.select %14, %8, %15 : vector<8x256xi1>, vector<8x256xf32>
    %c0_6 = arith.constant 0 : index
    %c0_7 = arith.constant 0 : index
    %17 = vector.load %arg4[%c0_6, %c0_7] : memref<1x256xf32, #tpu.memory_space<vmem>>, vector<1x256xf32>
    %18 = arith.mulf %16, %16 : vector<8x256xf32>
    %cst_8 = arith.constant dense<0.000000e+00> : vector<256xf32>
    %19 = vector.multi_reduction <add>, %18, %cst_8 [0] : vector<8x256xf32> to vector<256xf32>
    %20 = vector.shape_cast %19 : vector<256xf32> to vector<1x256xf32>
    %21 = arith.addf %17, %20 : vector<1x256xf32>
    %c0_9 = arith.constant 0 : index
    %c0_10 = arith.constant 0 : index
    %22 = vector.load %arg4[%c0_9, %c0_10] : memref<1x256xf32, #tpu.memory_space<vmem>>, vector<1x256xf32>
    tpu.vector_store %arg4[%c0_9, %c0_10], %21 {strides = array<i32>} : memref<1x256xf32, #tpu.memory_space<vmem>>, vector<1x256xf32>,
    return
  }
  func.func @transform_0(%arg0: i32, %arg1: i32) -> (i32, i32) {
    %c0_i32 = arith.constant 0 : i32
    return %arg1, %arg0 : i32, i32
  }
  func.func @transform_1(%arg0: i32, %arg1: i32) -> (i32, i32) {
    %c0_i32 = arith.constant 0 : i32
    %c0_i32_0 = arith.constant 0 : i32
    return %c0_i32, %arg0 : i32, i32
  }
  func.func @transform_2(%arg0: i32, %arg1: i32) -> (i32, i32) {
    %c0_i32 = arith.constant 0 : i32
    %c0_i32_0 = arith.constant 0 : i32
    return %c0_i32, %arg0 : i32, i32
  }
}

module attributes {stable_mosaic.version = 11 : i64} {
  func.func @kernel(%arg0: i32, %arg1: i32, %arg2: memref<8x256xf32, #tpu.memory_space<vmem>>, %arg3: memref<1x256xf32, #tpu.memory_space<vmem>>, %arg4: memref<1x256xf32, #tpu.memory_space<vmem>>, %arg5: memref<1x256xf32, #tpu.memory_space<vmem>>, %arg6: memref<1x256xf32, #tpu.memory_space<vmem>>, %arg7: memref<8x256xf32, #tpu.memory_space<vmem>>) attributes {dimension_semantics = [#tpu.dimension_semantics<parallel>, #tpu.dimension_semantics<parallel>], iteration_bounds = array<i64: 1, 2>, scalar_prefetch = 0 : i64, scratch_operands = 0 : i64, tpu.core_type = #tpu.core_type<tc>, window_params = [{transform_indices = @transform_0, window_bounds = array<i64: 8, 256>}, {transform_indices = @transform_1, window_bounds = array<i64: 1, 256>}, {transform_indices = @transform_2, window_bounds = array<i64: 1, 256>}, {transform_indices = @transform_3, window_bounds = array<i64: 1, 256>}, {transform_indices = @transform_4, window_bounds = array<i64: 1, 256>}, {transform_indices = @transform_5, window_bounds = array<i64: 8, 256>}]} {
    %c0 = arith.constant 0 : index
    %c0_0 = arith.constant 0 : index
    %0 = vector.load %arg3[%c0, %c0_0] : memref<1x256xf32, #tpu.memory_space<vmem>>, vector<1x256xf32>
    %cst = arith.constant 1.250000e-01 : f32
    %1 = vector.broadcast %cst : f32 to vector<1x256xf32>
    %2 = arith.mulf %0, %1 : vector<1x256xf32>
    %c0_1 = arith.constant 0 : index
    %c0_2 = arith.constant 0 : index
    %3 = vector.load %arg4[%c0_1, %c0_2] : memref<1x256xf32, #tpu.memory_space<vmem>>, vector<1x256xf32>
    %cst_3 = arith.constant 1.250000e-01 : f32
    %4 = vector.broadcast %cst_3 : f32 to vector<1x256xf32>
    %5 = arith.mulf %3, %4 : vector<1x256xf32>
    %cst_4 = arith.constant 9.99999974E-6 : f32
    %6 = vector.broadcast %cst_4 : f32 to vector<1x256xf32>
    %7 = arith.addf %5, %6 : vector<1x256xf32>
    %8 = math.rsqrt %7 : vector<1x256xf32>
    %c0_5 = arith.constant 0 : index
    %c0_6 = arith.constant 0 : index
    %9 = vector.load %arg5[%c0_5, %c0_6] : memref<1x256xf32, #tpu.memory_space<vmem>>, vector<1x256xf32>
    %10 = arith.mulf %8, %9 : vector<1x256xf32>
    %c0_7 = arith.constant 0 : index
    %c0_8 = arith.constant 0 : index
    %11 = vector.load %arg6[%c0_7, %c0_8] : memref<1x256xf32, #tpu.memory_space<vmem>>, vector<1x256xf32>
    %12 = arith.mulf %2, %10 : vector<1x256xf32>
    %13 = arith.subf %11, %12 : vector<1x256xf32>
    %c0_9 = arith.constant 0 : index
    %c0_10 = arith.constant 0 : index
    %14 = vector.load %arg2[%c0_9, %c0_10] : memref<8x256xf32, #tpu.memory_space<vmem>>, vector<8x256xf32>
    %15 = vector.broadcast %10 : vector<1x256xf32> to vector<8x256xf32>
    %16 = arith.mulf %14, %15 : vector<8x256xf32>
    %17 = vector.broadcast %13 : vector<1x256xf32> to vector<8x256xf32>
    %18 = arith.addf %16, %17 : vector<8x256xf32>
    %cst_11 = arith.constant 0.000000e+00 : f32
    %19 = vector.broadcast %cst_11 : f32 to vector<8x256xf32>
    %20 = arith.maximumf %18, %19 : vector<8x256xf32>
    %c0_12 = arith.constant 0 : index
    %c0_13 = arith.constant 0 : index
    %21 = vector.load %arg7[%c0_12, %c0_13] : memref<8x256xf32, #tpu.memory_space<vmem>>, vector<8x256xf32>
    tpu.vector_store %arg7[%c0_12, %c0_13], %20 {strides = array<i32>} : memref<8x256xf32, #tpu.memory_space<vmem>>, vector<8x256xf32>,
    return
  }
  func.func @transform_0(%arg0: i32, %arg1: i32) -> (i32, i32) {
    %c0_i32 = arith.constant 0 : i32
    return %arg0, %arg1 : i32, i32
  }
  func.func @transform_1(%arg0: i32, %arg1: i32) -> (i32, i32) {
    %c0_i32 = arith.constant 0 : i32
    %c0_i32_0 = arith.constant 0 : i32
    return %c0_i32, %arg1 : i32, i32
  }
  func.func @transform_2(%arg0: i32, %arg1: i32) -> (i32, i32) {
    %c0_i32 = arith.constant 0 : i32
    %c0_i32_0 = arith.constant 0 : i32
    return %c0_i32, %arg1 : i32, i32
  }
  func.func @transform_3(%arg0: i32, %arg1: i32) -> (i32, i32) {
    %c0_i32 = arith.constant 0 : i32
    %c0_i32_0 = arith.constant 0 : i32
    return %c0_i32, %arg1 : i32, i32
  }
  func.func @transform_4(%arg0: i32, %arg1: i32) -> (i32, i32) {
    %c0_i32 = arith.constant 0 : i32
    %c0_i32_0 = arith.constant 0 : i32
    return %c0_i32, %arg1 : i32, i32
  }
  func.func @transform_5(%arg0: i32, %arg1: i32) -> (i32, i32) {
    %c0_i32 = arith.constant 0 : i32
    return %arg0, %arg1 : i32, i32
  }
}

module attributes {stable_mosaic.version = 11 : i64} {
  func.func @kernel(%arg0: i32, %arg1: i32, %arg2: i32, %arg3: memref<8x512xbf16, #tpu.memory_space<vmem>>, %arg4: memref<512x256xbf16, #tpu.memory_space<vmem>>, %arg5: memref<8x256xf32, #tpu.memory_space<vmem>>, %arg6: memref<1x256xf32, #tpu.memory_space<vmem>>) attributes {dimension_semantics = [#tpu.dimension_semantics<parallel>, #tpu.dimension_semantics<arbitrary>, #tpu.dimension_semantics<arbitrary>], iteration_bounds = array<i64: 4, 1, 49>, scalar_prefetch = 0 : i64, scratch_operands = 0 : i64, tpu.core_type = #tpu.core_type<tc>, window_params = [{transform_indices = @transform_0, window_bounds = array<i64: 8, 512>}, {transform_indices = @transform_1, window_bounds = array<i64: 512, 256>}, {transform_indices = @transform_2, window_bounds = array<i64: 8, 256>}, {transform_indices = @transform_3, window_bounds = array<i64: 1, 256>}]} {
    %c0_i32 = arith.constant 0 : i32
    %0 = arith.cmpi eq, %arg2, %c0_i32 : i32
    %1 = arith.extui %0 : i1 to i32
    %c0_i32_0 = arith.constant 0 : i32
    %2 = arith.cmpi ne, %1, %c0_i32_0 : i32
    scf.if %2 {
      %cst_12 = arith.constant 0.000000e+00 : f32
      %17 = vector.broadcast %cst_12 : f32 to vector<8x256xf32>
      %c0_13 = arith.constant 0 : index
      %c0_14 = arith.constant 0 : index
      %18 = vector.load %arg5[%c0_13, %c0_14] : memref<8x256xf32, #tpu.memory_space<vmem>>, vector<8x256xf32>
      tpu.vector_store %arg5[%c0_13, %c0_14], %17 {strides = array<i32>} : memref<8x256xf32, #tpu.memory_space<vmem>>, vector<8x256xf32>,
    } else {
    }
    %c0_i32_1 = arith.constant 0 : i32
    %3 = arith.cmpi eq, %arg1, %c0_i32_1 : i32
    %c0_i32_2 = arith.constant 0 : i32
    %4 = arith.cmpi eq, %arg2, %c0_i32_2 : i32
    %5 = arith.andi %3, %4 : i1
    %6 = arith.extui %5 : i1 to i32
    %c0_i32_3 = arith.constant 0 : i32
    %7 = arith.cmpi ne, %6, %c0_i32_3 : i32
    scf.if %7 {
      %cst_12 = arith.constant 0.000000e+00 : f32
      %17 = vector.broadcast %cst_12 : f32 to vector<1x256xf32>
      %c0_13 = arith.constant 0 : index
      %c0_14 = arith.constant 0 : index
      %18 = vector.load %arg6[%c0_13, %c0_14] : memref<1x256xf32, #tpu.memory_space<vmem>>, vector<1x256xf32>
      tpu.vector_store %arg6[%c0_13, %c0_14], %17 {strides = array<i32>} : memref<1x256xf32, #tpu.memory_space<vmem>>, vector<1x256xf32>,
    } else {
    }
    %c0 = arith.constant 0 : index
    %c0_4 = arith.constant 0 : index
    %8 = vector.load %arg5[%c0, %c0_4] : memref<8x256xf32, #tpu.memory_space<vmem>>, vector<8x256xf32>
    %c0_5 = arith.constant 0 : index
    %c0_6 = arith.constant 0 : index
    %9 = vector.load %arg3[%c0_5, %c0_6] : memref<8x512xbf16, #tpu.memory_space<vmem>>, vector<8x512xbf16>
    %c0_7 = arith.constant 0 : index
    %c0_8 = arith.constant 0 : index
    %10 = vector.load %arg4[%c0_7, %c0_8] : memref<512x256xbf16, #tpu.memory_space<vmem>>, vector<512x256xbf16>
    %cst = arith.constant dense<0.000000e+00> : vector<8x256xf32>
    %11 = tpu.matmul %9, %10, %cst {dimension_numbers = #tpu.dot_dimension_numbers<[1], [0], [0], [1], [0, 0, 1, 1], [], []>} : vector<8x512xbf16>, vector<512x256xbf16>, vector<8x256xf32> -> vector<8x256xf32>
    %12 = arith.addf %8, %11 : vector<8x256xf32>
    %c0_9 = arith.constant 0 : index
    %c0_10 = arith.constant 0 : index
    %13 = vector.load %arg5[%c0_9, %c0_10] : memref<8x256xf32, #tpu.memory_space<vmem>>, vector<8x256xf32>
    tpu.vector_store %arg5[%c0_9, %c0_10], %12 {strides = array<i32>} : memref<8x256xf32, #tpu.memory_space<vmem>>, vector<8x256xf32>,
    %c48_i32 = arith.constant 48 : i32
    %14 = arith.cmpi eq, %arg2, %c48_i32 : i32
    %15 = arith.extui %14 : i1 to i32
    %c0_i32_11 = arith.constant 0 : i32
    %16 = arith.cmpi ne, %15, %c0_i32_11 : i32
    scf.if %16 {
      %c0_12 = arith.constant 0 : index
      %c0_13 = arith.constant 0 : index
      %17 = vector.load %arg6[%c0_12, %c0_13] : memref<1x256xf32, #tpu.memory_space<vmem>>, vector<1x256xf32>
      %c0_14 = arith.constant 0 : index
      %c0_15 = arith.constant 0 : index
      %18 = vector.load %arg5[%c0_14, %c0_15] : memref<8x256xf32, #tpu.memory_space<vmem>>, vector<8x256xf32>
      %cst_16 = arith.constant dense<0.000000e+00> : vector<256xf32>
      %19 = vector.multi_reduction <add>, %18, %cst_16 [0] : vector<8x256xf32> to vector<256xf32>
      %20 = vector.shape_cast %19 : vector<256xf32> to vector<1x256xf32>
      %21 = arith.addf %17, %20 : vector<1x256xf32>
      %c0_17 = arith.constant 0 : index
      %c0_18 = arith.constant 0 : index
      %22 = vector.load %arg6[%c0_17, %c0_18] : memref<1x256xf32, #tpu.memory_space<vmem>>, vector<1x256xf32>
      tpu.vector_store %arg6[%c0_17, %c0_18], %21 {strides = array<i32>} : memref<1x256xf32, #tpu.memory_space<vmem>>, vector<1x256xf32>,
    } else {
    }
    return
  }
  func.func @transform_0(%arg0: i32, %arg1: i32, %arg2: i32) -> (i32, i32) {
    %c0_i32 = arith.constant 0 : i32
    return %arg1, %arg2 : i32, i32
  }
  func.func @transform_1(%arg0: i32, %arg1: i32, %arg2: i32) -> (i32, i32) {
    %c0_i32 = arith.constant 0 : i32
    return %arg2, %arg0 : i32, i32
  }
  func.func @transform_2(%arg0: i32, %arg1: i32, %arg2: i32) -> (i32, i32) {
    %c0_i32 = arith.constant 0 : i32
    return %arg1, %arg0 : i32, i32
  }
  func.func @transform_3(%arg0: i32, %arg1: i32, %arg2: i32) -> (i32, i32) {
    %c0_i32 = arith.constant 0 : i32
    %c0_i32_0 = arith.constant 0 : i32
    return %c0_i32, %arg0 : i32, i32
  }
}

module attributes {stable_mosaic.version = 11 : i64} {
  func.func @kernel(%arg0: i32, %arg1: i32, %arg2: memref<8x256xf32, #tpu.memory_space<vmem>>, %arg3: memref<1x256xf32, #tpu.memory_space<vmem>>, %arg4: memref<1x256xf32, #tpu.memory_space<vmem>>) attributes {dimension_semantics = [#tpu.dimension_semantics<parallel>, #tpu.dimension_semantics<arbitrary>], iteration_bounds = array<i64: 4, 1>, scalar_prefetch = 0 : i64, scratch_operands = 0 : i64, tpu.core_type = #tpu.core_type<tc>, window_params = [{transform_indices = @transform_0, window_bounds = array<i64: 8, 256>}, {transform_indices = @transform_1, window_bounds = array<i64: 1, 256>}, {transform_indices = @transform_2, window_bounds = array<i64: 1, 256>}]} {
    %c0_i32 = arith.constant 0 : i32
    %0 = arith.cmpi eq, %arg1, %c0_i32 : i32
    %1 = arith.extui %0 : i1 to i32
    %c0_i32_0 = arith.constant 0 : i32
    %2 = arith.cmpi ne, %1, %c0_i32_0 : i32
    scf.if %2 {
      %cst_10 = arith.constant 0.000000e+00 : f32
      %23 = vector.broadcast %cst_10 : f32 to vector<1x256xf32>
      %c0_11 = arith.constant 0 : index
      %c0_12 = arith.constant 0 : index
      %24 = vector.load %arg4[%c0_11, %c0_12] : memref<1x256xf32, #tpu.memory_space<vmem>>, vector<1x256xf32>
      tpu.vector_store %arg4[%c0_11, %c0_12], %23 {strides = array<i32>} : memref<1x256xf32, #tpu.memory_space<vmem>>, vector<1x256xf32>,
    } else {
    }
    %c0 = arith.constant 0 : index
    %c0_1 = arith.constant 0 : index
    %3 = vector.load %arg3[%c0, %c0_1] : memref<1x256xf32, #tpu.memory_space<vmem>>, vector<1x256xf32>
    %cst = arith.constant 5.000000e-01 : f32
    %4 = vector.broadcast %cst : f32 to vector<1x256xf32>
    %5 = arith.mulf %3, %4 : vector<1x256xf32>
    %c0_2 = arith.constant 0 : index
    %c0_3 = arith.constant 0 : index
    %6 = vector.load %arg2[%c0_2, %c0_3] : memref<8x256xf32, #tpu.memory_space<vmem>>, vector<8x256xf32>
    %7 = vector.broadcast %5 : vector<1x256xf32> to vector<8x256xf32>
    %8 = arith.subf %6, %7 : vector<8x256xf32>
    %9 = tpu.iota {dimensions = array<i32: 0>} : vector<8x256xi32>
    %c8_i32 = arith.constant 8 : i32
    %10 = arith.muli %arg1, %c8_i32 : i32
    %11 = vector.broadcast %10 : i32 to vector<8x256xi32>
    %12 = arith.addi %9, %11 : vector<8x256xi32>
    %c2_i32 = arith.constant 2 : i32
    %13 = vector.broadcast %c2_i32 : i32 to vector<8x256xi32>
    %14 = arith.cmpi slt, %12, %13 : vector<8x256xi32>
    %cst_4 = arith.constant 0.000000e+00 : f32
    %15 = vector.broadcast %cst_4 : f32 to vector<8x256xf32>
    %16 = arith.select %14, %8, %15 : vector<8x256xi1>, vector<8x256xf32>
    %c0_5 = arith.constant 0 : index
    %c0_6 = arith.constant 0 : index
    %17 = vector.load %arg4[%c0_5, %c0_6] : memref<1x256xf32, #tpu.memory_space<vmem>>, vector<1x256xf32>
    %18 = arith.mulf %16, %16 : vector<8x256xf32>
    %cst_7 = arith.constant dense<0.000000e+00> : vector<256xf32>
    %19 = vector.multi_reduction <add>, %18, %cst_7 [0] : vector<8x256xf32> to vector<256xf32>
    %20 = vector.shape_cast %19 : vector<256xf32> to vector<1x256xf32>
    %21 = arith.addf %17, %20 : vector<1x256xf32>
    %c0_8 = arith.constant 0 : index
    %c0_9 = arith.constant 0 : index
    %22 = vector.load %arg4[%c0_8, %c0_9] : memref<1x256xf32, #tpu.memory_space<vmem>>, vector<1x256xf32>
    tpu.vector_store %arg4[%c0_8, %c0_9], %21 {strides = array<i32>} : memref<1x256xf32, #tpu.memory_space<vmem>>, vector<1x256xf32>,
    return
  }
  func.func @transform_0(%arg0: i32, %arg1: i32) -> (i32, i32) {
    %c0_i32 = arith.constant 0 : i32
    return %arg1, %arg0 : i32, i32
  }
  func.func @transform_1(%arg0: i32, %arg1: i32) -> (i32, i32) {
    %c0_i32 = arith.constant 0 : i32
    %c0_i32_0 = arith.constant 0 : i32
    return %c0_i32, %arg0 : i32, i32
  }
  func.func @transform_2(%arg0: i32, %arg1: i32) -> (i32, i32) {
    %c0_i32 = arith.constant 0 : i32
    %c0_i32_0 = arith.constant 0 : i32
    return %c0_i32, %arg0 : i32, i32
  }
}

module attributes {stable_mosaic.version = 11 : i64} {
  func.func @kernel(%arg0: i32, %arg1: i32, %arg2: memref<8x256xf32, #tpu.memory_space<vmem>>, %arg3: memref<1x256xf32, #tpu.memory_space<vmem>>, %arg4: memref<1x256xf32, #tpu.memory_space<vmem>>, %arg5: memref<1x256xf32, #tpu.memory_space<vmem>>, %arg6: memref<1x256xf32, #tpu.memory_space<vmem>>, %arg7: memref<8x256xf32, #tpu.memory_space<vmem>>) attributes {dimension_semantics = [#tpu.dimension_semantics<parallel>, #tpu.dimension_semantics<parallel>], iteration_bounds = array<i64: 1, 4>, scalar_prefetch = 0 : i64, scratch_operands = 0 : i64, tpu.core_type = #tpu.core_type<tc>, window_params = [{transform_indices = @transform_0, window_bounds = array<i64: 8, 256>}, {transform_indices = @transform_1, window_bounds = array<i64: 1, 256>}, {transform_indices = @transform_2, window_bounds = array<i64: 1, 256>}, {transform_indices = @transform_3, window_bounds = array<i64: 1, 256>}, {transform_indices = @transform_4, window_bounds = array<i64: 1, 256>}, {transform_indices = @transform_5, window_bounds = array<i64: 8, 256>}]} {
    %c0 = arith.constant 0 : index
    %c0_0 = arith.constant 0 : index
    %0 = vector.load %arg3[%c0, %c0_0] : memref<1x256xf32, #tpu.memory_space<vmem>>, vector<1x256xf32>
    %cst = arith.constant 5.000000e-01 : f32
    %1 = vector.broadcast %cst : f32 to vector<1x256xf32>
    %2 = arith.mulf %0, %1 : vector<1x256xf32>
    %c0_1 = arith.constant 0 : index
    %c0_2 = arith.constant 0 : index
    %3 = vector.load %arg4[%c0_1, %c0_2] : memref<1x256xf32, #tpu.memory_space<vmem>>, vector<1x256xf32>
    %cst_3 = arith.constant 5.000000e-01 : f32
    %4 = vector.broadcast %cst_3 : f32 to vector<1x256xf32>
    %5 = arith.mulf %3, %4 : vector<1x256xf32>
    %cst_4 = arith.constant 9.99999974E-6 : f32
    %6 = vector.broadcast %cst_4 : f32 to vector<1x256xf32>
    %7 = arith.addf %5, %6 : vector<1x256xf32>
    %8 = math.rsqrt %7 : vector<1x256xf32>
    %c0_5 = arith.constant 0 : index
    %c0_6 = arith.constant 0 : index
    %9 = vector.load %arg5[%c0_5, %c0_6] : memref<1x256xf32, #tpu.memory_space<vmem>>, vector<1x256xf32>
    %10 = arith.mulf %8, %9 : vector<1x256xf32>
    %c0_7 = arith.constant 0 : index
    %c0_8 = arith.constant 0 : index
    %11 = vector.load %arg6[%c0_7, %c0_8] : memref<1x256xf32, #tpu.memory_space<vmem>>, vector<1x256xf32>
    %12 = arith.mulf %2, %10 : vector<1x256xf32>
    %13 = arith.subf %11, %12 : vector<1x256xf32>
    %c0_9 = arith.constant 0 : index
    %c0_10 = arith.constant 0 : index
    %14 = vector.load %arg2[%c0_9, %c0_10] : memref<8x256xf32, #tpu.memory_space<vmem>>, vector<8x256xf32>
    %15 = vector.broadcast %10 : vector<1x256xf32> to vector<8x256xf32>
    %16 = arith.mulf %14, %15 : vector<8x256xf32>
    %17 = vector.broadcast %13 : vector<1x256xf32> to vector<8x256xf32>
    %18 = arith.addf %16, %17 : vector<8x256xf32>
    %cst_11 = arith.constant 0.000000e+00 : f32
    %19 = vector.broadcast %cst_11 : f32 to vector<8x256xf32>
    %20 = arith.maximumf %18, %19 : vector<8x256xf32>
    %c0_12 = arith.constant 0 : index
    %c0_13 = arith.constant 0 : index
    %21 = vector.load %arg7[%c0_12, %c0_13] : memref<8x256xf32, #tpu.memory_space<vmem>>, vector<8x256xf32>
    tpu.vector_store %arg7[%c0_12, %c0_13], %20 {strides = array<i32>} : memref<8x256xf32, #tpu.memory_space<vmem>>, vector<8x256xf32>,
    return
  }
  func.func @transform_0(%arg0: i32, %arg1: i32) -> (i32, i32) {
    %c0_i32 = arith.constant 0 : i32
    return %arg0, %arg1 : i32, i32
  }
  func.func @transform_1(%arg0: i32, %arg1: i32) -> (i32, i32) {
    %c0_i32 = arith.constant 0 : i32
    %c0_i32_0 = arith.constant 0 : i32
    return %c0_i32, %arg1 : i32, i32
  }
  func.func @transform_2(%arg0: i32, %arg1: i32) -> (i32, i32) {
    %c0_i32 = arith.constant 0 : i32
    %c0_i32_0 = arith.constant 0 : i32
    return %c0_i32, %arg1 : i32, i32
  }
  func.func @transform_3(%arg0: i32, %arg1: i32) -> (i32, i32) {
    %c0_i32 = arith.constant 0 : i32
    %c0_i32_0 = arith.constant 0 : i32
    return %c0_i32, %arg1 : i32, i32
  }
  func.func @transform_4(%arg0: i32, %arg1: i32) -> (i32, i32) {
    %c0_i32 = arith.constant 0 : i32
    %c0_i32_0 = arith.constant 0 : i32
    return %c0_i32, %arg1 : i32, i32
  }
  func.func @transform_5(%arg0: i32, %arg1: i32) -> (i32, i32) {
    %c0_i32 = arith.constant 0 : i32
    return %arg0, %arg1 : i32, i32
  }
}

module attributes {stable_mosaic.version = 11 : i64} {
  func.func @kernel(%arg0: i32, %arg1: i32, %arg2: i32, %arg3: memref<8x1024xbf16, #tpu.memory_space<vmem>>, %arg4: memref<1024x128xbf16, #tpu.memory_space<vmem>>, %arg5: memref<8x128xf32, #tpu.memory_space<vmem>>) attributes {dimension_semantics = [#tpu.dimension_semantics<parallel>, #tpu.dimension_semantics<parallel>, #tpu.dimension_semantics<arbitrary>], iteration_bounds = array<i64: 1, 1, 1>, scalar_prefetch = 0 : i64, scratch_operands = 0 : i64, tpu.core_type = #tpu.core_type<tc>, window_params = [{transform_indices = @transform_0, window_bounds = array<i64: 8, 1024>}, {transform_indices = @transform_1, window_bounds = array<i64: 1024, 128>}, {transform_indices = @transform_2, window_bounds = array<i64: 8, 128>}]} {
    %c0_i32 = arith.constant 0 : i32
    %0 = arith.cmpi eq, %arg2, %c0_i32 : i32
    %1 = arith.extui %0 : i1 to i32
    %c0_i32_0 = arith.constant 0 : i32
    %2 = arith.cmpi ne, %1, %c0_i32_0 : i32
    scf.if %2 {
      %cst_8 = arith.constant 0.000000e+00 : f32
      %9 = vector.broadcast %cst_8 : f32 to vector<8x128xf32>
      %c0_9 = arith.constant 0 : index
      %c0_10 = arith.constant 0 : index
      %10 = vector.load %arg5[%c0_9, %c0_10] : memref<8x128xf32, #tpu.memory_space<vmem>>, vector<8x128xf32>
      tpu.vector_store %arg5[%c0_9, %c0_10], %9 {strides = array<i32>} : memref<8x128xf32, #tpu.memory_space<vmem>>, vector<8x128xf32>,
    } else {
    }
    %c0 = arith.constant 0 : index
    %c0_1 = arith.constant 0 : index
    %3 = vector.load %arg5[%c0, %c0_1] : memref<8x128xf32, #tpu.memory_space<vmem>>, vector<8x128xf32>
    %c0_2 = arith.constant 0 : index
    %c0_3 = arith.constant 0 : index
    %4 = vector.load %arg3[%c0_2, %c0_3] : memref<8x1024xbf16, #tpu.memory_space<vmem>>, vector<8x1024xbf16>
    %c0_4 = arith.constant 0 : index
    %c0_5 = arith.constant 0 : index
    %5 = vector.load %arg4[%c0_4, %c0_5] : memref<1024x128xbf16, #tpu.memory_space<vmem>>, vector<1024x128xbf16>
    %cst = arith.constant dense<0.000000e+00> : vector<8x128xf32>
    %6 = tpu.matmul %4, %5, %cst {dimension_numbers = #tpu.dot_dimension_numbers<[1], [0], [0], [1], [0, 0, 1, 1], [], []>} : vector<8x1024xbf16>, vector<1024x128xbf16>, vector<8x128xf32> -> vector<8x128xf32>
    %7 = arith.addf %3, %6 : vector<8x128xf32>
    %c0_6 = arith.constant 0 : index
    %c0_7 = arith.constant 0 : index
    %8 = vector.load %arg5[%c0_6, %c0_7] : memref<8x128xf32, #tpu.memory_space<vmem>>, vector<8x128xf32>
    tpu.vector_store %arg5[%c0_6, %c0_7], %7 {strides = array<i32>} : memref<8x128xf32, #tpu.memory_space<vmem>>, vector<8x128xf32>,
    return
  }
  func.func @transform_0(%arg0: i32, %arg1: i32, %arg2: i32) -> (i32, i32) {
    %c0_i32 = arith.constant 0 : i32
    return %arg1, %arg2 : i32, i32
  }
  func.func @transform_1(%arg0: i32, %arg1: i32, %arg2: i32) -> (i32, i32) {
    %c0_i32 = arith.constant 0 : i32
    return %arg2, %arg0 : i32, i32
  }
  func.func @transform_2(%arg0: i32, %arg1: i32, %arg2: i32) -> (i32, i32) {
    %c0_i32 = arith.constant 0 : i32
    return %arg1, %arg0 : i32, i32
  }
}

module attributes {stable_mosaic.version = 11 : i64} {
  func.func @kernel(%arg0: i32, %arg1: i32, %arg2: i32, %arg3: memref<8x512xbf16, #tpu.memory_space<vmem>>, %arg4: memref<512x128xbf16, #tpu.memory_space<vmem>>, %arg5: memref<8x128xf32, #tpu.memory_space<vmem>>, %arg6: memref<8x128xf32, #tpu.memory_space<vmem>>) attributes {dimension_semantics = [#tpu.dimension_semantics<parallel>, #tpu.dimension_semantics<parallel>, #tpu.dimension_semantics<arbitrary>], iteration_bounds = array<i64: 1, 1, 1>, scalar_prefetch = 0 : i64, scratch_operands = 0 : i64, tpu.core_type = #tpu.core_type<tc>, window_params = [{transform_indices = @transform_0, window_bounds = array<i64: 8, 512>}, {transform_indices = @transform_1, window_bounds = array<i64: 512, 128>}, {transform_indices = @transform_2, window_bounds = array<i64: 8, 128>}, {transform_indices = @transform_3, window_bounds = array<i64: 8, 128>}]} {
    %c0_i32 = arith.constant 0 : i32
    %0 = arith.cmpi eq, %arg2, %c0_i32 : i32
    %1 = arith.extui %0 : i1 to i32
    %c0_i32_0 = arith.constant 0 : i32
    %2 = arith.cmpi ne, %1, %c0_i32_0 : i32
    scf.if %2 {
      %cst_10 = arith.constant 0.000000e+00 : f32
      %12 = vector.broadcast %cst_10 : f32 to vector<8x128xf32>
      %c0_11 = arith.constant 0 : index
      %c0_12 = arith.constant 0 : index
      %13 = vector.load %arg6[%c0_11, %c0_12] : memref<8x128xf32, #tpu.memory_space<vmem>>, vector<8x128xf32>
      tpu.vector_store %arg6[%c0_11, %c0_12], %12 {strides = array<i32>} : memref<8x128xf32, #tpu.memory_space<vmem>>, vector<8x128xf32>,
    } else {
    }
    %c0 = arith.constant 0 : index
    %c0_1 = arith.constant 0 : index
    %3 = vector.load %arg6[%c0, %c0_1] : memref<8x128xf32, #tpu.memory_space<vmem>>, vector<8x128xf32>
    %c0_2 = arith.constant 0 : index
    %c0_3 = arith.constant 0 : index
    %4 = vector.load %arg3[%c0_2, %c0_3] : memref<8x512xbf16, #tpu.memory_space<vmem>>, vector<8x512xbf16>
    %c0_4 = arith.constant 0 : index
    %c0_5 = arith.constant 0 : index
    %5 = vector.load %arg4[%c0_4, %c0_5] : memref<512x128xbf16, #tpu.memory_space<vmem>>, vector<512x128xbf16>
    %cst = arith.constant dense<0.000000e+00> : vector<8x128xf32>
    %6 = tpu.matmul %4, %5, %cst {dimension_numbers = #tpu.dot_dimension_numbers<[1], [0], [0], [1], [0, 0, 1, 1], [], []>} : vector<8x512xbf16>, vector<512x128xbf16>, vector<8x128xf32> -> vector<8x128xf32>
    %7 = arith.addf %3, %6 : vector<8x128xf32>
    %c0_6 = arith.constant 0 : index
    %c0_7 = arith.constant 0 : index
    %8 = vector.load %arg6[%c0_6, %c0_7] : memref<8x128xf32, #tpu.memory_space<vmem>>, vector<8x128xf32>
    tpu.vector_store %arg6[%c0_6, %c0_7], %7 {strides = array<i32>} : memref<8x128xf32, #tpu.memory_space<vmem>>, vector<8x128xf32>,
    %c0_i32_8 = arith.constant 0 : i32
    %9 = arith.cmpi eq, %arg2, %c0_i32_8 : i32
    %10 = arith.extui %9 : i1 to i32
    %c0_i32_9 = arith.constant 0 : i32
    %11 = arith.cmpi ne, %10, %c0_i32_9 : i32
    scf.if %11 {
      %c0_10 = arith.constant 0 : index
      %c0_11 = arith.constant 0 : index
      %12 = vector.load %arg6[%c0_10, %c0_11] : memref<8x128xf32, #tpu.memory_space<vmem>>, vector<8x128xf32>
      %c0_12 = arith.constant 0 : index
      %c0_13 = arith.constant 0 : index
      %13 = vector.load %arg5[%c0_12, %c0_13] : memref<8x128xf32, #tpu.memory_space<vmem>>, vector<8x128xf32>
      %14 = arith.addf %12, %13 : vector<8x128xf32>
      %c0_14 = arith.constant 0 : index
      %c0_15 = arith.constant 0 : index
      %15 = vector.load %arg6[%c0_14, %c0_15] : memref<8x128xf32, #tpu.memory_space<vmem>>, vector<8x128xf32>
      tpu.vector_store %arg6[%c0_14, %c0_15], %14 {strides = array<i32>} : memref<8x128xf32, #tpu.memory_space<vmem>>, vector<8x128xf32>,
    } else {
    }
    return
  }
  func.func @transform_0(%arg0: i32, %arg1: i32, %arg2: i32) -> (i32, i32) {
    %c0_i32 = arith.constant 0 : i32
    return %arg1, %arg2 : i32, i32
  }
  func.func @transform_1(%arg0: i32, %arg1: i32, %arg2: i32) -> (i32, i32) {
    %c0_i32 = arith.constant 0 : i32
    return %arg2, %arg0 : i32, i32
  }
  func.func @transform_2(%arg0: i32, %arg1: i32, %arg2: i32) -> (i32, i32) {
    %c0_i32 = arith.constant 0 : i32
    return %arg1, %arg0 : i32, i32
  }
  func.func @transform_3(%arg0: i32, %arg1: i32, %arg2: i32) -> (i32, i32) {
    %c0_i32 = arith.constant 0 : i32
    return %arg1, %arg0 : i32, i32
  }
}

module attributes {stable_mosaic.version = 11 : i64} {
  func.func @kernel(%arg0: i32, %arg1: i32, %arg2: i32, %arg3: memref<32x256xbf16, #tpu.memory_space<vmem>>, %arg4: memref<256x128xbf16, #tpu.memory_space<vmem>>, %arg5: memref<32x128xf32, #tpu.memory_space<vmem>>, %arg6: memref<32x128xf32, #tpu.memory_space<vmem>>) attributes {dimension_semantics = [#tpu.dimension_semantics<parallel>, #tpu.dimension_semantics<parallel>, #tpu.dimension_semantics<arbitrary>], iteration_bounds = array<i64: 1, 1, 1>, scalar_prefetch = 0 : i64, scratch_operands = 0 : i64, tpu.core_type = #tpu.core_type<tc>, window_params = [{transform_indices = @transform_0, window_bounds = array<i64: 32, 256>}, {transform_indices = @transform_1, window_bounds = array<i64: 256, 128>}, {transform_indices = @transform_2, window_bounds = array<i64: 32, 128>}, {transform_indices = @transform_3, window_bounds = array<i64: 32, 128>}]} {
    %c0_i32 = arith.constant 0 : i32
    %0 = arith.cmpi eq, %arg2, %c0_i32 : i32
    %1 = arith.extui %0 : i1 to i32
    %c0_i32_0 = arith.constant 0 : i32
    %2 = arith.cmpi ne, %1, %c0_i32_0 : i32
    scf.if %2 {
      %cst_10 = arith.constant 0.000000e+00 : f32
      %12 = vector.broadcast %cst_10 : f32 to vector<32x128xf32>
      %c0_11 = arith.constant 0 : index
      %c0_12 = arith.constant 0 : index
      %13 = vector.load %arg6[%c0_11, %c0_12] : memref<32x128xf32, #tpu.memory_space<vmem>>, vector<32x128xf32>
      tpu.vector_store %arg6[%c0_11, %c0_12], %12 {strides = array<i32>} : memref<32x128xf32, #tpu.memory_space<vmem>>, vector<32x128xf32>,
    } else {
    }
    %c0 = arith.constant 0 : index
    %c0_1 = arith.constant 0 : index
    %3 = vector.load %arg6[%c0, %c0_1] : memref<32x128xf32, #tpu.memory_space<vmem>>, vector<32x128xf32>
    %c0_2 = arith.constant 0 : index
    %c0_3 = arith.constant 0 : index
    %4 = vector.load %arg3[%c0_2, %c0_3] : memref<32x256xbf16, #tpu.memory_space<vmem>>, vector<32x256xbf16>
    %c0_4 = arith.constant 0 : index
    %c0_5 = arith.constant 0 : index
    %5 = vector.load %arg4[%c0_4, %c0_5] : memref<256x128xbf16, #tpu.memory_space<vmem>>, vector<256x128xbf16>
    %cst = arith.constant dense<0.000000e+00> : vector<32x128xf32>
    %6 = tpu.matmul %4, %5, %cst {dimension_numbers = #tpu.dot_dimension_numbers<[1], [0], [0], [1], [0, 0, 1, 1], [], []>} : vector<32x256xbf16>, vector<256x128xbf16>, vector<32x128xf32> -> vector<32x128xf32>
    %7 = arith.addf %3, %6 : vector<32x128xf32>
    %c0_6 = arith.constant 0 : index
    %c0_7 = arith.constant 0 : index
    %8 = vector.load %arg6[%c0_6, %c0_7] : memref<32x128xf32, #tpu.memory_space<vmem>>, vector<32x128xf32>
    tpu.vector_store %arg6[%c0_6, %c0_7], %7 {strides = array<i32>} : memref<32x128xf32, #tpu.memory_space<vmem>>, vector<32x128xf32>,
    %c0_i32_8 = arith.constant 0 : i32
    %9 = arith.cmpi eq, %arg2, %c0_i32_8 : i32
    %10 = arith.extui %9 : i1 to i32
    %c0_i32_9 = arith.constant 0 : i32
    %11 = arith.cmpi ne, %10, %c0_i32_9 : i32
    scf.if %11 {
      %c0_10 = arith.constant 0 : index
      %c0_11 = arith.constant 0 : index
      %12 = vector.load %arg6[%c0_10, %c0_11] : memref<32x128xf32, #tpu.memory_space<vmem>>, vector<32x128xf32>
      %c0_12 = arith.constant 0 : index
      %c0_13 = arith.constant 0 : index
      %13 = vector.load %arg5[%c0_12, %c0_13] : memref<32x128xf32, #tpu.memory_space<vmem>>, vector<32x128xf32>
      %14 = arith.addf %12, %13 : vector<32x128xf32>
      %c0_14 = arith.constant 0 : index
      %c0_15 = arith.constant 0 : index
      %15 = vector.load %arg6[%c0_14, %c0_15] : memref<32x128xf32, #tpu.memory_space<vmem>>, vector<32x128xf32>
      tpu.vector_store %arg6[%c0_14, %c0_15], %14 {strides = array<i32>} : memref<32x128xf32, #tpu.memory_space<vmem>>, vector<32x128xf32>,
    } else {
    }
    return
  }
  func.func @transform_0(%arg0: i32, %arg1: i32, %arg2: i32) -> (i32, i32) {
    %c0_i32 = arith.constant 0 : i32
    return %arg1, %arg2 : i32, i32
  }
  func.func @transform_1(%arg0: i32, %arg1: i32, %arg2: i32) -> (i32, i32) {
    %c0_i32 = arith.constant 0 : i32
    return %arg2, %arg0 : i32, i32
  }
  func.func @transform_2(%arg0: i32, %arg1: i32, %arg2: i32) -> (i32, i32) {
    %c0_i32 = arith.constant 0 : i32
    return %arg1, %arg0 : i32, i32
  }
  func.func @transform_3(%arg0: i32, %arg1: i32, %arg2: i32) -> (i32, i32) {
    %c0_i32 = arith.constant 0 : i32
    return %arg1, %arg0 : i32, i32
  }
}

module attributes {stable_mosaic.version = 11 : i64} {
  func.func @kernel(%arg0: i32, %arg1: i32, %arg2: i32, %arg3: memref<128x128xbf16, #tpu.memory_space<vmem>>, %arg4: memref<128x128xbf16, #tpu.memory_space<vmem>>, %arg5: memref<128x128xf32, #tpu.memory_space<vmem>>, %arg6: memref<128x128xf32, #tpu.memory_space<vmem>>) attributes {dimension_semantics = [#tpu.dimension_semantics<parallel>, #tpu.dimension_semantics<parallel>, #tpu.dimension_semantics<arbitrary>], iteration_bounds = array<i64: 1, 1, 1>, scalar_prefetch = 0 : i64, scratch_operands = 0 : i64, tpu.core_type = #tpu.core_type<tc>, window_params = [{transform_indices = @transform_0, window_bounds = array<i64: 128, 128>}, {transform_indices = @transform_1, window_bounds = array<i64: 128, 128>}, {transform_indices = @transform_2, window_bounds = array<i64: 128, 128>}, {transform_indices = @transform_3, window_bounds = array<i64: 128, 128>}]} {
    %c0_i32 = arith.constant 0 : i32
    %0 = arith.cmpi eq, %arg2, %c0_i32 : i32
    %1 = arith.extui %0 : i1 to i32
    %c0_i32_0 = arith.constant 0 : i32
    %2 = arith.cmpi ne, %1, %c0_i32_0 : i32
    scf.if %2 {
      %cst_10 = arith.constant 0.000000e+00 : f32
      %12 = vector.broadcast %cst_10 : f32 to vector<128x128xf32>
      %c0_11 = arith.constant 0 : index
      %c0_12 = arith.constant 0 : index
      %13 = vector.load %arg6[%c0_11, %c0_12] : memref<128x128xf32, #tpu.memory_space<vmem>>, vector<128x128xf32>
      tpu.vector_store %arg6[%c0_11, %c0_12], %12 {strides = array<i32>} : memref<128x128xf32, #tpu.memory_space<vmem>>, vector<128x128xf32>,
    } else {
    }
    %c0 = arith.constant 0 : index
    %c0_1 = arith.constant 0 : index
    %3 = vector.load %arg6[%c0, %c0_1] : memref<128x128xf32, #tpu.memory_space<vmem>>, vector<128x128xf32>
    %c0_2 = arith.constant 0 : index
    %c0_3 = arith.constant 0 : index
    %4 = vector.load %arg3[%c0_2, %c0_3] : memref<128x128xbf16, #tpu.memory_space<vmem>>, vector<128x128xbf16>
    %c0_4 = arith.constant 0 : index
    %c0_5 = arith.constant 0 : index
    %5 = vector.load %arg4[%c0_4, %c0_5] : memref<128x128xbf16, #tpu.memory_space<vmem>>, vector<128x128xbf16>
    %cst = arith.constant dense<0.000000e+00> : vector<128x128xf32>
    %6 = tpu.matmul %4, %5, %cst {dimension_numbers = #tpu.dot_dimension_numbers<[1], [0], [0], [1], [0, 0, 1, 1], [], []>} : vector<128x128xbf16>, vector<128x128xbf16>, vector<128x128xf32> -> vector<128x128xf32>
    %7 = arith.addf %3, %6 : vector<128x128xf32>
    %c0_6 = arith.constant 0 : index
    %c0_7 = arith.constant 0 : index
    %8 = vector.load %arg6[%c0_6, %c0_7] : memref<128x128xf32, #tpu.memory_space<vmem>>, vector<128x128xf32>
    tpu.vector_store %arg6[%c0_6, %c0_7], %7 {strides = array<i32>} : memref<128x128xf32, #tpu.memory_space<vmem>>, vector<128x128xf32>,
    %c0_i32_8 = arith.constant 0 : i32
    %9 = arith.cmpi eq, %arg2, %c0_i32_8 : i32
    %10 = arith.extui %9 : i1 to i32
    %c0_i32_9 = arith.constant 0 : i32
    %11 = arith.cmpi ne, %10, %c0_i32_9 : i32
    scf.if %11 {
      %c0_10 = arith.constant 0 : index
      %c0_11 = arith.constant 0 : index
      %12 = vector.load %arg6[%c0_10, %c0_11] : memref<128x128xf32, #tpu.memory_space<vmem>>, vector<128x128xf32>
      %c0_12 = arith.constant 0 : index
      %c0_13 = arith.constant 0 : index
      %13 = vector.load %arg5[%c0_12, %c0_13] : memref<128x128xf32, #tpu.memory_space<vmem>>, vector<128x128xf32>
      %14 = arith.addf %12, %13 : vector<128x128xf32>
      %c0_14 = arith.constant 0 : index
      %c0_15 = arith.constant 0 : index
      %15 = vector.load %arg6[%c0_14, %c0_15] : memref<128x128xf32, #tpu.memory_space<vmem>>, vector<128x128xf32>
      tpu.vector_store %arg6[%c0_14, %c0_15], %14 {strides = array<i32>} : memref<128x128xf32, #tpu.memory_space<vmem>>, vector<128x128xf32>,
    } else {
    }
    return
  }
  func.func @transform_0(%arg0: i32, %arg1: i32, %arg2: i32) -> (i32, i32) {
    %c0_i32 = arith.constant 0 : i32
    return %arg1, %arg2 : i32, i32
  }
  func.func @transform_1(%arg0: i32, %arg1: i32, %arg2: i32) -> (i32, i32) {
    %c0_i32 = arith.constant 0 : i32
    return %arg2, %arg0 : i32, i32
  }
  func.func @transform_2(%arg0: i32, %arg1: i32, %arg2: i32) -> (i32, i32) {
    %c0_i32 = arith.constant 0 : i32
    return %arg1, %arg0 : i32, i32
  }
  func.func @transform_3(%arg0: i32, %arg1: i32, %arg2: i32) -> (i32, i32) {
    %c0_i32 = arith.constant 0 : i32
    return %arg1, %arg0 : i32, i32
  }
}

module attributes {stable_mosaic.version = 11 : i64} {
  func.func @kernel(%arg0: i32, %arg1: i32, %arg2: i32, %arg3: memref<512x128xbf16, #tpu.memory_space<vmem>>, %arg4: memref<128x128xbf16, #tpu.memory_space<vmem>>, %arg5: memref<512x128xf32, #tpu.memory_space<vmem>>, %arg6: memref<512x128xf32, #tpu.memory_space<vmem>>) attributes {dimension_semantics = [#tpu.dimension_semantics<parallel>, #tpu.dimension_semantics<parallel>, #tpu.dimension_semantics<arbitrary>], iteration_bounds = array<i64: 1, 1, 1>, scalar_prefetch = 0 : i64, scratch_operands = 0 : i64, tpu.core_type = #tpu.core_type<tc>, window_params = [{transform_indices = @transform_0, window_bounds = array<i64: 512, 128>}, {transform_indices = @transform_1, window_bounds = array<i64: 128, 128>}, {transform_indices = @transform_2, window_bounds = array<i64: 512, 128>}, {transform_indices = @transform_3, window_bounds = array<i64: 512, 128>}]} {
    %c0_i32 = arith.constant 0 : i32
    %0 = arith.cmpi eq, %arg2, %c0_i32 : i32
    %1 = arith.extui %0 : i1 to i32
    %c0_i32_0 = arith.constant 0 : i32
    %2 = arith.cmpi ne, %1, %c0_i32_0 : i32
    scf.if %2 {
      %cst_10 = arith.constant 0.000000e+00 : f32
      %12 = vector.broadcast %cst_10 : f32 to vector<512x128xf32>
      %c0_11 = arith.constant 0 : index
      %c0_12 = arith.constant 0 : index
      %13 = vector.load %arg6[%c0_11, %c0_12] : memref<512x128xf32, #tpu.memory_space<vmem>>, vector<512x128xf32>
      tpu.vector_store %arg6[%c0_11, %c0_12], %12 {strides = array<i32>} : memref<512x128xf32, #tpu.memory_space<vmem>>, vector<512x128xf32>,
    } else {
    }
    %c0 = arith.constant 0 : index
    %c0_1 = arith.constant 0 : index
    %3 = vector.load %arg6[%c0, %c0_1] : memref<512x128xf32, #tpu.memory_space<vmem>>, vector<512x128xf32>
    %c0_2 = arith.constant 0 : index
    %c0_3 = arith.constant 0 : index
    %4 = vector.load %arg3[%c0_2, %c0_3] : memref<512x128xbf16, #tpu.memory_space<vmem>>, vector<512x128xbf16>
    %c0_4 = arith.constant 0 : index
    %c0_5 = arith.constant 0 : index
    %5 = vector.load %arg4[%c0_4, %c0_5] : memref<128x128xbf16, #tpu.memory_space<vmem>>, vector<128x128xbf16>
    %cst = arith.constant dense<0.000000e+00> : vector<512x128xf32>
    %6 = tpu.matmul %4, %5, %cst {dimension_numbers = #tpu.dot_dimension_numbers<[1], [0], [0], [1], [0, 0, 1, 1], [], []>} : vector<512x128xbf16>, vector<128x128xbf16>, vector<512x128xf32> -> vector<512x128xf32>
    %7 = arith.addf %3, %6 : vector<512x128xf32>
    %c0_6 = arith.constant 0 : index
    %c0_7 = arith.constant 0 : index
    %8 = vector.load %arg6[%c0_6, %c0_7] : memref<512x128xf32, #tpu.memory_space<vmem>>, vector<512x128xf32>
    tpu.vector_store %arg6[%c0_6, %c0_7], %7 {strides = array<i32>} : memref<512x128xf32, #tpu.memory_space<vmem>>, vector<512x128xf32>,
    %c0_i32_8 = arith.constant 0 : i32
    %9 = arith.cmpi eq, %arg2, %c0_i32_8 : i32
    %10 = arith.extui %9 : i1 to i32
    %c0_i32_9 = arith.constant 0 : i32
    %11 = arith.cmpi ne, %10, %c0_i32_9 : i32
    scf.if %11 {
      %c0_10 = arith.constant 0 : index
      %c0_11 = arith.constant 0 : index
      %12 = vector.load %arg6[%c0_10, %c0_11] : memref<512x128xf32, #tpu.memory_space<vmem>>, vector<512x128xf32>
      %c0_12 = arith.constant 0 : index
      %c0_13 = arith.constant 0 : index
      %13 = vector.load %arg5[%c0_12, %c0_13] : memref<512x128xf32, #tpu.memory_space<vmem>>, vector<512x128xf32>
      %14 = arith.addf %12, %13 : vector<512x128xf32>
      %c0_14 = arith.constant 0 : index
      %c0_15 = arith.constant 0 : index
      %15 = vector.load %arg6[%c0_14, %c0_15] : memref<512x128xf32, #tpu.memory_space<vmem>>, vector<512x128xf32>
      tpu.vector_store %arg6[%c0_14, %c0_15], %14 {strides = array<i32>} : memref<512x128xf32, #tpu.memory_space<vmem>>, vector<512x128xf32>,
    } else {
    }
    return
  }
  func.func @transform_0(%arg0: i32, %arg1: i32, %arg2: i32) -> (i32, i32) {
    %c0_i32 = arith.constant 0 : i32
    return %arg1, %arg2 : i32, i32
  }
  func.func @transform_1(%arg0: i32, %arg1: i32, %arg2: i32) -> (i32, i32) {
    %c0_i32 = arith.constant 0 : i32
    return %arg2, %arg0 : i32, i32
  }
  func.func @transform_2(%arg0: i32, %arg1: i32, %arg2: i32) -> (i32, i32) {
    %c0_i32 = arith.constant 0 : i32
    return %arg1, %arg0 : i32, i32
  }
  func.func @transform_3(%arg0: i32, %arg1: i32, %arg2: i32) -> (i32, i32) {
    %c0_i32 = arith.constant 0 : i32
    return %arg1, %arg0 : i32, i32
  }
}

module attributes {stable_mosaic.version = 11 : i64} {
  func.func @kernel(%arg0: i32, %arg1: i32, %arg2: i32, %arg3: memref<512x640xbf16, #tpu.memory_space<vmem>>, %arg4: memref<640x128xbf16, #tpu.memory_space<vmem>>, %arg5: memref<512x128xf32, #tpu.memory_space<vmem>>) attributes {dimension_semantics = [#tpu.dimension_semantics<parallel>, #tpu.dimension_semantics<parallel>, #tpu.dimension_semantics<arbitrary>], iteration_bounds = array<i64: 1, 1, 1>, scalar_prefetch = 0 : i64, scratch_operands = 0 : i64, tpu.core_type = #tpu.core_type<tc>, window_params = [{transform_indices = @transform_0, window_bounds = array<i64: 512, 640>}, {transform_indices = @transform_1, window_bounds = array<i64: 640, 128>}, {transform_indices = @transform_2, window_bounds = array<i64: 512, 128>}]} {
    %c0_i32 = arith.constant 0 : i32
    %0 = arith.cmpi eq, %arg2, %c0_i32 : i32
    %1 = arith.extui %0 : i1 to i32
    %c0_i32_0 = arith.constant 0 : i32
    %2 = arith.cmpi ne, %1, %c0_i32_0 : i32
    scf.if %2 {
      %cst_8 = arith.constant 0.000000e+00 : f32
      %9 = vector.broadcast %cst_8 : f32 to vector<512x128xf32>
      %c0_9 = arith.constant 0 : index
      %c0_10 = arith.constant 0 : index
      %10 = vector.load %arg5[%c0_9, %c0_10] : memref<512x128xf32, #tpu.memory_space<vmem>>, vector<512x128xf32>
      tpu.vector_store %arg5[%c0_9, %c0_10], %9 {strides = array<i32>} : memref<512x128xf32, #tpu.memory_space<vmem>>, vector<512x128xf32>,
    } else {
    }
    %c0 = arith.constant 0 : index
    %c0_1 = arith.constant 0 : index
    %3 = vector.load %arg5[%c0, %c0_1] : memref<512x128xf32, #tpu.memory_space<vmem>>, vector<512x128xf32>
    %c0_2 = arith.constant 0 : index
    %c0_3 = arith.constant 0 : index
    %4 = vector.load %arg3[%c0_2, %c0_3] : memref<512x640xbf16, #tpu.memory_space<vmem>>, vector<512x640xbf16>
    %c0_4 = arith.constant 0 : index
    %c0_5 = arith.constant 0 : index
    %5 = vector.load %arg4[%c0_4, %c0_5] : memref<640x128xbf16, #tpu.memory_space<vmem>>, vector<640x128xbf16>
    %cst = arith.constant dense<0.000000e+00> : vector<512x128xf32>
    %6 = tpu.matmul %4, %5, %cst {dimension_numbers = #tpu.dot_dimension_numbers<[1], [0], [0], [1], [0, 0, 1, 1], [], []>} : vector<512x640xbf16>, vector<640x128xbf16>, vector<512x128xf32> -> vector<512x128xf32>
    %7 = arith.addf %3, %6 : vector<512x128xf32>
    %c0_6 = arith.constant 0 : index
    %c0_7 = arith.constant 0 : index
    %8 = vector.load %arg5[%c0_6, %c0_7] : memref<512x128xf32, #tpu.memory_space<vmem>>, vector<512x128xf32>
    tpu.vector_store %arg5[%c0_6, %c0_7], %7 {strides = array<i32>} : memref<512x128xf32, #tpu.memory_space<vmem>>, vector<512x128xf32>,
    return
  }
  func.func @transform_0(%arg0: i32, %arg1: i32, %arg2: i32) -> (i32, i32) {
    %c0_i32 = arith.constant 0 : i32
    return %arg1, %arg2 : i32, i32
  }
  func.func @transform_1(%arg0: i32, %arg1: i32, %arg2: i32) -> (i32, i32) {
    %c0_i32 = arith.constant 0 : i32
    return %arg2, %arg0 : i32, i32
  }
  func.func @transform_2(%arg0: i32, %arg1: i32, %arg2: i32) -> (i32, i32) {
    %c0_i32 = arith.constant 0 : i32
    return %arg1, %arg0 : i32, i32
  }
}

module attributes {stable_mosaic.version = 11 : i64} {
  func.func @kernel(%arg0: i32, %arg1: i32, %arg2: i32, %arg3: memref<128x640xbf16, #tpu.memory_space<vmem>>, %arg4: memref<640x128xbf16, #tpu.memory_space<vmem>>, %arg5: memref<128x128xf32, #tpu.memory_space<vmem>>) attributes {dimension_semantics = [#tpu.dimension_semantics<parallel>, #tpu.dimension_semantics<parallel>, #tpu.dimension_semantics<arbitrary>], iteration_bounds = array<i64: 1, 1, 1>, scalar_prefetch = 0 : i64, scratch_operands = 0 : i64, tpu.core_type = #tpu.core_type<tc>, window_params = [{transform_indices = @transform_0, window_bounds = array<i64: 128, 640>}, {transform_indices = @transform_1, window_bounds = array<i64: 640, 128>}, {transform_indices = @transform_2, window_bounds = array<i64: 128, 128>}]} {
    %c0_i32 = arith.constant 0 : i32
    %0 = arith.cmpi eq, %arg2, %c0_i32 : i32
    %1 = arith.extui %0 : i1 to i32
    %c0_i32_0 = arith.constant 0 : i32
    %2 = arith.cmpi ne, %1, %c0_i32_0 : i32
    scf.if %2 {
      %cst_8 = arith.constant 0.000000e+00 : f32
      %9 = vector.broadcast %cst_8 : f32 to vector<128x128xf32>
      %c0_9 = arith.constant 0 : index
      %c0_10 = arith.constant 0 : index
      %10 = vector.load %arg5[%c0_9, %c0_10] : memref<128x128xf32, #tpu.memory_space<vmem>>, vector<128x128xf32>
      tpu.vector_store %arg5[%c0_9, %c0_10], %9 {strides = array<i32>} : memref<128x128xf32, #tpu.memory_space<vmem>>, vector<128x128xf32>,
    } else {
    }
    %c0 = arith.constant 0 : index
    %c0_1 = arith.constant 0 : index
    %3 = vector.load %arg5[%c0, %c0_1] : memref<128x128xf32, #tpu.memory_space<vmem>>, vector<128x128xf32>
    %c0_2 = arith.constant 0 : index
    %c0_3 = arith.constant 0 : index
    %4 = vector.load %arg3[%c0_2, %c0_3] : memref<128x640xbf16, #tpu.memory_space<vmem>>, vector<128x640xbf16>
    %c0_4 = arith.constant 0 : index
    %c0_5 = arith.constant 0 : index
    %5 = vector.load %arg4[%c0_4, %c0_5] : memref<640x128xbf16, #tpu.memory_space<vmem>>, vector<640x128xbf16>
    %cst = arith.constant dense<0.000000e+00> : vector<128x128xf32>
    %6 = tpu.matmul %4, %5, %cst {dimension_numbers = #tpu.dot_dimension_numbers<[1], [0], [0], [1], [0, 0, 1, 1], [], []>} : vector<128x640xbf16>, vector<640x128xbf16>, vector<128x128xf32> -> vector<128x128xf32>
    %7 = arith.addf %3, %6 : vector<128x128xf32>
    %c0_6 = arith.constant 0 : index
    %c0_7 = arith.constant 0 : index
    %8 = vector.load %arg5[%c0_6, %c0_7] : memref<128x128xf32, #tpu.memory_space<vmem>>, vector<128x128xf32>
    tpu.vector_store %arg5[%c0_6, %c0_7], %7 {strides = array<i32>} : memref<128x128xf32, #tpu.memory_space<vmem>>, vector<128x128xf32>,
    return
  }
  func.func @transform_0(%arg0: i32, %arg1: i32, %arg2: i32) -> (i32, i32) {
    %c0_i32 = arith.constant 0 : i32
    return %arg1, %arg2 : i32, i32
  }
  func.func @transform_1(%arg0: i32, %arg1: i32, %arg2: i32) -> (i32, i32) {
    %c0_i32 = arith.constant 0 : i32
    return %arg2, %arg0 : i32, i32
  }
  func.func @transform_2(%arg0: i32, %arg1: i32, %arg2: i32) -> (i32, i32) {
    %c0_i32 = arith.constant 0 : i32
    return %arg1, %arg0 : i32, i32
  }
}

module attributes {stable_mosaic.version = 11 : i64} {
  func.func @kernel(%arg0: i32, %arg1: i32, %arg2: i32, %arg3: memref<32x640xbf16, #tpu.memory_space<vmem>>, %arg4: memref<640x128xbf16, #tpu.memory_space<vmem>>, %arg5: memref<32x128xf32, #tpu.memory_space<vmem>>) attributes {dimension_semantics = [#tpu.dimension_semantics<parallel>, #tpu.dimension_semantics<parallel>, #tpu.dimension_semantics<arbitrary>], iteration_bounds = array<i64: 1, 1, 1>, scalar_prefetch = 0 : i64, scratch_operands = 0 : i64, tpu.core_type = #tpu.core_type<tc>, window_params = [{transform_indices = @transform_0, window_bounds = array<i64: 32, 640>}, {transform_indices = @transform_1, window_bounds = array<i64: 640, 128>}, {transform_indices = @transform_2, window_bounds = array<i64: 32, 128>}]} {
    %c0_i32 = arith.constant 0 : i32
    %0 = arith.cmpi eq, %arg2, %c0_i32 : i32
    %1 = arith.extui %0 : i1 to i32
    %c0_i32_0 = arith.constant 0 : i32
    %2 = arith.cmpi ne, %1, %c0_i32_0 : i32
    scf.if %2 {
      %cst_8 = arith.constant 0.000000e+00 : f32
      %9 = vector.broadcast %cst_8 : f32 to vector<32x128xf32>
      %c0_9 = arith.constant 0 : index
      %c0_10 = arith.constant 0 : index
      %10 = vector.load %arg5[%c0_9, %c0_10] : memref<32x128xf32, #tpu.memory_space<vmem>>, vector<32x128xf32>
      tpu.vector_store %arg5[%c0_9, %c0_10], %9 {strides = array<i32>} : memref<32x128xf32, #tpu.memory_space<vmem>>, vector<32x128xf32>,
    } else {
    }
    %c0 = arith.constant 0 : index
    %c0_1 = arith.constant 0 : index
    %3 = vector.load %arg5[%c0, %c0_1] : memref<32x128xf32, #tpu.memory_space<vmem>>, vector<32x128xf32>
    %c0_2 = arith.constant 0 : index
    %c0_3 = arith.constant 0 : index
    %4 = vector.load %arg3[%c0_2, %c0_3] : memref<32x640xbf16, #tpu.memory_space<vmem>>, vector<32x640xbf16>
    %c0_4 = arith.constant 0 : index
    %c0_5 = arith.constant 0 : index
    %5 = vector.load %arg4[%c0_4, %c0_5] : memref<640x128xbf16, #tpu.memory_space<vmem>>, vector<640x128xbf16>
    %cst = arith.constant dense<0.000000e+00> : vector<32x128xf32>
    %6 = tpu.matmul %4, %5, %cst {dimension_numbers = #tpu.dot_dimension_numbers<[1], [0], [0], [1], [0, 0, 1, 1], [], []>} : vector<32x640xbf16>, vector<640x128xbf16>, vector<32x128xf32> -> vector<32x128xf32>
    %7 = arith.addf %3, %6 : vector<32x128xf32>
    %c0_6 = arith.constant 0 : index
    %c0_7 = arith.constant 0 : index
    %8 = vector.load %arg5[%c0_6, %c0_7] : memref<32x128xf32, #tpu.memory_space<vmem>>, vector<32x128xf32>
    tpu.vector_store %arg5[%c0_6, %c0_7], %7 {strides = array<i32>} : memref<32x128xf32, #tpu.memory_space<vmem>>, vector<32x128xf32>,
    return
  }
  func.func @transform_0(%arg0: i32, %arg1: i32, %arg2: i32) -> (i32, i32) {
    %c0_i32 = arith.constant 0 : i32
    return %arg1, %arg2 : i32, i32
  }
  func.func @transform_1(%arg0: i32, %arg1: i32, %arg2: i32) -> (i32, i32) {
    %c0_i32 = arith.constant 0 : i32
    return %arg2, %arg0 : i32, i32
  }
  func.func @transform_2(%arg0: i32, %arg1: i32, %arg2: i32) -> (i32, i32) {
    %c0_i32 = arith.constant 0 : i32
    return %arg1, %arg0 : i32, i32
  }
}

module attributes {stable_mosaic.version = 11 : i64} {
  func.func @kernel(%arg0: i32, %arg1: i32, %arg2: i32, %arg3: memref<8x640xbf16, #tpu.memory_space<vmem>>, %arg4: memref<640x128xbf16, #tpu.memory_space<vmem>>, %arg5: memref<8x128xf32, #tpu.memory_space<vmem>>) attributes {dimension_semantics = [#tpu.dimension_semantics<parallel>, #tpu.dimension_semantics<parallel>, #tpu.dimension_semantics<arbitrary>], iteration_bounds = array<i64: 1, 1, 1>, scalar_prefetch = 0 : i64, scratch_operands = 0 : i64, tpu.core_type = #tpu.core_type<tc>, window_params = [{transform_indices = @transform_0, window_bounds = array<i64: 8, 640>}, {transform_indices = @transform_1, window_bounds = array<i64: 640, 128>}, {transform_indices = @transform_2, window_bounds = array<i64: 8, 128>}]} {
    %c0_i32 = arith.constant 0 : i32
    %0 = arith.cmpi eq, %arg2, %c0_i32 : i32
    %1 = arith.extui %0 : i1 to i32
    %c0_i32_0 = arith.constant 0 : i32
    %2 = arith.cmpi ne, %1, %c0_i32_0 : i32
    scf.if %2 {
      %cst_8 = arith.constant 0.000000e+00 : f32
      %9 = vector.broadcast %cst_8 : f32 to vector<8x128xf32>
      %c0_9 = arith.constant 0 : index
      %c0_10 = arith.constant 0 : index
      %10 = vector.load %arg5[%c0_9, %c0_10] : memref<8x128xf32, #tpu.memory_space<vmem>>, vector<8x128xf32>
      tpu.vector_store %arg5[%c0_9, %c0_10], %9 {strides = array<i32>} : memref<8x128xf32, #tpu.memory_space<vmem>>, vector<8x128xf32>,
    } else {
    }
    %c0 = arith.constant 0 : index
    %c0_1 = arith.constant 0 : index
    %3 = vector.load %arg5[%c0, %c0_1] : memref<8x128xf32, #tpu.memory_space<vmem>>, vector<8x128xf32>
    %c0_2 = arith.constant 0 : index
    %c0_3 = arith.constant 0 : index
    %4 = vector.load %arg3[%c0_2, %c0_3] : memref<8x640xbf16, #tpu.memory_space<vmem>>, vector<8x640xbf16>
    %c0_4 = arith.constant 0 : index
    %c0_5 = arith.constant 0 : index
    %5 = vector.load %arg4[%c0_4, %c0_5] : memref<640x128xbf16, #tpu.memory_space<vmem>>, vector<640x128xbf16>
    %cst = arith.constant dense<0.000000e+00> : vector<8x128xf32>
    %6 = tpu.matmul %4, %5, %cst {dimension_numbers = #tpu.dot_dimension_numbers<[1], [0], [0], [1], [0, 0, 1, 1], [], []>} : vector<8x640xbf16>, vector<640x128xbf16>, vector<8x128xf32> -> vector<8x128xf32>
    %7 = arith.addf %3, %6 : vector<8x128xf32>
    %c0_6 = arith.constant 0 : index
    %c0_7 = arith.constant 0 : index
    %8 = vector.load %arg5[%c0_6, %c0_7] : memref<8x128xf32, #tpu.memory_space<vmem>>, vector<8x128xf32>
    tpu.vector_store %arg5[%c0_6, %c0_7], %7 {strides = array<i32>} : memref<8x128xf32, #tpu.memory_space<vmem>>, vector<8x128xf32>,
    return
  }
  func.func @transform_0(%arg0: i32, %arg1: i32, %arg2: i32) -> (i32, i32) {
    %c0_i32 = arith.constant 0 : i32
    return %arg1, %arg2 : i32, i32
  }
  func.func @transform_1(%arg0: i32, %arg1: i32, %arg2: i32) -> (i32, i32) {
    %c0_i32 = arith.constant 0 : i32
    return %arg2, %arg0 : i32, i32
  }
  func.func @transform_2(%arg0: i32, %arg1: i32, %arg2: i32) -> (i32, i32) {
    %c0_i32 = arith.constant 0 : i32
    return %arg1, %arg0 : i32, i32
  }
}

</mosaic_0001>

<bundles_post_ra>
// kernel: fpn1_forward.25
= control target key start
LH: loop header
LB: loop body
LE: loop exit
PB: predicated region body
PF: predicated region fallthrough
CT: control target
= control target key end

     0   :  { %v552_v0 = vmov 0.0   ;;  %v83_v1 = vlaneseq  ;;  %s962_s2 = inlined_call_operand.vmem [shape: f32[1,128], index: 2, kind: output, shape index: {}]   ;;  %s963_s1 = inlined_call_operand.vmem [shape: f32[1,128], index: 1, kind: input, shape index: {}]   ;;  %s964_s0 = inlined_call_operand.vmem [shape: f32[512,128], index: 0, kind: input, shape index: {}]  }
   0x1   :  { %15 = vst [vmem:[%s962_s2] sm:$0x1] %v552_v0  ;;  %v16_v3 = vld [vmem:[%s963_s1] sm:$0x1]  ;;  %v51_v6 = vld [vmem:[%s964_s0 + $0x108] sm:$0xff]  ;;  %v52_v7 = vld [vmem:[%s964_s0 + $0x110] sm:$0xff] }
   0x2   :  { %v84_v2 = vshrl.u32 %v83_v1, 7  ;;  %v17_v4 = vmul.f32 0.001953125, %v16_v3  ;;  %v53_v8 = vld [vmem:[%s964_s0 + $0x118] sm:$0xff]  ;;  %v54_v9 = vld [vmem:[%s964_s0 + $0x120] sm:$0xff]  ;;  %v55_v10 = vld [vmem:[%s964_s0 + $0x128] sm:$0xff] }
   0x3   :  { %v56_v11 = vld [vmem:[%s964_s0 + $0x130] sm:$0xff]  ;;  %v57_v12 = vld [vmem:[%s964_s0 + $0x138] sm:$0xff]  ;;  %v58_v13 = vld [vmem:[%s964_s0 + $0x140] sm:$0xff] }
   0x4   :  { %v85_v5 = vsub.s32 0, %v84_v2  ;;  %v59_v15 = vld [vmem:[%s964_s0 + $0x148] sm:$0xff]  ;;  %v60_v16 = vld [vmem:[%s964_s0 + $0x150] sm:$0xff]  ;;  %v61_v17 = vld [vmem:[%s964_s0 + $0x158] sm:$0xff] }
   0x5   :  { %v62_v18 = vld [vmem:[%s964_s0 + $0x160] sm:$0xff]  ;;  %v63_v19 = vld [vmem:[%s964_s0 + $0x168] sm:$0xff]  ;;  %v64_v20 = vld [vmem:[%s964_s0 + $0x170] sm:$0xff] }
   0x6   :  { %v598_v14 = vrot.slane %v17_v4, %v85_v5  ;;  %v65_v24 = vld [vmem:[%s964_s0 + $0x178] sm:$0xff]  ;;  %v66_v25 = vld [vmem:[%s964_s0 + $0x180] sm:$0xff]  ;;  %v67_v26 = vld [vmem:[%s964_s0 + $0x188] sm:$0xff] }
   0x7   :  { %v68_v31 = vld [vmem:[%s964_s0 + $0x190] sm:$0xff]  ;;  %v69_v32 = vld [vmem:[%s964_s0 + $0x198] sm:$0xff]  ;;  %v70_v33 = vld [vmem:[%s964_s0 + $0x1a0] sm:$0xff] }
   0x8   :  { %v619_v21 = vsub.f32 %v51_v6, %v598_v14  ;;  %v622_v22 = vsub.f32 %v52_v7, %v598_v14  ;;  %v625_v23 = vsub.f32 %v53_v8, %v598_v14  ;;  %v637_v27 = vsub.f32 %v54_v9, %v598_v14  ;;  %v71_v38 = vld [vmem:[%s964_s0 + $0x1a8] sm:$0xff]  ;;  %v72_v39 = vld [vmem:[%s964_s0 + $0x1b0] sm:$0xff]  ;;  %v73_v40 = vld [vmem:[%s964_s0 + $0x1b8] sm:$0xff] }
   0x9   :  { %v640_v28 = vsub.f32 %v55_v10, %v598_v14  ;;  %v643_v29 = vsub.f32 %v56_v11, %v598_v14  ;;  %v646_v30 = vsub.f32 %v57_v12, %v598_v14  ;;  %v658_v34 = vsub.f32 %v58_v13, %v598_v14  ;;  %v74_v45 = vld [vmem:[%s964_s0 + $0x1c0] sm:$0xff]  ;;  %v75_v46 = vld [vmem:[%s964_s0 + $0x1c8] sm:$0xff]  ;;  %v76_v47 = vld [vmem:[%s964_s0 + $0x1d0] sm:$0xff] }
   0xa   :  { %v661_v35 = vsub.f32 %v59_v15, %v598_v14  ;;  %v664_v36 = vsub.f32 %v60_v16, %v598_v14  ;;  %v667_v37 = vsub.f32 %v61_v17, %v598_v14  ;;  %v679_v41 = vsub.f32 %v62_v18, %v598_v14  ;;  %v77_v52 = vld [vmem:[%s964_s0 + $0x1d8] sm:$0xff]  ;;  %v78_v53 = vld [vmem:[%s964_s0 + $0x1e0] sm:$0xff]  ;;  %v79_v54 = vld [vmem:[%s964_s0 + $0x1e8] sm:$0xff] }
   0xb   :  { %v682_v42 = vsub.f32 %v63_v19, %v598_v14  ;;  %v685_v43 = vsub.f32 %v64_v20, %v598_v14  ;;  %v688_v44 = vsub.f32 %v65_v24, %v598_v14  ;;  %v700_v48 = vsub.f32 %v66_v25, %v598_v14  ;;  %v80_v59 = vld [vmem:[%s964_s0 + $0x1f0] sm:$0xff]  ;;  %v81_v60 = vld [vmem:[%s964_s0 + $0x1f8] sm:$0xff]  ;;  %v18_v5 = vld [vmem:[%s964_s0] sm:$0xff] }
   0xc   :  { %v703_v49 = vsub.f32 %v67_v26, %v598_v14  ;;  %v706_v50 = vsub.f32 %v68_v31, %v598_v14  ;;  %v709_v51 = vsub.f32 %v69_v32, %v598_v14  ;;  %v721_v55 = vsub.f32 %v70_v33, %v598_v14  ;;  %v19_v6 = vld [vmem:[%s964_s0 + $0x8] sm:$0xff]  ;;  %v20_v7 = vld [vmem:[%s964_s0 + $0x10] sm:$0xff]  ;;  %v21_v10 = vld [vmem:[%s964_s0 + $0x18] sm:$0xff] }
   0xd   :  { %v724_v56 = vsub.f32 %v71_v38, %v598_v14  ;;  %v727_v57 = vsub.f32 %v72_v39, %v598_v14  ;;  %v730_v58 = vsub.f32 %v73_v40, %v598_v14  ;;  %v739_v61 = vsub.f32 %v74_v45, %v598_v14  ;;  %v22_v12 = vld [vmem:[%s964_s0 + $0x20] sm:$0xff]  ;;  %v23_v17 = vld [vmem:[%s964_s0 + $0x28] sm:$0xff]  ;;  %v24_v20 = vld [vmem:[%s964_s0 + $0x30] sm:$0xff] }
   0xe   :  { %v742_v62 = vsub.f32 %v75_v46, %v598_v14  ;;  %v745_v63 = vsub.f32 %v76_v47, %v598_v14  ;;  %v748_v0 = vsub.f32 %v77_v52, %v598_v14  ;;  %v751_v1 = vsub.f32 %v78_v53, %v598_v14  ;;  %v25_v31 = vld [vmem:[%s964_s0 + $0x38] sm:$0xff]  ;;  %v26_v39 = vld [vmem:[%s964_s0 + $0x40] sm:$0xff]  ;;  %v27_v47 = vld [vmem:[%s964_s0 + $0x48] sm:$0xff] }
   0xf   :  { %v754_v2 = vsub.f32 %v79_v54, %v598_v14  ;;  %v757_v3 = vsub.f32 %v80_v59, %v598_v14  ;;  %v760_v4 = vsub.f32 %v81_v60, %v598_v14  ;;  %v88_v8 = vsub.f32 %v18_v5, %v598_v14  ;;  %v28_v59 = vld [vmem:[%s964_s0 + $0x50] sm:$0xff] }
  0x10   :  { %v89_v9 = vsub.f32 %v19_v6, %v598_v14  ;;  %v90_v11 = vsub.f32 %v20_v7, %v598_v14  ;;  %v91_v13 = vsub.f32 %v21_v10, %v598_v14  ;;  %v92_v18 = vsub.f32 %v22_v12, %v598_v14  ;;  %v29_v7 = vld [vmem:[%s964_s0 + $0x58] sm:$0xff] }
  0x11   :  { %v412_v15 = vmul.f32 %v88_v8, %v88_v8  ;;  %v93_v24 = vsub.f32 %v23_v17, %v598_v14  ;;  %v94_v32 = vsub.f32 %v24_v20, %v598_v14  ;;  %v95_v40 = vsub.f32 %v25_v31, %v598_v14  ;;  %v32_v20 = vld [vmem:[%s964_s0 + $0x70] sm:$0xff]  ;;  %v33_v31 = vld [vmem:[%s964_s0 + $0x78] sm:$0xff] }
  0x12   :  { %v413_v16 = vmul.f32 %v89_v9, %v89_v9  ;;  %v414_v19 = vmul.f32 %v90_v11, %v90_v11  ;;  %v415_v25 = vmul.f32 %v91_v13, %v91_v13  ;;  %v416_v33 = vmul.f32 %v92_v18, %v92_v18  ;;  %v30_v11 = vld [vmem:[%s964_s0 + $0x60] sm:$0xff] }
  0x13   :  { %v417_v45 = vmul.f32 %v93_v24, %v93_v24  ;;  %v96_v52 = vsub.f32 %v26_v39, %v598_v14  ;;  %v418_v53 = vmul.f32 %v94_v32, %v94_v32  ;;  %v97_v60 = vsub.f32 %v27_v47, %v598_v14  ;;  %v34_v39 = vld [vmem:[%s964_s0 + $0x80] sm:$0xff]  ;;  %v35_v47 = vld [vmem:[%s964_s0 + $0x88] sm:$0xff] }
  0x14   :  { %v476_v26 = vadd.f32 %v413_v16, %v412_v15  ;;  %v419_v5 = vmul.f32 %v95_v40, %v95_v40  ;;  %v98_v8 = vsub.f32 %v28_v59, %v598_v14  ;;  %v99_v12 = vsub.f32 %v29_v7, %v598_v14  ;;  %v31_v16 = vld [vmem:[%s964_s0 + $0x68] sm:$0xff]  ;;  %v36_v59 = vld [vmem:[%s964_s0 + $0x90] sm:$0xff]  ;;  %v37_v7 = vld [vmem:[%s964_s0 + $0x98] sm:$0xff] }
  0x15   :  { %v420_v9 = vmul.f32 %v96_v52, %v96_v52  ;;  %v421_v13 = vmul.f32 %v97_v60, %v97_v60  ;;  %v100_v17 = vsub.f32 %v30_v11, %v598_v14  ;;  %v101_v24 = vsub.f32 %v31_v16, %v598_v14  ;;  %v38_v11 = vld [vmem:[%s964_s0 + $0xa0] sm:$0xff]  ;;  %v39_v16 = vld [vmem:[%s964_s0 + $0xa8] sm:$0xff] }
  0x16   :  { %v477_v38 = vadd.f32 %v476_v26, %v414_v19  ;;  %v422_v18 = vmul.f32 %v98_v8, %v98_v8  ;;  %v102_v32 = vsub.f32 %v32_v20, %v598_v14  ;;  %v103_v40 = vsub.f32 %v33_v31, %v598_v14  ;;  %v40_v20 = vld [vmem:[%s964_s0 + $0xb0] sm:$0xff]  ;;  %v41_v31 = vld [vmem:[%s964_s0 + $0xb8] sm:$0xff] }
  0x17   :  { %v104_v52 = vsub.f32 %v34_v39, %v598_v14  ;;  %v105_v60 = vsub.f32 %v35_v47, %v598_v14  ;;  %v106_v8 = vsub.f32 %v36_v59, %v598_v14  ;;  %v42_v39 = vld [vmem:[%s964_s0 + $0xc0] sm:$0xff]  ;;  %v43_v47 = vld [vmem:[%s964_s0 + $0xc8] sm:$0xff]  ;;  %v44_v59 = vld [vmem:[%s964_s0 + $0xd0] sm:$0xff] }
  0x18   :  { %v478_v46 = vadd.f32 %v477_v38, %v415_v25  ;;  %v423_v25 = vmul.f32 %v99_v12, %v99_v12  ;;  %v107_v12 = vsub.f32 %v37_v7, %v598_v14  ;;  %v45_v7 = vld [vmem:[%s964_s0 + $0xd8] sm:$0xff] }
  0x1a   :  { %v479_v54 = vadd.f32 %v478_v46, %v416_v33  ;;  %v424_v33 = vmul.f32 %v100_v17, %v100_v17  ;;  %v108_v17 = vsub.f32 %v38_v11, %v598_v14  ;;  %v46_v11 = vld [vmem:[%s964_s0 + $0xe0] sm:$0xff] }
  0x1c   :  { %v480_v6 = vadd.f32 %v479_v54, %v417_v45  ;;  %v425_v45 = vmul.f32 %v101_v24, %v101_v24  ;;  %v109_v24 = vsub.f32 %v39_v16, %v598_v14  ;;  %v47_v16 = vld [vmem:[%s964_s0 + $0xe8] sm:$0xff] }
  0x1e   :  { %v481_v10 = vadd.f32 %v480_v6, %v418_v53  ;;  %v426_v53 = vmul.f32 %v102_v32, %v102_v32  ;;  %v110_v32 = vsub.f32 %v40_v20, %v598_v14  ;;  %v48_v20 = vld [vmem:[%s964_s0 + $0xf0] sm:$0xff] }
  0x20   :  { %v482_v15 = vadd.f32 %v481_v10, %v419_v5  ;;  %v427_v5 = vmul.f32 %v103_v40, %v103_v40  ;;  %v111_v40 = vsub.f32 %v41_v31, %v598_v14  ;;  %v49_v31 = vld [vmem:[%s964_s0 + $0xf8] sm:$0xff] }
  0x22   :  { %v483_v19 = vadd.f32 %v482_v15, %v420_v9  ;;  %v428_v9 = vmul.f32 %v104_v52, %v104_v52  ;;  %v112_v52 = vsub.f32 %v42_v39, %v598_v14  ;;  %v50_v39 = vld [vmem:[%s964_s0 + $0x100] sm:$0xff] }
  0x24   :  { %v484_v26 = vadd.f32 %v483_v19, %v421_v13  ;;  %v429_v13 = vmul.f32 %v105_v60, %v105_v60  ;;  %v113_v60 = vsub.f32 %v43_v47, %v598_v14  ;;  %v120_v47 = vsub.f32 %v50_v39, %v598_v14 }
  0x26   :  { %v485_v38 = vadd.f32 %v484_v26, %v422_v18  ;;  %v430_v18 = vmul.f32 %v106_v8, %v106_v8  ;;  %v114_v8 = vsub.f32 %v44_v59, %v598_v14 }
  0x28   :  { %v486_v46 = vadd.f32 %v485_v38, %v423_v25  ;;  %v431_v25 = vmul.f32 %v107_v12, %v107_v12  ;;  %v115_v12 = vsub.f32 %v45_v7, %v598_v14 }
  0x2a   :  { %v487_v54 = vadd.f32 %v486_v46, %v424_v33  ;;  %v432_v33 = vmul.f32 %v108_v17, %v108_v17  ;;  %v116_v17 = vsub.f32 %v46_v11, %v598_v14 }
  0x2c   :  { %v488_v6 = vadd.f32 %v487_v54, %v425_v45  ;;  %v433_v45 = vmul.f32 %v109_v24, %v109_v24  ;;  %v117_v24 = vsub.f32 %v47_v16, %v598_v14 }
  0x2e   :  { %v489_v10 = vadd.f32 %v488_v6, %v426_v53  ;;  %v434_v53 = vmul.f32 %v110_v32, %v110_v32  ;;  %v118_v32 = vsub.f32 %v48_v20, %v598_v14 }
  0x30   :  { %v490_v15 = vadd.f32 %v489_v10, %v427_v5  ;;  %v435_v5 = vmul.f32 %v111_v40, %v111_v40  ;;  %v119_v40 = vsub.f32 %v49_v31, %v598_v14  ;;  %v448_v14 = vmul.f32 %v637_v27, %v637_v27 }
  0x31   :  { %v453_v27 = vmul.f32 %v661_v35, %v661_v35  ;;  %v458_v35 = vmul.f32 %v685_v43, %v685_v43  ;;  %v463_v43 = vmul.f32 %v709_v51, %v709_v51  ;;  %v468_v51 = vmul.f32 %v739_v61, %v739_v61 }
  0x32   :  { %v491_v19 = vadd.f32 %v490_v15, %v428_v9  ;;  %v436_v9 = vmul.f32 %v112_v52, %v112_v52  ;;  %v442_v52 = vmul.f32 %v118_v32, %v118_v32  ;;  %v473_v61 = vmul.f32 %v754_v2, %v754_v2  ;;  %v411_v2 = vld [vmem:[%s962_s2] sm:$0x1] }
  0x34   :  { %v492_v26 = vadd.f32 %v491_v19, %v429_v13  ;;  %v437_v13 = vmul.f32 %v113_v60, %v113_v60  ;;  %v444_v60 = vmul.f32 %v120_v47, %v120_v47 }
  0x36   :  { %v493_v38 = vadd.f32 %v492_v26, %v430_v18  ;;  %v438_v18 = vmul.f32 %v114_v8, %v114_v8  ;;  %v446_v8 = vmul.f32 %v622_v22, %v622_v22  ;;  %v451_v22 = vmul.f32 %v646_v30, %v646_v30 }
  0x37   :  { %v456_v30 = vmul.f32 %v679_v41, %v679_v41  ;;  %v461_v41 = vmul.f32 %v703_v49, %v703_v49  ;;  %v466_v49 = vmul.f32 %v727_v57, %v727_v57  ;;  %v471_v57 = vmul.f32 %v748_v0, %v748_v0 }
  0x38   :  { %v494_v46 = vadd.f32 %v493_v38, %v431_v25  ;;  %v439_v25 = vmul.f32 %v115_v12, %v115_v12 }
  0x3a   :  { %v495_v54 = vadd.f32 %v494_v46, %v432_v33  ;;  %v440_v33 = vmul.f32 %v116_v17, %v116_v17 }
  0x3c   :  { %v496_v6 = vadd.f32 %v495_v54, %v433_v45  ;;  %v441_v45 = vmul.f32 %v117_v24, %v117_v24  ;;  %v443_v54 = vmul.f32 %v119_v40, %v119_v40 }
  0x3e   :  { %v497_v10 = vadd.f32 %v496_v6, %v434_v53  ;;  %v445_v6 = vmul.f32 %v619_v21, %v619_v21  ;;  %v450_v21 = vmul.f32 %v643_v29, %v643_v29  ;;  %v455_v29 = vmul.f32 %v667_v37, %v667_v37 }
  0x3f   :  { %v460_v37 = vmul.f32 %v700_v48, %v700_v48  ;;  %v465_v48 = vmul.f32 %v724_v56, %v724_v56  ;;  %v470_v56 = vmul.f32 %v745_v63, %v745_v63  ;;  %v475_v63 = vmul.f32 %v760_v4, %v760_v4 }
  0x40   :  { %v498_v15 = vadd.f32 %v497_v10, %v435_v5  ;;  %v447_v10 = vmul.f32 %v625_v23, %v625_v23  ;;  %v452_v23 = vmul.f32 %v658_v34, %v658_v34  ;;  %v457_v34 = vmul.f32 %v682_v42, %v682_v42 }
  0x41   :  { %v462_v42 = vmul.f32 %v706_v50, %v706_v50  ;;  %v467_v50 = vmul.f32 %v730_v58, %v730_v58  ;;  %v472_v58 = vmul.f32 %v751_v1, %v751_v1 }
  0x42   :  { %v499_v19 = vadd.f32 %v498_v15, %v436_v9 }
  0x44   :  { %v500_v26 = vadd.f32 %v499_v19, %v437_v13  ;;  %v449_v13 = vmul.f32 %v640_v28, %v640_v28  ;;  %v454_v28 = vmul.f32 %v664_v36, %v664_v36  ;;  %v459_v36 = vmul.f32 %v688_v44, %v688_v44 }
  0x45   :  { %v464_v44 = vmul.f32 %v721_v55, %v721_v55  ;;  %v469_v55 = vmul.f32 %v742_v62, %v742_v62  ;;  %v474_v62 = vmul.f32 %v757_v3, %v757_v3 }
  0x46   :  { %v501_v38 = vadd.f32 %v500_v26, %v438_v18 }
  0x48   :  { %v502_v46 = vadd.f32 %v501_v38, %v439_v25 }
  0x4a   :  { %v503_v53 = vadd.f32 %v502_v46, %v440_v33 }
  0x4c   :  { %v504_v59 = vadd.f32 %v503_v53, %v441_v45 }
  0x4e   :  { %v505_v5 = vadd.f32 %v504_v59, %v442_v52 }
  0x50   :  { %v506_v7 = vadd.f32 %v505_v5, %v443_v54 }
  0x52   :  { %v507_v9 = vadd.f32 %v506_v7, %v444_v60 }
  0x54   :  { %v508_v11 = vadd.f32 %v507_v9, %v445_v6 }
  0x56   :  { %v509_v12 = vadd.f32 %v508_v11, %v446_v8 }
  0x58   :  { %v510_v15 = vadd.f32 %v509_v12, %v447_v10 }
  0x5a   :  { %v511_v16 = vadd.f32 %v510_v15, %v448_v14 }
  0x5c   :  { %v512_v17 = vadd.f32 %v511_v16, %v449_v13 }
  0x5e   :  { %v513_v18 = vadd.f32 %v512_v17, %v450_v21 }
  0x60   :  { %v514_v19 = vadd.f32 %v513_v18, %v451_v22 }
  0x62   :  { %v515_v20 = vadd.f32 %v514_v19, %v452_v23 }
  0x64   :  { %v516_v24 = vadd.f32 %v515_v20, %v453_v27 }
  0x66   :  { %v517_v25 = vadd.f32 %v516_v24, %v454_v28 }
  0x68   :  { %v518_v26 = vadd.f32 %v517_v25, %v455_v29 }
  0x6a   :  { %v519_v31 = vadd.f32 %v518_v26, %v456_v30 }
  0x6c   :  { %v520_v32 = vadd.f32 %v519_v31, %v457_v34 }
  0x6e   :  { %v521_v33 = vadd.f32 %v520_v32, %v458_v35 }
  0x70   :  { %v522_v38 = vadd.f32 %v521_v33, %v459_v36 }
  0x72   :  { %v523_v39 = vadd.f32 %v522_v38, %v460_v37 }
  0x74   :  { %v524_v40 = vadd.f32 %v523_v39, %v461_v41 }
  0x76   :  { %v525_v45 = vadd.f32 %v524_v40, %v462_v42 }
  0x78   :  { %v526_v46 = vadd.f32 %v525_v45, %v463_v43 }
  0x7a   :  { %v527_v47 = vadd.f32 %v526_v46, %v464_v44 }
  0x7c   :  { %v528_v52 = vadd.f32 %v527_v47, %v465_v48 }
  0x7e   :  { %v529_v53 = vadd.f32 %v528_v52, %v466_v49 }
  0x80   :  { %v530_v54 = vadd.f32 %v529_v53, %v467_v50 }
  0x82   :  { %v531_v59 = vadd.f32 %v530_v54, %v468_v51 }
  0x84   :  { %v532_v60 = vadd.f32 %v531_v59, %v469_v55 }
  0x86   :  { %v533_v5 = vadd.f32 %v532_v60, %v470_v56 }
  0x88   :  { %v534_v6 = vadd.f32 %v533_v5, %v471_v57 }
  0x8a   :  { %v535_v7 = vadd.f32 %v534_v6, %v472_v58 }
  0x8c   :  { %v536_v8 = vadd.f32 %v535_v7, %v473_v61 }
  0x8e   :  { %v537_v9 = vadd.f32 %v536_v8, %v474_v62 }
  0x90   :  { %v538_v10 = vadd.f32 %v537_v9, %v475_v63 }
  0x92   :  { %v539_v0 = vrot.slane %v538_v10, 4 }
  0x94   :  { %v540_v11 = vadd.f32 %v539_v0, %v538_v10 }
  0x96   :  { %v541_v14 = vrot.slane %v540_v11, 2 }
  0x98   :  { %v542_v12 = vadd.f32 %v541_v14, %v540_v11 }
  0x9a   :  { %v543_v1 = vrot.slane %v542_v12, 1 }
  0x9c   :  { %v544_v13 = vadd.f32 %v543_v1, %v542_v12 }
  0x9e   :  { %v545_v15 = vadd.f32 %v544_v13, %v411_v2 }
  0xa0   :  { %546 = vst [vmem:[%s962_s2] sm:$0x1] %v545_v15 }

// kernel: fpn1_forward.26
= control target key start
LH: loop header
LB: loop body
LE: loop exit
PB: predicated region body
PF: predicated region fallthrough
CT: control target
= control target key end

     0   :  { %10 = vsyncpa [#allocation3], 0  ;;  %s407_s18 = smov [#allocation2]   ;;  %s975_s0 = inlined_call_operand.vmem [shape: f32[512,128], index: 0, kind: input, shape index: {}]   ;;  %s976_s1 = inlined_call_operand.vmem [shape: f32[1,128], index: 1, kind: input, shape index: {}]   ;;  %s977_s2 = inlined_call_operand.vmem [shape: f32[1,128], index: 2, kind: input, shape index: {}]   ;;  %s978_s3 = inlined_call_operand.hbm [shape: f32[1,128], index: 3, kind: input, shape index: {}]   ;;  %s979_s4 = inlined_call_operand.vmem [shape: f32[1,128], index: 4, kind: input, shape index: {}]   ;;  %s980_s5 = inlined_call_operand.vmem [shape: f32[512,128], index: 5, kind: output, shape index: {}]  }
   0x1   :  { %s23_s19 = sshll.u32 %s407_s18, 4  ;;  %s383_s22 = scalar_lea.hbm %s978_s3, 16  ;;  %s24_s19 = int_to_ptr.vmem [resolvable:$true] %s23_s19 }
   0x2   :  { %p384_p0 = scmp.ne.s32.totalorder %s978_s3, %s383_s22  ;;  %p387_p1 = scmp.lt.u32.totalorder %s383_s22, %s978_s3 }
   0x4   :  { %p389_p2 = pnand %p387_p1, %p384_p0 }
   0x6   :  { %392 = shalt.err (!%p389_p2)
}
   0x7   :  { %s393_s27 = scalar_lea.vmem %s24_s19, 16  ;;  %s397_s28 = scalar_lea.vmem %s24_s19, 32 }
   0x8   :  { %p394_p3 = scmp.ne.s32.totalorder %s24_s19, %s393_s27  ;;  %p398_p4 = scmp.lt.s32.totalorder %s24_s19, %s24_s19 }
   0x9   :  { %p399_p5 = scmp.lt.s32.totalorder %s397_s28, %s393_s27 }
   0xb   :  { %p400_p6 = por %p399_p5, %p398_p4 }
   0xd   :  { %p401_p7 = pnand %p400_p6, %p394_p3 }
   0xf   :  { %404 = shalt.err (!%p401_p7)
}
  0x10   :  { %26 = dma.hbm_to_vmem [thread:$0]  %s978_s3, 16, %s24_s19, [#allocation3]  }
  0x11   :  { %405 = dma.done.wait [#allocation3], 16  }
  0x12   :  { %406 = vsyncadd [#allocation3], 4294967280  ;;  %v34_v0 = vld [vmem:[%s977_s2] sm:$0x1]  ;;  %v108_v3 = vlaneseq  ;;  %v44_v13 = vld [vmem:[%s975_s0 + $0x8] sm:$0xff] }
  0x13   :  { %v35_v1 = vmul.f32 0.001953125, %v34_v0  ;;  %v32_v5 = vld [vmem:[%s976_s1] sm:$0x1]  ;;  %v45_v14 = vld [vmem:[%s975_s0 + $0x10] sm:$0xff]  ;;  %v46_v15 = vld [vmem:[%s975_s0 + $0x18] sm:$0xff] }
  0x14   :  { %v109_v4 = vshrl.u32 %v108_v3, 7  ;;  %v38_v6 = vld [vmem:[#allocation2] sm:$0x1]  ;;  %v33_v7 = vmul.f32 0.001953125, %v32_v5  ;;  %v48_v19 = vld [vmem:[%s975_s0 + $0x28] sm:$0xff]  ;;  %v49_v20 = vld [vmem:[%s975_s0 + $0x30] sm:$0xff] }
  0x15   :  { %v36_v2 = vadd.f32 1e-05, %v35_v1  ;;  %v40_v11 = vld [vmem:[%s979_s4] sm:$0x1]  ;;  %v50_v21 = vld [vmem:[%s975_s0 + $0x38] sm:$0xff]  ;;  %v52_v23 = vld [vmem:[%s975_s0 + $0x48] sm:$0xff] }
  0x16   :  { %v110_v8 = vsub.s32 0, %v109_v4  ;;  %v43_v12 = vld [vmem:[%s975_s0] sm:$0xff]  ;;  %v53_v24 = vld [vmem:[%s975_s0 + $0x50] sm:$0xff]  ;;  %v54_v29 = vld [vmem:[%s975_s0 + $0x58] sm:$0xff] }
  0x17   :  { %381 = vrsqrt.f32 %v36_v2  ;;  %v47_v16 = vld [vmem:[%s975_s0 + $0x20] sm:$0xff]  ;;  %v56_v31 = vld [vmem:[%s975_s0 + $0x68] sm:$0xff]  ;;  %v57_v56 = vld [vmem:[%s975_s0 + $0x70] sm:$0xff] }
  0x18   :  { %v51_v22 = vld [vmem:[%s975_s0 + $0x40] sm:$0xff]  ;;  %v58_v57 = vld [vmem:[%s975_s0 + $0x78] sm:$0xff] }
  0x19   :  { %v55_v30 = vld [vmem:[%s975_s0 + $0x60] sm:$0xff] }
  0x1a   :  { %v59_v2 = vld [vmem:[%s975_s0 + $0x80] sm:$0xff] }
  0x21   :  { %v382_v9 = vpop.eup %381 }
  0x22   :  { %v39_v10 = vmul.f32 %v382_v9, %v38_v6  ;;  %v62_v9 = vld [vmem:[%s975_s0 + $0x98] sm:$0xff] }
  0x24   :  { %v41_v17 = vmul.f32 %v39_v10, %v33_v7  ;;  %v474_v18 = vrot.slane %v39_v10, %v110_v8  ;;  %v60_v7 = vld [vmem:[%s975_s0 + $0x88] sm:$0xff] }
  0x26   :  { %v42_v25 = vsub.f32 %v40_v11, %v41_v17  ;;  %v113_v26 = vmul.f32 %v474_v18, %v43_v12  ;;  %v114_v27 = vmul.f32 %v474_v18, %v44_v13  ;;  %v115_v28 = vmul.f32 %v474_v18, %v45_v14  ;;  %v63_v14 = vld [vmem:[%s975_s0 + $0xa0] sm:$0xff] }
  0x27   :  { %v116_v32 = vmul.f32 %v474_v18, %v46_v15  ;;  %v117_v33 = vmul.f32 %v474_v18, %v47_v16  ;;  %v118_v34 = vmul.f32 %v474_v18, %v48_v19  ;;  %v119_v35 = vmul.f32 %v474_v18, %v49_v20  ;;  %v64_v15 = vld [vmem:[%s975_s0 + $0xa8] sm:$0xff] }
  0x28   :  { %v510_v36 = vrot.slane %v42_v25, %v110_v8  ;;  %v120_v37 = vmul.f32 %v474_v18, %v50_v21  ;;  %v121_v38 = vmul.f32 %v474_v18, %v51_v22  ;;  %v122_v39 = vmul.f32 %v474_v18, %v52_v23  ;;  %v61_v8 = vld [vmem:[%s975_s0 + $0x90] sm:$0xff] }
  0x29   :  { %v123_v40 = vmul.f32 %v474_v18, %v53_v24  ;;  %v124_v41 = vmul.f32 %v474_v18, %v54_v29  ;;  %v125_v42 = vmul.f32 %v474_v18, %v55_v30  ;;  %v126_v43 = vmul.f32 %v474_v18, %v56_v31  ;;  %v65_v25 = vld [vmem:[%s975_s0 + $0xb0] sm:$0xff] }
  0x2a   :  { %v183_v44 = vadd.f32 %v510_v36, %v113_v26  ;;  %v184_v45 = vadd.f32 %v510_v36, %v114_v27  ;;  %v185_v46 = vadd.f32 %v510_v36, %v115_v28  ;;  %v186_v47 = vadd.f32 %v510_v36, %v116_v32  ;;  %v66_v26 = vld [vmem:[%s975_s0 + $0xb8] sm:$0xff] }
  0x2b   :  { %v187_v48 = vadd.f32 %v510_v36, %v117_v33  ;;  %v188_v49 = vadd.f32 %v510_v36, %v118_v34  ;;  %v189_v50 = vadd.f32 %v510_v36, %v119_v35  ;;  %v190_v51 = vadd.f32 %v510_v36, %v120_v37  ;;  %v67_v35 = vld [vmem:[%s975_s0 + $0xc0] sm:$0xff] }
  0x2c   :  { %v247_v52 = vmax.f32 %v183_v44, 0.0  ;;  %v248_v53 = vmax.f32 %v184_v45, 0.0  ;;  %v249_v54 = vmax.f32 %v185_v46, 0.0  ;;  %v250_v55 = vmax.f32 %v186_v47, 0.0 }
  0x2d   :  { %v251_v58 = vmax.f32 %v187_v48, 0.0  ;;  %v252_v59 = vmax.f32 %v188_v49, 0.0  ;;  %v253_v60 = vmax.f32 %v189_v50, 0.0  ;;  %v254_v61 = vmax.f32 %v190_v51, 0.0  ;;  %v71_v48 = vld [vmem:[%s975_s0 + $0xe0] sm:$0xff]  ;;  %v72_v49 = vld [vmem:[%s975_s0 + $0xe8] sm:$0xff] }
  0x2e   :  { %311 = vst [vmem:[%s980_s5] sm:$0xff] %v247_v52  ;;  %312 = vst [vmem:[%s980_s5 + $0x8] sm:$0xff] %v248_v53  ;;  %v191_v62 = vadd.f32 %v510_v36, %v121_v38  ;;  %v192_v63 = vadd.f32 %v510_v36, %v122_v39  ;;  %v193_v0 = vadd.f32 %v510_v36, %v123_v40 }
  0x2f   :  { %313 = vst [vmem:[%s980_s5 + $0x10] sm:$0xff] %v249_v54  ;;  %314 = vst [vmem:[%s980_s5 + $0x18] sm:$0xff] %v250_v55  ;;  %v194_v1 = vadd.f32 %v510_v36, %v124_v41  ;;  %v195_v3 = vadd.f32 %v510_v36, %v125_v42  ;;  %v196_v4 = vadd.f32 %v510_v36, %v126_v43  ;;  %v68_v41 = vld [vmem:[%s975_s0 + $0xc8] sm:$0xff]  ;;  %v69_v42 = vld [vmem:[%s975_s0 + $0xd0] sm:$0xff] }
  0x30   :  { %315 = vst [vmem:[%s980_s5 + $0x20] sm:$0xff] %v251_v58  ;;  %316 = vst [vmem:[%s980_s5 + $0x28] sm:$0xff] %v252_v59  ;;  %v127_v5 = vmul.f32 %v474_v18, %v57_v56  ;;  %v128_v6 = vmul.f32 %v474_v18, %v58_v57  ;;  %v255_v10 = vmax.f32 %v191_v62, 0.0  ;;  %v256_v11 = vmax.f32 %v192_v63, 0.0  ;;  %v70_v43 = vld [vmem:[%s975_s0 + $0xd8] sm:$0xff]  ;;  %v73_v58 = vld [vmem:[%s975_s0 + $0xf0] sm:$0xff] }
  0x31   :  { %317 = vst [vmem:[%s980_s5 + $0x30] sm:$0xff] %v253_v60  ;;  %318 = vst [vmem:[%s980_s5 + $0x38] sm:$0xff] %v254_v61  ;;  %v257_v12 = vmax.f32 %v193_v0, 0.0  ;;  %v258_v13 = vmax.f32 %v194_v1, 0.0  ;;  %v259_v16 = vmax.f32 %v195_v3, 0.0  ;;  %v260_v17 = vmax.f32 %v196_v4, 0.0 }
  0x32   :  { %v197_v19 = vadd.f32 %v510_v36, %v127_v5  ;;  %v198_v20 = vadd.f32 %v510_v36, %v128_v6  ;;  %319 = vst [vmem:[%s980_s5 + $0x40] sm:$0xff] %v255_v10  ;;  %320 = vst [vmem:[%s980_s5 + $0x48] sm:$0xff] %v256_v11  ;;  %v129_v21 = vmul.f32 %v474_v18, %v59_v2  ;;  %v74_v59 = vld [vmem:[%s975_s0 + $0xf8] sm:$0xff]  ;;  %v75_v4 = vld [vmem:[%s975_s0 + $0x100] sm:$0xff] }
  0x33   :  { %321 = vst [vmem:[%s980_s5 + $0x50] sm:$0xff] %v257_v12  ;;  %322 = vst [vmem:[%s980_s5 + $0x58] sm:$0xff] %v258_v13  ;;  %v130_v22 = vmul.f32 %v474_v18, %v60_v7  ;;  %v131_v23 = vmul.f32 %v474_v18, %v61_v8  ;;  %v132_v24 = vmul.f32 %v474_v18, %v62_v9  ;;  %v76_v9 = vld [vmem:[%s975_s0 + $0x108] sm:$0xff]  ;;  %v77_v10 = vld [vmem:[%s975_s0 + $0x110] sm:$0xff] }
  0x34   :  { %323 = vst [vmem:[%s980_s5 + $0x60] sm:$0xff] %v259_v16  ;;  %324 = vst [vmem:[%s980_s5 + $0x68] sm:$0xff] %v260_v17  ;;  %v261_v27 = vmax.f32 %v197_v19, 0.0  ;;  %v262_v28 = vmax.f32 %v198_v20, 0.0  ;;  %v133_v29 = vmul.f32 %v474_v18, %v63_v14  ;;  %v134_v30 = vmul.f32 %v474_v18, %v64_v15  ;;  %v78_v11 = vld [vmem:[%s975_s0 + $0x118] sm:$0xff]  ;;  %v79_v16 = vld [vmem:[%s975_s0 + $0x120] sm:$0xff] }
  0x35   :  { %v199_v31 = vadd.f32 %v510_v36, %v129_v21  ;;  %v200_v32 = vadd.f32 %v510_v36, %v130_v22  ;;  %v201_v33 = vadd.f32 %v510_v36, %v131_v23  ;;  %v202_v34 = vadd.f32 %v510_v36, %v132_v24  ;;  %v80_v17 = vld [vmem:[%s975_s0 + $0x128] sm:$0xff] }
  0x36   :  { %325 = vst [vmem:[%s980_s5 + $0x70] sm:$0xff] %v261_v27  ;;  %326 = vst [vmem:[%s980_s5 + $0x78] sm:$0xff] %v262_v28  ;;  %v203_v37 = vadd.f32 %v510_v36, %v133_v29  ;;  %v204_v38 = vadd.f32 %v510_v36, %v134_v30  ;;  %v135_v39 = vmul.f32 %v474_v18, %v65_v25  ;;  %v81_v27 = vld [vmem:[%s975_s0 + $0x130] sm:$0xff]  ;;  %v82_v28 = vld [vmem:[%s975_s0 + $0x138] sm:$0xff] }
  0x37   :  { %v136_v40 = vmul.f32 %v474_v18, %v66_v26  ;;  %v263_v44 = vmax.f32 %v199_v31, 0.0  ;;  %v264_v45 = vmax.f32 %v200_v32, 0.0  ;;  %v265_v46 = vmax.f32 %v201_v33, 0.0 }
  0x38   :  { %v266_v47 = vmax.f32 %v202_v34, 0.0  ;;  %v267_v50 = vmax.f32 %v203_v37, 0.0  ;;  %v268_v51 = vmax.f32 %v204_v38, 0.0  ;;  %v205_v52 = vadd.f32 %v510_v36, %v135_v39  ;;  %v83_v38 = vld [vmem:[%s975_s0 + $0x140] sm:$0xff] }
  0x39   :  { %v206_v53 = vadd.f32 %v510_v36, %v136_v40  ;;  %327 = vst [vmem:[%s980_s5 + $0x80] sm:$0xff] %v263_v44  ;;  %328 = vst [vmem:[%s980_s5 + $0x88] sm:$0xff] %v264_v45  ;;  %v137_v54 = vmul.f32 %v474_v18, %v67_v35  ;;  %v138_v55 = vmul.f32 %v474_v18, %v68_v41  ;;  %v85_v44 = vld [vmem:[%s975_s0 + $0x150] sm:$0xff]  ;;  %v86_v45 = vld [vmem:[%s975_s0 + $0x158] sm:$0xff] }
  0x3a   :  { %329 = vst [vmem:[%s980_s5 + $0x90] sm:$0xff] %v265_v46  ;;  %330 = vst [vmem:[%s980_s5 + $0x98] sm:$0xff] %v266_v47  ;;  %v139_v56 = vmul.f32 %v474_v18, %v69_v42  ;;  %v140_v57 = vmul.f32 %v474_v18, %v70_v43  ;;  %v269_v60 = vmax.f32 %v205_v52, 0.0  ;;  %v141_v62 = vmul.f32 %v474_v18, %v71_v48  ;;  %v84_v43 = vld [vmem:[%s975_s0 + $0x148] sm:$0xff] }
  0x3b   :  { %331 = vst [vmem:[%s980_s5 + $0xa0] sm:$0xff] %v267_v50  ;;  %332 = vst [vmem:[%s980_s5 + $0xa8] sm:$0xff] %v268_v51  ;;  %v270_v61 = vmax.f32 %v206_v53, 0.0  ;;  %v142_v63 = vmul.f32 %v474_v18, %v72_v49  ;;  %v207_v0 = vadd.f32 %v510_v36, %v137_v54  ;;  %v208_v1 = vadd.f32 %v510_v36, %v138_v55  ;;  %v87_v50 = vld [vmem:[%s975_s0 + $0x160] sm:$0xff]  ;;  %v88_v51 = vld [vmem:[%s975_s0 + $0x168] sm:$0xff] }
  0x3c   :  { %v209_v2 = vadd.f32 %v510_v36, %v139_v56  ;;  %v210_v3 = vadd.f32 %v510_v36, %v140_v57  ;;  %333 = vst [vmem:[%s980_s5 + $0xb0] sm:$0xff] %v269_v60  ;;  %v211_v5 = vadd.f32 %v510_v36, %v141_v62  ;;  %v143_v7 = vmul.f32 %v474_v18, %v73_v58  ;;  %v89_v60 = vld [vmem:[%s975_s0 + $0x170] sm:$0xff] }
  0x3d   :  { %334 = vst [vmem:[%s980_s5 + $0xb8] sm:$0xff] %v270_v61  ;;  %v212_v6 = vadd.f32 %v510_v36, %v142_v63  ;;  %v144_v8 = vmul.f32 %v474_v18, %v74_v59  ;;  %v271_v12 = vmax.f32 %v207_v0, 0.0  ;;  %v272_v13 = vmax.f32 %v208_v1, 0.0  ;;  %v90_v61 = vld [vmem:[%s975_s0 + $0x178] sm:$0xff] }
  0x3e   :  { %v273_v14 = vmax.f32 %v209_v2, 0.0  ;;  %v274_v15 = vmax.f32 %v210_v3, 0.0  ;;  %v275_v19 = vmax.f32 %v211_v5, 0.0  ;;  %v213_v21 = vadd.f32 %v510_v36, %v143_v7 }
  0x3f   :  { %v276_v20 = vmax.f32 %v212_v6, 0.0  ;;  %v214_v22 = vadd.f32 %v510_v36, %v144_v8  ;;  %335 = vst [vmem:[%s980_s5 + $0xc0] sm:$0xff] %v271_v12  ;;  %336 = vst [vmem:[%s980_s5 + $0xc8] sm:$0xff] %v272_v13  ;;  %v145_v23 = vmul.f32 %v474_v18, %v75_v4  ;;  %v146_v24 = vmul.f32 %v474_v18, %v76_v9  ;;  %v91_v6 = vld [vmem:[%s975_s0 + $0x180] sm:$0xff]  ;;  %v93_v12 = vld [vmem:[%s975_s0 + $0x190] sm:$0xff] }
  0x40   :  { %337 = vst [vmem:[%s980_s5 + $0xd0] sm:$0xff] %v273_v14  ;;  %338 = vst [vmem:[%s980_s5 + $0xd8] sm:$0xff] %v274_v15  ;;  %v147_v25 = vmul.f32 %v474_v18, %v77_v10  ;;  %v148_v26 = vmul.f32 %v474_v18, %v78_v11  ;;  %v277_v29 = vmax.f32 %v213_v21, 0.0  ;;  %v149_v31 = vmul.f32 %v474_v18, %v79_v16  ;;  %v92_v11 = vld [vmem:[%s975_s0 + $0x188] sm:$0xff]  ;;  %v94_v13 = vld [vmem:[%s975_s0 + $0x198] sm:$0xff] }
  0x41   :  { %339 = vst [vmem:[%s980_s5 + $0xe0] sm:$0xff] %v275_v19  ;;  %340 = vst [vmem:[%s980_s5 + $0xe8] sm:$0xff] %v276_v20  ;;  %v278_v30 = vmax.f32 %v214_v22, 0.0  ;;  %v150_v32 = vmul.f32 %v474_v18, %v80_v17  ;;  %v215_v33 = vadd.f32 %v510_v36, %v145_v23  ;;  %v216_v34 = vadd.f32 %v510_v36, %v146_v24  ;;  %v95_v19 = vld [vmem:[%s975_s0 + $0x1a0] sm:$0xff]  ;;  %v96_v20 = vld [vmem:[%s975_s0 + $0x1a8] sm:$0xff] }
  0x42   :  { %v217_v35 = vadd.f32 %v510_v36, %v147_v25  ;;  %v218_v37 = vadd.f32 %v510_v36, %v148_v26  ;;  %341 = vst [vmem:[%s980_s5 + $0xf0] sm:$0xff] %v277_v29  ;;  %v219_v39 = vadd.f32 %v510_v36, %v149_v31  ;;  %v151_v41 = vmul.f32 %v474_v18, %v81_v27  ;;  %v97_v29 = vld [vmem:[%s975_s0 + $0x1b0] sm:$0xff] }
  0x43   :  { %342 = vst [vmem:[%s980_s5 + $0xf8] sm:$0xff] %v278_v30  ;;  %v220_v40 = vadd.f32 %v510_v36, %v150_v32  ;;  %v152_v42 = vmul.f32 %v474_v18, %v82_v28  ;;  %v279_v46 = vmax.f32 %v215_v33, 0.0  ;;  %v280_v47 = vmax.f32 %v216_v34, 0.0  ;;  %v98_v30 = vld [vmem:[%s975_s0 + $0x1b8] sm:$0xff] }
  0x44   :  { %v281_v48 = vmax.f32 %v217_v35, 0.0  ;;  %v282_v49 = vmax.f32 %v218_v37, 0.0  ;;  %v283_v52 = vmax.f32 %v219_v39, 0.0  ;;  %v221_v54 = vadd.f32 %v510_v36, %v151_v41 }
  0x45   :  { %v284_v53 = vmax.f32 %v220_v40, 0.0  ;;  %v222_v55 = vadd.f32 %v510_v36, %v152_v42  ;;  %343 = vst [vmem:[%s980_s5 + $0x100] sm:$0xff] %v279_v46  ;;  %344 = vst [vmem:[%s980_s5 + $0x108] sm:$0xff] %v280_v47  ;;  %v153_v56 = vmul.f32 %v474_v18, %v83_v38  ;;  %v154_v57 = vmul.f32 %v474_v18, %v84_v43  ;;  %v99_v40 = vld [vmem:[%s975_s0 + $0x1c0] sm:$0xff]  ;;  %v101_v46 = vld [vmem:[%s975_s0 + $0x1d0] sm:$0xff] }
  0x46   :  { %345 = vst [vmem:[%s980_s5 + $0x110] sm:$0xff] %v281_v48  ;;  %346 = vst [vmem:[%s980_s5 + $0x118] sm:$0xff] %v282_v49  ;;  %v155_v58 = vmul.f32 %v474_v18, %v85_v44  ;;  %v156_v59 = vmul.f32 %v474_v18, %v86_v45  ;;  %v285_v62 = vmax.f32 %v221_v54, 0.0  ;;  %v157_v0 = vmul.f32 %v474_v18, %v87_v50  ;;  %v100_v45 = vld [vmem:[%s975_s0 + $0x1c8] sm:$0xff]  ;;  %v102_v47 = vld [vmem:[%s975_s0 + $0x1d8] sm:$0xff] }
  0x47   :  { %347 = vst [vmem:[%s980_s5 + $0x120] sm:$0xff] %v283_v52  ;;  %348 = vst [vmem:[%s980_s5 + $0x128] sm:$0xff] %v284_v53  ;;  %v286_v63 = vmax.f32 %v222_v55, 0.0  ;;  %v158_v1 = vmul.f32 %v474_v18, %v88_v51  ;;  %v223_v2 = vadd.f32 %v510_v36, %v153_v56  ;;  %v224_v3 = vadd.f32 %v510_v36, %v154_v57  ;;  %v103_v52 = vld [vmem:[%s975_s0 + $0x1e0] sm:$0xff]  ;;  %v104_v53 = vld [vmem:[%s975_s0 + $0x1e8] sm:$0xff] }
  0x48   :  { %v225_v4 = vadd.f32 %v510_v36, %v155_v58  ;;  %v226_v5 = vadd.f32 %v510_v36, %v156_v59  ;;  %349 = vst [vmem:[%s980_s5 + $0x130] sm:$0xff] %v285_v62  ;;  %v227_v7 = vadd.f32 %v510_v36, %v157_v0  ;;  %v159_v9 = vmul.f32 %v474_v18, %v89_v60  ;;  %v105_v62 = vld [vmem:[%s975_s0 + $0x1f0] sm:$0xff] }
  0x49   :  { %350 = vst [vmem:[%s980_s5 + $0x138] sm:$0xff] %v286_v63  ;;  %v228_v8 = vadd.f32 %v510_v36, %v158_v1  ;;  %v160_v10 = vmul.f32 %v474_v18, %v90_v61  ;;  %v287_v14 = vmax.f32 %v223_v2, 0.0  ;;  %v288_v15 = vmax.f32 %v224_v3, 0.0  ;;  %v106_v63 = vld [vmem:[%s975_s0 + $0x1f8] sm:$0xff] }
  0x4a   :  { %v289_v16 = vmax.f32 %v225_v4, 0.0  ;;  %v290_v17 = vmax.f32 %v226_v5, 0.0  ;;  %v291_v21 = vmax.f32 %v227_v7, 0.0  ;;  %v229_v23 = vadd.f32 %v510_v36, %v159_v9 }
  0x4b   :  { %v292_v22 = vmax.f32 %v228_v8, 0.0  ;;  %v230_v24 = vadd.f32 %v510_v36, %v160_v10  ;;  %351 = vst [vmem:[%s980_s5 + $0x140] sm:$0xff] %v287_v14  ;;  %352 = vst [vmem:[%s980_s5 + $0x148] sm:$0xff] %v288_v15  ;;  %v161_v25 = vmul.f32 %v474_v18, %v91_v6  ;;  %v162_v26 = vmul.f32 %v474_v18, %v92_v11 }
  0x4c   :  { %353 = vst [vmem:[%s980_s5 + $0x150] sm:$0xff] %v289_v16  ;;  %354 = vst [vmem:[%s980_s5 + $0x158] sm:$0xff] %v290_v17  ;;  %v163_v27 = vmul.f32 %v474_v18, %v93_v12  ;;  %v164_v28 = vmul.f32 %v474_v18, %v94_v13  ;;  %v293_v31 = vmax.f32 %v229_v23, 0.0  ;;  %v165_v33 = vmul.f32 %v474_v18, %v95_v19 }
  0x4d   :  { %355 = vst [vmem:[%s980_s5 + $0x160] sm:$0xff] %v291_v21  ;;  %356 = vst [vmem:[%s980_s5 + $0x168] sm:$0xff] %v292_v22  ;;  %v294_v32 = vmax.f32 %v230_v24, 0.0  ;;  %v166_v34 = vmul.f32 %v474_v18, %v96_v20  ;;  %v231_v35 = vadd.f32 %v510_v36, %v161_v25  ;;  %v232_v37 = vadd.f32 %v510_v36, %v162_v26 }
  0x4e   :  { %v233_v38 = vadd.f32 %v510_v36, %v163_v27  ;;  %v234_v39 = vadd.f32 %v510_v36, %v164_v28  ;;  %357 = vst [vmem:[%s980_s5 + $0x170] sm:$0xff] %v293_v31  ;;  %v235_v41 = vadd.f32 %v510_v36, %v165_v33  ;;  %v167_v43 = vmul.f32 %v474_v18, %v97_v29 }
  0x4f   :  { %358 = vst [vmem:[%s980_s5 + $0x178] sm:$0xff] %v294_v32  ;;  %v236_v42 = vadd.f32 %v510_v36, %v166_v34  ;;  %v168_v44 = vmul.f32 %v474_v18, %v98_v30  ;;  %v295_v48 = vmax.f32 %v231_v35, 0.0  ;;  %v296_v49 = vmax.f32 %v232_v37, 0.0 }
  0x50   :  { %v297_v50 = vmax.f32 %v233_v38, 0.0  ;;  %v298_v51 = vmax.f32 %v234_v39, 0.0  ;;  %v299_v54 = vmax.f32 %v235_v41, 0.0  ;;  %v237_v56 = vadd.f32 %v510_v36, %v167_v43 }
  0x51   :  { %v300_v55 = vmax.f32 %v236_v42, 0.0  ;;  %v238_v57 = vadd.f32 %v510_v36, %v168_v44  ;;  %359 = vst [vmem:[%s980_s5 + $0x180] sm:$0xff] %v295_v48  ;;  %360 = vst [vmem:[%s980_s5 + $0x188] sm:$0xff] %v296_v49  ;;  %v169_v58 = vmul.f32 %v474_v18, %v99_v40  ;;  %v170_v59 = vmul.f32 %v474_v18, %v100_v45 }
  0x52   :  { %361 = vst [vmem:[%s980_s5 + $0x190] sm:$0xff] %v297_v50  ;;  %362 = vst [vmem:[%s980_s5 + $0x198] sm:$0xff] %v298_v51  ;;  %v171_v60 = vmul.f32 %v474_v18, %v101_v46  ;;  %v172_v61 = vmul.f32 %v474_v18, %v102_v47  ;;  %v301_v0 = vmax.f32 %v237_v56, 0.0  ;;  %v173_v2 = vmul.f32 %v474_v18, %v103_v52 }
  0x53   :  { %363 = vst [vmem:[%s980_s5 + $0x1a0] sm:$0xff] %v299_v54  ;;  %364 = vst [vmem:[%s980_s5 + $0x1a8] sm:$0xff] %v300_v55  ;;  %v302_v1 = vmax.f32 %v238_v57, 0.0  ;;  %v174_v3 = vmul.f32 %v474_v18, %v104_v53  ;;  %v239_v4 = vadd.f32 %v510_v36, %v169_v58  ;;  %v240_v5 = vadd.f32 %v510_v36, %v170_v59 }
  0x54   :  { %v241_v6 = vadd.f32 %v510_v36, %v171_v60  ;;  %v242_v7 = vadd.f32 %v510_v36, %v172_v61  ;;  %365 = vst [vmem:[%s980_s5 + $0x1b0] sm:$0xff] %v301_v0  ;;  %v243_v8 = vadd.f32 %v510_v36, %v173_v2  ;;  %v175_v10 = vmul.f32 %v474_v18, %v105_v62 }
  0x55   :  { %366 = vst [vmem:[%s980_s5 + $0x1b8] sm:$0xff] %v302_v1  ;;  %v244_v9 = vadd.f32 %v510_v36, %v174_v3  ;;  %v176_v11 = vmul.f32 %v474_v18, %v106_v63  ;;  %v303_v12 = vmax.f32 %v239_v4, 0.0  ;;  %v304_v13 = vmax.f32 %v240_v5, 0.0 }
  0x56   :  { %v305_v14 = vmax.f32 %v241_v6, 0.0  ;;  %v306_v15 = vmax.f32 %v242_v7, 0.0  ;;  %v307_v16 = vmax.f32 %v243_v8, 0.0  ;;  %v245_v19 = vadd.f32 %v510_v36, %v175_v10 }
  0x57   :  { %v308_v17 = vmax.f32 %v244_v9, 0.0  ;;  %v246_v20 = vadd.f32 %v510_v36, %v176_v11  ;;  %367 = vst [vmem:[%s980_s5 + $0x1c0] sm:$0xff] %v303_v12  ;;  %368 = vst [vmem:[%s980_s5 + $0x1c8] sm:$0xff] %v304_v13 }
  0x58   :  { %369 = vst [vmem:[%s980_s5 + $0x1d0] sm:$0xff] %v305_v14  ;;  %370 = vst [vmem:[%s980_s5 + $0x1d8] sm:$0xff] %v306_v15  ;;  %v309_v18 = vmax.f32 %v245_v19, 0.0 }
  0x59   :  { %371 = vst [vmem:[%s980_s5 + $0x1e0] sm:$0xff] %v307_v16  ;;  %372 = vst [vmem:[%s980_s5 + $0x1e8] sm:$0xff] %v308_v17  ;;  %v310_v36 = vmax.f32 %v246_v20, 0.0 }
  0x5a   :  { %373 = vst [vmem:[%s980_s5 + $0x1f0] sm:$0xff] %v309_v18 }
  0x5b   :  { %374 = vst [vmem:[%s980_s5 + $0x1f8] sm:$0xff] %v310_v36 }
  0x5c   :  { %379 = vsyncpa [#allocation3], 1 }

// kernel: fpn1_forward.24
= control target key start
LH: loop header
LB: loop body
LE: loop exit
PB: predicated region body
PF: predicated region fallthrough
CT: control target
= control target key end

     0   :  { %9 = vsyncpa [#allocation3], 0  ;;  %s1295_s12 = smov [#allocation2]   ;;  %s1728_s0 = inlined_call_operand.vmem [shape: bf16[512,128], index: 0, kind: input, shape index: {}]   ;;  %s1729_s1 = inlined_call_operand.hbm [shape: bf16[128,128], index: 1, kind: input, shape index: {}]   ;;  %s1730_s2 = inlined_call_operand.vmem [shape: f32[512,128], index: 2, kind: output, shape index: {0}]   ;;  %s1731_s3 = inlined_call_operand.vmem [shape: f32[1,128], index: 3, kind: output, shape index: {1}]  }
   0x1   :  { %s17_s13 = sshll.u32 %s1295_s12, 4  ;;  %s1271_s16 = scalar_lea.hbm %s1729_s1, 1024  ;;  %s18_s13 = int_to_ptr.vmem [resolvable:$true] %s17_s13 }
   0x2   :  { %p1272_p0 = scmp.ne.s32.totalorder %s1729_s1, %s1271_s16  ;;  %p1275_p1 = scmp.lt.u32.totalorder %s1271_s16, %s1729_s1 }
   0x4   :  { %p1277_p2 = pnand %p1275_p1, %p1272_p0 }
   0x6   :  { %1280 = shalt.err (!%p1277_p2)
}
   0x7   :  { %s1281_s21 = scalar_lea.vmem %s18_s13, 1024  ;;  %p1286_p4 = scmp.lt.s32.totalorder %s18_s13, %s18_s13 }
   0x8   :  { %p1282_p3 = scmp.ne.s32.totalorder %s18_s13, %s1281_s21  ;;  %p1287_p5 = scmp.lt.s32.totalorder %s1281_s21, %s1281_s21 }
   0xa   :  { %p1288_p6 = por %p1287_p5, %p1286_p4 }
   0xc   :  { %p1289_p7 = pnand %p1288_p6, %p1282_p3 }
   0xe   :  { %1292 = shalt.err (!%p1289_p7)
}
   0xf   :  { %s1296_s22 = smov 64   ;;  %s1297_s23 = smov 4  }
  0x10   :  { %23 = dma.hbm_to_vmem [thread:$0]  %s1729_s1, 1024, %s18_s13, [#allocation3], %s1296_s22, %s1296_s22, %s1297_s23  }
  0x11   :  { %1293 = dma.done.wait [#allocation3], 1024  }
  0x12   :  { %1294 = vsyncadd [#allocation3], 4294966272  ;;  %v1298_v0 = vmov 0.0   ;;  %v1231_v1 = vld [vmem:[#allocation2] sm:$0xff]   ;;  %v1232_v2 = vld [vmem:[#allocation2 + $0x8] sm:$0xff]  }
  0x13   :  { %101 = vst [vmem:[%s1731_s3] sm:$0x1] %v1298_v0  ;;  %1131 = vmatprep.subr.bf16.mxu0 %v1231_v1  ;;  %1211 = vmatprep.subr.bf16.mxu1 %v1231_v1  ;;  %v1233_v3 = vld [vmem:[#allocation2 + $0x10] sm:$0xff]   ;;  %v1234_v4 = vld [vmem:[#allocation2 + $0x18] sm:$0xff]   ;;  %v1239_v5 = vld [vmem:[%s1728_s0] sm:$0xff]  }
  0x14   :  { %1132 = vmatpush3.bf16.msra.mxu0 %v1231_v1  ;;  %1219 = vmatpush3.bf16.msra.mxu1 %v1231_v1  ;;  %v1235_v6 = vld [vmem:[#allocation2 + $0x20] sm:$0xff]   ;;  %v1236_v7 = vld [vmem:[#allocation2 + $0x28] sm:$0xff]   ;;  %v1237_v8 = vld [vmem:[#allocation2 + $0x30] sm:$0xff]  }
  0x15   :  { %1133 = vmatprep.subr.bf16.mxu0 %v1232_v2  ;;  %1212 = vmatprep.subr.bf16.mxu1 %v1232_v2  ;;  %v1238_v9 = vld [vmem:[#allocation2 + $0x38] sm:$0xff]   ;;  %v1255_v10 = vld [vmem:[%s1728_s0 + $0x80] sm:$0xff]   ;;  %v1240_v11 = vld [vmem:[%s1728_s0 + $0x8] sm:$0xff]  }
  0x16   :  { %1147 = vmatprep.mubr.bf16.mxu0 %v1239_v5  ;;  %1179 = vmatprep.mubr.bf16.mxu1 %v1255_v10  ;;  %v1241_v12 = vld [vmem:[%s1728_s0 + $0x10] sm:$0xff]   ;;  %v1256_v13 = vld [vmem:[%s1728_s0 + $0x88] sm:$0xff]   ;;  %v1242_v15 = vld [vmem:[%s1728_s0 + $0x18] sm:$0xff]  }
  0x17   :  { %v1257_v14 = vld [vmem:[%s1728_s0 + $0x90] sm:$0xff]   ;;  %v1243_v16 = vld [vmem:[%s1728_s0 + $0x20] sm:$0xff]   ;;  %v1258_v17 = vld [vmem:[%s1728_s0 + $0x98] sm:$0xff]  }
  0x18   :  { %1134 = vmatpush3.bf16.msra.mxu0 %v1232_v2  ;;  %1220 = vmatpush3.bf16.msra.mxu1 %v1232_v2  ;;  %v1259_v18 = vld [vmem:[%s1728_s0 + $0xa0] sm:$0xff]   ;;  %v1244_v19 = vld [vmem:[%s1728_s0 + $0x28] sm:$0xff]   ;;  %v1245_v21 = vld [vmem:[%s1728_s0 + $0x30] sm:$0xff]  }
  0x19   :  { %1135 = vmatprep.subr.bf16.mxu0 %v1233_v3  ;;  %1213 = vmatprep.subr.bf16.mxu1 %v1233_v3  ;;  %v1260_v20 = vld [vmem:[%s1728_s0 + $0xa8] sm:$0xff]   ;;  %v1261_v22 = vld [vmem:[%s1728_s0 + $0xb0] sm:$0xff]   ;;  %v1246_v23 = vld [vmem:[%s1728_s0 + $0x38] sm:$0xff]  }
  0x1a   :  { %v1262_v24 = vld [vmem:[%s1728_s0 + $0xb8] sm:$0xff]   ;;  %v1247_v25 = vld [vmem:[%s1728_s0 + $0x40] sm:$0xff]   ;;  %v1248_v27 = vld [vmem:[%s1728_s0 + $0x48] sm:$0xff]  }
  0x1b   :  { %v1263_v26 = vld [vmem:[%s1728_s0 + $0xc0] sm:$0xff]   ;;  %v1264_v28 = vld [vmem:[%s1728_s0 + $0xc8] sm:$0xff]   ;;  %v1249_v29 = vld [vmem:[%s1728_s0 + $0x50] sm:$0xff]  }
  0x1c   :  { %1136 = vmatpush3.bf16.msra.mxu0 %v1233_v3  ;;  %1221 = vmatpush3.bf16.msra.mxu1 %v1233_v3  ;;  %v1265_v30 = vld [vmem:[%s1728_s0 + $0xd0] sm:$0xff]   ;;  %v1250_v31 = vld [vmem:[%s1728_s0 + $0x58] sm:$0xff]   ;;  %v1251_v33 = vld [vmem:[%s1728_s0 + $0x60] sm:$0xff]  }
  0x1d   :  { %1137 = vmatprep.subr.bf16.mxu0 %v1234_v4  ;;  %1214 = vmatprep.subr.bf16.mxu1 %v1234_v4  ;;  %v1266_v32 = vld [vmem:[%s1728_s0 + $0xd8] sm:$0xff]   ;;  %v1267_v34 = vld [vmem:[%s1728_s0 + $0xe0] sm:$0xff]   ;;  %v1252_v35 = vld [vmem:[%s1728_s0 + $0x68] sm:$0xff]  }
  0x1e   :  { %v1268_v36 = vld [vmem:[%s1728_s0 + $0xe8] sm:$0xff]   ;;  %v1253_v37 = vld [vmem:[%s1728_s0 + $0x70] sm:$0xff]   ;;  %v1254_v39 = vld [vmem:[%s1728_s0 + $0x78] sm:$0xff]  }
  0x1f   :  { %v1269_v38 = vld [vmem:[%s1728_s0 + $0xf0] sm:$0xff]   ;;  %v1270_v40 = vld [vmem:[%s1728_s0 + $0xf8] sm:$0xff]  }
  0x20   :  { %1138 = vmatpush3.bf16.msra.mxu0 %v1234_v4  ;;  %1222 = vmatpush3.bf16.msra.mxu1 %v1234_v4 }
  0x21   :  { %1139 = vmatprep.subr.bf16.mxu0 %v1235_v6  ;;  %1215 = vmatprep.subr.bf16.mxu1 %v1235_v6 }
  0x24   :  { %1140 = vmatpush3.bf16.msra.mxu0 %v1235_v6  ;;  %1223 = vmatpush3.bf16.msra.mxu1 %v1235_v6 }
  0x25   :  { %1141 = vmatprep.subr.bf16.mxu0 %v1236_v7  ;;  %1216 = vmatprep.subr.bf16.mxu1 %v1236_v7 }
  0x28   :  { %1142 = vmatpush3.bf16.msra.mxu0 %v1236_v7  ;;  %1224 = vmatpush3.bf16.msra.mxu1 %v1236_v7 }
  0x29   :  { %1143 = vmatprep.subr.bf16.mxu0 %v1237_v8  ;;  %1217 = vmatprep.subr.bf16.mxu1 %v1237_v8 }
  0x2c   :  { %1144 = vmatpush3.bf16.msra.mxu0 %v1237_v8  ;;  %1225 = vmatpush3.bf16.msra.mxu1 %v1237_v8 }
  0x2d   :  { %1145 = vmatprep.subr.bf16.mxu0 %v1238_v9  ;;  %1218 = vmatprep.subr.bf16.mxu1 %v1238_v9 }
  0x30   :  { %1146 = vmatpush3.bf16.msra.mxu0 %v1238_v9  ;;  %1226 = vmatpush3.bf16.msra.mxu1 %v1238_v9 }
  0x33   :  { %1148 = vmatmul.mubr.bf16.vlgmr.msra.gmra.mrb[0].mxu0 %v1240_v11  ;;  %1180 = vmatmul.mubr.bf16.vlgmr.msra.gmra.mrb[0].mxu1 %v1256_v13 }
  0x34   :  { %1151 = vmatprep.mubr.bf16.mxu0 %v1241_v12  ;;  %1183 = vmatprep.mubr.bf16.mxu1 %v1257_v14 }
  0x3b   :  { %1152 = vmatmul.mubr.bf16.gmra.mrb[4].mxu0 %v1242_v15  ;;  %1184 = vmatmul.mubr.bf16.gmra.mrb[4].mxu1 %v1258_v17 }
  0x3c   :  { %1155 = vmatprep.mubr.bf16.mxu0 %v1243_v16  ;;  %1187 = vmatprep.mubr.bf16.mxu1 %v1259_v18 }
  0x43   :  { %1156 = vmatmul.mubr.bf16.gmra.mrb[8].mxu0 %v1244_v19  ;;  %1188 = vmatmul.mubr.bf16.gmra.mrb[8].mxu1 %v1260_v20 }
  0x44   :  { %1159 = vmatprep.mubr.bf16.mxu0 %v1245_v21  ;;  %1191 = vmatprep.mubr.bf16.mxu1 %v1261_v22 }
  0x4b   :  { %1160 = vmatmul.mubr.bf16.gmra.mrb[12].mxu0 %v1246_v23  ;;  %1192 = vmatmul.mubr.bf16.gmra.mrb[12].mxu1 %v1262_v24 }
  0x4c   :  { %1163 = vmatprep.mubr.bf16.mxu0 %v1247_v25  ;;  %1195 = vmatprep.mubr.bf16.mxu1 %v1263_v26 }
  0x53   :  { %1164 = vmatmul.mubr.bf16.gmra.mrb[16].mxu0 %v1248_v27  ;;  %1196 = vmatmul.mubr.bf16.gmra.mrb[16].mxu1 %v1264_v28 }
  0x54   :  { %1167 = vmatprep.mubr.bf16.mxu0 %v1249_v29  ;;  %1199 = vmatprep.mubr.bf16.mxu1 %v1265_v30 }
  0x5b   :  { %1168 = vmatmul.mubr.bf16.gmra.mrb[20].mxu0 %v1250_v31  ;;  %1200 = vmatmul.mubr.bf16.gmra.mrb[20].mxu1 %v1266_v32 }
  0x5c   :  { %1171 = vmatprep.mubr.bf16.mxu0 %v1251_v33  ;;  %1203 = vmatprep.mubr.bf16.mxu1 %v1267_v34 }
  0x63   :  { %1172 = vmatmul.mubr.bf16.gmra.mrb[24].mxu0 %v1252_v35  ;;  %1204 = vmatmul.mubr.bf16.gmra.mrb[24].mxu1 %v1268_v36 }
  0x64   :  { %1175 = vmatprep.mubr.bf16.mxu0 %v1253_v37  ;;  %1207 = vmatprep.mubr.bf16.mxu1 %v1269_v38 }
  0x6b   :  { %1176 = vmatmul.mubr.bf16.gmra.mrb[28].mxu0 %v1254_v39  ;;  %1208 = vmatmul.mubr.bf16.gmra.mrb[28].mxu1 %v1270_v40 }
 0x106   :  { %v1149_v41 = vpop.f32.mrb[0].mxu0  ;;  %v1430_v42 = vpop.f32.mrb[0].mxu1 }
 0x107   :  { %v520_v43 = vpop.f32.mrb[1].mxu0  ;;  %v1432_v44 = vpop.f32.mrb[1].mxu1  ;;  %841 = vst [vmem:[%s1730_s2 + $0x10] sm:$0xff] %v1149_v41  ;;  %873 = vst [vmem:[%s1730_s2 + $0x110] sm:$0xff] %v1430_v42 }
 0x108   :  { %v1150_v45 = vpop.f32.mrb[2].mxu0  ;;  %v1434_v46 = vpop.f32.mrb[2].mxu1  ;;  %839 = vst [vmem:[%s1730_s2] sm:$0xff] %v520_v43  ;;  %871 = vst [vmem:[%s1730_s2 + $0x100] sm:$0xff] %v1432_v44 }
 0x109   :  { %v523_v47 = vpop.f32.mrb[3].mxu0  ;;  %v1443_v48 = vpop.f32.mrb[3].mxu1  ;;  %842 = vst [vmem:[%s1730_s2 + $0x18] sm:$0xff] %v1150_v45  ;;  %874 = vst [vmem:[%s1730_s2 + $0x118] sm:$0xff] %v1434_v46 }
 0x10a   :  { %840 = vst [vmem:[%s1730_s2 + $0x8] sm:$0xff] %v523_v47  ;;  %v971_v49 = vadd.f32 %v523_v47, %v520_v43  ;;  %872 = vst [vmem:[%s1730_s2 + $0x108] sm:$0xff] %v1443_v48 }
 0x10c   :  { %v972_v50 = vadd.f32 %v1149_v41, %v971_v49 }
 0x10e   :  { %v1153_v51 = vpop.f32.mrb[4].mxu0  ;;  %v1466_v52 = vpop.f32.mrb[4].mxu1  ;;  %v973_v55 = vadd.f32 %v1150_v45, %v972_v50 }
 0x10f   :  { %v536_v53 = vpop.f32.mrb[5].mxu0  ;;  %v1468_v54 = vpop.f32.mrb[5].mxu1  ;;  %845 = vst [vmem:[%s1730_s2 + $0x30] sm:$0xff] %v1153_v51  ;;  %877 = vst [vmem:[%s1730_s2 + $0x130] sm:$0xff] %v1466_v52 }
 0x110   :  { %v1154_v56 = vpop.f32.mrb[6].mxu0  ;;  %v1470_v57 = vpop.f32.mrb[6].mxu1  ;;  %843 = vst [vmem:[%s1730_s2 + $0x20] sm:$0xff] %v536_v53  ;;  %v974_v60 = vadd.f32 %v973_v55, %v536_v53  ;;  %875 = vst [vmem:[%s1730_s2 + $0x120] sm:$0xff] %v1468_v54 }
 0x111   :  { %v539_v58 = vpop.f32.mrb[7].mxu0  ;;  %v1479_v59 = vpop.f32.mrb[7].mxu1  ;;  %846 = vst [vmem:[%s1730_s2 + $0x38] sm:$0xff] %v1154_v56  ;;  %878 = vst [vmem:[%s1730_s2 + $0x138] sm:$0xff] %v1470_v57 }
 0x112   :  { %844 = vst [vmem:[%s1730_s2 + $0x28] sm:$0xff] %v539_v58  ;;  %v975_v61 = vadd.f32 %v974_v60, %v539_v58  ;;  %876 = vst [vmem:[%s1730_s2 + $0x128] sm:$0xff] %v1479_v59 }
 0x114   :  { %v976_v62 = vadd.f32 %v1153_v51, %v975_v61 }
 0x116   :  { %v1157_v63 = vpop.f32.mrb[8].mxu0  ;;  %v1502_v0 = vpop.f32.mrb[8].mxu1  ;;  %v977_v3 = vadd.f32 %v1154_v56, %v976_v62 }
 0x117   :  { %v552_v1 = vpop.f32.mrb[9].mxu0  ;;  %v1504_v2 = vpop.f32.mrb[9].mxu1  ;;  %849 = vst [vmem:[%s1730_s2 + $0x50] sm:$0xff] %v1157_v63  ;;  %881 = vst [vmem:[%s1730_s2 + $0x150] sm:$0xff] %v1502_v0 }
 0x118   :  { %v1158_v4 = vpop.f32.mrb[10].mxu0  ;;  %v1506_v5 = vpop.f32.mrb[10].mxu1  ;;  %847 = vst [vmem:[%s1730_s2 + $0x40] sm:$0xff] %v552_v1  ;;  %v978_v8 = vadd.f32 %v977_v3, %v552_v1  ;;  %879 = vst [vmem:[%s1730_s2 + $0x140] sm:$0xff] %v1504_v2 }
 0x119   :  { %v555_v6 = vpop.f32.mrb[11].mxu0  ;;  %v1515_v7 = vpop.f32.mrb[11].mxu1  ;;  %850 = vst [vmem:[%s1730_s2 + $0x58] sm:$0xff] %v1158_v4  ;;  %882 = vst [vmem:[%s1730_s2 + $0x158] sm:$0xff] %v1506_v5 }
 0x11a   :  { %848 = vst [vmem:[%s1730_s2 + $0x48] sm:$0xff] %v555_v6  ;;  %v979_v9 = vadd.f32 %v978_v8, %v555_v6  ;;  %880 = vst [vmem:[%s1730_s2 + $0x148] sm:$0xff] %v1515_v7 }
 0x11c   :  { %v980_v10 = vadd.f32 %v1157_v63, %v979_v9 }
 0x11e   :  { %v1161_v11 = vpop.f32.mrb[12].mxu0  ;;  %v1538_v12 = vpop.f32.mrb[12].mxu1  ;;  %v981_v15 = vadd.f32 %v1158_v4, %v980_v10 }
 0x11f   :  { %v568_v13 = vpop.f32.mrb[13].mxu0  ;;  %v1540_v14 = vpop.f32.mrb[13].mxu1  ;;  %853 = vst [vmem:[%s1730_s2 + $0x70] sm:$0xff] %v1161_v11  ;;  %885 = vst [vmem:[%s1730_s2 + $0x170] sm:$0xff] %v1538_v12 }
 0x120   :  { %v1162_v16 = vpop.f32.mrb[14].mxu0  ;;  %v1542_v17 = vpop.f32.mrb[14].mxu1  ;;  %851 = vst [vmem:[%s1730_s2 + $0x60] sm:$0xff] %v568_v13  ;;  %v982_v20 = vadd.f32 %v981_v15, %v568_v13  ;;  %883 = vst [vmem:[%s1730_s2 + $0x160] sm:$0xff] %v1540_v14 }
 0x121   :  { %v571_v18 = vpop.f32.mrb[15].mxu0  ;;  %v1551_v19 = vpop.f32.mrb[15].mxu1  ;;  %854 = vst [vmem:[%s1730_s2 + $0x78] sm:$0xff] %v1162_v16  ;;  %886 = vst [vmem:[%s1730_s2 + $0x178] sm:$0xff] %v1542_v17 }
 0x122   :  { %852 = vst [vmem:[%s1730_s2 + $0x68] sm:$0xff] %v571_v18  ;;  %v983_v21 = vadd.f32 %v982_v20, %v571_v18  ;;  %884 = vst [vmem:[%s1730_s2 + $0x168] sm:$0xff] %v1551_v19 }
 0x124   :  { %v984_v22 = vadd.f32 %v1161_v11, %v983_v21 }
 0x126   :  { %v1165_v23 = vpop.f32.mrb[16].mxu0  ;;  %v1574_v24 = vpop.f32.mrb[16].mxu1  ;;  %v985_v27 = vadd.f32 %v1162_v16, %v984_v22 }
 0x127   :  { %v584_v25 = vpop.f32.mrb[17].mxu0  ;;  %v1576_v26 = vpop.f32.mrb[17].mxu1  ;;  %857 = vst [vmem:[%s1730_s2 + $0x90] sm:$0xff] %v1165_v23  ;;  %889 = vst [vmem:[%s1730_s2 + $0x190] sm:$0xff] %v1574_v24 }
 0x128   :  { %v1166_v28 = vpop.f32.mrb[18].mxu0  ;;  %v1578_v29 = vpop.f32.mrb[18].mxu1  ;;  %855 = vst [vmem:[%s1730_s2 + $0x80] sm:$0xff] %v584_v25  ;;  %v986_v32 = vadd.f32 %v985_v27, %v584_v25  ;;  %887 = vst [vmem:[%s1730_s2 + $0x180] sm:$0xff] %v1576_v26 }
 0x129   :  { %v587_v30 = vpop.f32.mrb[19].mxu0  ;;  %v1587_v31 = vpop.f32.mrb[19].mxu1  ;;  %858 = vst [vmem:[%s1730_s2 + $0x98] sm:$0xff] %v1166_v28  ;;  %890 = vst [vmem:[%s1730_s2 + $0x198] sm:$0xff] %v1578_v29 }
 0x12a   :  { %856 = vst [vmem:[%s1730_s2 + $0x88] sm:$0xff] %v587_v30  ;;  %v987_v33 = vadd.f32 %v986_v32, %v587_v30  ;;  %888 = vst [vmem:[%s1730_s2 + $0x188] sm:$0xff] %v1587_v31 }
 0x12c   :  { %v988_v34 = vadd.f32 %v1165_v23, %v987_v33 }
 0x12e   :  { %v1169_v35 = vpop.f32.mrb[20].mxu0  ;;  %v1610_v36 = vpop.f32.mrb[20].mxu1  ;;  %v989_v39 = vadd.f32 %v1166_v28, %v988_v34 }
 0x12f   :  { %v600_v37 = vpop.f32.mrb[21].mxu0  ;;  %v1612_v38 = vpop.f32.mrb[21].mxu1  ;;  %861 = vst [vmem:[%s1730_s2 + $0xb0] sm:$0xff] %v1169_v35  ;;  %893 = vst [vmem:[%s1730_s2 + $0x1b0] sm:$0xff] %v1610_v36 }
 0x130   :  { %v1170_v40 = vpop.f32.mrb[22].mxu0  ;;  %v1614_v41 = vpop.f32.mrb[22].mxu1  ;;  %859 = vst [vmem:[%s1730_s2 + $0xa0] sm:$0xff] %v600_v37  ;;  %v990_v47 = vadd.f32 %v989_v39, %v600_v37  ;;  %891 = vst [vmem:[%s1730_s2 + $0x1a0] sm:$0xff] %v1612_v38 }
 0x131   :  { %v603_v43 = vpop.f32.mrb[23].mxu0  ;;  %v1623_v45 = vpop.f32.mrb[23].mxu1  ;;  %862 = vst [vmem:[%s1730_s2 + $0xb8] sm:$0xff] %v1170_v40  ;;  %894 = vst [vmem:[%s1730_s2 + $0x1b8] sm:$0xff] %v1614_v41 }
 0x132   :  { %860 = vst [vmem:[%s1730_s2 + $0xa8] sm:$0xff] %v603_v43  ;;  %v991_v49 = vadd.f32 %v990_v47, %v603_v43  ;;  %892 = vst [vmem:[%s1730_s2 + $0x1a8] sm:$0xff] %v1623_v45 }
 0x134   :  { %v992_v50 = vadd.f32 %v1169_v35, %v991_v49 }
 0x136   :  { %v1173_v51 = vpop.f32.mrb[24].mxu0  ;;  %v1646_v53 = vpop.f32.mrb[24].mxu1  ;;  %v993_v58 = vadd.f32 %v1170_v40, %v992_v50 }
 0x137   :  { %v616_v55 = vpop.f32.mrb[25].mxu0  ;;  %v744_v56 = vpop.f32.mrb[25].mxu1  ;;  %865 = vst [vmem:[%s1730_s2 + $0xd0] sm:$0xff] %v1173_v51  ;;  %897 = vst [vmem:[%s1730_s2 + $0x1d0] sm:$0xff] %v1646_v53 }
 0x138   :  { %v1174_v60 = vpop.f32.mrb[26].mxu0  ;;  %v1206_v61 = vpop.f32.mrb[26].mxu1  ;;  %863 = vst [vmem:[%s1730_s2 + $0xc0] sm:$0xff] %v616_v55  ;;  %v994_v1 = vadd.f32 %v993_v58, %v616_v55  ;;  %895 = vst [vmem:[%s1730_s2 + $0x1c0] sm:$0xff] %v744_v56 }
 0x139   :  { %v619_v62 = vpop.f32.mrb[27].mxu0  ;;  %v747_v63 = vpop.f32.mrb[27].mxu1  ;;  %866 = vst [vmem:[%s1730_s2 + $0xd8] sm:$0xff] %v1174_v60  ;;  %898 = vst [vmem:[%s1730_s2 + $0x1d8] sm:$0xff] %v1206_v61 }
 0x13a   :  { %864 = vst [vmem:[%s1730_s2 + $0xc8] sm:$0xff] %v619_v62  ;;  %v995_v3 = vadd.f32 %v994_v1, %v619_v62  ;;  %896 = vst [vmem:[%s1730_s2 + $0x1c8] sm:$0xff] %v747_v63 }
 0x13c   :  { %v996_v4 = vadd.f32 %v1173_v51, %v995_v3 }
 0x13e   :  { %v1177_v6 = vpop.f32.mrb[28].mxu0  ;;  %v1209_v8 = vpop.f32.mrb[28].mxu1  ;;  %v997_v11 = vadd.f32 %v1174_v60, %v996_v4 }
 0x13f   :  { %v632_v9 = vpop.f32.mrb[29].mxu0  ;;  %v760_v10 = vpop.f32.mrb[29].mxu1  ;;  %869 = vst [vmem:[%s1730_s2 + $0xf0] sm:$0xff] %v1177_v6  ;;  %901 = vst [vmem:[%s1730_s2 + $0x1f0] sm:$0xff] %v1209_v8 }
 0x140   :  { %v1178_v13 = vpop.f32.mrb[30].mxu0  ;;  %v1210_v15 = vpop.f32.mrb[30].mxu1  ;;  %867 = vst [vmem:[%s1730_s2 + $0xe0] sm:$0xff] %v632_v9  ;;  %v998_v20 = vadd.f32 %v997_v11, %v632_v9  ;;  %899 = vst [vmem:[%s1730_s2 + $0x1e0] sm:$0xff] %v760_v10 }
 0x141   :  { %v635_v16 = vpop.f32.mrb[31].mxu0  ;;  %v763_v18 = vpop.f32.mrb[31].mxu1  ;;  %870 = vst [vmem:[%s1730_s2 + $0xf8] sm:$0xff] %v1178_v13  ;;  %902 = vst [vmem:[%s1730_s2 + $0x1f8] sm:$0xff] %v1210_v15 }
 0x142   :  { %868 = vst [vmem:[%s1730_s2 + $0xe8] sm:$0xff] %v635_v16  ;;  %v999_v21 = vadd.f32 %v998_v20, %v635_v16  ;;  %900 = vst [vmem:[%s1730_s2 + $0x1e8] sm:$0xff] %v763_v18 }
 0x144   :  { %v1000_v22 = vadd.f32 %v1177_v6, %v999_v21 }
 0x146   :  { %v1001_v23 = vadd.f32 %v1178_v13, %v1000_v22 }
 0x148   :  { %v1002_v25 = vadd.f32 %v1001_v23, %v1432_v44 }
 0x14a   :  { %v1003_v27 = vadd.f32 %v1002_v25, %v1443_v48 }
 0x14c   :  { %v1004_v28 = vadd.f32 %v1430_v42, %v1003_v27 }
 0x14e   :  { %v1005_v30 = vadd.f32 %v1434_v46, %v1004_v28 }
 0x150   :  { %v1006_v32 = vadd.f32 %v1005_v30, %v1468_v54 }
 0x152   :  { %v1007_v33 = vadd.f32 %v1006_v32, %v1479_v59 }
 0x154   :  { %v1008_v34 = vadd.f32 %v1466_v52, %v1007_v33 }
 0x156   :  { %v1009_v35 = vadd.f32 %v1470_v57, %v1008_v34 }
 0x158   :  { %v1010_v37 = vadd.f32 %v1009_v35, %v1504_v2 }
 0x15a   :  { %v1011_v39 = vadd.f32 %v1010_v37, %v1515_v7 }
 0x15c   :  { %v1012_v44 = vadd.f32 %v1502_v0, %v1011_v39 }
 0x15e   :  { %v1013_v48 = vadd.f32 %v1506_v5, %v1012_v44 }
 0x160   :  { %v1014_v42 = vadd.f32 %v1013_v48, %v1540_v14 }
 0x162   :  { %v1015_v46 = vadd.f32 %v1014_v42, %v1551_v19 }
 0x164   :  { %v1016_v54 = vadd.f32 %v1538_v12, %v1015_v46 }
 0x166   :  { %v1017_v59 = vadd.f32 %v1542_v17, %v1016_v54 }
 0x168   :  { %v1018_v52 = vadd.f32 %v1017_v59, %v1576_v26 }
 0x16a   :  { %v1019_v57 = vadd.f32 %v1018_v52, %v1587_v31 }
 0x16c   :  { %v1020_v2 = vadd.f32 %v1574_v24, %v1019_v57 }
 0x16e   :  { %v1021_v7 = vadd.f32 %v1578_v29, %v1020_v2 }
 0x170   :  { %v1022_v0 = vadd.f32 %v1021_v7, %v1612_v38 }
 0x172   :  { %v1023_v5 = vadd.f32 %v1022_v0, %v1623_v45 }
 0x174   :  { %v1024_v14 = vadd.f32 %v1610_v36, %v1023_v5  ;;  %v906_v36 = vld [vmem:[%s1731_s3] sm:$0x1] }
 0x176   :  { %v1025_v19 = vadd.f32 %v1614_v41, %v1024_v14 }
 0x178   :  { %v1026_v40 = vadd.f32 %v1025_v19, %v744_v56 }
 0x17a   :  { %v1027_v12 = vadd.f32 %v1026_v40, %v747_v63 }
 0x17c   :  { %v1028_v17 = vadd.f32 %v1646_v53, %v1027_v12 }
 0x17e   :  { %v1029_v43 = vadd.f32 %v1206_v61, %v1028_v17 }
 0x180   :  { %v1030_v26 = vadd.f32 %v1029_v43, %v760_v10 }
 0x182   :  { %v1031_v47 = vadd.f32 %v1030_v26, %v763_v18 }
 0x184   :  { %v1032_v31 = vadd.f32 %v1209_v8, %v1031_v47 }
 0x186   :  { %v1033_v49 = vadd.f32 %v1210_v15, %v1032_v31 }
 0x188   :  { %v1034_v24 = vrot.slane %v1033_v49, 4 }
 0x18a   :  { %v1035_v50 = vadd.f32 %v1034_v24, %v1033_v49 }
 0x18c   :  { %v1036_v29 = vrot.slane %v1035_v50, 2 }
 0x18e   :  { %v1037_v51 = vadd.f32 %v1036_v29, %v1035_v50 }
 0x190   :  { %v1038_v38 = vrot.slane %v1037_v51, 1 }
 0x192   :  { %v1039_v45 = vadd.f32 %v1038_v38, %v1037_v51 }
 0x194   :  { %v1040_v41 = vadd.f32 %v1039_v45, %v906_v36 }
 0x196   :  { %1041 = vst [vmem:[%s1731_s3] sm:$0x1] %v1040_v41 }
 0x197   :  { %1050 = vsyncpa [#allocation3], 1 }

// kernel: fpn1_forward.28
= control target key start
LH: loop header
LB: loop body
LE: loop exit
PB: predicated region body
PF: predicated region fallthrough
CT: control target
= control target key end

     0   :  { %v35_v0 = vlaneseq  ;;  %v168_v1 = vmov 0.0   ;;  %s244_s2 = inlined_call_operand.vmem [shape: f32[1,128], index: 2, kind: output, shape index: {}]   ;;  %s245_s1 = inlined_call_operand.vmem [shape: f32[1,128], index: 1, kind: input, shape index: {}]   ;;  %s246_s0 = inlined_call_operand.vmem [shape: f32[128,128], index: 0, kind: input, shape index: {}]  }
   0x1   :  { %15 = vst [vmem:[%s244_s2] sm:$0x1] %v168_v1  ;;  %v16_v2 = vld [vmem:[%s245_s1] sm:$0x1]  ;;  %v19_v7 = vld [vmem:[%s246_s0 + $0x8] sm:$0xff]  ;;  %v20_v9 = vld [vmem:[%s246_s0 + $0x10] sm:$0xff] }
   0x2   :  { %v17_v3 = vmul.f32 0.0078125, %v16_v2  ;;  %v36_v4 = vshrl.u32 %v35_v0, 7  ;;  %v18_v6 = vld [vmem:[%s246_s0] sm:$0xff]  ;;  %v21_v12 = vld [vmem:[%s246_s0 + $0x18] sm:$0xff]  ;;  %v23_v18 = vld [vmem:[%s246_s0 + $0x28] sm:$0xff] }
   0x3   :  { %v22_v14 = vld [vmem:[%s246_s0 + $0x20] sm:$0xff]  ;;  %v24_v21 = vld [vmem:[%s246_s0 + $0x30] sm:$0xff]  ;;  %v25_v25 = vld [vmem:[%s246_s0 + $0x38] sm:$0xff] }
   0x4   :  { %v37_v5 = vsub.s32 0, %v36_v4  ;;  %v26_v29 = vld [vmem:[%s246_s0 + $0x40] sm:$0xff]  ;;  %v27_v33 = vld [vmem:[%s246_s0 + $0x48] sm:$0xff]  ;;  %v28_v37 = vld [vmem:[%s246_s0 + $0x50] sm:$0xff] }
   0x5   :  { %v29_v41 = vld [vmem:[%s246_s0 + $0x58] sm:$0xff]  ;;  %v30_v45 = vld [vmem:[%s246_s0 + $0x60] sm:$0xff]  ;;  %v31_v49 = vld [vmem:[%s246_s0 + $0x68] sm:$0xff] }
   0x6   :  { %v38_v8 = vrot.slane %v17_v3, %v37_v5  ;;  %v32_v53 = vld [vmem:[%s246_s0 + $0x70] sm:$0xff]  ;;  %v33_v57 = vld [vmem:[%s246_s0 + $0x78] sm:$0xff] }
   0x8   :  { %v40_v10 = vsub.f32 %v18_v6, %v38_v8  ;;  %v41_v11 = vsub.f32 %v19_v7, %v38_v8  ;;  %v42_v13 = vsub.f32 %v20_v9, %v38_v8  ;;  %v43_v15 = vsub.f32 %v21_v12, %v38_v8  ;;  %v123_v12 = vld [vmem:[%s244_s2] sm:$0x1] }
   0x9   :  { %v44_v19 = vsub.f32 %v22_v14, %v38_v8  ;;  %v45_v22 = vsub.f32 %v23_v18, %v38_v8  ;;  %v46_v26 = vsub.f32 %v24_v21, %v38_v8  ;;  %v47_v30 = vsub.f32 %v25_v25, %v38_v8 }
   0xa   :  { %v124_v16 = vmul.f32 %v40_v10, %v40_v10  ;;  %v125_v17 = vmul.f32 %v41_v11, %v41_v11  ;;  %v126_v20 = vmul.f32 %v42_v13, %v42_v13  ;;  %v127_v23 = vmul.f32 %v43_v15, %v43_v15 }
   0xb   :  { %v128_v27 = vmul.f32 %v44_v19, %v44_v19  ;;  %v129_v31 = vmul.f32 %v45_v22, %v45_v22  ;;  %v48_v34 = vsub.f32 %v26_v29, %v38_v8  ;;  %v130_v35 = vmul.f32 %v46_v26, %v46_v26 }
   0xc   :  { %v140_v24 = vadd.f32 %v125_v17, %v124_v16  ;;  %v49_v38 = vsub.f32 %v27_v33, %v38_v8  ;;  %v131_v39 = vmul.f32 %v47_v30, %v47_v30  ;;  %v50_v42 = vsub.f32 %v28_v37, %v38_v8 }
   0xd   :  { %v132_v43 = vmul.f32 %v48_v34, %v48_v34  ;;  %v51_v46 = vsub.f32 %v29_v41, %v38_v8  ;;  %v52_v50 = vsub.f32 %v30_v45, %v38_v8  ;;  %v53_v54 = vsub.f32 %v31_v49, %v38_v8 }
   0xe   :  { %v141_v28 = vadd.f32 %v140_v24, %v126_v20  ;;  %v133_v47 = vmul.f32 %v49_v38, %v49_v38  ;;  %v134_v51 = vmul.f32 %v50_v42, %v50_v42  ;;  %v54_v58 = vsub.f32 %v32_v53, %v38_v8 }
   0xf   :  { %v135_v55 = vmul.f32 %v51_v46, %v51_v46  ;;  %v136_v59 = vmul.f32 %v52_v50, %v52_v50  ;;  %v55_v61 = vsub.f32 %v33_v57, %v38_v8  ;;  %v137_v62 = vmul.f32 %v53_v54, %v53_v54 }
  0x10   :  { %v142_v32 = vadd.f32 %v141_v28, %v127_v23  ;;  %v138_v0 = vmul.f32 %v54_v58, %v54_v58 }
  0x11   :  { %v139_v2 = vmul.f32 %v55_v61, %v55_v61 }
  0x12   :  { %v143_v36 = vadd.f32 %v142_v32, %v128_v27 }
  0x14   :  { %v144_v40 = vadd.f32 %v143_v36, %v129_v31 }
  0x16   :  { %v145_v44 = vadd.f32 %v144_v40, %v130_v35 }
  0x18   :  { %v146_v48 = vadd.f32 %v145_v44, %v131_v39 }
  0x1a   :  { %v147_v52 = vadd.f32 %v146_v48, %v132_v43 }
  0x1c   :  { %v148_v56 = vadd.f32 %v147_v52, %v133_v47 }
  0x1e   :  { %v149_v60 = vadd.f32 %v148_v56, %v134_v51 }
  0x20   :  { %v150_v63 = vadd.f32 %v149_v60, %v135_v55 }
  0x22   :  { %v151_v1 = vadd.f32 %v150_v63, %v136_v59 }
  0x24   :  { %v152_v3 = vadd.f32 %v151_v1, %v137_v62 }
  0x26   :  { %v153_v4 = vadd.f32 %v152_v3, %v138_v0 }
  0x28   :  { %v154_v5 = vadd.f32 %v153_v4, %v139_v2 }
  0x2a   :  { %v155_v6 = vrot.slane %v154_v5, 4 }
  0x2c   :  { %v156_v7 = vadd.f32 %v155_v6, %v154_v5 }
  0x2e   :  { %v157_v9 = vrot.slane %v156_v7, 2 }
  0x30   :  { %v158_v10 = vadd.f32 %v157_v9, %v156_v7 }
  0x32   :  { %v159_v11 = vrot.slane %v158_v10, 1 }
  0x34   :  { %v160_v13 = vadd.f32 %v159_v11, %v158_v10 }
  0x36   :  { %v161_v14 = vadd.f32 %v160_v13, %v123_v12 }
  0x38   :  { %162 = vst [vmem:[%s244_s2] sm:$0x1] %v161_v14 }

// kernel: fpn1_forward.29
= control target key start
LH: loop header
LB: loop body
LE: loop exit
PB: predicated region body
PF: predicated region fallthrough
CT: control target
= control target key end

     0   :  { %v48_v3 = vlaneseq  ;;  %s267_s2 = inlined_call_operand.vmem [shape: f32[1,128], index: 2, kind: input, shape index: {}]   ;;  %s268_s1 = inlined_call_operand.vmem [shape: f32[1,128], index: 1, kind: input, shape index: {}]   ;;  %s269_s3 = inlined_call_operand.vmem [shape: f32[1,128], index: 3, kind: input, shape index: {}]   ;;  %s270_s0 = inlined_call_operand.vmem [shape: f32[128,128], index: 0, kind: input, shape index: {}]   ;;  %s271_s4 = inlined_call_operand.vmem [shape: f32[1,128], index: 4, kind: input, shape index: {}]   ;;  %s272_s5 = inlined_call_operand.vmem [shape: f32[128,128], index: 5, kind: output, shape index: {}]  }
   0x1   :  { %v22_v0 = vld [vmem:[%s267_s2] sm:$0x1]  ;;  %v32_v13 = vld [vmem:[%s270_s0 + $0x8] sm:$0xff]  ;;  %v33_v14 = vld [vmem:[%s270_s0 + $0x10] sm:$0xff] }
   0x2   :  { %v23_v1 = vmul.f32 0.0078125, %v22_v0  ;;  %v49_v4 = vshrl.u32 %v48_v3, 7  ;;  %v20_v5 = vld [vmem:[%s268_s1] sm:$0x1]  ;;  %v34_v15 = vld [vmem:[%s270_s0 + $0x18] sm:$0xff]  ;;  %v36_v19 = vld [vmem:[%s270_s0 + $0x28] sm:$0xff] }
   0x3   :  { %v26_v6 = vld [vmem:[%s269_s3] sm:$0x1]  ;;  %v21_v7 = vmul.f32 0.0078125, %v20_v5  ;;  %v37_v20 = vld [vmem:[%s270_s0 + $0x30] sm:$0xff]  ;;  %v38_v21 = vld [vmem:[%s270_s0 + $0x38] sm:$0xff] }
   0x4   :  { %v24_v2 = vadd.f32 1e-05, %v23_v1  ;;  %v50_v8 = vsub.s32 0, %v49_v4  ;;  %v28_v11 = vld [vmem:[%s271_s4] sm:$0x1]  ;;  %v40_v23 = vld [vmem:[%s270_s0 + $0x48] sm:$0xff] }
   0x5   :  { %v31_v12 = vld [vmem:[%s270_s0] sm:$0xff]  ;;  %v41_v24 = vld [vmem:[%s270_s0 + $0x50] sm:$0xff]  ;;  %v42_v29 = vld [vmem:[%s270_s0 + $0x58] sm:$0xff] }
   0x6   :  { %127 = vrsqrt.f32 %v24_v2  ;;  %v35_v16 = vld [vmem:[%s270_s0 + $0x20] sm:$0xff]  ;;  %v44_v31 = vld [vmem:[%s270_s0 + $0x68] sm:$0xff]  ;;  %v45_v56 = vld [vmem:[%s270_s0 + $0x70] sm:$0xff] }
   0x7   :  { %v39_v22 = vld [vmem:[%s270_s0 + $0x40] sm:$0xff]  ;;  %v46_v57 = vld [vmem:[%s270_s0 + $0x78] sm:$0xff] }
   0x8   :  { %v43_v30 = vld [vmem:[%s270_s0 + $0x60] sm:$0xff] }
  0x10   :  { %v128_v9 = vpop.eup %127 }
  0x11   :  { %v27_v10 = vmul.f32 %v128_v9, %v26_v6 }
  0x13   :  { %v29_v17 = vmul.f32 %v27_v10, %v21_v7  ;;  %v51_v18 = vrot.slane %v27_v10, %v50_v8 }
  0x15   :  { %v30_v25 = vsub.f32 %v28_v11, %v29_v17  ;;  %v53_v26 = vmul.f32 %v51_v18, %v31_v12  ;;  %v54_v27 = vmul.f32 %v51_v18, %v32_v13  ;;  %v55_v28 = vmul.f32 %v51_v18, %v33_v14 }
  0x16   :  { %v56_v32 = vmul.f32 %v51_v18, %v34_v15  ;;  %v57_v33 = vmul.f32 %v51_v18, %v35_v16  ;;  %v58_v34 = vmul.f32 %v51_v18, %v36_v19  ;;  %v59_v35 = vmul.f32 %v51_v18, %v37_v20 }
  0x17   :  { %v73_v36 = vrot.slane %v30_v25, %v50_v8  ;;  %v60_v37 = vmul.f32 %v51_v18, %v38_v21  ;;  %v61_v38 = vmul.f32 %v51_v18, %v39_v22  ;;  %v62_v39 = vmul.f32 %v51_v18, %v40_v23 }
  0x18   :  { %v63_v40 = vmul.f32 %v51_v18, %v41_v24  ;;  %v64_v41 = vmul.f32 %v51_v18, %v42_v29  ;;  %v65_v42 = vmul.f32 %v51_v18, %v43_v30  ;;  %v66_v43 = vmul.f32 %v51_v18, %v44_v31 }
  0x19   :  { %v75_v44 = vadd.f32 %v73_v36, %v53_v26  ;;  %v76_v45 = vadd.f32 %v73_v36, %v54_v27  ;;  %v77_v46 = vadd.f32 %v73_v36, %v55_v28  ;;  %v78_v47 = vadd.f32 %v73_v36, %v56_v32 }
  0x1a   :  { %v79_v48 = vadd.f32 %v73_v36, %v57_v33  ;;  %v80_v49 = vadd.f32 %v73_v36, %v58_v34  ;;  %v81_v50 = vadd.f32 %v73_v36, %v59_v35  ;;  %v82_v51 = vadd.f32 %v73_v36, %v60_v37 }
  0x1b   :  { %v91_v52 = vmax.f32 %v75_v44, 0.0  ;;  %v92_v53 = vmax.f32 %v76_v45, 0.0  ;;  %v93_v54 = vmax.f32 %v77_v46, 0.0  ;;  %v94_v55 = vmax.f32 %v78_v47, 0.0 }
  0x1c   :  { %v95_v58 = vmax.f32 %v79_v48, 0.0  ;;  %v96_v59 = vmax.f32 %v80_v49, 0.0  ;;  %v97_v60 = vmax.f32 %v81_v50, 0.0  ;;  %v98_v61 = vmax.f32 %v82_v51, 0.0 }
  0x1d   :  { %107 = vst [vmem:[%s272_s5] sm:$0xff] %v91_v52  ;;  %108 = vst [vmem:[%s272_s5 + $0x8] sm:$0xff] %v92_v53  ;;  %v83_v62 = vadd.f32 %v73_v36, %v61_v38  ;;  %v84_v63 = vadd.f32 %v73_v36, %v62_v39  ;;  %v85_v0 = vadd.f32 %v73_v36, %v63_v40 }
  0x1e   :  { %109 = vst [vmem:[%s272_s5 + $0x10] sm:$0xff] %v93_v54  ;;  %110 = vst [vmem:[%s272_s5 + $0x18] sm:$0xff] %v94_v55  ;;  %v86_v1 = vadd.f32 %v73_v36, %v64_v41  ;;  %v87_v2 = vadd.f32 %v73_v36, %v65_v42  ;;  %v88_v3 = vadd.f32 %v73_v36, %v66_v43 }
  0x1f   :  { %111 = vst [vmem:[%s272_s5 + $0x20] sm:$0xff] %v95_v58  ;;  %112 = vst [vmem:[%s272_s5 + $0x28] sm:$0xff] %v96_v59  ;;  %v67_v4 = vmul.f32 %v51_v18, %v45_v56  ;;  %v68_v5 = vmul.f32 %v51_v18, %v46_v57  ;;  %v99_v6 = vmax.f32 %v83_v62, 0.0  ;;  %v100_v7 = vmax.f32 %v84_v63, 0.0 }
  0x20   :  { %113 = vst [vmem:[%s272_s5 + $0x30] sm:$0xff] %v97_v60  ;;  %114 = vst [vmem:[%s272_s5 + $0x38] sm:$0xff] %v98_v61  ;;  %v101_v8 = vmax.f32 %v85_v0, 0.0  ;;  %v102_v9 = vmax.f32 %v86_v1, 0.0  ;;  %v103_v10 = vmax.f32 %v87_v2, 0.0  ;;  %v104_v11 = vmax.f32 %v88_v3, 0.0 }
  0x21   :  { %v89_v12 = vadd.f32 %v73_v36, %v67_v4  ;;  %v90_v13 = vadd.f32 %v73_v36, %v68_v5  ;;  %115 = vst [vmem:[%s272_s5 + $0x40] sm:$0xff] %v99_v6  ;;  %116 = vst [vmem:[%s272_s5 + $0x48] sm:$0xff] %v100_v7 }
  0x22   :  { %117 = vst [vmem:[%s272_s5 + $0x50] sm:$0xff] %v101_v8  ;;  %118 = vst [vmem:[%s272_s5 + $0x58] sm:$0xff] %v102_v9 }
  0x23   :  { %119 = vst [vmem:[%s272_s5 + $0x60] sm:$0xff] %v103_v10  ;;  %120 = vst [vmem:[%s272_s5 + $0x68] sm:$0xff] %v104_v11  ;;  %v105_v14 = vmax.f32 %v89_v12, 0.0  ;;  %v106_v15 = vmax.f32 %v90_v13, 0.0 }
  0x25   :  { %121 = vst [vmem:[%s272_s5 + $0x70] sm:$0xff] %v105_v14  ;;  %122 = vst [vmem:[%s272_s5 + $0x78] sm:$0xff] %v106_v15 }

// kernel: fpn1_forward.27
= control target key start
LH: loop header
LB: loop body
LE: loop exit
PB: predicated region body
PF: predicated region fallthrough
CT: control target
= control target key end

     0   :  { %9 = vsyncpa [#allocation4], 0  ;;  %s2145_s0 = inlined_call_operand.vmem [shape: bf16[128,3584], index: 0, kind: input, shape index: {}]   ;;  %s2146_s1 = inlined_call_operand.hbm [shape: bf16[3584,128], index: 1, kind: input, shape index: {}]   ;;  %s2147_s2 = inlined_call_operand.vmem [shape: f32[128,128], index: 2, kind: output, shape index: {0}]   ;;  %s2148_s3 = inlined_call_operand.vmem [shape: f32[1,128], index: 3, kind: output, shape index: {1}]  }
   0x1   :  { %11 = vsyncpa [#allocation4 + $0x1], 0  ;;  %s1687_s12 = smov 0   ;;  %s1689_s13 = smov 0  }
   0x2   :  { %s1691_s14 = smov 0   ;;  %s1693_s15 = smov 0  }
   0x3   :  { %s1695_s16 = smov 0   ;;  %s1697_s17 = smov 0  }
   0x4 LB: > { %s1233_s18 = sadd.s32 4294967295, %s1660_s17   ;;  %s29_s19 = sadd.s32 1, %s1656_s16  ;;  %s1660_s17 = sphi %s1697_s17, %s17_s17   ;;  %s1656_s16 = sphi %s1695_s16, %s2155_s16   ;;  %s1652_s15 = sphi %s1693_s15, %s2154_s15   ;;  %s1648_s14 = sphi %s1691_s14, %s2153_s14   ;;  %s1644_s13 = sphi %s1689_s13, %s2152_s13   ;;  %s1640_s12 = sphi %s1687_s12, %s2151_s12  }
   0x5   : > { %p30_p0 = scmp.ge.s32.totalorder %s29_s19, 7  ;;  %s45_s20 = sadd.s32 1, %s1648_s14 }
   0x6   : > { %p52_p1 = scmp.ne.s32.totalorder %s1648_s14, %s1644_s13  ;;  %p53_p2 = scmp.eq.s32.totalorder %s1660_s17, 0 }
   0x7   : > { %s2157_s19 = smov (%p30_p0, %s29_s19), 0  ;;  %p86_p4 = scmp.ne.s32.totalorder %s1644_s13, %s1640_s12 }
   0x8   : > { %p1723_p3 = por %p53_p2, %p52_p1  ;;  %s41_s22 = ssub.s32 %s1656_s16, %s2157_s19 }
   0x9   : > { %p87_p5 = scmp.eq.s32.totalorder %s1233_s18, 0  ;;  %p43_p6 = scmp.eq.s32.totalorder %s41_s22, 0 }
   0xa   : > { %p1235_p8 = scmp.ge.s32.totalorder %s1660_s17, 7 }
   0xb   : > { %p1730_p7 = por %p87_p5, %p86_p4 }
   0xc   : > { %s1735_s24 = scalar_select %p43_p6, %s1648_s14, %s45_s20  }
   0xd   : > { %160 = sbr.rel (%p1235_p8) target bundleno = 66 (0x42), region = 16 }
  0x14   : > { %163 = sbr.rel (!%p1723_p3) target bundleno = 40 (0x28), region = 20  ;;  %s165_s25 = sand.u32 (%p1723_p3), 1, %s1648_s14  }
  0x15   : > { %s1317_s26 = sshll.u32 (%p1723_p3), %s1656_s16, 4  ;;  %s1236_s27 = sshll.u32 (%p1723_p3), %s165_s25, 8 }
  0x16   : > { %s1745_s30 = scalar_lea.vmem (%p1723_p3), %s2145_s0, %s1317_s26  ;;  %s1750_s4 = scalar_lea.vmem (%p1723_p3), [#allocation2], %s1236_s27 }
  0x17   : > { %v186_v0 = vld [vmem:[%s1745_s30] sm:$0xff] (%p1723_p3)  ;;  %v188_v1 = vld [vmem:[%s1745_s30 + $0x8] sm:$0xff] (%p1723_p3)  ;;  %v190_v2 = vld [vmem:[%s1745_s30 + $0x70] sm:$0xff] (%p1723_p3) }
  0x18   : > { %187 = vst [vmem:[%s1750_s4] sm:$0xff] (%p1723_p3), %v186_v0  ;;  %189 = vst [vmem:[%s1750_s4 + $0x8] sm:$0xff] (%p1723_p3), %v188_v1  ;;  %v192_v3 = vld [vmem:[%s1745_s30 + $0x78] sm:$0xff] (%p1723_p3)  ;;  %v194_v4 = vld [vmem:[%s1745_s30 + $0xe0] sm:$0xff] (%p1723_p3) }
  0x19   : > { %191 = vst [vmem:[%s1750_s4 + $0x10] sm:$0xff] (%p1723_p3), %v190_v2  ;;  %v196_v5 = vld [vmem:[%s1745_s30 + $0xe8] sm:$0xff] (%p1723_p3)  ;;  %193 = vst [vmem:[%s1750_s4 + $0x18] sm:$0xff] (%p1723_p3), %v192_v3  ;;  %v198_v6 = vld [vmem:[%s1745_s30 + $0x150] sm:$0xff] (%p1723_p3) }
  0x1a   : > { %195 = vst [vmem:[%s1750_s4 + $0x20] sm:$0xff] (%p1723_p3), %v194_v4  ;;  %197 = vst [vmem:[%s1750_s4 + $0x28] sm:$0xff] (%p1723_p3), %v196_v5  ;;  %v200_v7 = vld [vmem:[%s1745_s30 + $0x158] sm:$0xff] (%p1723_p3)  ;;  %v202_v8 = vld [vmem:[%s1745_s30 + $0x1c0] sm:$0xff] (%p1723_p3) }
  0x1b   : > { %199 = vst [vmem:[%s1750_s4 + $0x30] sm:$0xff] %v198_v6  ;;  %201 = vst [vmem:[%s1750_s4 + $0x38] sm:$0xff] %v200_v7  ;;  %v204_v9 = vld [vmem:[%s1745_s30 + $0x1c8] sm:$0xff]  ;;  %v206_v10 = vld [vmem:[%s1745_s30 + $0x230] sm:$0xff] }
  0x1c   : > { %203 = vst [vmem:[%s1750_s4 + $0x40] sm:$0xff] %v202_v8  ;;  %v208_v11 = vld [vmem:[%s1745_s30 + $0x238] sm:$0xff]  ;;  %205 = vst [vmem:[%s1750_s4 + $0x48] sm:$0xff] %v204_v9  ;;  %v210_v12 = vld [vmem:[%s1745_s30 + $0x2a0] sm:$0xff] }
  0x1d   : > { %207 = vst [vmem:[%s1750_s4 + $0x50] sm:$0xff] %v206_v10  ;;  %209 = vst [vmem:[%s1750_s4 + $0x58] sm:$0xff] %v208_v11  ;;  %v212_v13 = vld [vmem:[%s1745_s30 + $0x2a8] sm:$0xff]  ;;  %v214_v14 = vld [vmem:[%s1745_s30 + $0x310] sm:$0xff] }
  0x1e   : > { %211 = vst [vmem:[%s1750_s4 + $0x60] sm:$0xff] %v210_v12  ;;  %213 = vst [vmem:[%s1750_s4 + $0x68] sm:$0xff] %v212_v13  ;;  %v216_v15 = vld [vmem:[%s1745_s30 + $0x318] sm:$0xff]  ;;  %v218_v16 = vld [vmem:[%s1745_s30 + $0x380] sm:$0xff] }
  0x1f   : > { %215 = vst [vmem:[%s1750_s4 + $0x70] sm:$0xff] %v214_v14  ;;  %v220_v17 = vld [vmem:[%s1745_s30 + $0x388] sm:$0xff]  ;;  %217 = vst [vmem:[%s1750_s4 + $0x78] sm:$0xff] %v216_v15  ;;  %v222_v18 = vld [vmem:[%s1745_s30 + $0x3f0] sm:$0xff] }
  0x20   : > { %219 = vst [vmem:[%s1750_s4 + $0x80] sm:$0xff] %v218_v16  ;;  %221 = vst [vmem:[%s1750_s4 + $0x88] sm:$0xff] %v220_v17  ;;  %v224_v19 = vld [vmem:[%s1745_s30 + $0x3f8] sm:$0xff]  ;;  %v226_v20 = vld [vmem:[%s1745_s30 + $0x460] sm:$0xff] }
  0x21   : > { %223 = vst [vmem:[%s1750_s4 + $0x90] sm:$0xff] %v222_v18  ;;  %225 = vst [vmem:[%s1750_s4 + $0x98] sm:$0xff] %v224_v19  ;;  %v228_v21 = vld [vmem:[%s1745_s30 + $0x468] sm:$0xff]  ;;  %v230_v22 = vld [vmem:[%s1745_s30 + $0x4d0] sm:$0xff] }
  0x22   : > { %227 = vst [vmem:[%s1750_s4 + $0xa0] sm:$0xff] %v226_v20  ;;  %v232_v23 = vld [vmem:[%s1745_s30 + $0x4d8] sm:$0xff]  ;;  %229 = vst [vmem:[%s1750_s4 + $0xa8] sm:$0xff] %v228_v21  ;;  %v234_v24 = vld [vmem:[%s1745_s30 + $0x540] sm:$0xff] }
  0x23   : > { %231 = vst [vmem:[%s1750_s4 + $0xb0] sm:$0xff] %v230_v22  ;;  %233 = vst [vmem:[%s1750_s4 + $0xb8] sm:$0xff] %v232_v23  ;;  %v236_v25 = vld [vmem:[%s1745_s30 + $0x548] sm:$0xff]  ;;  %v238_v26 = vld [vmem:[%s1745_s30 + $0x5b0] sm:$0xff] }
  0x24   : > { %235 = vst [vmem:[%s1750_s4 + $0xc0] sm:$0xff] %v234_v24  ;;  %237 = vst [vmem:[%s1750_s4 + $0xc8] sm:$0xff] %v236_v25  ;;  %v240_v27 = vld [vmem:[%s1745_s30 + $0x5b8] sm:$0xff]  ;;  %v242_v28 = vld [vmem:[%s1745_s30 + $0x620] sm:$0xff] }
  0x25   : > { %239 = vst [vmem:[%s1750_s4 + $0xd0] sm:$0xff] %v238_v26  ;;  %v244_v29 = vld [vmem:[%s1745_s30 + $0x628] sm:$0xff]  ;;  %241 = vst [vmem:[%s1750_s4 + $0xd8] sm:$0xff] %v240_v27  ;;  %v246_v30 = vld [vmem:[%s1745_s30 + $0x690] sm:$0xff] }
  0x26   : > { %243 = vst [vmem:[%s1750_s4 + $0xe0] sm:$0xff] %v242_v28  ;;  %245 = vst [vmem:[%s1750_s4 + $0xe8] sm:$0xff] %v244_v29  ;;  %v248_v31 = vld [vmem:[%s1745_s30 + $0x698] sm:$0xff] }
  0x27   : > { %247 = vst [vmem:[%s1750_s4 + $0xf0] sm:$0xff] %v246_v30  ;;  %249 = vst [vmem:[%s1750_s4 + $0xf8] sm:$0xff] %v248_v31 }
  0x28 PF: > { %s256_s5 = sand.u32 1, %s1648_s14   ;;  %s1318_s6 = sshll.u32 %s1656_s16, 12 }
  0x29   : > { %s1239_s7 = sshll.u32 %s256_s5, 8  ;;  %s1818_s10 = scalar_lea.hbm %s2146_s1, %s1318_s6 }
  0x2a   : > { %s260_s11 = scalar_lea.vmem [#allocation3], %s1239_s7  ;;  %s1822_s18 = scalar_lea.sflag [#allocation4], %s256_s5 }
  0x2b   : > { %s268_s12 = sshll.u32 %s260_s11, 4  ;;  %s1582_s20 = scalar_lea.hbm %s1818_s10, 4096  ;;  %s1820_s12 = int_to_ptr.vmem [resolvable:$true] %s268_s12 }
  0x2c   : > { %p1583_p9 = scmp.ne.s32.totalorder %s1818_s10, %s1582_s20  ;;  %s1586_s26 = scalar_lea.hbm %s2146_s1, 28672 }
  0x2d   : > { %p1587_p12 = scmp.lt.u32.totalorder %s1818_s10, %s2146_s1  ;;  %p1588_p13 = scmp.lt.u32.totalorder %s1586_s26, %s1582_s20 }
  0x2e   : > { %p1584_p10 = pnand %p1583_p9, %p1723_p3  ;;  %p1590_p1 = scmp.lt.u32.totalorder %s1582_s20, %s1818_s10 }
  0x2f   : > { %p1589_p0 = por %p1588_p13, %p1587_p12 }
  0x30   : > { %p1585_p11 = pneg %p1584_p10 }
  0x31   : > { %p1591_p2 = por %p1590_p1, %p1589_p0 }
  0x33   : > { %p1592_p4 = pnand %p1591_p2, %p1585_p11 }
  0x35   : > { %1595 = shalt.err (!%p1592_p4)
}
  0x36   : > { %s1596_s29 = scalar_lea.vmem %s1820_s12, 4096  ;;  %s1662_s30 = smov [#allocation3]  }
  0x37   : > { %p1597_p5 = scmp.ne.s32.totalorder %s1820_s12, %s1596_s29  ;;  %s1600_s4 = sshll.u32 %s1662_s30, 4  ;;  %s1601_s4 = int_to_ptr.vmem [resolvable:$false] %s1600_s4 }
  0x38   : > { %s1602_s5 = scalar_lea.vmem %s1601_s4, 8192  ;;  %p1603_p9 = scmp.lt.s32.totalorder %s1820_s12, %s1601_s4 }
  0x39   : > { %p1598_p6 = pnand %p1597_p5, %p1723_p3  ;;  %p1604_p10 = scmp.lt.s32.totalorder %s1602_s5, %s1596_s29 }
  0x3b   : > { %p1599_p8 = pneg %p1598_p6  ;;  %p1605_p12 = por %p1604_p10, %p1603_p9 }
  0x3d   : > { %p1606_p13 = pnand %p1605_p12, %p1599_p8 }
  0x3f   : > { %1609 = shalt.err (!%p1606_p13)
}
  0x40   : > { %s1663_s6 = smov 64   ;;  %s1664_s7 = smov 4  }
  0x41   : > { %1448 = dma.hbm_to_vmem [thread:$0]  (%p1723_p3), %s1818_s10, 4096, %s1820_s12, %s1822_s18, %s1663_s6, %s1663_s6, %s1664_s7  }
  0x42 PF: > { %p1242_p11 = scmp.ge.s32.totalorder %s1660_s17, 1  ;;  %p276_p0 = scmp.lt.s32.totalorder %s1660_s17, 8 }
  0x44   : > { %p277_p1 = pnand %p1242_p11, %p276_p0 }
  0x45   : > { %s283_s8 = sand.u32 (!%p277_p1), 1, %s1644_s13  }
  0x46   : > { %280 = sbr.rel (%p277_p1) target bundleno = 432 (0x1b0), region = 47  ;;  %s1243_s9 = sshll.u32 (!%p277_p1), %s283_s8, 8 }
  0x47   : > { %s1849_s11 = scalar_lea.vmem (!%p277_p1), [#allocation2], %s1243_s9  ;;  %s290_s20 = scalar_lea.sflag (!%p277_p1), [#allocation4], %s283_s8 }
  0x48   : > { %s1851_s22 = scalar_lea.vmem (!%p277_p1), [#allocation3], %s1243_s9 }
  0x4d   : > { %1635 = dma.done.wait (%p1730_p7), %s290_s20, 4096  }
  0x4e   : > { %1637 = vsyncadd (%p1730_p7), %s290_s20, 4294963200  ;;  %p342_p3 = scmp.eq.s32.totalorder %s1652_s15, 0  ;;  %p1245_p2 = scmp.ne.s32.totalorder %s1652_s15, 0 }
  0x4f   : > { %v1665_v32 = vmov (!%p1245_p2), 0.0  }
  0x50   : > { %345 = sbr.rel (%p1245_p2) target bundleno = 88 (0x58), region = 59  ;;  %346 = vst [vmem:[%s2147_s2] sm:$0xff] (!%p1245_p2), %v1665_v32  ;;  %347 = vst [vmem:[%s2147_s2 + $0x8] sm:$0xff] (!%p1245_p2), %v1665_v32 }
  0x51   : > { %348 = vst [vmem:[%s2147_s2 + $0x10] sm:$0xff] (!%p1245_p2), %v1665_v32  ;;  %349 = vst [vmem:[%s2147_s2 + $0x18] sm:$0xff] (!%p1245_p2), %v1665_v32 }
  0x52   : > { %350 = vst [vmem:[%s2147_s2 + $0x20] sm:$0xff] (!%p1245_p2), %v1665_v32  ;;  %351 = vst [vmem:[%s2147_s2 + $0x28] sm:$0xff] (!%p1245_p2), %v1665_v32 }
  0x53   : > { %352 = vst [vmem:[%s2147_s2 + $0x30] sm:$0xff] (!%p1245_p2), %v1665_v32  ;;  %353 = vst [vmem:[%s2147_s2 + $0x38] sm:$0xff] (!%p1245_p2), %v1665_v32 }
  0x54   : > { %354 = vst [vmem:[%s2147_s2 + $0x40] sm:$0xff] (!%p1245_p2), %v1665_v32  ;;  %355 = vst [vmem:[%s2147_s2 + $0x48] sm:$0xff] (!%p1245_p2), %v1665_v32 }
  0x55   : > { %356 = vst [vmem:[%s2147_s2 + $0x50] sm:$0xff] (!%p1245_p2), %v1665_v32  ;;  %357 = vst [vmem:[%s2147_s2 + $0x58] sm:$0xff] (!%p1245_p2), %v1665_v32 }
  0x56   : > { %358 = vst [vmem:[%s2147_s2 + $0x60] sm:$0xff] (!%p1245_p2), %v1665_v32  ;;  %359 = vst [vmem:[%s2147_s2 + $0x68] sm:$0xff] (!%p1245_p2), %v1665_v32 }
  0x57   : > { %360 = vst [vmem:[%s2147_s2 + $0x70] sm:$0xff] %v1665_v32  ;;  %361 = vst [vmem:[%s2147_s2 + $0x78] sm:$0xff] %v1665_v32 }
  0x58 PF: > { %366 = sbr.rel (!%p342_p3) target bundleno = 95 (0x5f), region = 63  ;;  %v1666_v33 = vmov (%p342_p3), 0.0  }
  0x59   : > { %367 = vst [vmem:[%s2148_s3] sm:$0x1] (%p342_p3), %v1666_v33 }
  0x5f PF: > { %v1502_v34 = vld [vmem:[%s1851_s22 + $0x40] sm:$0xff]   ;;  %v1506_v38 = vld [vmem:[%s1851_s22 + $0x48] sm:$0xff]   ;;  %v1510_v42 = vld [vmem:[%s1851_s22 + $0x50] sm:$0xff]   ;;  %p1311_p7 = scmp.ne.s32.totalorder %s1652_s15, 6 }
  0x60   : > { %v1503_v35 = vld [vmem:[%s1851_s22 + $0xc0] sm:$0xff]   ;;  %1320 = vmatprep.subr.bf16.mxu0 %v1502_v34  ;;  %v1507_v39 = vld [vmem:[%s1851_s22 + $0xc8] sm:$0xff]   ;;  %v1511_v43 = vld [vmem:[%s1851_s22 + $0xd0] sm:$0xff]  }
  0x61   : > { %v1504_v36 = vld [vmem:[%s1851_s22] sm:$0xff]   ;;  %1384 = vmatprep.subr.bf16.mxu1 %v1503_v35  ;;  %v1508_v40 = vld [vmem:[%s1851_s22 + $0x8] sm:$0xff]   ;;  %v1512_v44 = vld [vmem:[%s1851_s22 + $0x10] sm:$0xff]  }
  0x62   : > { %v1505_v37 = vld [vmem:[%s1851_s22 + $0x80] sm:$0xff]   ;;  %1321 = vmatpush3.bf16.msra.mxu0 %v1504_v36  ;;  %v1509_v41 = vld [vmem:[%s1851_s22 + $0x88] sm:$0xff]   ;;  %v1513_v45 = vld [vmem:[%s1851_s22 + $0x90] sm:$0xff]  }
  0x63   : > { %1385 = vmatpush3.bf16.msra.mxu1 %v1505_v37  ;;  %1322 = vmatprep.subr.bf16.mxu0 %v1506_v38  ;;  %v1514_v46 = vld [vmem:[%s1851_s22 + $0x58] sm:$0xff]   ;;  %v1518_v50 = vld [vmem:[%s1851_s22 + $0x60] sm:$0xff]   ;;  %v1522_v54 = vld [vmem:[%s1851_s22 + $0x68] sm:$0xff]  }
  0x64   : > { %1386 = vmatprep.subr.bf16.mxu1 %v1507_v39  ;;  %v1515_v47 = vld [vmem:[%s1851_s22 + $0xd8] sm:$0xff]   ;;  %v1519_v51 = vld [vmem:[%s1851_s22 + $0xe0] sm:$0xff]   ;;  %v1523_v55 = vld [vmem:[%s1851_s22 + $0xe8] sm:$0xff]  }
  0x65   : > { %v1516_v48 = vld [vmem:[%s1851_s22 + $0x18] sm:$0xff]   ;;  %v1520_v52 = vld [vmem:[%s1851_s22 + $0x20] sm:$0xff]   ;;  %v1524_v56 = vld [vmem:[%s1851_s22 + $0x28] sm:$0xff]  }
  0x66   : > { %1323 = vmatpush3.bf16.msra.mxu0 %v1508_v40  ;;  %v1517_v49 = vld [vmem:[%s1851_s22 + $0x98] sm:$0xff]   ;;  %v1521_v53 = vld [vmem:[%s1851_s22 + $0xa0] sm:$0xff]   ;;  %v1525_v57 = vld [vmem:[%s1851_s22 + $0xa8] sm:$0xff]  }
  0x67   : > { %1387 = vmatpush3.bf16.msra.mxu1 %v1509_v41  ;;  %1324 = vmatprep.subr.bf16.mxu0 %v1510_v42  ;;  %v1526_v58 = vld [vmem:[%s1851_s22 + $0x70] sm:$0xff]   ;;  %v1530_v62 = vld [vmem:[%s1851_s22 + $0x78] sm:$0xff]  }
  0x68   : > { %1388 = vmatprep.subr.bf16.mxu1 %v1511_v43  ;;  %v1527_v59 = vld [vmem:[%s1851_s22 + $0xf0] sm:$0xff]   ;;  %v1531_v63 = vld [vmem:[%s1851_s22 + $0xf8] sm:$0xff]   ;;  %v368_v43 = vld [vmem:[%s2147_s2] sm:$0xff] }
  0x69   : > { %v1528_v60 = vld [vmem:[%s1851_s22 + $0x30] sm:$0xff]   ;;  %v1532_v0 = vld [vmem:[%s1851_s22 + $0x38] sm:$0xff]  }
  0x6a   : > { %1325 = vmatpush3.bf16.msra.mxu0 %v1512_v44  ;;  %v1529_v61 = vld [vmem:[%s1851_s22 + $0xb0] sm:$0xff]   ;;  %v1533_v1 = vld [vmem:[%s1851_s22 + $0xb8] sm:$0xff]  }
  0x6b   : > { %1389 = vmatpush3.bf16.msra.mxu1 %v1513_v45  ;;  %1326 = vmatprep.subr.bf16.mxu0 %v1514_v46  ;;  %v1534_v2 = vld [vmem:[%s1849_s11] ss:$16 sps:$4 sm:$0xff]   ;;  %v1536_v3 = vld [vmem:[%s1849_s11 + $0x4] ss:$16 sps:$4 sm:$0xff]   ;;  %v1537_v4 = vld [vmem:[%s1849_s11 + $0x8] ss:$16 sps:$4 sm:$0xff]  }
  0x6c   : > { %1390 = vmatprep.subr.bf16.mxu1 %v1515_v47  ;;  %v1539_v5 = vld [vmem:[%s1849_s11 + $0xc] ss:$16 sps:$4 sm:$0xff]   ;;  %864 = vmatprep.mubr.bf16.mxu0 %v1536_v3  ;;  %v1540_v6 = vld [vmem:[%s1849_s11 + $0x24] ss:$16 sps:$4 sm:$0xff]   ;;  %v1544_v8 = vld [vmem:[%s1849_s11 + $0x20] ss:$16 sps:$4 sm:$0xff]  }
  0x6d   : > { %961 = vmatprep.mubr.bf16.mxu1 %v1539_v5  ;;  %v1542_v7 = vld [vmem:[%s1849_s11 + $0x2c] ss:$16 sps:$4 sm:$0xff]   ;;  %v1545_v9 = vld [vmem:[%s1849_s11 + $0x28] ss:$16 sps:$4 sm:$0xff]   ;;  %v1546_v10 = vld [vmem:[%s1849_s11 + $0x44] ss:$16 sps:$4 sm:$0xff]  }
  0x6e   : > { %1327 = vmatpush3.bf16.msra.mxu0 %v1516_v48  ;;  %v1548_v11 = vld [vmem:[%s1849_s11 + $0x4c] ss:$16 sps:$4 sm:$0xff]   ;;  %v1550_v12 = vld [vmem:[%s1849_s11 + $0x40] ss:$16 sps:$4 sm:$0xff]   ;;  %v1551_v13 = vld [vmem:[%s1849_s11 + $0x48] ss:$16 sps:$4 sm:$0xff]  }
  0x6f   : > { %1391 = vmatpush3.bf16.msra.mxu1 %v1517_v49  ;;  %1328 = vmatprep.subr.bf16.mxu0 %v1518_v50  ;;  %v1552_v14 = vld [vmem:[%s1849_s11 + $0x64] ss:$16 sps:$4 sm:$0xff]   ;;  %v1554_v15 = vld [vmem:[%s1849_s11 + $0x6c] ss:$16 sps:$4 sm:$0xff]   ;;  %v1556_v16 = vld [vmem:[%s1849_s11 + $0x60] ss:$16 sps:$4 sm:$0xff]  }
  0x70   : > { %1392 = vmatprep.subr.bf16.mxu1 %v1519_v51  ;;  %v1557_v17 = vld [vmem:[%s1849_s11 + $0x68] ss:$16 sps:$4 sm:$0xff]   ;;  %v1558_v18 = vld [vmem:[%s1849_s11 + $0x84] ss:$16 sps:$4 sm:$0xff]   ;;  %v1560_v19 = vld [vmem:[%s1849_s11 + $0x8c] ss:$16 sps:$4 sm:$0xff]  }
  0x71   : > { %v1562_v20 = vld [vmem:[%s1849_s11 + $0x80] ss:$16 sps:$4 sm:$0xff]   ;;  %v1563_v21 = vld [vmem:[%s1849_s11 + $0x88] ss:$16 sps:$4 sm:$0xff]   ;;  %v1564_v22 = vld [vmem:[%s1849_s11 + $0xa4] ss:$16 sps:$4 sm:$0xff]  }
  0x72   : > { %1329 = vmatpush3.bf16.msra.mxu0 %v1520_v52  ;;  %v1566_v23 = vld [vmem:[%s1849_s11 + $0xac] ss:$16 sps:$4 sm:$0xff]   ;;  %v1568_v24 = vld [vmem:[%s1849_s11 + $0xa0] ss:$16 sps:$4 sm:$0xff]   ;;  %v1569_v25 = vld [vmem:[%s1849_s11 + $0xa8] ss:$16 sps:$4 sm:$0xff]  }
  0x73   : > { %1393 = vmatpush3.bf16.msra.mxu1 %v1521_v53  ;;  %1330 = vmatprep.subr.bf16.mxu0 %v1522_v54  ;;  %v1570_v26 = vld [vmem:[%s1849_s11 + $0xc4] ss:$16 sps:$4 sm:$0xff]   ;;  %v1572_v27 = vld [vmem:[%s1849_s11 + $0xcc] ss:$16 sps:$4 sm:$0xff]   ;;  %v1574_v28 = vld [vmem:[%s1849_s11 + $0xc0] ss:$16 sps:$4 sm:$0xff]  }
  0x74   : > { %1394 = vmatprep.subr.bf16.mxu1 %v1523_v55  ;;  %v1575_v29 = vld [vmem:[%s1849_s11 + $0xc8] ss:$16 sps:$4 sm:$0xff]   ;;  %v1576_v30 = vld [vmem:[%s1849_s11 + $0xe4] ss:$16 sps:$4 sm:$0xff]   ;;  %v1578_v31 = vld [vmem:[%s1849_s11 + $0xec] ss:$16 sps:$4 sm:$0xff]  }
  0x75   : > { %v1580_v32 = vld [vmem:[%s1849_s11 + $0xe0] ss:$16 sps:$4 sm:$0xff]   ;;  %v1581_v33 = vld [vmem:[%s1849_s11 + $0xe8] ss:$16 sps:$4 sm:$0xff]  }
  0x76   : > { %1331 = vmatpush3.bf16.msra.mxu0 %v1524_v56  ;;  %v369_v48 = vld [vmem:[%s2147_s2 + $0x8] sm:$0xff] }
  0x77   : > { %1395 = vmatpush3.bf16.msra.mxu1 %v1525_v57  ;;  %1332 = vmatprep.subr.bf16.mxu0 %v1526_v58 }
  0x78   : > { %1396 = vmatprep.subr.bf16.mxu1 %v1527_v59 }
  0x7a   : > { %1333 = vmatpush3.bf16.msra.mxu0 %v1528_v60 }
  0x7b   : > { %1397 = vmatpush3.bf16.msra.mxu1 %v1529_v61  ;;  %1334 = vmatprep.subr.bf16.mxu0 %v1530_v62  ;;  %v370_v61 = vld [vmem:[%s2147_s2 + $0x10] sm:$0xff] }
  0x7c   : > { %1398 = vmatprep.subr.bf16.mxu1 %v1531_v63 }
  0x7e   : > { %1335 = vmatpush3.bf16.msra.mxu0 %v1532_v0 }
  0x7f   : > { %1399 = vmatpush3.bf16.msra.mxu1 %v1533_v1 }
  0x81   : > { %865 = vmatmul.mubr.bf16.vlgmr.msra.gmra.mrb[0].mxu0 %v1534_v2  ;;  %v371_v2 = vld [vmem:[%s2147_s2 + $0x18] sm:$0xff] }
  0x82   : > { %962 = vmatmul.mubr.bf16.vlgmr.msra.gmra.mrb[0].mxu1 %v1537_v4  ;;  %872 = vmatprep.mubr.bf16.mxu0 %v1540_v6 }
  0x83   : > { %969 = vmatprep.mubr.bf16.mxu1 %v1542_v7 }
  0x89   : > { %873 = vmatmul.mubr.bf16.gmra.mrb[4].mxu0 %v1544_v8 }
  0x8a   : > { %970 = vmatmul.mubr.bf16.gmra.mrb[4].mxu1 %v1545_v9  ;;  %880 = vmatprep.mubr.bf16.mxu0 %v1546_v10 }
  0x8b   : > { %977 = vmatprep.mubr.bf16.mxu1 %v1548_v11 }
  0x91   : > { %881 = vmatmul.mubr.bf16.gmra.mrb[8].mxu0 %v1550_v12 }
  0x92   : > { %978 = vmatmul.mubr.bf16.gmra.mrb[8].mxu1 %v1551_v13  ;;  %888 = vmatprep.mubr.bf16.mxu0 %v1552_v14 }
  0x93   : > { %985 = vmatprep.mubr.bf16.mxu1 %v1554_v15  ;;  %v372_v15 = vld [vmem:[%s2147_s2 + $0x20] sm:$0xff] }
  0x99   : > { %889 = vmatmul.mubr.bf16.gmra.mrb[12].mxu0 %v1556_v16 }
  0x9a   : > { %986 = vmatmul.mubr.bf16.gmra.mrb[12].mxu1 %v1557_v17  ;;  %896 = vmatprep.mubr.bf16.mxu0 %v1558_v18 }
  0x9b   : > { %993 = vmatprep.mubr.bf16.mxu1 %v1560_v19 }
  0xa1   : > { %897 = vmatmul.mubr.bf16.gmra.mrb[16].mxu0 %v1562_v20  ;;  %v373_v20 = vld [vmem:[%s2147_s2 + $0x28] sm:$0xff] }
  0xa2   : > { %994 = vmatmul.mubr.bf16.gmra.mrb[16].mxu1 %v1563_v21  ;;  %904 = vmatprep.mubr.bf16.mxu0 %v1564_v22 }
  0xa3   : > { %1001 = vmatprep.mubr.bf16.mxu1 %v1566_v23 }
  0xa9   : > { %905 = vmatmul.mubr.bf16.gmra.mrb[20].mxu0 %v1568_v24 }
  0xaa   : > { %1002 = vmatmul.mubr.bf16.gmra.mrb[20].mxu1 %v1569_v25  ;;  %912 = vmatprep.mubr.bf16.mxu0 %v1570_v26 }
  0xab   : > { %1009 = vmatprep.mubr.bf16.mxu1 %v1572_v27 }
  0xb1   : > { %913 = vmatmul.mubr.bf16.gmra.mrb[24].mxu0 %v1574_v28 }
  0xb2   : > { %1010 = vmatmul.mubr.bf16.gmra.mrb[24].mxu1 %v1575_v29  ;;  %920 = vmatprep.mubr.bf16.mxu0 %v1576_v30 }
  0xb3   : > { %1017 = vmatprep.mubr.bf16.mxu1 %v1578_v31 }
  0xb9   : > { %921 = vmatmul.mubr.bf16.gmra.mrb[28].mxu0 %v1580_v32 }
  0xba   : > { %1018 = vmatmul.mubr.bf16.gmra.mrb[28].mxu1 %v1581_v33  ;;  %v374_v33 = vld [vmem:[%s2147_s2 + $0x30] sm:$0xff] }
 0x154   : > { %v1336_v34 = vpop.f32.mrb[0].mxu0 }
 0x155   : > { %v1400_v35 = vpop.f32.mrb[0].mxu1  ;;  %v1337_v36 = vpop.f32.mrb[1].mxu0 }
 0x156   : > { %v1338_v37 = vadd.f32 %v1337_v36, %v1336_v34  ;;  %v1401_v38 = vpop.f32.mrb[1].mxu1  ;;  %v1339_v39 = vpop.f32.mrb[2].mxu0 }
 0x157   : > { %v1402_v40 = vadd.f32 %v1401_v38, %v1400_v35  ;;  %v1403_v41 = vpop.f32.mrb[2].mxu1  ;;  %v1340_v42 = vpop.f32.mrb[3].mxu0  ;;  %v375_v38 = vld [vmem:[%s2147_s2 + $0x38] sm:$0xff] }
 0x158   : > { %v1341_v44 = vadd.f32 %v1340_v42, %v1339_v39  ;;  %v1404_v45 = vpop.f32.mrb[3].mxu1 }
 0x159   : > { %v964_v46 = vadd.f32 %v1402_v40, %v1338_v37  ;;  %v1405_v47 = vadd.f32 %v1404_v45, %v1403_v41 }
 0x15b   : > { %v1026_v49 = vadd.f32 %v964_v46, %v368_v43  ;;  %v967_v50 = vadd.f32 %v1405_v47, %v1341_v44 }
 0x15c   : > { %v1342_v51 = vpop.f32.mrb[4].mxu0 }
 0x15d   : > { %1042 = vst [vmem:[%s2147_s2] sm:$0xff] %v1026_v49  ;;  %v1027_v52 = vadd.f32 %v967_v50, %v369_v48  ;;  %v1406_v53 = vpop.f32.mrb[4].mxu1  ;;  %v1343_v54 = vpop.f32.mrb[5].mxu0 }
 0x15e   : > { %v1344_v55 = vadd.f32 %v1343_v54, %v1342_v51  ;;  %v1407_v56 = vpop.f32.mrb[5].mxu1  ;;  %v1345_v57 = vpop.f32.mrb[6].mxu0  ;;  %v376_v51 = vld [vmem:[%s2147_s2 + $0x40] sm:$0xff] }
 0x15f   : > { %1043 = vst [vmem:[%s2147_s2 + $0x8] sm:$0xff] %v1027_v52  ;;  %v1408_v58 = vadd.f32 %v1407_v56, %v1406_v53  ;;  %v1409_v59 = vpop.f32.mrb[6].mxu1  ;;  %v1346_v60 = vpop.f32.mrb[7].mxu0  ;;  %v377_v56 = vld [vmem:[%s2147_s2 + $0x48] sm:$0xff] }
 0x160   : > { %v1347_v62 = vadd.f32 %v1346_v60, %v1345_v57  ;;  %v1410_v63 = vpop.f32.mrb[7].mxu1 }
 0x161   : > { %v972_v0 = vadd.f32 %v1408_v58, %v1344_v55  ;;  %v1411_v1 = vadd.f32 %v1410_v63, %v1409_v59 }
 0x163   : > { %v1028_v3 = vadd.f32 %v972_v0, %v370_v61  ;;  %v975_v4 = vadd.f32 %v1411_v1, %v1347_v62 }
 0x164   : > { %v1348_v5 = vpop.f32.mrb[8].mxu0 }
 0x165   : > { %1044 = vst [vmem:[%s2147_s2 + $0x10] sm:$0xff] %v1028_v3  ;;  %v1029_v6 = vadd.f32 %v975_v4, %v371_v2  ;;  %v1412_v7 = vpop.f32.mrb[8].mxu1  ;;  %v1349_v8 = vpop.f32.mrb[9].mxu0 }
 0x166   : > { %v1350_v9 = vadd.f32 %v1349_v8, %v1348_v5  ;;  %v1413_v10 = vpop.f32.mrb[9].mxu1  ;;  %v1351_v11 = vpop.f32.mrb[10].mxu0  ;;  %v378_v5 = vld [vmem:[%s2147_s2 + $0x50] sm:$0xff] }
 0x167   : > { %1045 = vst [vmem:[%s2147_s2 + $0x18] sm:$0xff] %v1029_v6  ;;  %v1414_v12 = vadd.f32 %v1413_v10, %v1412_v7  ;;  %v1415_v13 = vpop.f32.mrb[10].mxu1  ;;  %v1352_v14 = vpop.f32.mrb[11].mxu0  ;;  %v379_v10 = vld [vmem:[%s2147_s2 + $0x58] sm:$0xff] }
 0x168   : > { %v1353_v16 = vadd.f32 %v1352_v14, %v1351_v11  ;;  %v1416_v17 = vpop.f32.mrb[11].mxu1 }
 0x169   : > { %v980_v18 = vadd.f32 %v1414_v12, %v1350_v9  ;;  %v1417_v19 = vadd.f32 %v1416_v17, %v1415_v13 }
 0x16b   : > { %v1030_v21 = vadd.f32 %v980_v18, %v372_v15  ;;  %v983_v22 = vadd.f32 %v1417_v19, %v1353_v16 }
 0x16c   : > { %v1354_v23 = vpop.f32.mrb[12].mxu0 }
 0x16d   : > { %1046 = vst [vmem:[%s2147_s2 + $0x20] sm:$0xff] %v1030_v21  ;;  %v1031_v24 = vadd.f32 %v983_v22, %v373_v20  ;;  %v1418_v25 = vpop.f32.mrb[12].mxu1  ;;  %v1355_v26 = vpop.f32.mrb[13].mxu0 }
 0x16e   : > { %v1356_v27 = vadd.f32 %v1355_v26, %v1354_v23  ;;  %v1419_v28 = vpop.f32.mrb[13].mxu1  ;;  %v1357_v29 = vpop.f32.mrb[14].mxu0  ;;  %v380_v23 = vld [vmem:[%s2147_s2 + $0x60] sm:$0xff] }
 0x16f   : > { %1047 = vst [vmem:[%s2147_s2 + $0x28] sm:$0xff] %v1031_v24  ;;  %v1420_v30 = vadd.f32 %v1419_v28, %v1418_v25  ;;  %v1421_v31 = vpop.f32.mrb[14].mxu1  ;;  %v1358_v32 = vpop.f32.mrb[15].mxu0  ;;  %v381_v28 = vld [vmem:[%s2147_s2 + $0x68] sm:$0xff] }
 0x170   : > { %v1359_v34 = vadd.f32 %v1358_v32, %v1357_v29  ;;  %v1422_v35 = vpop.f32.mrb[15].mxu1 }
 0x171   : > { %v988_v36 = vadd.f32 %v1420_v30, %v1356_v27  ;;  %v1423_v37 = vadd.f32 %v1422_v35, %v1421_v31 }
 0x173   : > { %v1032_v39 = vadd.f32 %v988_v36, %v374_v33  ;;  %v991_v40 = vadd.f32 %v1423_v37, %v1359_v34 }
 0x174   : > { %v1360_v41 = vpop.f32.mrb[16].mxu0 }
 0x175   : > { %1048 = vst [vmem:[%s2147_s2 + $0x30] sm:$0xff] %v1032_v39  ;;  %v1033_v42 = vadd.f32 %v991_v40, %v375_v38  ;;  %v1424_v43 = vpop.f32.mrb[16].mxu1  ;;  %v1361_v44 = vpop.f32.mrb[17].mxu0 }
 0x176   : > { %v1362_v45 = vadd.f32 %v1361_v44, %v1360_v41  ;;  %v1425_v46 = vpop.f32.mrb[17].mxu1  ;;  %v1363_v47 = vpop.f32.mrb[18].mxu0  ;;  %v382_v41 = vld [vmem:[%s2147_s2 + $0x70] sm:$0xff] }
 0x177   : > { %1049 = vst [vmem:[%s2147_s2 + $0x38] sm:$0xff] %v1033_v42  ;;  %v1426_v48 = vadd.f32 %v1425_v46, %v1424_v43  ;;  %v1427_v49 = vpop.f32.mrb[18].mxu1  ;;  %v1364_v50 = vpop.f32.mrb[19].mxu0  ;;  %v383_v46 = vld [vmem:[%s2147_s2 + $0x78] sm:$0xff] }
 0x178   : > { %v1365_v52 = vadd.f32 %v1364_v50, %v1363_v47  ;;  %v1428_v53 = vpop.f32.mrb[19].mxu1  ;;  %v1063_v50 = vld [vmem:[%s2147_s2] sm:$0xff] (!%p1311_p7) }
 0x179   : > { %v996_v54 = vadd.f32 %v1426_v48, %v1362_v45  ;;  %v1429_v55 = vadd.f32 %v1428_v53, %v1427_v49 }
 0x17b   : > { %v1034_v57 = vadd.f32 %v996_v54, %v376_v51  ;;  %v999_v58 = vadd.f32 %v1429_v55, %v1365_v52  ;;  %v1064_v51 = vld [vmem:[%s2147_s2 + $0x8] sm:$0xff] (!%p1311_p7)  ;;  %v1065_v52 = vld [vmem:[%s2147_s2 + $0x10] sm:$0xff] (!%p1311_p7)  ;;  %v1066_v54 = vld [vmem:[%s2147_s2 + $0x18] sm:$0xff] (!%p1311_p7) }
 0x17c   : > { %v1366_v59 = vpop.f32.mrb[20].mxu0  ;;  %v1079_v53 = vadd.f32 (!%p1311_p7), %v1064_v51, %v1063_v50 }
 0x17d   : > { %1050 = vst [vmem:[%s2147_s2 + $0x40] sm:$0xff] %v1034_v57  ;;  %v1035_v60 = vadd.f32 %v999_v58, %v377_v56  ;;  %v1430_v61 = vpop.f32.mrb[20].mxu1  ;;  %v1367_v62 = vpop.f32.mrb[21].mxu0  ;;  %v1067_v56 = vld [vmem:[%s2147_s2 + $0x20] sm:$0xff] (!%p1311_p7)  ;;  %v1068_v58 = vld [vmem:[%s2147_s2 + $0x28] sm:$0xff] (!%p1311_p7) }
 0x17e   : > { %v1368_v63 = vadd.f32 %v1367_v62, %v1366_v59  ;;  %v1431_v0 = vpop.f32.mrb[21].mxu1  ;;  %v1369_v1 = vpop.f32.mrb[22].mxu0  ;;  %v1080_v55 = vadd.f32 (!%p1311_p7), %v1079_v53, %v1065_v52  ;;  %v1070_v62 = vld [vmem:[%s2147_s2 + $0x38] sm:$0xff] (!%p1311_p7) }
 0x17f   : > { %1051 = vst [vmem:[%s2147_s2 + $0x48] sm:$0xff] %v1035_v60  ;;  %v1432_v2 = vadd.f32 %v1431_v0, %v1430_v61  ;;  %v1433_v3 = vpop.f32.mrb[22].mxu1  ;;  %v1370_v4 = vpop.f32.mrb[23].mxu0  ;;  %v1069_v60 = vld [vmem:[%s2147_s2 + $0x30] sm:$0xff] (!%p1311_p7) }
 0x180   : > { %v1371_v6 = vadd.f32 %v1370_v4, %v1369_v1  ;;  %v1434_v7 = vpop.f32.mrb[23].mxu1  ;;  %v1081_v57 = vadd.f32 (!%p1311_p7), %v1080_v55, %v1066_v54 }
 0x181   : > { %v1004_v8 = vadd.f32 %v1432_v2, %v1368_v63  ;;  %v1435_v9 = vadd.f32 %v1434_v7, %v1433_v3 }
 0x182   : > { %v1082_v59 = vadd.f32 (!%p1311_p7), %v1081_v57, %v1067_v56 }
 0x183   : > { %v1036_v11 = vadd.f32 %v1004_v8, %v378_v5  ;;  %v1007_v12 = vadd.f32 %v1435_v9, %v1371_v6 }
 0x184   : > { %v1372_v13 = vpop.f32.mrb[24].mxu0  ;;  %v1083_v61 = vadd.f32 (!%p1311_p7), %v1082_v59, %v1068_v58  ;;  %v1071_v0 = vld [vmem:[%s2147_s2 + $0x40] sm:$0xff] (!%p1311_p7) }
 0x185   : > { %1052 = vst [vmem:[%s2147_s2 + $0x50] sm:$0xff] %v1036_v11  ;;  %v1037_v14 = vadd.f32 %v1007_v12, %v379_v10  ;;  %v1436_v15 = vpop.f32.mrb[24].mxu1  ;;  %v1373_v16 = vpop.f32.mrb[25].mxu0 }
 0x186   : > { %v1374_v17 = vadd.f32 %v1373_v16, %v1372_v13  ;;  %v1437_v18 = vpop.f32.mrb[25].mxu1  ;;  %v1375_v19 = vpop.f32.mrb[26].mxu0  ;;  %v1084_v63 = vadd.f32 (!%p1311_p7), %v1083_v61, %v1069_v60  ;;  %v1072_v2 = vld [vmem:[%s2147_s2 + $0x48] sm:$0xff] (!%p1311_p7) }
 0x187   : > { %1053 = vst [vmem:[%s2147_s2 + $0x58] sm:$0xff] %v1037_v14  ;;  %v1438_v20 = vadd.f32 %v1437_v18, %v1436_v15  ;;  %v1439_v21 = vpop.f32.mrb[26].mxu1  ;;  %v1376_v22 = vpop.f32.mrb[27].mxu0 }
 0x188   : > { %v1377_v24 = vadd.f32 %v1376_v22, %v1375_v19  ;;  %v1440_v25 = vpop.f32.mrb[27].mxu1  ;;  %v1085_v1 = vadd.f32 (!%p1311_p7), %v1084_v63, %v1070_v62  ;;  %v1062_v22 = vld [vmem:[%s2148_s3] sm:$0x1] (!%p1311_p7) }
 0x189   : > { %v1012_v26 = vadd.f32 %v1438_v20, %v1374_v17  ;;  %v1441_v27 = vadd.f32 %v1440_v25, %v1439_v21 }
 0x18a   : > { %v1086_v3 = vadd.f32 (!%p1311_p7), %v1085_v1, %v1071_v0 }
 0x18b   : > { %v1038_v29 = vadd.f32 %v1012_v26, %v380_v23  ;;  %v1015_v30 = vadd.f32 %v1441_v27, %v1377_v24 }
 0x18c   : > { %v1378_v31 = vpop.f32.mrb[28].mxu0  ;;  %v1073_v4 = vld [vmem:[%s2147_s2 + $0x50] sm:$0xff] (!%p1311_p7)  ;;  %v1087_v5 = vadd.f32 (!%p1311_p7), %v1086_v3, %v1072_v2 }
 0x18d   : > { %1054 = vst [vmem:[%s2147_s2 + $0x60] sm:$0xff] %v1038_v29  ;;  %v1039_v32 = vadd.f32 %v1015_v30, %v381_v28  ;;  %v1442_v33 = vpop.f32.mrb[28].mxu1  ;;  %v1379_v34 = vpop.f32.mrb[29].mxu0 }
 0x18e   : > { %v1380_v35 = vadd.f32 %v1379_v34, %v1378_v31  ;;  %v1443_v36 = vpop.f32.mrb[29].mxu1  ;;  %v1381_v37 = vpop.f32.mrb[30].mxu0  ;;  %v1074_v6 = vld [vmem:[%s2147_s2 + $0x58] sm:$0xff] (!%p1311_p7)  ;;  %v1088_v7 = vadd.f32 (!%p1311_p7), %v1087_v5, %v1073_v4 }
 0x18f   : > { %1055 = vst [vmem:[%s2147_s2 + $0x68] sm:$0xff] %v1039_v32  ;;  %v1444_v38 = vadd.f32 %v1443_v36, %v1442_v33  ;;  %v1445_v39 = vpop.f32.mrb[30].mxu1  ;;  %v1382_v40 = vpop.f32.mrb[31].mxu0 }
 0x190   : > { %v1383_v42 = vadd.f32 %v1382_v40, %v1381_v37  ;;  %v1446_v43 = vpop.f32.mrb[31].mxu1  ;;  %v1089_v9 = vadd.f32 (!%p1311_p7), %v1088_v7, %v1074_v6 }
 0x191   : > { %v1020_v44 = vadd.f32 %v1444_v38, %v1380_v35  ;;  %v1447_v45 = vadd.f32 %v1446_v43, %v1445_v39  ;;  %1061 = sbr.rel (%p1311_p7) target bundleno = 432 (0x1b0), region = 67 }
 0x193   : > { %v1040_v47 = vadd.f32 %v1020_v44, %v382_v41  ;;  %v1023_v48 = vadd.f32 %v1447_v45, %v1383_v42 }
 0x194   : > { %v1075_v8 = vld [vmem:[%s2147_s2 + $0x60] sm:$0xff] (!%p1311_p7) }
 0x195   : > { %1056 = vst [vmem:[%s2147_s2 + $0x70] sm:$0xff] %v1040_v47  ;;  %v1041_v49 = vadd.f32 %v1023_v48, %v383_v46  ;;  %v1090_v11 = vadd.f32 (!%p1311_p7), %v1089_v9, %v1075_v8 }
 0x196   : > { %v1076_v10 = vld [vmem:[%s2147_s2 + $0x68] sm:$0xff] (!%p1311_p7) }
 0x197   : > { %1057 = vst [vmem:[%s2147_s2 + $0x78] sm:$0xff] %v1041_v49  ;;  %v1091_v13 = vadd.f32 (!%p1311_p7), %v1090_v11, %v1076_v10 }
 0x19c   : > { %v1077_v12 = vld [vmem:[%s2147_s2 + $0x70] sm:$0xff] }
 0x19d   : > { %v1092_v15 = vadd.f32 %v1091_v13, %v1077_v12 }
 0x19e   : > { %v1078_v14 = vld [vmem:[%s2147_s2 + $0x78] sm:$0xff] }
 0x19f   : > { %v1093_v16 = vadd.f32 %v1092_v15, %v1078_v14 }
 0x1a1   : > { %v1094_v17 = vrot.slane %v1093_v16, 4 }
 0x1a3   : > { %v1095_v18 = vadd.f32 %v1094_v17, %v1093_v16 }
 0x1a5   : > { %v1096_v19 = vrot.slane %v1095_v18, 2 }
 0x1a7   : > { %v1097_v20 = vadd.f32 %v1096_v19, %v1095_v18 }
 0x1a9   : > { %v1098_v21 = vrot.slane %v1097_v20, 1 }
 0x1ab   : > { %v1099_v23 = vadd.f32 %v1098_v21, %v1097_v20 }
 0x1ad   : > { %v1100_v24 = vadd.f32 %v1099_v23, %v1062_v22 }
 0x1af   : > { %1101 = vst [vmem:[%s2148_s3] sm:$0x1] %v1100_v24 }
 0x1b0 PF: > { %s17_s17 = sadd.s32 1, %s1660_s17   ;;  %s2151_s12 = smov %s1644_s13 }
 0x1b1   : > { %p14_p4 = scmp.ge.s32.totalorder %s17_s17, 9   ;;  %s2152_s13 = smov %s1648_s14 }
 0x1b2   : > { %s2153_s14 = smov %s1735_s24  ;;  %s2154_s15 = smov %s1656_s16 }
 0x1b3   : > { %s2155_s16 = smov %s2157_s19  ;;  %16 = sbr.rel (!%p14_p4) target bundleno = 4 (0x4), region = 123 }
 0x1ba   :  { %1142 = vsyncpa [#allocation4], 1 }
 0x1bb   :  { %1144 = vsyncpa [#allocation4 + $0x1], 1 }

// kernel: fpn1_forward.30
= control target key start
LH: loop header
LB: loop body
LE: loop exit
PB: predicated region body
PF: predicated region fallthrough
CT: control target
= control target key end

     0   :  { %s1390_s12 = smov 0   ;;  %s1392_s13 = smov 0   ;;  %s1641_s0 = inlined_call_operand.vmem [shape: bf16[32,6656], index: 0, kind: input, shape index: {}]   ;;  %s1642_s1 = inlined_call_operand.vmem [shape: bf16[6656,256], index: 1, kind: input, shape index: {}]   ;;  %s1643_s2 = inlined_call_operand.vmem [shape: f32[32,256], index: 2, kind: output, shape index: {0}]   ;;  %s1644_s3 = inlined_call_operand.vmem [shape: f32[1,256], index: 3, kind: output, shape index: {1}]  }
   0x1   :  { %s1394_s14 = smov 0   ;;  %s1396_s15 = smov 0  }
   0x2   :  { %s1398_s16 = smov 0  }
   0x3 LB: > { %s26_s17 = sadd.s32 1, %s1361_s15  ;;  %p49_p1 = scmp.ne.s32.totalorder %s1353_s13, %s1349_s12  ;;  %s1365_s16 = sphi %s1398_s16, %s14_s16   ;;  %s1361_s15 = sphi %s1396_s15, %s1648_s15   ;;  %s1357_s14 = sphi %s1394_s14, %s1647_s14   ;;  %s1353_s13 = sphi %s1392_s13, %s1646_s13   ;;  %s1349_s12 = sphi %s1390_s12, %s1645_s12  }
   0x4   : > { %p27_p0 = scmp.ge.s32.totalorder %s26_s17, 13  ;;  %p50_p2 = scmp.eq.s32.totalorder %s1365_s16, 0 }
   0x5   : > { %s42_s19 = sadd.s32 1, %s1353_s13  ;;  %p1075_p5 = scmp.ge.s32.totalorder %s1365_s16, 13 }
   0x6   : > { %s1650_s17 = smov (%p27_p0, %s26_s17), 0  ;;  %p51_p3 = por %p50_p2, %p49_p1 }
   0x7   : > { %s38_s18 = ssub.s32 %s1361_s15, %s1650_s17  ;;  %157 = sbr.rel (%p1075_p5) target bundleno = 22 (0x16), region = 16 }
   0x8   : > { %p40_p4 = scmp.eq.s32.totalorder %s38_s18, 0 }
   0xa   : > { %s1425_s20 = scalar_select %p40_p4, %s1353_s13, %s42_s19  }
   0xe   : > { %160 = sbr.rel (!%p51_p3) target bundleno = 22 (0x16), region = 20  ;;  %s162_s21 = sand.u32 (%p51_p3), 1, %s1353_s13  }
   0xf   : > { %s1165_s22 = sshll.u32 (%p51_p3), %s1361_s15, 4  ;;  %s1076_s23 = sshll.u32 (%p51_p3), %s162_s21, 6 }
  0x10   : > { %s170_s26 = scalar_lea.vmem (%p51_p3), %s1641_s0, %s1165_s22  ;;  %s164_s27 = scalar_lea.vmem (%p51_p3), [#allocation2], %s1076_s23 }
  0x11   : > { %v183_v0 = vld [vmem:[%s170_s26] sm:$0xff] (%p51_p3)  ;;  %v185_v1 = vld [vmem:[%s170_s26 + $0x8] sm:$0xff] (%p51_p3)  ;;  %v187_v2 = vld [vmem:[%s170_s26 + $0xd0] sm:$0xff] (%p51_p3) }
  0x12   : > { %184 = vst [vmem:[%s164_s27] sm:$0xff] (%p51_p3), %v183_v0  ;;  %186 = vst [vmem:[%s164_s27 + $0x8] sm:$0xff] (%p51_p3), %v185_v1  ;;  %v189_v3 = vld [vmem:[%s170_s26 + $0xd8] sm:$0xff] (%p51_p3)  ;;  %v191_v4 = vld [vmem:[%s170_s26 + $0x1a0] sm:$0xff] (%p51_p3) }
  0x13   : > { %188 = vst [vmem:[%s164_s27 + $0x10] sm:$0xff] (%p51_p3), %v187_v2  ;;  %v193_v5 = vld [vmem:[%s170_s26 + $0x1a8] sm:$0xff] (%p51_p3)  ;;  %190 = vst [vmem:[%s164_s27 + $0x18] sm:$0xff] (%p51_p3), %v189_v3  ;;  %v195_v6 = vld [vmem:[%s170_s26 + $0x270] sm:$0xff] (%p51_p3) }
  0x14   : > { %192 = vst [vmem:[%s164_s27 + $0x20] sm:$0xff] (%p51_p3), %v191_v4  ;;  %194 = vst [vmem:[%s164_s27 + $0x28] sm:$0xff] (%p51_p3), %v193_v5  ;;  %v197_v7 = vld [vmem:[%s170_s26 + $0x278] sm:$0xff] (%p51_p3) }
  0x15   : > { %196 = vst [vmem:[%s164_s27 + $0x30] sm:$0xff] %v195_v6  ;;  %198 = vst [vmem:[%s164_s27 + $0x38] sm:$0xff] %v197_v7 }
  0x16 PF: > { %p1079_p6 = scmp.ge.s32.totalorder %s1365_s16, 1  ;;  %p218_p7 = scmp.lt.s32.totalorder %s1365_s16, 14 }
  0x18   : > { %p219_p8 = pnand %p1079_p6, %p218_p7 }
  0x19   : > { %s225_s28 = sand.u32 (!%p219_p8), 1, %s1349_s12   ;;  %s1081_s29 = sshll.u32 (!%p219_p8), %s1357_s14, 6 }
  0x1a   : > { %222 = sbr.rel (%p219_p8) target bundleno = 371 (0x173), region = 47  ;;  %s1080_s30 = sshll.u32 (!%p219_p8), %s225_s28, 6 }
  0x1b   : > { %p271_p9 = scmp.lt.s32.totalorder (!%p219_p8), %s1081_s29, 831  ;;  %p298_p10 = scmp.eq.s32.totalorder (!%p219_p8), %s1357_s14, 0 }
  0x1c   : > { %s1443_s8 = scalar_lea.vmem (!%p219_p8), [#allocation2], %s1080_s30  ;;  %p1084_p11 = scmp.ne.s32.totalorder (!%p219_p8), %s1357_s14, 0 }
  0x21   : > { %s1652_s29 = smov (!%p271_p9, %s1081_s29), 831  ;;  %301 = sbr.rel (%p1084_p11) target bundleno = 40 (0x28), region = 55 }
  0x22   : > { %s1166_s4 = sshll.u32 %s1652_s29, 3  ;;  %v1367_v8 = vmov (!%p1084_p11), 0.0  }
  0x23   : > { %s1441_s7 = scalar_lea.vmem %s1642_s1, %s1166_s4  ;;  %302 = vst [vmem:[%s1643_s2] sm:$0xff] (!%p1084_p11), %v1367_v8  ;;  %303 = vst [vmem:[%s1643_s2 + $0x8] sm:$0xff] (!%p1084_p11), %v1367_v8 }
  0x24   : > { %304 = vst [vmem:[%s1643_s2 + $0x10] sm:$0xff] (!%p1084_p11), %v1367_v8  ;;  %305 = vst [vmem:[%s1643_s2 + $0x18] sm:$0xff] (!%p1084_p11), %v1367_v8 }
  0x25   : > { %306 = vst [vmem:[%s1643_s2 + $0x20] sm:$0xff] (!%p1084_p11), %v1367_v8  ;;  %307 = vst [vmem:[%s1643_s2 + $0x28] sm:$0xff] (!%p1084_p11), %v1367_v8 }
  0x26   : > { %308 = vst [vmem:[%s1643_s2 + $0x30] sm:$0xff] (!%p1084_p11), %v1367_v8  ;;  %309 = vst [vmem:[%s1643_s2 + $0x38] sm:$0xff] (!%p1084_p11), %v1367_v8 }
  0x28 PF: > { %314 = sbr.rel (!%p298_p10) target bundleno = 47 (0x2f), region = 59  ;;  %v315_v9 = vlaneseq (%p298_p10)  ;;  %v1368_v10 = vmov (%p298_p10), 0.0  }
  0x2a   : > { %vm317_vm0 = vcmp.lt.s32.totalorder (%p298_p10), %v315_v9, 256 }
  0x2b   : > { %319 = vst.msk [vmem:[%s1644_s3] sm:$0x3] (%p298_p10), %vm317_vm0, %v1368_v10 }
  0x2f PF: > { %v1219_v11 = vld [vmem:[%s1441_s7 + $0x4] ss:$8 sps:$4 sm:$0xff]   ;;  %v1223_v13 = vld [vmem:[%s1441_s7] ss:$8 sps:$4 sm:$0xff]   ;;  %v1225_v15 = vld [vmem:[%s1441_s7 + $0x14] ss:$8 sps:$4 sm:$0xff]  }
  0x30   : > { %v1221_v12 = vld [vmem:[%s1441_s7 + $0x104] ss:$8 sps:$4 sm:$0xff]   ;;  %760 = vmatprep.subr.bf16.mxu1 %v1219_v11  ;;  %v1224_v14 = vld [vmem:[%s1441_s7 + $0x100] ss:$8 sps:$4 sm:$0xff]   ;;  %v1227_v16 = vld [vmem:[%s1441_s7 + $0x114] ss:$8 sps:$4 sm:$0xff]  }
  0x31   : > { %813 = vmatprep.subr.bf16.mxu0 %v1221_v12  ;;  %761 = vmatpush1.bf16.msra.mxu1 %v1223_v13  ;;  %v1229_v17 = vld [vmem:[%s1441_s7 + $0x10] ss:$8 sps:$4 sm:$0xff]   ;;  %v1231_v19 = vld [vmem:[%s1441_s7 + $0x24] ss:$8 sps:$4 sm:$0xff]   ;;  %v1235_v21 = vld [vmem:[%s1441_s7 + $0x20] ss:$8 sps:$4 sm:$0xff]  }
  0x32   : > { %814 = vmatpush1.bf16.msra.mxu0 %v1224_v14  ;;  %762 = vmatprep.subr.bf16.mxu1 %v1225_v15  ;;  %v1230_v18 = vld [vmem:[%s1441_s7 + $0x110] ss:$8 sps:$4 sm:$0xff]   ;;  %v1233_v20 = vld [vmem:[%s1441_s7 + $0x124] ss:$8 sps:$4 sm:$0xff]   ;;  %v1236_v22 = vld [vmem:[%s1441_s7 + $0x120] ss:$8 sps:$4 sm:$0xff]  }
  0x33   : > { %815 = vmatprep.subr.bf16.mxu0 %v1227_v16  ;;  %v1237_v23 = vld [vmem:[%s1441_s7 + $0x34] ss:$8 sps:$4 sm:$0xff]   ;;  %v1241_v25 = vld [vmem:[%s1441_s7 + $0x30] ss:$8 sps:$4 sm:$0xff]   ;;  %v1243_v27 = vld [vmem:[%s1441_s7 + $0x44] ss:$8 sps:$4 sm:$0xff]  }
  0x34   : > { %v1239_v24 = vld [vmem:[%s1441_s7 + $0x134] ss:$8 sps:$4 sm:$0xff]   ;;  %v1242_v26 = vld [vmem:[%s1441_s7 + $0x130] ss:$8 sps:$4 sm:$0xff]   ;;  %v1245_v28 = vld [vmem:[%s1441_s7 + $0x144] ss:$8 sps:$4 sm:$0xff]  }
  0x35   : > { %763 = vmatpush1.bf16.msra.mxu1 %v1229_v17  ;;  %v1247_v29 = vld [vmem:[%s1441_s7 + $0x40] ss:$8 sps:$4 sm:$0xff]   ;;  %v1249_v31 = vld [vmem:[%s1441_s7 + $0x54] ss:$8 sps:$4 sm:$0xff]   ;;  %v1253_v33 = vld [vmem:[%s1441_s7 + $0x50] ss:$8 sps:$4 sm:$0xff]  }
  0x36   : > { %816 = vmatpush1.bf16.msra.mxu0 %v1230_v18  ;;  %764 = vmatprep.subr.bf16.mxu1 %v1231_v19  ;;  %v1248_v30 = vld [vmem:[%s1441_s7 + $0x140] ss:$8 sps:$4 sm:$0xff]   ;;  %v1251_v32 = vld [vmem:[%s1441_s7 + $0x154] ss:$8 sps:$4 sm:$0xff]   ;;  %v1254_v34 = vld [vmem:[%s1441_s7 + $0x150] ss:$8 sps:$4 sm:$0xff]  }
  0x37   : > { %817 = vmatprep.subr.bf16.mxu0 %v1233_v20  ;;  %v1255_v35 = vld [vmem:[%s1441_s7 + $0x64] ss:$8 sps:$4 sm:$0xff]   ;;  %v1259_v37 = vld [vmem:[%s1441_s7 + $0x60] ss:$8 sps:$4 sm:$0xff]   ;;  %v1261_v39 = vld [vmem:[%s1441_s7 + $0x74] ss:$8 sps:$4 sm:$0xff]  }
  0x38   : > { %v1257_v36 = vld [vmem:[%s1441_s7 + $0x164] ss:$8 sps:$4 sm:$0xff]   ;;  %v1260_v38 = vld [vmem:[%s1441_s7 + $0x160] ss:$8 sps:$4 sm:$0xff]   ;;  %v1263_v40 = vld [vmem:[%s1441_s7 + $0x174] ss:$8 sps:$4 sm:$0xff]  }
  0x39   : > { %765 = vmatpush1.bf16.msra.mxu1 %v1235_v21  ;;  %v1265_v41 = vld [vmem:[%s1441_s7 + $0x70] ss:$8 sps:$4 sm:$0xff]   ;;  %v1267_v43 = vld [vmem:[%s1441_s7 + $0x84] ss:$8 sps:$4 sm:$0xff]   ;;  %v1271_v45 = vld [vmem:[%s1441_s7 + $0x80] ss:$8 sps:$4 sm:$0xff]  }
  0x3a   : > { %818 = vmatpush1.bf16.msra.mxu0 %v1236_v22  ;;  %766 = vmatprep.subr.bf16.mxu1 %v1237_v23  ;;  %v1266_v42 = vld [vmem:[%s1441_s7 + $0x170] ss:$8 sps:$4 sm:$0xff]   ;;  %v1269_v44 = vld [vmem:[%s1441_s7 + $0x184] ss:$8 sps:$4 sm:$0xff]   ;;  %v1272_v46 = vld [vmem:[%s1441_s7 + $0x180] ss:$8 sps:$4 sm:$0xff]  }
  0x3b   : > { %819 = vmatprep.subr.bf16.mxu0 %v1239_v24  ;;  %v1273_v47 = vld [vmem:[%s1441_s7 + $0x94] ss:$8 sps:$4 sm:$0xff]   ;;  %v1277_v49 = vld [vmem:[%s1441_s7 + $0x90] ss:$8 sps:$4 sm:$0xff]   ;;  %v1279_v51 = vld [vmem:[%s1441_s7 + $0xa4] ss:$8 sps:$4 sm:$0xff]  }
  0x3c   : > { %v1275_v48 = vld [vmem:[%s1441_s7 + $0x194] ss:$8 sps:$4 sm:$0xff]   ;;  %v1278_v50 = vld [vmem:[%s1441_s7 + $0x190] ss:$8 sps:$4 sm:$0xff]   ;;  %v1281_v52 = vld [vmem:[%s1441_s7 + $0x1a4] ss:$8 sps:$4 sm:$0xff]  }
  0x3d   : > { %767 = vmatpush1.bf16.msra.mxu1 %v1241_v25  ;;  %v1283_v53 = vld [vmem:[%s1441_s7 + $0xa0] ss:$8 sps:$4 sm:$0xff]   ;;  %v1285_v55 = vld [vmem:[%s1441_s7 + $0xb4] ss:$8 sps:$4 sm:$0xff]   ;;  %v1289_v57 = vld [vmem:[%s1441_s7 + $0xb0] ss:$8 sps:$4 sm:$0xff]  }
  0x3e   : > { %820 = vmatpush1.bf16.msra.mxu0 %v1242_v26  ;;  %768 = vmatprep.subr.bf16.mxu1 %v1243_v27  ;;  %v1284_v54 = vld [vmem:[%s1441_s7 + $0x1a0] ss:$8 sps:$4 sm:$0xff]   ;;  %v1287_v56 = vld [vmem:[%s1441_s7 + $0x1b4] ss:$8 sps:$4 sm:$0xff]   ;;  %v1290_v58 = vld [vmem:[%s1441_s7 + $0x1b0] ss:$8 sps:$4 sm:$0xff]  }
  0x3f   : > { %821 = vmatprep.subr.bf16.mxu0 %v1245_v28  ;;  %v1291_v59 = vld [vmem:[%s1441_s7 + $0xc4] ss:$8 sps:$4 sm:$0xff]   ;;  %v1295_v63 = vld [vmem:[%s1441_s7 + $0xc0] ss:$8 sps:$4 sm:$0xff]   ;;  %v1297_v1 = vld [vmem:[%s1441_s7 + $0xd4] ss:$8 sps:$4 sm:$0xff]  }
  0x40   : > { %v1317_v60 = vld [vmem:[%s1443_s8 + $0x4] ss:$16 sps:$4 sm:$0xff]   ;;  %v1320_v62 = vld [vmem:[%s1443_s8 + $0xc] ss:$16 sps:$4 sm:$0xff]   ;;  %v1296_v0 = vld [vmem:[%s1441_s7 + $0x1c0] ss:$8 sps:$4 sm:$0xff]  }
  0x41   : > { %769 = vmatpush1.bf16.msra.mxu1 %v1247_v29  ;;  %v1293_v61 = vld [vmem:[%s1441_s7 + $0x1c4] ss:$8 sps:$4 sm:$0xff]   ;;  %792 = vmatprep.mubr.bf16.mxu1 %v1317_v60  ;;  %v1299_v2 = vld [vmem:[%s1441_s7 + $0x1d4] ss:$8 sps:$4 sm:$0xff]   ;;  %v1301_v3 = vld [vmem:[%s1441_s7 + $0xd0] ss:$8 sps:$4 sm:$0xff]  }
  0x42   : > { %822 = vmatpush1.bf16.msra.mxu0 %v1248_v30  ;;  %770 = vmatprep.subr.bf16.mxu1 %v1249_v31  ;;  %v1302_v4 = vld [vmem:[%s1441_s7 + $0x1d0] ss:$8 sps:$4 sm:$0xff]   ;;  %v1303_v5 = vld [vmem:[%s1441_s7 + $0xe4] ss:$8 sps:$4 sm:$0xff]   ;;  %v1307_v7 = vld [vmem:[%s1441_s7 + $0xe0] ss:$8 sps:$4 sm:$0xff]  }
  0x43   : > { %823 = vmatprep.subr.bf16.mxu0 %v1251_v32  ;;  %845 = vmatprep.mubr.bf16.mxu0 %v1320_v62  ;;  %v1305_v6 = vld [vmem:[%s1441_s7 + $0x1e4] ss:$8 sps:$4 sm:$0xff]   ;;  %v1308_v8 = vld [vmem:[%s1441_s7 + $0x1e0] ss:$8 sps:$4 sm:$0xff]   ;;  %v1309_v9 = vld [vmem:[%s1441_s7 + $0xf4] ss:$8 sps:$4 sm:$0xff]  }
  0x44   : > { %v1311_v10 = vld [vmem:[%s1441_s7 + $0x1f4] ss:$8 sps:$4 sm:$0xff]   ;;  %v1313_v11 = vld [vmem:[%s1441_s7 + $0xf0] ss:$8 sps:$4 sm:$0xff]   ;;  %v320_v20 = vld [vmem:[%s1643_s2] sm:$0xff]  ;;  %p1158_p12 = scmp.ne.s32.totalorder %s1357_s14, 12 }
  0x45   : > { %771 = vmatpush1.bf16.msra.mxu1 %v1253_v33  ;;  %v1314_v12 = vld [vmem:[%s1441_s7 + $0x1f0] ss:$8 sps:$4 sm:$0xff]   ;;  %v1321_v15 = vld [vmem:[%s1443_s8 + $0x24] ss:$16 sps:$4 sm:$0xff]   ;;  %v1323_v16 = vld [vmem:[%s1443_s8 + $0x2c] ss:$16 sps:$4 sm:$0xff]  }
  0x46   : > { %824 = vmatpush1.bf16.msra.mxu0 %v1254_v34  ;;  %772 = vmatprep.subr.bf16.mxu1 %v1255_v35  ;;  %v1315_v13 = vld [vmem:[%s1443_s8] ss:$16 sps:$4 sm:$0xff]   ;;  %v1318_v14 = vld [vmem:[%s1443_s8 + $0x8] ss:$16 sps:$4 sm:$0xff]  }
  0x47   : > { %825 = vmatprep.subr.bf16.mxu0 %v1257_v36  ;;  %v1325_v17 = vld [vmem:[%s1443_s8 + $0x20] ss:$16 sps:$4 sm:$0xff]   ;;  %v1326_v18 = vld [vmem:[%s1443_s8 + $0x28] ss:$16 sps:$4 sm:$0xff]  }
  0x48   : > { %v321_v24 = vld [vmem:[%s1643_s2 + $0x8] sm:$0xff]  ;;  %v322_v28 = vld [vmem:[%s1643_s2 + $0x10] sm:$0xff]  ;;  %v323_v33 = vld [vmem:[%s1643_s2 + $0x18] sm:$0xff] }
  0x49   : > { %773 = vmatpush1.bf16.msra.mxu1 %v1259_v37 }
  0x4a   : > { %826 = vmatpush1.bf16.msra.mxu0 %v1260_v38  ;;  %774 = vmatprep.subr.bf16.mxu1 %v1261_v39 }
  0x4b   : > { %827 = vmatprep.subr.bf16.mxu0 %v1263_v40  ;;  %v324_v40 = vld [vmem:[%s1643_s2 + $0x20] sm:$0xff] }
  0x4d   : > { %775 = vmatpush1.bf16.msra.mxu1 %v1265_v41 }
  0x4e   : > { %828 = vmatpush1.bf16.msra.mxu0 %v1266_v42  ;;  %776 = vmatprep.subr.bf16.mxu1 %v1267_v43 }
  0x4f   : > { %829 = vmatprep.subr.bf16.mxu0 %v1269_v44  ;;  %v325_v44 = vld [vmem:[%s1643_s2 + $0x28] sm:$0xff] }
  0x51   : > { %777 = vmatpush1.bf16.msra.mxu1 %v1271_v45 }
  0x52   : > { %830 = vmatpush1.bf16.msra.mxu0 %v1272_v46  ;;  %778 = vmatprep.subr.bf16.mxu1 %v1273_v47 }
  0x53   : > { %831 = vmatprep.subr.bf16.mxu0 %v1275_v48  ;;  %v326_v48 = vld [vmem:[%s1643_s2 + $0x30] sm:$0xff] }
  0x55   : > { %779 = vmatpush1.bf16.msra.mxu1 %v1277_v49 }
  0x56   : > { %832 = vmatpush1.bf16.msra.mxu0 %v1278_v50  ;;  %780 = vmatprep.subr.bf16.mxu1 %v1279_v51 }
  0x57   : > { %833 = vmatprep.subr.bf16.mxu0 %v1281_v52 }
  0x59   : > { %781 = vmatpush1.bf16.msra.mxu1 %v1283_v53  ;;  %v327_v53 = vld [vmem:[%s1643_s2 + $0x38] sm:$0xff] }
  0x5a   : > { %834 = vmatpush1.bf16.msra.mxu0 %v1284_v54  ;;  %782 = vmatprep.subr.bf16.mxu1 %v1285_v55 }
  0x5b   : > { %835 = vmatprep.subr.bf16.mxu0 %v1287_v56 }
  0x5d   : > { %783 = vmatpush1.bf16.msra.mxu1 %v1289_v57 }
  0x5e   : > { %836 = vmatpush1.bf16.msra.mxu0 %v1290_v58  ;;  %784 = vmatprep.subr.bf16.mxu1 %v1291_v59 }
  0x5f   : > { %837 = vmatprep.subr.bf16.mxu0 %v1293_v61 }
  0x61   : > { %785 = vmatpush1.bf16.msra.mxu1 %v1295_v63 }
  0x62   : > { %838 = vmatpush1.bf16.msra.mxu0 %v1296_v0  ;;  %786 = vmatprep.subr.bf16.mxu1 %v1297_v1 }
  0x63   : > { %839 = vmatprep.subr.bf16.mxu0 %v1299_v2 }
  0x65   : > { %787 = vmatpush1.bf16.msra.mxu1 %v1301_v3 }
  0x66   : > { %840 = vmatpush1.bf16.msra.mxu0 %v1302_v4  ;;  %788 = vmatprep.subr.bf16.mxu1 %v1303_v5 }
  0x67   : > { %841 = vmatprep.subr.bf16.mxu0 %v1305_v6 }
  0x69   : > { %789 = vmatpush1.bf16.msra.mxu1 %v1307_v7 }
  0x6a   : > { %842 = vmatpush1.bf16.msra.mxu0 %v1308_v8  ;;  %790 = vmatprep.subr.bf16.mxu1 %v1309_v9 }
  0x6b   : > { %843 = vmatprep.subr.bf16.mxu0 %v1311_v10 }
  0x6d   : > { %791 = vmatpush1.bf16.msra.mxu1 %v1313_v11 }
  0x6e   : > { %844 = vmatpush1.bf16.msra.mxu0 %v1314_v12 }
  0x70   : > { %793 = vmatmul.mubr.bf16.vlgmr.msra.gmra.mrb[0].mxu1 %v1315_v13  ;;  %v1369_v13 = vmov (!%p1158_p12), 1966171168  }
  0x71   : > { %846 = vmatmul.mubr.bf16.vlgmr.msra.gmra.mrb[0].mxu0 %v1318_v14  ;;  %802 = vmatprep.mubr.bf16.mxu1 %v1321_v15  ;;  %v917_v14 = vunpack.c.l.s4 (!%p1158_p12), %v1369_v13  ;;  %v919_v15 = vlaneseq (!%p1158_p12) }
  0x72   : > { %855 = vmatprep.mubr.bf16.mxu0 %v1323_v16 }
  0x73   : > { %vm934_vm1 = vcmp.lt.s32.totalorder (!%p1158_p12), %v919_v15, 256 }
  0x78   : > { %803 = vmatmul.mubr.bf16.gmra.mrb[4].mxu1 %v1325_v17 }
  0x79   : > { %856 = vmatmul.mubr.bf16.gmra.mrb[4].mxu0 %v1326_v18 }
 0x143   : > { %v794_v19 = vpop.f32.mrb[0].mxu1 }
 0x144   : > { %v847_v21 = vpop.f32.mrb[0].mxu0  ;;  %v796_v23 = vpop.f32.mrb[1].mxu1 }
 0x145   : > { %v848_v22 = vadd.f32 %v847_v21, %v794_v19  ;;  %v849_v25 = vpop.f32.mrb[1].mxu0  ;;  %v798_v27 = vpop.f32.mrb[2].mxu1  ;;  %v920_v21 = vshrl.u32 (!%p1158_p12), %v919_v15, 7 }
 0x146   : > { %v850_v26 = vadd.f32 %v849_v25, %v796_v23  ;;  %v851_v29 = vpop.f32.mrb[2].mxu0  ;;  %v800_v32 = vpop.f32.mrb[3].mxu1 }
 0x147   : > { %v866_v30 = vadd.f32 %v848_v22, %v320_v20  ;;  %v852_v31 = vadd.f32 %v851_v29, %v798_v27  ;;  %v853_v34 = vpop.f32.mrb[3].mxu0  ;;  %v918_v20 = vunpack.c.0.s8 (!%p1158_p12), %v917_v14  ;;  %v886_v29 = vld [vmem:[%s1644_s3] sm:$0x3] (!%p1158_p12) }
 0x148   : > { %v867_v35 = vadd.f32 %v850_v26, %v321_v24  ;;  %v854_v36 = vadd.f32 %v853_v34, %v800_v32 }
 0x149   : > { %874 = vst [vmem:[%s1643_s2] sm:$0xff] %v866_v30  ;;  %v868_v37 = vadd.f32 %v852_v31, %v322_v28  ;;  %v921_v26 = vsub.s32 (!%p1158_p12), %v918_v20, %v920_v21 }
 0x14a   : > { %875 = vst [vmem:[%s1643_s2 + $0x8] sm:$0xff] %v867_v35  ;;  %v869_v38 = vadd.f32 %v854_v36, %v323_v33 }
 0x14b   : > { %876 = vst [vmem:[%s1643_s2 + $0x10] sm:$0xff] %v868_v37  ;;  %v804_v39 = vpop.f32.mrb[4].mxu1 }
 0x14c   : > { %877 = vst [vmem:[%s1643_s2 + $0x18] sm:$0xff] %v869_v38  ;;  %v857_v41 = vpop.f32.mrb[4].mxu0  ;;  %v806_v43 = vpop.f32.mrb[5].mxu1 }
 0x14d   : > { %v858_v42 = vadd.f32 %v857_v41, %v804_v39  ;;  %v859_v45 = vpop.f32.mrb[5].mxu0  ;;  %v808_v47 = vpop.f32.mrb[6].mxu1 }
 0x14e   : > { %v860_v46 = vadd.f32 %v859_v45, %v806_v43  ;;  %v861_v49 = vpop.f32.mrb[6].mxu0  ;;  %v810_v52 = vpop.f32.mrb[7].mxu1  ;;  %885 = sbr.rel (%p1158_p12) target bundleno = 371 (0x173), region = 63 }
 0x14f   : > { %v870_v50 = vadd.f32 %v858_v42, %v324_v40  ;;  %v862_v51 = vadd.f32 %v861_v49, %v808_v47  ;;  %v863_v54 = vpop.f32.mrb[7].mxu0 }
 0x150   : > { %v871_v55 = vadd.f32 %v860_v46, %v325_v44  ;;  %v864_v56 = vadd.f32 %v863_v54, %v810_v52  ;;  %v887_v59 = vld [vmem:[%s1643_s2] sm:$0xff] (!%p1158_p12) }
 0x151   : > { %878 = vst [vmem:[%s1643_s2 + $0x20] sm:$0xff] %v870_v50  ;;  %v872_v57 = vadd.f32 %v862_v51, %v326_v48  ;;  %v888_v60 = vld [vmem:[%s1643_s2 + $0x8] sm:$0xff] (!%p1158_p12) }
 0x152   : > { %879 = vst [vmem:[%s1643_s2 + $0x28] sm:$0xff] %v871_v55  ;;  %v873_v58 = vadd.f32 %v864_v56, %v327_v53  ;;  %v889_v61 = vld [vmem:[%s1643_s2 + $0x10] sm:$0xff] (!%p1158_p12) }
 0x153   : > { %880 = vst [vmem:[%s1643_s2 + $0x30] sm:$0xff] %v872_v57  ;;  %v890_v62 = vld [vmem:[%s1643_s2 + $0x18] sm:$0xff] (!%p1158_p12)  ;;  %v895_v1 = vadd.f32 (!%p1158_p12), %v889_v61, %v887_v59 }
 0x154   : > { %881 = vst [vmem:[%s1643_s2 + $0x38] sm:$0xff] %v873_v58  ;;  %v904_v2 = vadd.f32 (!%p1158_p12), %v890_v62, %v888_v60 }
 0x158   : > { %v891_v63 = vld [vmem:[%s1643_s2 + $0x20] sm:$0xff] }
 0x159   : > { %v892_v0 = vld [vmem:[%s1643_s2 + $0x28] sm:$0xff]  ;;  %v896_v5 = vadd.f32 %v895_v1, %v891_v63 }
 0x15a   : > { %v893_v3 = vld [vmem:[%s1643_s2 + $0x30] sm:$0xff]  ;;  %v905_v6 = vadd.f32 %v904_v2, %v892_v0 }
 0x15b   : > { %v894_v4 = vld [vmem:[%s1643_s2 + $0x38] sm:$0xff]  ;;  %v897_v7 = vadd.f32 %v896_v5, %v893_v3 }
 0x15c   : > { %v906_v8 = vadd.f32 %v905_v6, %v894_v4 }
 0x15d   : > { %v898_v9 = vrot.slane %v897_v7, 4 }
 0x15e   : > { %v907_v10 = vrot.slane %v906_v8, 4 }
 0x15f   : > { %v899_v11 = vadd.f32 %v898_v9, %v897_v7 }
 0x160   : > { %v908_v12 = vadd.f32 %v907_v10, %v906_v8 }
 0x161   : > { %v900_v16 = vrot.slane %v899_v11, 2 }
 0x162   : > { %v909_v17 = vrot.slane %v908_v12, 2 }
 0x163   : > { %v901_v18 = vadd.f32 %v900_v16, %v899_v11 }
 0x164   : > { %v910_v19 = vadd.f32 %v909_v17, %v908_v12 }
 0x165   : > { %v902_v22 = vrot.slane %v901_v18, 1 }
 0x166   : > { %v911_v23 = vrot.slane %v910_v19, 1 }
 0x167   : > { %v903_v24 = vadd.f32 %v902_v22, %v901_v18 }
 0x168   : > { %v912_v25 = vadd.f32 %v911_v23, %v910_v19 }
 0x16a   : > { %v915_v27 = vcombine.low %v903_v24, %v912_v25 }
 0x16c   : > { %v922_v28 = vrot.slane %v915_v27, %v921_v26 }
 0x16e   : > { %v929_v30 = vrot.slane %v922_v28, %v921_v26 }
 0x170   : > { %v931_v31 = vadd.f32 %v929_v30, %v886_v29 }
 0x172   : > { %936 = vst.msk [vmem:[%s1644_s3] sm:$0x3] %vm934_vm1, %v931_v31 }
 0x173 PF: > { %s14_s16 = sadd.s32 1, %s1365_s16   ;;  %s1645_s12 = smov %s1353_s13 }
 0x174   : > { %p11_p13 = scmp.ge.s32.totalorder %s14_s16, 15   ;;  %s1646_s13 = smov %s1425_s20 }
 0x175   : > { %s1647_s14 = smov %s1361_s15  ;;  %s1648_s15 = smov %s1650_s17 }
 0x176   :  { %13 = sbr.rel (!%p11_p13) target bundleno = 3 (0x3), region = 113 }

// kernel: fpn1_forward.31
= control target key start
LH: loop header
LB: loop body
LE: loop exit
PB: predicated region body
PF: predicated region fallthrough
CT: control target
= control target key end

     0   :  { %v15_v0 = vlaneseq  ;;  %v129_v5 = vmov 0.0   ;;  %v130_v44 = vmov 1966171168   ;;  %s190_s1 = inlined_call_operand.vmem [shape: f32[1,256], index: 1, kind: input, shape index: {}]   ;;  %s191_s2 = inlined_call_operand.vmem [shape: f32[1,256], index: 2, kind: output, shape index: {}]   ;;  %s192_s0 = inlined_call_operand.vmem [shape: f32[32,256], index: 0, kind: input, shape index: {}]  }
   0x1   :  { %v20_v1 = vld [vmem:[%s190_s1] sm:$0x3]  ;;  %v23_v7 = vld [vmem:[%s192_s0 + $0x8] sm:$0xff]  ;;  %v24_v10 = vld [vmem:[%s192_s0 + $0x10] sm:$0xff]  ;;  %v103_v45 = vunpack.c.l.s4 %v130_v44 }
   0x2   :  { %vm149_vm0 = vcmp.lt.s32.totalorder %v15_v0, 256  ;;  %v21_v3 = vmul.f32 0.03125, %v20_v1  ;;  %v32_v4 = vshrl.u32 %v15_v0, 7  ;;  %v22_v6 = vld [vmem:[%s192_s0] sm:$0xff]  ;;  %v25_v11 = vld [vmem:[%s192_s0 + $0x18] sm:$0xff]  ;;  %v27_v13 = vld [vmem:[%s192_s0 + $0x28] sm:$0xff] }
   0x3   :  { %19 = vst.msk [vmem:[%s191_s2] sm:$0x3] %vm149_vm0, %v129_v5  ;;  %v26_v12 = vld [vmem:[%s192_s0 + $0x20] sm:$0xff]  ;;  %v28_v14 = vld [vmem:[%s192_s0 + $0x30] sm:$0xff]  ;;  %v29_v15 = vld [vmem:[%s192_s0 + $0x38] sm:$0xff]  ;;  %v104_v50 = vunpack.c.0.s8 %v103_v45 }
   0x4   :  { %v33_v8 = vsub.s32 0, %v32_v4  ;;  %v37_v9 = vsub.s32 1, %v32_v4 }
   0x5   :  { %v107_v55 = vsub.s32 %v104_v50, %v32_v4 }
   0x6   :  { %v34_v16 = vrot.slane %v21_v3, %v33_v8  ;;  %v38_v17 = vrot.slane %v21_v3, %v37_v9 }
   0x8   :  { %v41_v18 = vsub.f32 %v22_v6, %v34_v16  ;;  %v42_v19 = vsub.f32 %v23_v7, %v38_v17  ;;  %v43_v20 = vsub.f32 %v24_v10, %v34_v16  ;;  %v44_v21 = vsub.f32 %v25_v11, %v38_v17 }
   0x9   :  { %v45_v22 = vsub.f32 %v26_v12, %v34_v16  ;;  %v46_v23 = vsub.f32 %v27_v13, %v38_v17  ;;  %v47_v24 = vsub.f32 %v28_v14, %v34_v16  ;;  %v48_v25 = vsub.f32 %v29_v15, %v38_v17 }
   0xa   :  { %v73_v26 = vmul.f32 %v41_v18, %v41_v18  ;;  %v74_v27 = vmul.f32 %v42_v19, %v42_v19  ;;  %v75_v28 = vmul.f32 %v43_v20, %v43_v20  ;;  %v76_v29 = vmul.f32 %v44_v21, %v44_v21  ;;  %v72_v58 = vld [vmem:[%s191_s2] sm:$0x3] }
   0xb   :  { %v77_v30 = vmul.f32 %v45_v22, %v45_v22  ;;  %v78_v31 = vmul.f32 %v46_v23, %v46_v23  ;;  %v79_v32 = vmul.f32 %v47_v24, %v47_v24  ;;  %v80_v33 = vmul.f32 %v48_v25, %v48_v25 }
   0xc   :  { %v81_v34 = vadd.f32 %v75_v28, %v73_v26  ;;  %v90_v35 = vadd.f32 %v76_v29, %v74_v27 }
   0xe   :  { %v82_v36 = vadd.f32 %v81_v34, %v77_v30  ;;  %v91_v37 = vadd.f32 %v90_v35, %v78_v31 }
  0x10   :  { %v83_v38 = vadd.f32 %v82_v36, %v79_v32  ;;  %v92_v39 = vadd.f32 %v91_v37, %v80_v33 }
  0x12   :  { %v84_v40 = vrot.slane %v83_v38, 4  ;;  %v93_v41 = vrot.slane %v92_v39, 4 }
  0x14   :  { %v85_v42 = vadd.f32 %v84_v40, %v83_v38  ;;  %v94_v43 = vadd.f32 %v93_v41, %v92_v39 }
  0x16   :  { %v86_v46 = vrot.slane %v85_v42, 2  ;;  %v95_v47 = vrot.slane %v94_v43, 2 }
  0x18   :  { %v87_v48 = vadd.f32 %v86_v46, %v85_v42  ;;  %v96_v49 = vadd.f32 %v95_v47, %v94_v43 }
  0x1a   :  { %v88_v51 = vrot.slane %v87_v48, 1  ;;  %v97_v52 = vrot.slane %v96_v49, 1 }
  0x1c   :  { %v89_v53 = vadd.f32 %v88_v51, %v87_v48  ;;  %v98_v54 = vadd.f32 %v97_v52, %v96_v49 }
  0x1e   :  { %v101_v56 = vcombine.low %v89_v53, %v98_v54 }
  0x20   :  { %v108_v57 = vrot.slane %v101_v56, %v107_v55 }
  0x22   :  { %v115_v59 = vrot.slane %v108_v57, %v107_v55 }
  0x24   :  { %v117_v60 = vadd.f32 %v115_v59, %v72_v58 }
  0x26   :  { %122 = vst.msk [vmem:[%s191_s2] sm:$0x3] %vm149_vm0, %v117_v60 }

// kernel: fpn1_forward.32
= control target key start
LH: loop header
LB: loop body
LE: loop exit
PB: predicated region body
PF: predicated region fallthrough
CT: control target
= control target key end

     0   :  { %v40_v3 = vlaneseq  ;;  %s189_s2 = inlined_call_operand.vmem [shape: f32[1,256], index: 2, kind: input, shape index: {}]   ;;  %s190_s1 = inlined_call_operand.vmem [shape: f32[1,256], index: 1, kind: input, shape index: {}]   ;;  %s191_s3 = inlined_call_operand.vmem [shape: f32[1,256], index: 3, kind: input, shape index: {}]   ;;  %s192_s0 = inlined_call_operand.vmem [shape: f32[32,256], index: 0, kind: input, shape index: {}]   ;;  %s193_s4 = inlined_call_operand.vmem [shape: f32[1,256], index: 4, kind: input, shape index: {}]   ;;  %s194_s5 = inlined_call_operand.vmem [shape: f32[32,256], index: 5, kind: output, shape index: {}]  }
   0x1   :  { %v22_v0 = vld [vmem:[%s189_s2] sm:$0x3]  ;;  %v32_v14 = vld [vmem:[%s192_s0 + $0x8] sm:$0xff]  ;;  %v33_v15 = vld [vmem:[%s192_s0 + $0x10] sm:$0xff] }
   0x2   :  { %v23_v1 = vmul.f32 0.03125, %v22_v0  ;;  %v41_v4 = vshrl.u32 %v40_v3, 7  ;;  %v20_v5 = vld [vmem:[%s190_s1] sm:$0x3]  ;;  %v34_v16 = vld [vmem:[%s192_s0 + $0x18] sm:$0xff]  ;;  %v36_v21 = vld [vmem:[%s192_s0 + $0x28] sm:$0xff] }
   0x3   :  { %v26_v6 = vld [vmem:[%s191_s3] sm:$0x3]  ;;  %v21_v7 = vmul.f32 0.03125, %v20_v5  ;;  %v37_v22 = vld [vmem:[%s192_s0 + $0x30] sm:$0xff]  ;;  %v38_v23 = vld [vmem:[%s192_s0 + $0x38] sm:$0xff] }
   0x4   :  { %v24_v2 = vadd.f32 1e-05, %v23_v1  ;;  %v42_v8 = vsub.s32 0, %v41_v4  ;;  %v46_v9 = vsub.s32 1, %v41_v4  ;;  %v28_v12 = vld [vmem:[%s193_s4] sm:$0x3] }
   0x5   :  { %v31_v13 = vld [vmem:[%s192_s0] sm:$0xff] }
   0x6   :  { %97 = vrsqrt.f32 %v24_v2  ;;  %v35_v20 = vld [vmem:[%s192_s0 + $0x20] sm:$0xff] }
  0x10   :  { %v98_v10 = vpop.eup %97 }
  0x11   :  { %v27_v11 = vmul.f32 %v98_v10, %v26_v6 }
  0x13   :  { %v29_v17 = vmul.f32 %v27_v11, %v21_v7  ;;  %v43_v18 = vrot.slane %v27_v11, %v42_v8  ;;  %v47_v19 = vrot.slane %v27_v11, %v46_v9 }
  0x15   :  { %v30_v24 = vsub.f32 %v28_v12, %v29_v17  ;;  %v50_v25 = vmul.f32 %v43_v18, %v31_v13  ;;  %v51_v26 = vmul.f32 %v47_v19, %v32_v14  ;;  %v52_v27 = vmul.f32 %v43_v18, %v33_v15 }
  0x16   :  { %v53_v28 = vmul.f32 %v47_v19, %v34_v16  ;;  %v54_v29 = vmul.f32 %v43_v18, %v35_v20  ;;  %v55_v30 = vmul.f32 %v47_v19, %v36_v21  ;;  %v56_v31 = vmul.f32 %v43_v18, %v37_v22 }
  0x17   :  { %v62_v32 = vrot.slane %v30_v24, %v42_v8  ;;  %v66_v33 = vrot.slane %v30_v24, %v46_v9  ;;  %v57_v34 = vmul.f32 %v47_v19, %v38_v23 }
  0x19   :  { %v69_v35 = vadd.f32 %v62_v32, %v50_v25  ;;  %v70_v36 = vadd.f32 %v66_v33, %v51_v26  ;;  %v71_v37 = vadd.f32 %v62_v32, %v52_v27  ;;  %v72_v38 = vadd.f32 %v66_v33, %v53_v28 }
  0x1a   :  { %v73_v39 = vadd.f32 %v62_v32, %v54_v29  ;;  %v74_v40 = vadd.f32 %v66_v33, %v55_v30  ;;  %v75_v41 = vadd.f32 %v62_v32, %v56_v31  ;;  %v76_v42 = vadd.f32 %v66_v33, %v57_v34 }
  0x1b   :  { %v77_v43 = vmax.f32 %v69_v35, 0.0  ;;  %v78_v44 = vmax.f32 %v70_v36, 0.0  ;;  %v79_v45 = vmax.f32 %v71_v37, 0.0  ;;  %v80_v46 = vmax.f32 %v72_v38, 0.0 }
  0x1c   :  { %v81_v47 = vmax.f32 %v73_v39, 0.0  ;;  %v82_v48 = vmax.f32 %v74_v40, 0.0  ;;  %v83_v49 = vmax.f32 %v75_v41, 0.0  ;;  %v84_v50 = vmax.f32 %v76_v42, 0.0 }
  0x1d   :  { %85 = vst [vmem:[%s194_s5] sm:$0xff] %v77_v43  ;;  %86 = vst [vmem:[%s194_s5 + $0x8] sm:$0xff] %v78_v44 }
  0x1e   :  { %87 = vst [vmem:[%s194_s5 + $0x10] sm:$0xff] %v79_v45  ;;  %88 = vst [vmem:[%s194_s5 + $0x18] sm:$0xff] %v80_v46 }
  0x1f   :  { %89 = vst [vmem:[%s194_s5 + $0x20] sm:$0xff] %v81_v47  ;;  %90 = vst [vmem:[%s194_s5 + $0x28] sm:$0xff] %v82_v48 }
  0x20   :  { %91 = vst [vmem:[%s194_s5 + $0x30] sm:$0xff] %v83_v49  ;;  %92 = vst [vmem:[%s194_s5 + $0x38] sm:$0xff] %v84_v50 }

// kernel: fpn1_forward.33
= control target key start
LH: loop header
LB: loop body
LE: loop exit
PB: predicated region body
PF: predicated region fallthrough
CT: control target
= control target key end

     0   :  { %s1561_s12 = smov 0   ;;  %s1563_s13 = smov 0   ;;  %s1878_s0 = inlined_call_operand.vmem [shape: bf16[8,12800], index: 0, kind: input, shape index: {}]   ;;  %s1879_s1 = inlined_call_operand.vmem [shape: bf16[12800,512], index: 1, kind: input, shape index: {}]   ;;  %s1880_s2 = inlined_call_operand.vmem [shape: f32[8,512], index: 2, kind: output, shape index: {0}]   ;;  %s1881_s3 = inlined_call_operand.vmem [shape: f32[1,512], index: 3, kind: output, shape index: {1}]  }
   0x1   :  { %s1565_s14 = smov 0   ;;  %s1567_s15 = smov 0  }
   0x2   :  { %s1569_s16 = smov 0   ;;  %s1571_s17 = smov 0  }
   0x3   :  { %s1573_s18 = smov 0  }
   0x4 LB: > { %s26_s19 = sadd.s32 1, %s1528_s16  ;;  %s33_s20 = sadd.s32 1, %s1532_s17  ;;  %s1536_s18 = sphi %s1573_s18, %s14_s18   ;;  %s1532_s17 = sphi %s1571_s17, %s1887_s17   ;;  %s1528_s16 = sphi %s1569_s16, %s1886_s16   ;;  %s1524_s15 = sphi %s1567_s15, %s1885_s15   ;;  %s1520_s14 = sphi %s1565_s14, %s1884_s14   ;;  %s1516_s13 = sphi %s1563_s13, %s1883_s13   ;;  %s1512_s12 = sphi %s1561_s12, %s1882_s12  }
   0x5   : > { %p27_p0 = scmp.ge.s32.totalorder %s26_s19, 25  ;;  %p77_p1 = scmp.ne.s32.totalorder %s1516_s13, %s1512_s12 }
   0x6   : > { %p78_p2 = scmp.eq.s32.totalorder %s1536_s18, 0  ;;  %s70_s24 = sadd.s32 1, %s1516_s13 }
   0x7   : > { %s1889_s19 = smov (%p27_p0, %s26_s19), 0  ;;  %s1891_s20 = smov (!%p27_p0, %s33_s20), %s1532_s17 }
   0x8   : > { %p79_p3 = por %p78_p2, %p77_p1  ;;  %p35_p4 = scmp.ge.s32.totalorder %s1891_s20, 2 }
   0x9   : > { %s65_s21 = ssub.s32 %s1528_s16, %s1889_s19  ;;  %p1235_p6 = scmp.ge.s32.totalorder %s1536_s18, 50 }
   0xa   : > { %s1893_s20 = smov (%p35_p4, %s1891_s20), 0 }
   0xb   : > { %s66_s22 = ssub.s32 %s1532_s17, %s1893_s20  ;;  %157 = sbr.rel (%p1235_p6) target bundleno = 57 (0x39), region = 16 }
   0xc   : > { %s67_s23 = sor.u32 %s66_s22, %s65_s21 }
   0xd   : > { %p68_p5 = scmp.eq.s32.totalorder %s67_s23, 0 }
   0xf   : > { %s1612_s25 = scalar_select %p68_p5, %s1516_s13, %s70_s24  }
  0x12   : > { %173 = sbr.rel (!%p79_p3) target bundleno = 57 (0x39), region = 24  ;;  %s175_s26 = sand.u32 (%p79_p3), 1, %s1516_s13  }
  0x13   : > { %s1238_s27 = sshll.u32 (%p79_p3), %s1532_s17, 1  ;;  %s1236_s28 = sshll.u32 (%p79_p3), %s175_s26, 9 }
  0x14   : > { %s1321_s29 = sshll.u32 (%p79_p3), %s1528_s16, 8  ;;  %s1626_s8 = scalar_lea.vmem (%p79_p3), [#allocation2], %s1236_s28 }
  0x15   : > { %s181_s30 = sadd.s32 (%p79_p3), %s1321_s29, %s1238_s27 }
  0x16   : > { %s1240_s4 = sshll.u32 (%p79_p3), %s181_s30, 2 }
  0x17   : > { %s1621_s7 = scalar_lea.vmem (%p79_p3), %s1879_s1, %s1240_s4 }
  0x18   : > { %v337_v0 = vld [vmem:[%s1621_s7] sm:$0xff] (%p79_p3)  ;;  %v339_v1 = vld [vmem:[%s1621_s7 + $0x10] sm:$0xff] (%p79_p3) }
  0x19   : > { %v341_v2 = vld [vmem:[%s1621_s7 + $0x20] sm:$0xff]  ;;  %338 = vst [vmem:[%s1626_s8] sm:$0xff] %v337_v0  ;;  %340 = vst [vmem:[%s1626_s8 + $0x8] sm:$0xff] %v339_v1  ;;  %v343_v3 = vld [vmem:[%s1621_s7 + $0x30] sm:$0xff] }
  0x1a   : > { %342 = vst [vmem:[%s1626_s8 + $0x10] sm:$0xff] %v341_v2  ;;  %v345_v4 = vld [vmem:[%s1621_s7 + $0x40] sm:$0xff]  ;;  %v347_v5 = vld [vmem:[%s1621_s7 + $0x50] sm:$0xff]  ;;  %344 = vst [vmem:[%s1626_s8 + $0x18] sm:$0xff] %v343_v3 }
  0x1b   : > { %346 = vst [vmem:[%s1626_s8 + $0x20] sm:$0xff] %v345_v4  ;;  %348 = vst [vmem:[%s1626_s8 + $0x28] sm:$0xff] %v347_v5  ;;  %v349_v6 = vld [vmem:[%s1621_s7 + $0x60] sm:$0xff]  ;;  %v351_v7 = vld [vmem:[%s1621_s7 + $0x70] sm:$0xff] }
  0x1c   : > { %v353_v8 = vld [vmem:[%s1621_s7 + $0x80] sm:$0xff]  ;;  %350 = vst [vmem:[%s1626_s8 + $0x30] sm:$0xff] %v349_v6  ;;  %352 = vst [vmem:[%s1626_s8 + $0x38] sm:$0xff] %v351_v7  ;;  %v355_v9 = vld [vmem:[%s1621_s7 + $0x90] sm:$0xff] }
  0x1d   : > { %354 = vst [vmem:[%s1626_s8 + $0x40] sm:$0xff] %v353_v8  ;;  %v357_v10 = vld [vmem:[%s1621_s7 + $0xa0] sm:$0xff]  ;;  %v359_v11 = vld [vmem:[%s1621_s7 + $0xb0] sm:$0xff]  ;;  %356 = vst [vmem:[%s1626_s8 + $0x48] sm:$0xff] %v355_v9 }
  0x1e   : > { %358 = vst [vmem:[%s1626_s8 + $0x50] sm:$0xff] %v357_v10  ;;  %360 = vst [vmem:[%s1626_s8 + $0x58] sm:$0xff] %v359_v11  ;;  %v361_v12 = vld [vmem:[%s1621_s7 + $0xc0] sm:$0xff]  ;;  %v363_v13 = vld [vmem:[%s1621_s7 + $0xd0] sm:$0xff] }
  0x1f   : > { %v365_v14 = vld [vmem:[%s1621_s7 + $0xe0] sm:$0xff]  ;;  %362 = vst [vmem:[%s1626_s8 + $0x60] sm:$0xff] %v361_v12  ;;  %364 = vst [vmem:[%s1626_s8 + $0x68] sm:$0xff] %v363_v13  ;;  %v367_v15 = vld [vmem:[%s1621_s7 + $0xf0] sm:$0xff] }
  0x20   : > { %366 = vst [vmem:[%s1626_s8 + $0x70] sm:$0xff] %v365_v14  ;;  %v369_v16 = vld [vmem:[%s1621_s7 + $0x100] sm:$0xff]  ;;  %v371_v17 = vld [vmem:[%s1621_s7 + $0x110] sm:$0xff]  ;;  %368 = vst [vmem:[%s1626_s8 + $0x78] sm:$0xff] %v367_v15 }
  0x21   : > { %370 = vst [vmem:[%s1626_s8 + $0x80] sm:$0xff] %v369_v16  ;;  %372 = vst [vmem:[%s1626_s8 + $0x88] sm:$0xff] %v371_v17  ;;  %v373_v18 = vld [vmem:[%s1621_s7 + $0x120] sm:$0xff]  ;;  %v375_v19 = vld [vmem:[%s1621_s7 + $0x130] sm:$0xff] }
  0x22   : > { %v377_v20 = vld [vmem:[%s1621_s7 + $0x140] sm:$0xff]  ;;  %374 = vst [vmem:[%s1626_s8 + $0x90] sm:$0xff] %v373_v18  ;;  %376 = vst [vmem:[%s1626_s8 + $0x98] sm:$0xff] %v375_v19  ;;  %v379_v21 = vld [vmem:[%s1621_s7 + $0x150] sm:$0xff] }
  0x23   : > { %378 = vst [vmem:[%s1626_s8 + $0xa0] sm:$0xff] %v377_v20  ;;  %v381_v22 = vld [vmem:[%s1621_s7 + $0x160] sm:$0xff]  ;;  %v383_v23 = vld [vmem:[%s1621_s7 + $0x170] sm:$0xff]  ;;  %380 = vst [vmem:[%s1626_s8 + $0xa8] sm:$0xff] %v379_v21 }
  0x24   : > { %382 = vst [vmem:[%s1626_s8 + $0xb0] sm:$0xff] %v381_v22  ;;  %384 = vst [vmem:[%s1626_s8 + $0xb8] sm:$0xff] %v383_v23  ;;  %v385_v24 = vld [vmem:[%s1621_s7 + $0x180] sm:$0xff]  ;;  %v387_v25 = vld [vmem:[%s1621_s7 + $0x190] sm:$0xff] }
  0x25   : > { %v389_v26 = vld [vmem:[%s1621_s7 + $0x1a0] sm:$0xff]  ;;  %386 = vst [vmem:[%s1626_s8 + $0xc0] sm:$0xff] %v385_v24  ;;  %388 = vst [vmem:[%s1626_s8 + $0xc8] sm:$0xff] %v387_v25  ;;  %v391_v27 = vld [vmem:[%s1621_s7 + $0x1b0] sm:$0xff] }
  0x26   : > { %390 = vst [vmem:[%s1626_s8 + $0xd0] sm:$0xff] %v389_v26  ;;  %v393_v28 = vld [vmem:[%s1621_s7 + $0x1c0] sm:$0xff]  ;;  %v395_v29 = vld [vmem:[%s1621_s7 + $0x1d0] sm:$0xff]  ;;  %392 = vst [vmem:[%s1626_s8 + $0xd8] sm:$0xff] %v391_v27 }
  0x27   : > { %394 = vst [vmem:[%s1626_s8 + $0xe0] sm:$0xff] %v393_v28  ;;  %396 = vst [vmem:[%s1626_s8 + $0xe8] sm:$0xff] %v395_v29  ;;  %v397_v30 = vld [vmem:[%s1621_s7 + $0x1e0] sm:$0xff]  ;;  %v399_v31 = vld [vmem:[%s1621_s7 + $0x1f0] sm:$0xff] }
  0x28   : > { %v401_v32 = vld [vmem:[%s1621_s7 + $0x200] sm:$0xff]  ;;  %398 = vst [vmem:[%s1626_s8 + $0xf0] sm:$0xff] %v397_v30  ;;  %400 = vst [vmem:[%s1626_s8 + $0xf8] sm:$0xff] %v399_v31  ;;  %v403_v33 = vld [vmem:[%s1621_s7 + $0x210] sm:$0xff] }
  0x29   : > { %402 = vst [vmem:[%s1626_s8 + $0x100] sm:$0xff] %v401_v32  ;;  %v405_v34 = vld [vmem:[%s1621_s7 + $0x220] sm:$0xff]  ;;  %v407_v35 = vld [vmem:[%s1621_s7 + $0x230] sm:$0xff]  ;;  %404 = vst [vmem:[%s1626_s8 + $0x108] sm:$0xff] %v403_v33 }
  0x2a   : > { %406 = vst [vmem:[%s1626_s8 + $0x110] sm:$0xff] %v405_v34  ;;  %408 = vst [vmem:[%s1626_s8 + $0x118] sm:$0xff] %v407_v35  ;;  %v409_v36 = vld [vmem:[%s1621_s7 + $0x240] sm:$0xff]  ;;  %v411_v37 = vld [vmem:[%s1621_s7 + $0x250] sm:$0xff] }
  0x2b   : > { %v413_v38 = vld [vmem:[%s1621_s7 + $0x260] sm:$0xff]  ;;  %410 = vst [vmem:[%s1626_s8 + $0x120] sm:$0xff] %v409_v36  ;;  %412 = vst [vmem:[%s1626_s8 + $0x128] sm:$0xff] %v411_v37  ;;  %v415_v39 = vld [vmem:[%s1621_s7 + $0x270] sm:$0xff] }
  0x2c   : > { %414 = vst [vmem:[%s1626_s8 + $0x130] sm:$0xff] %v413_v38  ;;  %v417_v40 = vld [vmem:[%s1621_s7 + $0x280] sm:$0xff]  ;;  %v419_v41 = vld [vmem:[%s1621_s7 + $0x290] sm:$0xff]  ;;  %416 = vst [vmem:[%s1626_s8 + $0x138] sm:$0xff] %v415_v39 }
  0x2d   : > { %418 = vst [vmem:[%s1626_s8 + $0x140] sm:$0xff] %v417_v40  ;;  %420 = vst [vmem:[%s1626_s8 + $0x148] sm:$0xff] %v419_v41  ;;  %v421_v42 = vld [vmem:[%s1621_s7 + $0x2a0] sm:$0xff]  ;;  %v423_v43 = vld [vmem:[%s1621_s7 + $0x2b0] sm:$0xff] }
  0x2e   : > { %v425_v44 = vld [vmem:[%s1621_s7 + $0x2c0] sm:$0xff]  ;;  %422 = vst [vmem:[%s1626_s8 + $0x150] sm:$0xff] %v421_v42  ;;  %424 = vst [vmem:[%s1626_s8 + $0x158] sm:$0xff] %v423_v43  ;;  %v427_v45 = vld [vmem:[%s1621_s7 + $0x2d0] sm:$0xff] }
  0x2f   : > { %426 = vst [vmem:[%s1626_s8 + $0x160] sm:$0xff] %v425_v44  ;;  %v429_v46 = vld [vmem:[%s1621_s7 + $0x2e0] sm:$0xff]  ;;  %v431_v47 = vld [vmem:[%s1621_s7 + $0x2f0] sm:$0xff]  ;;  %428 = vst [vmem:[%s1626_s8 + $0x168] sm:$0xff] %v427_v45 }
  0x30   : > { %430 = vst [vmem:[%s1626_s8 + $0x170] sm:$0xff] %v429_v46  ;;  %432 = vst [vmem:[%s1626_s8 + $0x178] sm:$0xff] %v431_v47  ;;  %v433_v48 = vld [vmem:[%s1621_s7 + $0x300] sm:$0xff]  ;;  %v435_v49 = vld [vmem:[%s1621_s7 + $0x310] sm:$0xff] }
  0x31   : > { %v437_v50 = vld [vmem:[%s1621_s7 + $0x320] sm:$0xff]  ;;  %434 = vst [vmem:[%s1626_s8 + $0x180] sm:$0xff] %v433_v48  ;;  %436 = vst [vmem:[%s1626_s8 + $0x188] sm:$0xff] %v435_v49  ;;  %v439_v51 = vld [vmem:[%s1621_s7 + $0x330] sm:$0xff] }
  0x32   : > { %438 = vst [vmem:[%s1626_s8 + $0x190] sm:$0xff] %v437_v50  ;;  %v441_v52 = vld [vmem:[%s1621_s7 + $0x340] sm:$0xff]  ;;  %v443_v53 = vld [vmem:[%s1621_s7 + $0x350] sm:$0xff]  ;;  %440 = vst [vmem:[%s1626_s8 + $0x198] sm:$0xff] %v439_v51 }
  0x33   : > { %442 = vst [vmem:[%s1626_s8 + $0x1a0] sm:$0xff] %v441_v52  ;;  %444 = vst [vmem:[%s1626_s8 + $0x1a8] sm:$0xff] %v443_v53  ;;  %v445_v54 = vld [vmem:[%s1621_s7 + $0x360] sm:$0xff]  ;;  %v447_v55 = vld [vmem:[%s1621_s7 + $0x370] sm:$0xff] }
  0x34   : > { %v449_v56 = vld [vmem:[%s1621_s7 + $0x380] sm:$0xff]  ;;  %446 = vst [vmem:[%s1626_s8 + $0x1b0] sm:$0xff] %v445_v54  ;;  %448 = vst [vmem:[%s1626_s8 + $0x1b8] sm:$0xff] %v447_v55  ;;  %v451_v57 = vld [vmem:[%s1621_s7 + $0x390] sm:$0xff] }
  0x35   : > { %450 = vst [vmem:[%s1626_s8 + $0x1c0] sm:$0xff] %v449_v56  ;;  %v453_v58 = vld [vmem:[%s1621_s7 + $0x3a0] sm:$0xff]  ;;  %v455_v59 = vld [vmem:[%s1621_s7 + $0x3b0] sm:$0xff]  ;;  %452 = vst [vmem:[%s1626_s8 + $0x1c8] sm:$0xff] %v451_v57 }
  0x36   : > { %454 = vst [vmem:[%s1626_s8 + $0x1d0] sm:$0xff] %v453_v58  ;;  %456 = vst [vmem:[%s1626_s8 + $0x1d8] sm:$0xff] %v455_v59  ;;  %v457_v60 = vld [vmem:[%s1621_s7 + $0x3c0] sm:$0xff]  ;;  %v459_v61 = vld [vmem:[%s1621_s7 + $0x3d0] sm:$0xff] }
  0x37   : > { %v461_v62 = vld [vmem:[%s1621_s7 + $0x3e0] sm:$0xff]  ;;  %458 = vst [vmem:[%s1626_s8 + $0x1e0] sm:$0xff] %v457_v60  ;;  %460 = vst [vmem:[%s1626_s8 + $0x1e8] sm:$0xff] %v459_v61  ;;  %v463_v63 = vld [vmem:[%s1621_s7 + $0x3f0] sm:$0xff] }
  0x38   : > { %462 = vst [vmem:[%s1626_s8 + $0x1f0] sm:$0xff] %v461_v62  ;;  %464 = vst [vmem:[%s1626_s8 + $0x1f8] sm:$0xff] %v463_v63 }
  0x39 PF: > { %p1241_p7 = scmp.ge.s32.totalorder %s1536_s18, 1  ;;  %p469_p8 = scmp.lt.s32.totalorder %s1536_s18, 51 }
  0x3b   : > { %p470_p9 = pnand %p1241_p7, %p469_p8 }
  0x3c   : > { %s476_s9 = sand.u32 (!%p470_p9), 1, %s1512_s12   ;;  %s1243_s10 = sshll.u32 (!%p470_p9), %s1520_s14, 2 }
  0x3d   : > { %473 = sbr.rel (%p470_p9) target bundleno = 397 (0x18d), region = 62  ;;  %s1242_s11 = sshll.u32 (!%p470_p9), %s476_s9, 9 }
  0x3e   : > { %p519_p10 = scmp.lt.s32.totalorder (!%p470_p9), %s1243_s10, 99  ;;  %s1245_s21 = sshll.u32 (!%p470_p9), %s1524_s15, 1 }
  0x3f   : > { %p531_p11 = scmp.lt.s32.totalorder (!%p470_p9), %s1245_s21, 3  ;;  %p543_p12 = scmp.eq.s32.totalorder (!%p470_p9), %s1520_s14, 0 }
  0x40   : > { %s1774_s5 = scalar_lea.vmem (!%p470_p9), [#allocation2], %s1242_s11  ;;  %p1248_p13 = scmp.ne.s32.totalorder (!%p470_p9), %s1520_s14, 0 }
  0x44   : > { %s1895_s10 = smov (!%p519_p10, %s1243_s10), 99  ;;  %s1897_s21 = smov (!%p531_p11, %s1245_s21), 3 }
  0x45   : > { %s1244_s22 = sshll.u32 %s1895_s10, 2  ;;  %s1246_s27 = sshll.u32 %s1897_s21, 3  ;;  %v1538_v0 = vmov (!%p1248_p13), 0.0  }
  0x46   : > { %s1762_s26 = scalar_lea.vmem %s1878_s0, %s1244_s22  ;;  %s1767_s30 = scalar_lea.vmem %s1881_s3, %s1897_s21 }
  0x47   : > { %s1772_s15 = scalar_lea.vmem %s1880_s2, %s1246_s27  ;;  %546 = sbr.rel (%p1248_p13) target bundleno = 78 (0x4e), region = 70 }
  0x48   : > { %547 = vst [vmem:[%s1772_s15] sm:$0xff] (!%p1248_p13), %v1538_v0  ;;  %548 = vst [vmem:[%s1772_s15 + $0x8] sm:$0xff] (!%p1248_p13), %v1538_v0 }
  0x4e PF: > { %553 = sbr.rel (!%p543_p12) target bundleno = 85 (0x55), region = 74  ;;  %v554_v1 = vlaneseq (%p543_p12)  ;;  %v1539_v2 = vmov (%p543_p12), 0.0  }
  0x50   : > { %vm556_vm0 = vcmp.lt.s32.totalorder (%p543_p12), %v554_v1, 256 }
  0x51   : > { %558 = vst.msk [vmem:[%s1767_s30] sm:$0x3] (%p543_p12), %vm556_vm0, %v1539_v2 }
  0x55 PF: > { %v1382_v3 = vld [vmem:[%s1774_s5 + $0x4] ss:$8 sps:$4 sm:$0xff]   ;;  %v1386_v5 = vld [vmem:[%s1774_s5] ss:$8 sps:$4 sm:$0xff]   ;;  %v1388_v7 = vld [vmem:[%s1774_s5 + $0x14] ss:$8 sps:$4 sm:$0xff]  }
  0x56   : > { %v1384_v4 = vld [vmem:[%s1774_s5 + $0x104] ss:$8 sps:$4 sm:$0xff]   ;;  %961 = vmatprep.subr.bf16.mxu0 %v1382_v3  ;;  %v1387_v6 = vld [vmem:[%s1774_s5 + $0x100] ss:$8 sps:$4 sm:$0xff]   ;;  %v1390_v8 = vld [vmem:[%s1774_s5 + $0x114] ss:$8 sps:$4 sm:$0xff]  }
  0x57   : > { %1002 = vmatprep.subr.bf16.mxu1 %v1384_v4  ;;  %962 = vmatpush1.bf16.msra.mxu0 %v1386_v5  ;;  %v1392_v9 = vld [vmem:[%s1774_s5 + $0x10] ss:$8 sps:$4 sm:$0xff]   ;;  %v1394_v11 = vld [vmem:[%s1774_s5 + $0x24] ss:$8 sps:$4 sm:$0xff]   ;;  %v1398_v13 = vld [vmem:[%s1774_s5 + $0x20] ss:$8 sps:$4 sm:$0xff]  }
  0x58   : > { %1003 = vmatpush1.bf16.msra.mxu1 %v1387_v6  ;;  %963 = vmatprep.subr.bf16.mxu0 %v1388_v7  ;;  %v1393_v10 = vld [vmem:[%s1774_s5 + $0x110] ss:$8 sps:$4 sm:$0xff]   ;;  %v1396_v12 = vld [vmem:[%s1774_s5 + $0x124] ss:$8 sps:$4 sm:$0xff]   ;;  %v1399_v14 = vld [vmem:[%s1774_s5 + $0x120] ss:$8 sps:$4 sm:$0xff]  }
  0x59   : > { %1004 = vmatprep.subr.bf16.mxu1 %v1390_v8  ;;  %v1400_v15 = vld [vmem:[%s1774_s5 + $0x34] ss:$8 sps:$4 sm:$0xff]   ;;  %v1404_v17 = vld [vmem:[%s1774_s5 + $0x30] ss:$8 sps:$4 sm:$0xff]   ;;  %v1406_v19 = vld [vmem:[%s1774_s5 + $0x44] ss:$8 sps:$4 sm:$0xff]  }
  0x5a   : > { %v1402_v16 = vld [vmem:[%s1774_s5 + $0x134] ss:$8 sps:$4 sm:$0xff]   ;;  %v1405_v18 = vld [vmem:[%s1774_s5 + $0x130] ss:$8 sps:$4 sm:$0xff]   ;;  %v1408_v20 = vld [vmem:[%s1774_s5 + $0x144] ss:$8 sps:$4 sm:$0xff]  }
  0x5b   : > { %964 = vmatpush1.bf16.msra.mxu0 %v1392_v9  ;;  %v1410_v21 = vld [vmem:[%s1774_s5 + $0x40] ss:$8 sps:$4 sm:$0xff]   ;;  %v1412_v23 = vld [vmem:[%s1774_s5 + $0x54] ss:$8 sps:$4 sm:$0xff]   ;;  %v1416_v25 = vld [vmem:[%s1774_s5 + $0x50] ss:$8 sps:$4 sm:$0xff]  }
  0x5c   : > { %1005 = vmatpush1.bf16.msra.mxu1 %v1393_v10  ;;  %965 = vmatprep.subr.bf16.mxu0 %v1394_v11  ;;  %v1411_v22 = vld [vmem:[%s1774_s5 + $0x140] ss:$8 sps:$4 sm:$0xff]   ;;  %v1414_v24 = vld [vmem:[%s1774_s5 + $0x154] ss:$8 sps:$4 sm:$0xff]   ;;  %v1417_v26 = vld [vmem:[%s1774_s5 + $0x150] ss:$8 sps:$4 sm:$0xff]  }
  0x5d   : > { %1006 = vmatprep.subr.bf16.mxu1 %v1396_v12  ;;  %v1418_v27 = vld [vmem:[%s1774_s5 + $0x64] ss:$8 sps:$4 sm:$0xff]   ;;  %v1422_v29 = vld [vmem:[%s1774_s5 + $0x60] ss:$8 sps:$4 sm:$0xff]   ;;  %v1424_v31 = vld [vmem:[%s1774_s5 + $0x74] ss:$8 sps:$4 sm:$0xff]  }
  0x5e   : > { %v1420_v28 = vld [vmem:[%s1774_s5 + $0x164] ss:$8 sps:$4 sm:$0xff]   ;;  %v1423_v30 = vld [vmem:[%s1774_s5 + $0x160] ss:$8 sps:$4 sm:$0xff]   ;;  %v1426_v32 = vld [vmem:[%s1774_s5 + $0x174] ss:$8 sps:$4 sm:$0xff]  }
  0x5f   : > { %966 = vmatpush1.bf16.msra.mxu0 %v1398_v13  ;;  %v1428_v33 = vld [vmem:[%s1774_s5 + $0x70] ss:$8 sps:$4 sm:$0xff]   ;;  %v1430_v35 = vld [vmem:[%s1774_s5 + $0x84] ss:$8 sps:$4 sm:$0xff]   ;;  %v1434_v37 = vld [vmem:[%s1774_s5 + $0x80] ss:$8 sps:$4 sm:$0xff]  }
  0x60   : > { %1007 = vmatpush1.bf16.msra.mxu1 %v1399_v14  ;;  %967 = vmatprep.subr.bf16.mxu0 %v1400_v15  ;;  %v1429_v34 = vld [vmem:[%s1774_s5 + $0x170] ss:$8 sps:$4 sm:$0xff]   ;;  %v1432_v36 = vld [vmem:[%s1774_s5 + $0x184] ss:$8 sps:$4 sm:$0xff]   ;;  %v1435_v38 = vld [vmem:[%s1774_s5 + $0x180] ss:$8 sps:$4 sm:$0xff]  }
  0x61   : > { %1008 = vmatprep.subr.bf16.mxu1 %v1402_v16  ;;  %v1436_v39 = vld [vmem:[%s1774_s5 + $0x94] ss:$8 sps:$4 sm:$0xff]   ;;  %v1440_v41 = vld [vmem:[%s1774_s5 + $0x90] ss:$8 sps:$4 sm:$0xff]   ;;  %v1442_v43 = vld [vmem:[%s1774_s5 + $0xa4] ss:$8 sps:$4 sm:$0xff]  }
  0x62   : > { %v1438_v40 = vld [vmem:[%s1774_s5 + $0x194] ss:$8 sps:$4 sm:$0xff]   ;;  %v1441_v42 = vld [vmem:[%s1774_s5 + $0x190] ss:$8 sps:$4 sm:$0xff]   ;;  %v1444_v44 = vld [vmem:[%s1774_s5 + $0x1a4] ss:$8 sps:$4 sm:$0xff]  }
  0x63   : > { %968 = vmatpush1.bf16.msra.mxu0 %v1404_v17  ;;  %v1446_v45 = vld [vmem:[%s1774_s5 + $0xa0] ss:$8 sps:$4 sm:$0xff]   ;;  %v1448_v47 = vld [vmem:[%s1774_s5 + $0xb4] ss:$8 sps:$4 sm:$0xff]   ;;  %v1452_v52 = vld [vmem:[%s1774_s5 + $0xb0] ss:$8 sps:$4 sm:$0xff]  }
  0x64   : > { %1009 = vmatpush1.bf16.msra.mxu1 %v1405_v18  ;;  %969 = vmatprep.subr.bf16.mxu0 %v1406_v19  ;;  %v1447_v46 = vld [vmem:[%s1774_s5 + $0x1a0] ss:$8 sps:$4 sm:$0xff]   ;;  %v1450_v48 = vld [vmem:[%s1774_s5 + $0x1b4] ss:$8 sps:$4 sm:$0xff]   ;;  %v1453_v53 = vld [vmem:[%s1774_s5 + $0x1b0] ss:$8 sps:$4 sm:$0xff]  }
  0x65   : > { %1010 = vmatprep.subr.bf16.mxu1 %v1408_v20  ;;  %v561_v49 = vld [vmem:[%s1762_s26] sm:$0xff]  ;;  %v562_v51 = vld [vmem:[%s1762_s26 + $0x8] sm:$0xff]  ;;  %v1460_v59 = vld [vmem:[%s1774_s5 + $0xd4] ss:$8 sps:$4 sm:$0xff]   ;;  %p1318_p0 = scmp.ne.s32.totalorder %s1520_s14, 24 }
  0x66   : > { %v1251_v50 = vcombine.high %v561_v49, %v561_v49  ;;  %v1253_v54 = vcombine.high %v562_v51, %v562_v51  ;;  %v1454_v55 = vld [vmem:[%s1774_s5 + $0xc4] ss:$8 sps:$4 sm:$0xff]   ;;  %v1458_v57 = vld [vmem:[%s1774_s5 + $0xc0] ss:$8 sps:$4 sm:$0xff]   ;;  %v1462_v60 = vld [vmem:[%s1774_s5 + $0x1d4] ss:$8 sps:$4 sm:$0xff]   ;;  %v1250_v7 = vcombine.low %v561_v49, %v561_v49  ;;  %v1252_v8 = vcombine.low %v562_v51, %v562_v51 }
  0x67   : > { %970 = vmatpush1.bf16.msra.mxu0 %v1410_v21  ;;  %v1456_v56 = vld [vmem:[%s1774_s5 + $0x1c4] ss:$8 sps:$4 sm:$0xff]   ;;  %v1459_v58 = vld [vmem:[%s1774_s5 + $0x1c0] ss:$8 sps:$4 sm:$0xff]   ;;  %v1464_v61 = vld [vmem:[%s1774_s5 + $0xd0] ss:$8 sps:$4 sm:$0xff]  }
  0x68   : > { %1011 = vmatpush1.bf16.msra.mxu1 %v1411_v22  ;;  %971 = vmatprep.subr.bf16.mxu0 %v1412_v23  ;;  %v1465_v62 = vld [vmem:[%s1774_s5 + $0x1d0] ss:$8 sps:$4 sm:$0xff]   ;;  %v1466_v63 = vld [vmem:[%s1774_s5 + $0xe4] ss:$8 sps:$4 sm:$0xff]   ;;  %v1470_v1 = vld [vmem:[%s1774_s5 + $0xe0] ss:$8 sps:$4 sm:$0xff]  }
  0x69   : > { %1012 = vmatprep.subr.bf16.mxu1 %v1414_v24  ;;  %993 = vmatprep.mubr.bf16.mxu0 %v1251_v50  ;;  %v1468_v0 = vld [vmem:[%s1774_s5 + $0x1e4] ss:$8 sps:$4 sm:$0xff]   ;;  %v1471_v2 = vld [vmem:[%s1774_s5 + $0x1e0] ss:$8 sps:$4 sm:$0xff]   ;;  %v1472_v3 = vld [vmem:[%s1774_s5 + $0xf4] ss:$8 sps:$4 sm:$0xff]  }
  0x6a   : > { %1034 = vmatprep.mubr.bf16.mxu1 %v1253_v54  ;;  %v1474_v4 = vld [vmem:[%s1774_s5 + $0x1f4] ss:$8 sps:$4 sm:$0xff]   ;;  %v1476_v5 = vld [vmem:[%s1774_s5 + $0xf0] ss:$8 sps:$4 sm:$0xff]   ;;  %v559_v10 = vld [vmem:[%s1772_s15] sm:$0xff] }
  0x6b   : > { %972 = vmatpush1.bf16.msra.mxu0 %v1416_v25  ;;  %v1477_v6 = vld [vmem:[%s1774_s5 + $0x1f0] ss:$8 sps:$4 sm:$0xff]   ;;  %v560_v14 = vld [vmem:[%s1772_s15 + $0x8] sm:$0xff] }
  0x6c   : > { %1013 = vmatpush1.bf16.msra.mxu1 %v1417_v26  ;;  %973 = vmatprep.subr.bf16.mxu0 %v1418_v27 }
  0x6d   : > { %1014 = vmatprep.subr.bf16.mxu1 %v1420_v28 }
  0x6f   : > { %974 = vmatpush1.bf16.msra.mxu0 %v1422_v29  ;;  %v1540_v29 = vmov (!%p1318_p0), 1966171168  }
  0x70   : > { %1015 = vmatpush1.bf16.msra.mxu1 %v1423_v30  ;;  %975 = vmatprep.subr.bf16.mxu0 %v1424_v31  ;;  %v1070_v30 = vunpack.c.l.s4 (!%p1318_p0), %v1540_v29  ;;  %v1072_v31 = vlaneseq (!%p1318_p0) }
  0x71   : > { %1016 = vmatprep.subr.bf16.mxu1 %v1426_v32 }
  0x72   : > { %vm1087_vm1 = vcmp.lt.s32.totalorder (!%p1318_p0), %v1072_v31, 256 }
  0x73   : > { %976 = vmatpush1.bf16.msra.mxu0 %v1428_v33 }
  0x74   : > { %1017 = vmatpush1.bf16.msra.mxu1 %v1429_v34  ;;  %977 = vmatprep.subr.bf16.mxu0 %v1430_v35 }
  0x75   : > { %1018 = vmatprep.subr.bf16.mxu1 %v1432_v36  ;;  %v1071_v36 = vunpack.c.0.s8 (!%p1318_p0), %v1070_v30 }
  0x77   : > { %978 = vmatpush1.bf16.msra.mxu0 %v1434_v37  ;;  %v1073_v37 = vshrl.u32 (!%p1318_p0), %v1072_v31, 7 }
  0x78   : > { %1019 = vmatpush1.bf16.msra.mxu1 %v1435_v38  ;;  %979 = vmatprep.subr.bf16.mxu0 %v1436_v39 }
  0x79   : > { %1020 = vmatprep.subr.bf16.mxu1 %v1438_v40 }
  0x7b   : > { %980 = vmatpush1.bf16.msra.mxu0 %v1440_v41 }
  0x7c   : > { %1021 = vmatpush1.bf16.msra.mxu1 %v1441_v42  ;;  %981 = vmatprep.subr.bf16.mxu0 %v1442_v43  ;;  %v1074_v42 = vsub.s32 (!%p1318_p0), %v1071_v36, %v1073_v37 }
  0x7d   : > { %1022 = vmatprep.subr.bf16.mxu1 %v1444_v44 }
  0x7f   : > { %982 = vmatpush1.bf16.msra.mxu0 %v1446_v45  ;;  %v1051_v45 = vld [vmem:[%s1767_s30] sm:$0x3] (!%p1318_p0) }
  0x80   : > { %1023 = vmatpush1.bf16.msra.mxu1 %v1447_v46  ;;  %983 = vmatprep.subr.bf16.mxu0 %v1448_v47 }
  0x81   : > { %1024 = vmatprep.subr.bf16.mxu1 %v1450_v48 }
  0x83   : > { %984 = vmatpush1.bf16.msra.mxu0 %v1452_v52 }
  0x84   : > { %1025 = vmatpush1.bf16.msra.mxu1 %v1453_v53  ;;  %985 = vmatprep.subr.bf16.mxu0 %v1454_v55 }
  0x85   : > { %1026 = vmatprep.subr.bf16.mxu1 %v1456_v56 }
  0x87   : > { %986 = vmatpush1.bf16.msra.mxu0 %v1458_v57 }
  0x88   : > { %1027 = vmatpush1.bf16.msra.mxu1 %v1459_v58  ;;  %987 = vmatprep.subr.bf16.mxu0 %v1460_v59 }
  0x89   : > { %1028 = vmatprep.subr.bf16.mxu1 %v1462_v60 }
  0x8b   : > { %988 = vmatpush1.bf16.msra.mxu0 %v1464_v61 }
  0x8c   : > { %1029 = vmatpush1.bf16.msra.mxu1 %v1465_v62  ;;  %989 = vmatprep.subr.bf16.mxu0 %v1466_v63 }
  0x8d   : > { %1030 = vmatprep.subr.bf16.mxu1 %v1468_v0 }
  0x8f   : > { %990 = vmatpush1.bf16.msra.mxu0 %v1470_v1 }
  0x90   : > { %1031 = vmatpush1.bf16.msra.mxu1 %v1471_v2  ;;  %991 = vmatprep.subr.bf16.mxu0 %v1472_v3 }
  0x91   : > { %1032 = vmatprep.subr.bf16.mxu1 %v1474_v4 }
  0x93   : > { %992 = vmatpush1.bf16.msra.mxu0 %v1476_v5 }
  0x94   : > { %1033 = vmatpush1.bf16.msra.mxu1 %v1477_v6 }
  0x96   : > { %994 = vmatmul.mubr.bf16.vlgmr.msra.gmra.mrb[0].mxu0 %v1250_v7 }
  0x97   : > { %1035 = vmatmul.mubr.bf16.vlgmr.msra.gmra.mrb[0].mxu1 %v1252_v8 }
 0x169   : > { %v995_v9 = vpop.f32.mrb[0].mxu0 }
 0x16a   : > { %v1036_v11 = vpop.f32.mrb[0].mxu1  ;;  %v997_v13 = vpop.f32.mrb[1].mxu0  ;;  %1050 = sbr.rel (%p1318_p0) target bundleno = 397 (0x18d), region = 78 }
 0x16b   : > { %v1037_v12 = vadd.f32 %v1036_v11, %v995_v9  ;;  %v1038_v15 = vpop.f32.mrb[1].mxu1  ;;  %v999_v17 = vpop.f32.mrb[2].mxu0 }
 0x16c   : > { %v1039_v16 = vadd.f32 %v1038_v15, %v997_v13  ;;  %v1040_v18 = vpop.f32.mrb[2].mxu1  ;;  %v1000_v20 = vpop.f32.mrb[3].mxu0 }
 0x16d   : > { %v1043_v19 = vadd.f32 %v1037_v12, %v559_v10  ;;  %v1041_v21 = vpop.f32.mrb[3].mxu1 }
 0x16e   : > { %v1044_v22 = vadd.f32 %v1039_v16, %v560_v14 }
 0x16f   : > { %1045 = vst [vmem:[%s1772_s15] sm:$0xff] %v1043_v19 }
 0x170   : > { %1046 = vst [vmem:[%s1772_s15 + $0x8] sm:$0xff] %v1044_v22 }
 0x176   : > { %v1052_v23 = vld [vmem:[%s1772_s15] sm:$0xff] }
 0x177   : > { %v1053_v24 = vld [vmem:[%s1772_s15 + $0x8] sm:$0xff]  ;;  %v1054_v25 = vrot.slane %v1052_v23, 4 }
 0x178   : > { %v1060_v26 = vrot.slane %v1053_v24, 4 }
 0x179   : > { %v1055_v27 = vadd.f32 %v1054_v25, %v1052_v23 }
 0x17a   : > { %v1061_v28 = vadd.f32 %v1060_v26, %v1053_v24 }
 0x17b   : > { %v1056_v32 = vrot.slane %v1055_v27, 2 }
 0x17c   : > { %v1062_v33 = vrot.slane %v1061_v28, 2 }
 0x17d   : > { %v1057_v34 = vadd.f32 %v1056_v32, %v1055_v27 }
 0x17e   : > { %v1063_v35 = vadd.f32 %v1062_v33, %v1061_v28 }
 0x17f   : > { %v1058_v38 = vrot.slane %v1057_v34, 1 }
 0x180   : > { %v1064_v39 = vrot.slane %v1063_v35, 1 }
 0x181   : > { %v1059_v40 = vadd.f32 %v1058_v38, %v1057_v34 }
 0x182   : > { %v1065_v41 = vadd.f32 %v1064_v39, %v1063_v35 }
 0x184   : > { %v1068_v43 = vcombine.low %v1059_v40, %v1065_v41 }
 0x186   : > { %v1075_v44 = vrot.slane %v1068_v43, %v1074_v42 }
 0x188   : > { %v1082_v46 = vrot.slane %v1075_v44, %v1074_v42 }
 0x18a   : > { %v1084_v47 = vadd.f32 %v1082_v46, %v1051_v45 }
 0x18c   : > { %1089 = vst.msk [vmem:[%s1767_s30] sm:$0x3] %vm1087_vm1, %v1084_v47 }
 0x18d PF: > { %s14_s18 = sadd.s32 1, %s1536_s18   ;;  %s1882_s12 = smov %s1516_s13 }
 0x18e   : > { %p11_p1 = scmp.ge.s32.totalorder %s14_s18, 52   ;;  %s1883_s13 = smov %s1612_s25 }
 0x18f   : > { %s1884_s14 = smov %s1528_s16  ;;  %s1885_s15 = smov %s1532_s17 }
 0x190   : > { %s1886_s16 = smov %s1889_s19  ;;  %s1887_s17 = smov %s1893_s20 }
 0x191   :  { %13 = sbr.rel (!%p11_p1) target bundleno = 4 (0x4), region = 128 }

// kernel: fpn1_forward.34
= control target key start
LH: loop header
LB: loop body
LE: loop exit
PB: predicated region body
PF: predicated region fallthrough
CT: control target
= control target key end

     0   :  { %s415_s9 = smov 0   ;;  %s417_s10 = smov 0   ;;  %s464_s0 = inlined_call_operand.vmem [shape: f32[8,512], index: 0, kind: input, shape index: {}]   ;;  %s465_s1 = inlined_call_operand.vmem [shape: f32[1,512], index: 1, kind: input, shape index: {}]   ;;  %s466_s2 = inlined_call_operand.vmem [shape: f32[1,512], index: 2, kind: output, shape index: {}]  }
   0x1   :  { %s419_s11 = smov 0  }
   0x2 LB: > { %s24_s12 = sadd.s32 1, %s392_s10  ;;  %p341_p0 = scmp.ge.s32.totalorder %s396_s11, 1  ;;  %s396_s11 = sphi %s419_s11, %s12_s11   ;;  %s392_s10 = sphi %s417_s10, %s470_s10   ;;  %s388_s9 = sphi %s415_s9, %s469_s9  }
   0x3   : > { %p26_p1 = scmp.ge.s32.totalorder %s24_s12, 2  ;;  %p141_p2 = scmp.lt.s32.totalorder %s396_s11, 3 }
   0x5   : > { %s472_s12 = smov (%p26_p1, %s24_s12), 0  ;;  %p142_p3 = pnand %p341_p0, %p141_p2 }
   0x6   : > { %s342_s13 = sshll.u32 (!%p142_p3), %s388_s9, 1  ;;  %v194_v0 = vlaneseq (!%p142_p3)  ;;  %v398_v6 = vmov (!%p142_p3), 0.0   ;;  %v399_v20 = vmov (!%p142_p3), 1966171168  }
   0x7   : > { %145 = sbr.rel (%p142_p3) target bundleno = 46 (0x2e), region = 28  ;;  %p173_p4 = scmp.lt.s32.totalorder (!%p142_p3), %s342_s13, 3  ;;  %v243_v21 = vunpack.c.l.s4 (!%p142_p3), %v399_v20 }
   0x8   : > { %v205_v1 = vshrl.u32 (!%p142_p3), %v194_v0, 7  ;;  %vm433_vm0 = vcmp.lt.s32.totalorder (!%p142_p3), %v194_v0, 256 }
   0x9   : > { %v244_v26 = vunpack.c.0.s8 (!%p142_p3), %v243_v21 }
   0xa   : > { %v206_v3 = vsub.s32 (!%p142_p3), 0, %v205_v1  ;;  %v210_v4 = vsub.s32 (!%p142_p3), 1, %v205_v1 }
   0xb   : > { %v247_v31 = vsub.s32 (!%p142_p3), %v244_v26, %v205_v1 }
   0xe   : > { %s474_s13 = smov (!%p173_p4, %s342_s13), 3 }
   0xf   : > { %s343_s14 = sshll.u32 %s474_s13, 3  ;;  %s183_s17 = scalar_lea.vmem %s465_s1, %s474_s13 }
  0x10   : > { %s178_s20 = scalar_lea.vmem %s464_s0, %s343_s14  ;;  %s446_s23 = scalar_lea.vmem %s466_s2, %s474_s13  ;;  %v199_v5 = vld [vmem:[%s183_s17] sm:$0x3] }
  0x11   : > { %198 = vst.msk [vmem:[%s446_s23] sm:$0x3] %vm433_vm0, %v398_v6  ;;  %v200_v7 = vmul.f32 0.125, %v199_v5  ;;  %v201_v8 = vld [vmem:[%s178_s20] sm:$0xff]  ;;  %v202_v9 = vld [vmem:[%s178_s20 + $0x8] sm:$0xff] }
  0x13   : > { %v207_v10 = vrot.slane %v200_v7, %v206_v3  ;;  %v211_v11 = vrot.slane %v200_v7, %v210_v4 }
  0x15   : > { %v214_v12 = vsub.f32 %v201_v8, %v207_v10  ;;  %v215_v13 = vsub.f32 %v202_v9, %v211_v11 }
  0x17   : > { %v225_v14 = vmul.f32 %v214_v12, %v214_v12  ;;  %v226_v15 = vmul.f32 %v215_v13, %v215_v13 }
  0x18   : > { %v224_v34 = vld [vmem:[%s446_s23] sm:$0x3] }
  0x19   : > { %v227_v16 = vrot.slane %v225_v14, 4  ;;  %v233_v17 = vrot.slane %v226_v15, 4 }
  0x1b   : > { %v228_v18 = vadd.f32 %v227_v16, %v225_v14  ;;  %v234_v19 = vadd.f32 %v233_v17, %v226_v15 }
  0x1d   : > { %v229_v22 = vrot.slane %v228_v18, 2  ;;  %v235_v23 = vrot.slane %v234_v19, 2 }
  0x1f   : > { %v230_v24 = vadd.f32 %v229_v22, %v228_v18  ;;  %v236_v25 = vadd.f32 %v235_v23, %v234_v19 }
  0x21   : > { %v231_v27 = vrot.slane %v230_v24, 1  ;;  %v237_v28 = vrot.slane %v236_v25, 1 }
  0x23   : > { %v232_v29 = vadd.f32 %v231_v27, %v230_v24  ;;  %v238_v30 = vadd.f32 %v237_v28, %v236_v25 }
  0x25   : > { %v241_v32 = vcombine.low %v232_v29, %v238_v30 }
  0x27   : > { %v248_v33 = vrot.slane %v241_v32, %v247_v31 }
  0x29   : > { %v255_v35 = vrot.slane %v248_v33, %v247_v31 }
  0x2b   : > { %v257_v36 = vadd.f32 %v255_v35, %v224_v34 }
  0x2d   : > { %262 = vst.msk [vmem:[%s446_s23] sm:$0x3] %vm433_vm0, %v257_v36 }
  0x2e PF: > { %s12_s11 = sadd.s32 1, %s396_s11   ;;  %s469_s9 = smov %s392_s10 }
  0x2f   : > { %p9_p5 = scmp.ge.s32.totalorder %s12_s11, 4   ;;  %s470_s10 = smov %s472_s12 }
  0x31   :  { %11 = sbr.rel (!%p9_p5) target bundleno = 2 (0x2), region = 65 }

// kernel: fpn1_forward.35
= control target key start
LH: loop header
LB: loop body
LE: loop exit
PB: predicated region body
PF: predicated region fallthrough
CT: control target
= control target key end

     0   :  { %s601_s18 = smov 0   ;;  %s603_s19 = smov 0   ;;  %s653_s0 = inlined_call_operand.vmem [shape: f32[8,512], index: 0, kind: input, shape index: {}]   ;;  %s654_s1 = inlined_call_operand.vmem [shape: f32[1,512], index: 1, kind: input, shape index: {}]   ;;  %s655_s2 = inlined_call_operand.vmem [shape: f32[1,512], index: 2, kind: input, shape index: {}]   ;;  %s656_s3 = inlined_call_operand.vmem [shape: f32[1,512], index: 3, kind: input, shape index: {}]   ;;  %s657_s4 = inlined_call_operand.vmem [shape: f32[1,512], index: 4, kind: input, shape index: {}]   ;;  %s658_s5 = inlined_call_operand.vmem [shape: f32[8,512], index: 5, kind: output, shape index: {}]  }
   0x1   :  { %s605_s20 = smov 0  }
   0x2 LB: > { %s24_s21 = sadd.s32 1, %s565_s19  ;;  %p510_p0 = scmp.ge.s32.totalorder %s569_s20, 1  ;;  %s569_s20 = sphi %s605_s20, %s15_s20   ;;  %s565_s19 = sphi %s603_s19, %s660_s19   ;;  %s561_s18 = sphi %s601_s18, %s659_s18  }
   0x3   : > { %p25_p1 = scmp.ge.s32.totalorder %s24_s21, 2  ;;  %p248_p2 = scmp.lt.s32.totalorder %s569_s20, 3 }
   0x5   : > { %s662_s21 = smov (%p25_p1, %s24_s21), 0  ;;  %p249_p3 = pnand %p510_p0, %p248_p2 }
   0x6   : > { %s511_s22 = sshll.u32 (!%p249_p3), %s561_s18, 1  ;;  %v354_v3 = vlaneseq (!%p249_p3) }
   0x7   : > { %252 = sbr.rel (%p249_p3) target bundleno = 45 (0x2d), region = 40  ;;  %p303_p4 = scmp.lt.s32.totalorder (!%p249_p3), %s511_s22, 3 }
   0x8   : > { %v355_v4 = vshrl.u32 (!%p249_p3), %v354_v3, 7 }
   0xa   : > { %v356_v8 = vsub.s32 (!%p249_p3), 0, %v355_v4  ;;  %v360_v9 = vsub.s32 (!%p249_p3), 1, %v355_v4 }
   0xe   : > { %s664_s22 = smov (!%p303_p4, %s511_s22), 3 }
   0xf   : > { %s318_s25 = scalar_lea.vmem %s655_s2, %s664_s22  ;;  %s313_s28 = scalar_lea.vmem %s654_s1, %s664_s22 }
  0x10   : > { %v342_v0 = vld [vmem:[%s318_s25] sm:$0x3]  ;;  %s323_s6 = scalar_lea.vmem %s656_s3, %s664_s22  ;;  %s512_s7 = sshll.u32 %s664_s22, 3 }
  0x11   : > { %v343_v1 = vmul.f32 0.125, %v342_v0  ;;  %v340_v5 = vld [vmem:[%s313_s28] sm:$0x3]  ;;  %s308_s10 = scalar_lea.vmem %s653_s0, %s512_s7  ;;  %s328_s13 = scalar_lea.vmem %s657_s4, %s664_s22 }
  0x12   : > { %v346_v6 = vld [vmem:[%s323_s6] sm:$0x3]  ;;  %v341_v7 = vmul.f32 0.125, %v340_v5  ;;  %v352_v14 = vld [vmem:[%s308_s10 + $0x8] sm:$0xff]  ;;  %s338_s16 = scalar_lea.vmem %s658_s5, %s512_s7 }
  0x13   : > { %v344_v2 = vadd.f32 1e-05, %v343_v1  ;;  %v348_v12 = vld [vmem:[%s328_s13] sm:$0x3] }
  0x14   : > { %v351_v13 = vld [vmem:[%s308_s10] sm:$0xff] }
  0x15   : > { %545 = vrsqrt.f32 %v344_v2 }
  0x1f   : > { %v546_v10 = vpop.eup %545 }
  0x20   : > { %v347_v11 = vmul.f32 %v546_v10, %v346_v6 }
  0x22   : > { %v349_v15 = vmul.f32 %v347_v11, %v341_v7  ;;  %v357_v16 = vrot.slane %v347_v11, %v356_v8  ;;  %v361_v17 = vrot.slane %v347_v11, %v360_v9 }
  0x24   : > { %v350_v18 = vsub.f32 %v348_v12, %v349_v15  ;;  %v364_v19 = vmul.f32 %v357_v16, %v351_v13  ;;  %v365_v20 = vmul.f32 %v361_v17, %v352_v14 }
  0x26   : > { %v370_v21 = vrot.slane %v350_v18, %v356_v8  ;;  %v374_v22 = vrot.slane %v350_v18, %v360_v9 }
  0x28   : > { %v377_v23 = vadd.f32 %v370_v21, %v364_v19  ;;  %v378_v24 = vadd.f32 %v374_v22, %v365_v20 }
  0x2a   : > { %v379_v25 = vmax.f32 %v377_v23, 0.0  ;;  %v380_v26 = vmax.f32 %v378_v24, 0.0 }
  0x2c   : > { %381 = vst [vmem:[%s338_s16] sm:$0xff] %v379_v25  ;;  %382 = vst [vmem:[%s338_s16 + $0x8] sm:$0xff] %v380_v26 }
  0x2d PF: > { %s15_s20 = sadd.s32 1, %s569_s20   ;;  %s659_s18 = smov %s565_s19 }
  0x2e   : > { %p12_p5 = scmp.ge.s32.totalorder %s15_s20, 4   ;;  %s660_s19 = smov %s662_s21 }
  0x30   :  { %14 = sbr.rel (!%p12_p5) target bundleno = 2 (0x2), region = 82 }

// kernel: fpn1_forward.36
= control target key start
LH: loop header
LB: loop body
LE: loop exit
PB: predicated region body
PF: predicated region fallthrough
CT: control target
= control target key end

     0   :  { %9 = vsyncpa [#allocation3], 0  ;;  %s1608_s0 = inlined_call_operand.vmem [shape: bf16[8,25088], index: 0, kind: input, shape index: {}]   ;;  %s1609_s1 = inlined_call_operand.hbm [shape: bf16[25088,1024], index: 1, kind: input, shape index: {}]   ;;  %s1610_s2 = inlined_call_operand.vmem [shape: f32[8,1024], index: 2, kind: output, shape index: {0}]   ;;  %s1611_s3 = inlined_call_operand.vmem [shape: f32[1,1024], index: 3, kind: output, shape index: {1}]  }
   0x1   :  { %11 = vsyncpa [#allocation3 + $0x1], 0  ;;  %s1363_s12 = smov 0   ;;  %s1365_s13 = smov 0  }
   0x2   :  { %s1367_s14 = smov 0   ;;  %s1369_s15 = smov 0  }
   0x3   :  { %s1371_s16 = smov 0   ;;  %s1373_s17 = smov 0  }
   0x4   :  { %s1375_s18 = smov 0   ;;  %s1377_s19 = smov 0  }
   0x5 LB: > { %s970_s20 = sadd.s32 4294967295, %s1334_s19   ;;  %s29_s21 = sadd.s32 1, %s1326_s17  ;;  %s1334_s19 = sphi %s1377_s19, %s17_s19   ;;  %s1330_s18 = sphi %s1375_s18, %s1621_s18   ;;  %s1326_s17 = sphi %s1373_s17, %s1620_s17   ;;  %s1322_s16 = sphi %s1371_s16, %s1619_s16   ;;  %s1318_s15 = sphi %s1369_s15, %s1618_s15   ;;  %s1314_s14 = sphi %s1367_s14, %s1617_s14   ;;  %s1310_s13 = sphi %s1365_s13, %s1616_s13   ;;  %s1306_s12 = sphi %s1363_s12, %s1615_s12  }
   0x6   : > { %p30_p0 = scmp.ge.s32.totalorder %s29_s21, 49  ;;  %s36_s22 = sadd.s32 1, %s1330_s18 }
   0x7   : > { %s73_s23 = sadd.s32 1, %s1314_s14  ;;  %p80_p1 = scmp.ne.s32.totalorder %s1314_s14, %s1310_s13 }
   0x8   : > { %s1623_s21 = smov (%p30_p0, %s29_s21), 0  ;;  %s1625_s22 = smov (!%p30_p0, %s36_s22), %s1330_s18 }
   0x9   : > { %s68_s24 = ssub.s32 %s1326_s17, %s1623_s21  ;;  %p81_p2 = scmp.eq.s32.totalorder %s1334_s19, 0 }
   0xa   : > { %p38_p3 = scmp.ge.s32.totalorder %s1625_s22, 4  ;;  %p86_p4 = scmp.ne.s32.totalorder %s1310_s13, %s1306_s12 }
   0xb   : > { %p1414_p5 = por %p81_p2, %p80_p1  ;;  %p87_p6 = scmp.eq.s32.totalorder %s970_s20, 0 }
   0xc   : > { %s1627_s22 = smov (%p38_p3, %s1625_s22), 0  ;;  %p1067_p8 = scmp.lt.s32.totalorder %s1334_s19, 196 }
   0xd   : > { %p1420_p7 = por %p87_p6, %p86_p4  ;;  %s69_s27 = ssub.s32 %s1330_s18, %s1627_s22 }
   0xe   : > { %s70_s28 = sor.u32 %s69_s27, %s68_s24  ;;  %s177_s29 = sand.u32 1, %s1314_s14  }
   0xf   : > { %p71_p9 = scmp.eq.s32.totalorder %s70_s28, 0  ;;  %s974_s30 = sshll.u32 %s177_s29, 9 }
  0x10   : > { %s976_s4 = sshll.u32 %s1330_s18, 1  ;;  %s1059_s6 = sshll.u32 %s1326_s17, 9 }
  0x11   : > { %s1430_s5 = scalar_select %p71_p9, %s1314_s14, %s73_s23  }
  0x12   : > { %s188_s7 = sadd.s32 %s1059_s6, %s976_s4  ;;  %s181_s8 = scalar_lea.vmem [#allocation2], %s974_s30 }
  0x13   : > { %s191_s9 = sshll.u32 %s181_s8, 4  ;;  %s978_s10 = sshll.u32 %s188_s7, 6  ;;  %s1433_s9 = int_to_ptr.vmem [resolvable:$true] %s191_s9 }
  0x14   : > { %s1438_s20 = scalar_lea.hbm %s1609_s1, %s978_s10  ;;  %p1444_p10 = pnand %p1067_p8, %p1414_p5 }
  0x15   : > { %s1448_s24 = scalar_lea.sflag [#allocation3], %s177_s29  ;;  %s1238_s27 = scalar_lea.hbm %s1438_s20, 8192 }
  0x16   : > { %p1239_p11 = scmp.ne.s32.totalorder %s1438_s20, %s1238_s27  ;;  %p1240_p12 = pneg %p1444_p10 }
  0x17   : > { %s1243_s30 = scalar_lea.hbm %s1609_s1, 1605632  ;;  %p1244_p1 = scmp.lt.u32.totalorder %s1438_s20, %s1609_s1 }
  0x18   : > { %p1241_p13 = pnand %p1240_p12, %p1239_p11  ;;  %p1245_p2 = scmp.lt.u32.totalorder %s1243_s30, %s1238_s27 }
  0x19   : > { %p1247_p4 = scmp.lt.u32.totalorder %s1238_s27, %s1438_s20 }
  0x1a   : > { %p1242_p0 = pneg %p1241_p13  ;;  %p1246_p3 = por %p1245_p2, %p1244_p1 }
  0x1c   : > { %p1248_p5 = por %p1247_p4, %p1246_p3 }
  0x1e   : > { %p1249_p6 = pnand %p1248_p5, %p1242_p0 }
  0x20   : > { %1252 = shalt.err (!%p1249_p6)
}
  0x21   : > { %s1253_s29 = scalar_lea.vmem %s1433_s9, 8192  ;;  %s1336_s7 = smov [#allocation2]  }
  0x22   : > { %p1254_p8 = scmp.ne.s32.totalorder %s1433_s9, %s1253_s29  ;;  %s1258_s8 = sshll.u32 %s1336_s7, 4  ;;  %s1259_s8 = int_to_ptr.vmem [resolvable:$false] %s1258_s8 }
  0x23   : > { %s1260_s10 = scalar_lea.vmem %s1259_s8, 16384  ;;  %p1261_p13 = scmp.lt.s32.totalorder %s1433_s9, %s1259_s8 }
  0x24   : > { %p1256_p9 = pnand %p1254_p8, %p1240_p12  ;;  %p1262_p1 = scmp.lt.s32.totalorder %s1260_s10, %s1253_s29 }
  0x26   : > { %p1257_p11 = pneg %p1256_p9  ;;  %p1263_p2 = por %p1262_p1, %p1261_p13 }
  0x28   : > { %p1264_p3 = pnand %p1263_p2, %p1257_p11 }
  0x2a   : > { %1267 = shalt.err (!%p1264_p3)
}
  0x2b   : > { %s1337_s11 = smov 512   ;;  %s1338_s12 = smov 128  }
  0x2c   : > { %s1339_s27 = smov 8   ;;  %p979_p12 = scmp.ge.s32.totalorder %s1334_s19, 1 }
  0x2d   : > { %1066 = dma.hbm_to_vmem [thread:$0]  (!%p1444_p10), %s1438_s20, 8192, %s1433_s9, %s1448_s24, %s1337_s11, %s1338_s12, %s1339_s27  }
  0x2e   : > { %p199_p0 = scmp.lt.s32.totalorder %s1334_s19, 197 }
  0x30   : > { %p200_p4 = pnand %p979_p12, %p199_p0 }
  0x31   : > { %s205_s25 = sand.u32 (!%p200_p4), 1, %s1310_s13  }
  0x32   : > { %203 = sbr.rel (%p200_p4) target bundleno = 390 (0x186), region = 28  ;;  %s980_s28 = sshll.u32 (!%p200_p4), %s205_s25, 9 }
  0x33   : > { %s206_s30 = scalar_lea.sflag (!%p200_p4), [#allocation3], %s205_s25  ;;  %s1479_s4 = scalar_lea.vmem (!%p200_p4), [#allocation2], %s980_s28 }
  0x39   : > { %1301 = dma.done.wait (%p1420_p7), %s206_s30, 8192  }
  0x3a   : > { %1303 = vsyncadd (%p1420_p7), %s206_s30, 4294959104  ;;  %s981_s9 = sshll.u32 %s1318_s15, 2  ;;  %s983_s20 = sshll.u32 %s1322_s16, 1 }
  0x3b   : > { %p252_p10 = scmp.lt.s32.totalorder %s981_s9, 195  ;;  %p264_p5 = scmp.lt.s32.totalorder %s983_s20, 7 }
  0x3c   : > { %p276_p6 = scmp.eq.s32.totalorder %s1318_s15, 0  ;;  %p986_p7 = scmp.ne.s32.totalorder %s1318_s15, 0 }
  0x3d   : > { %s1629_s9 = smov (!%p252_p10, %s981_s9), 195  ;;  %s1631_s20 = smov (!%p264_p5, %s983_s20), 7 }
  0x3e   : > { %s982_s23 = sshll.u32 %s1629_s9, 2  ;;  %s984_s7 = sshll.u32 %s1631_s20, 3  ;;  %v1340_v0 = vmov (!%p986_p7), 0.0  }
  0x3f   : > { %s1491_s29 = scalar_lea.vmem %s1608_s0, %s982_s23  ;;  %s1496_s10 = scalar_lea.vmem %s1610_s2, %s984_s7 }
  0x40   : > { %s1501_s16 = scalar_lea.vmem %s1611_s3, %s1631_s20  ;;  %279 = sbr.rel (%p986_p7) target bundleno = 71 (0x47), region = 36  ;;  %280 = vst [vmem:[%s1496_s10] sm:$0xff] (!%p986_p7), %v1340_v0  ;;  %281 = vst [vmem:[%s1496_s10 + $0x8] sm:$0xff] (!%p986_p7), %v1340_v0 }
  0x47 PF: > { %286 = sbr.rel (!%p276_p6) target bundleno = 78 (0x4e), region = 40  ;;  %v287_v1 = vlaneseq (%p276_p6)  ;;  %v1341_v2 = vmov (%p276_p6), 0.0  }
  0x49   : > { %vm289_vm0 = vcmp.lt.s32.totalorder (%p276_p6), %v287_v1, 256 }
  0x4a   : > { %291 = vst.msk [vmem:[%s1501_s16] sm:$0x3] (%p276_p6), %vm289_vm0, %v1341_v2 }
  0x4e PF: > { %v1138_v3 = vld [vmem:[%s1479_s4 + $0x4] ss:$8 sps:$4 sm:$0xff]   ;;  %v1142_v5 = vld [vmem:[%s1479_s4] ss:$8 sps:$4 sm:$0xff]   ;;  %v1144_v7 = vld [vmem:[%s1479_s4 + $0x14] ss:$8 sps:$4 sm:$0xff]  }
  0x4f   : > { %v1140_v4 = vld [vmem:[%s1479_s4 + $0x104] ss:$8 sps:$4 sm:$0xff]   ;;  %694 = vmatprep.subr.bf16.mxu0 %v1138_v3  ;;  %v1143_v6 = vld [vmem:[%s1479_s4 + $0x100] ss:$8 sps:$4 sm:$0xff]   ;;  %v1146_v8 = vld [vmem:[%s1479_s4 + $0x114] ss:$8 sps:$4 sm:$0xff]  }
  0x50   : > { %735 = vmatprep.subr.bf16.mxu1 %v1140_v4  ;;  %695 = vmatpush1.bf16.msra.mxu0 %v1142_v5  ;;  %v1148_v9 = vld [vmem:[%s1479_s4 + $0x10] ss:$8 sps:$4 sm:$0xff]   ;;  %v1150_v11 = vld [vmem:[%s1479_s4 + $0x24] ss:$8 sps:$4 sm:$0xff]   ;;  %v1154_v13 = vld [vmem:[%s1479_s4 + $0x20] ss:$8 sps:$4 sm:$0xff]  }
  0x51   : > { %736 = vmatpush1.bf16.msra.mxu1 %v1143_v6  ;;  %696 = vmatprep.subr.bf16.mxu0 %v1144_v7  ;;  %v1149_v10 = vld [vmem:[%s1479_s4 + $0x110] ss:$8 sps:$4 sm:$0xff]   ;;  %v1152_v12 = vld [vmem:[%s1479_s4 + $0x124] ss:$8 sps:$4 sm:$0xff]   ;;  %v1155_v14 = vld [vmem:[%s1479_s4 + $0x120] ss:$8 sps:$4 sm:$0xff]  }
  0x52   : > { %737 = vmatprep.subr.bf16.mxu1 %v1146_v8  ;;  %v1156_v15 = vld [vmem:[%s1479_s4 + $0x34] ss:$8 sps:$4 sm:$0xff]   ;;  %v1160_v17 = vld [vmem:[%s1479_s4 + $0x30] ss:$8 sps:$4 sm:$0xff]   ;;  %v1162_v19 = vld [vmem:[%s1479_s4 + $0x44] ss:$8 sps:$4 sm:$0xff]  }
  0x53   : > { %v1158_v16 = vld [vmem:[%s1479_s4 + $0x134] ss:$8 sps:$4 sm:$0xff]   ;;  %v1161_v18 = vld [vmem:[%s1479_s4 + $0x130] ss:$8 sps:$4 sm:$0xff]   ;;  %v1164_v20 = vld [vmem:[%s1479_s4 + $0x144] ss:$8 sps:$4 sm:$0xff]  }
  0x54   : > { %697 = vmatpush1.bf16.msra.mxu0 %v1148_v9  ;;  %v1166_v21 = vld [vmem:[%s1479_s4 + $0x40] ss:$8 sps:$4 sm:$0xff]   ;;  %v1168_v23 = vld [vmem:[%s1479_s4 + $0x54] ss:$8 sps:$4 sm:$0xff]   ;;  %v1172_v25 = vld [vmem:[%s1479_s4 + $0x50] ss:$8 sps:$4 sm:$0xff]  }
  0x55   : > { %738 = vmatpush1.bf16.msra.mxu1 %v1149_v10  ;;  %698 = vmatprep.subr.bf16.mxu0 %v1150_v11  ;;  %v1167_v22 = vld [vmem:[%s1479_s4 + $0x140] ss:$8 sps:$4 sm:$0xff]   ;;  %v1170_v24 = vld [vmem:[%s1479_s4 + $0x154] ss:$8 sps:$4 sm:$0xff]   ;;  %v1173_v26 = vld [vmem:[%s1479_s4 + $0x150] ss:$8 sps:$4 sm:$0xff]  }
  0x56   : > { %739 = vmatprep.subr.bf16.mxu1 %v1152_v12  ;;  %v1174_v27 = vld [vmem:[%s1479_s4 + $0x64] ss:$8 sps:$4 sm:$0xff]   ;;  %v1178_v29 = vld [vmem:[%s1479_s4 + $0x60] ss:$8 sps:$4 sm:$0xff]   ;;  %v1180_v31 = vld [vmem:[%s1479_s4 + $0x74] ss:$8 sps:$4 sm:$0xff]  }
  0x57   : > { %v1176_v28 = vld [vmem:[%s1479_s4 + $0x164] ss:$8 sps:$4 sm:$0xff]   ;;  %v1179_v30 = vld [vmem:[%s1479_s4 + $0x160] ss:$8 sps:$4 sm:$0xff]   ;;  %v1182_v32 = vld [vmem:[%s1479_s4 + $0x174] ss:$8 sps:$4 sm:$0xff]  }
  0x58   : > { %699 = vmatpush1.bf16.msra.mxu0 %v1154_v13  ;;  %v1184_v33 = vld [vmem:[%s1479_s4 + $0x70] ss:$8 sps:$4 sm:$0xff]   ;;  %v1186_v35 = vld [vmem:[%s1479_s4 + $0x84] ss:$8 sps:$4 sm:$0xff]   ;;  %v1190_v37 = vld [vmem:[%s1479_s4 + $0x80] ss:$8 sps:$4 sm:$0xff]  }
  0x59   : > { %740 = vmatpush1.bf16.msra.mxu1 %v1155_v14  ;;  %700 = vmatprep.subr.bf16.mxu0 %v1156_v15  ;;  %v1185_v34 = vld [vmem:[%s1479_s4 + $0x170] ss:$8 sps:$4 sm:$0xff]   ;;  %v1188_v36 = vld [vmem:[%s1479_s4 + $0x184] ss:$8 sps:$4 sm:$0xff]   ;;  %v1191_v38 = vld [vmem:[%s1479_s4 + $0x180] ss:$8 sps:$4 sm:$0xff]  }
  0x5a   : > { %741 = vmatprep.subr.bf16.mxu1 %v1158_v16  ;;  %v1192_v39 = vld [vmem:[%s1479_s4 + $0x94] ss:$8 sps:$4 sm:$0xff]   ;;  %v1196_v41 = vld [vmem:[%s1479_s4 + $0x90] ss:$8 sps:$4 sm:$0xff]   ;;  %v1198_v43 = vld [vmem:[%s1479_s4 + $0xa4] ss:$8 sps:$4 sm:$0xff]  }
  0x5b   : > { %v1194_v40 = vld [vmem:[%s1479_s4 + $0x194] ss:$8 sps:$4 sm:$0xff]   ;;  %v1197_v42 = vld [vmem:[%s1479_s4 + $0x190] ss:$8 sps:$4 sm:$0xff]   ;;  %v1200_v44 = vld [vmem:[%s1479_s4 + $0x1a4] ss:$8 sps:$4 sm:$0xff]  }
  0x5c   : > { %701 = vmatpush1.bf16.msra.mxu0 %v1160_v17  ;;  %v1202_v45 = vld [vmem:[%s1479_s4 + $0xa0] ss:$8 sps:$4 sm:$0xff]   ;;  %v1204_v47 = vld [vmem:[%s1479_s4 + $0xb4] ss:$8 sps:$4 sm:$0xff]   ;;  %v1208_v52 = vld [vmem:[%s1479_s4 + $0xb0] ss:$8 sps:$4 sm:$0xff]  }
  0x5d   : > { %742 = vmatpush1.bf16.msra.mxu1 %v1161_v18  ;;  %702 = vmatprep.subr.bf16.mxu0 %v1162_v19  ;;  %v1203_v46 = vld [vmem:[%s1479_s4 + $0x1a0] ss:$8 sps:$4 sm:$0xff]   ;;  %v1206_v48 = vld [vmem:[%s1479_s4 + $0x1b4] ss:$8 sps:$4 sm:$0xff]   ;;  %v1209_v53 = vld [vmem:[%s1479_s4 + $0x1b0] ss:$8 sps:$4 sm:$0xff]  }
  0x5e   : > { %743 = vmatprep.subr.bf16.mxu1 %v1164_v20  ;;  %v294_v49 = vld [vmem:[%s1491_s29] sm:$0xff]  ;;  %v295_v51 = vld [vmem:[%s1491_s29 + $0x8] sm:$0xff]  ;;  %v1216_v59 = vld [vmem:[%s1479_s4 + $0xd4] ss:$8 sps:$4 sm:$0xff]   ;;  %p1056_p8 = scmp.ne.s32.totalorder %s1318_s15, 48 }
  0x5f   : > { %v989_v50 = vcombine.high %v294_v49, %v294_v49  ;;  %v991_v54 = vcombine.high %v295_v51, %v295_v51  ;;  %v1210_v55 = vld [vmem:[%s1479_s4 + $0xc4] ss:$8 sps:$4 sm:$0xff]   ;;  %v1214_v57 = vld [vmem:[%s1479_s4 + $0xc0] ss:$8 sps:$4 sm:$0xff]   ;;  %v1218_v60 = vld [vmem:[%s1479_s4 + $0x1d4] ss:$8 sps:$4 sm:$0xff]   ;;  %v988_v7 = vcombine.low %v294_v49, %v294_v49  ;;  %v990_v8 = vcombine.low %v295_v51, %v295_v51 }
  0x60   : > { %703 = vmatpush1.bf16.msra.mxu0 %v1166_v21  ;;  %v1212_v56 = vld [vmem:[%s1479_s4 + $0x1c4] ss:$8 sps:$4 sm:$0xff]   ;;  %v1215_v58 = vld [vmem:[%s1479_s4 + $0x1c0] ss:$8 sps:$4 sm:$0xff]   ;;  %v1220_v61 = vld [vmem:[%s1479_s4 + $0xd0] ss:$8 sps:$4 sm:$0xff]  }
  0x61   : > { %744 = vmatpush1.bf16.msra.mxu1 %v1167_v22  ;;  %704 = vmatprep.subr.bf16.mxu0 %v1168_v23  ;;  %v1221_v62 = vld [vmem:[%s1479_s4 + $0x1d0] ss:$8 sps:$4 sm:$0xff]   ;;  %v1222_v63 = vld [vmem:[%s1479_s4 + $0xe4] ss:$8 sps:$4 sm:$0xff]   ;;  %v1226_v1 = vld [vmem:[%s1479_s4 + $0xe0] ss:$8 sps:$4 sm:$0xff]  }
  0x62   : > { %745 = vmatprep.subr.bf16.mxu1 %v1170_v24  ;;  %726 = vmatprep.mubr.bf16.mxu0 %v989_v50  ;;  %v1224_v0 = vld [vmem:[%s1479_s4 + $0x1e4] ss:$8 sps:$4 sm:$0xff]   ;;  %v1227_v2 = vld [vmem:[%s1479_s4 + $0x1e0] ss:$8 sps:$4 sm:$0xff]   ;;  %v1228_v3 = vld [vmem:[%s1479_s4 + $0xf4] ss:$8 sps:$4 sm:$0xff]  }
  0x63   : > { %767 = vmatprep.mubr.bf16.mxu1 %v991_v54  ;;  %v1230_v4 = vld [vmem:[%s1479_s4 + $0x1f4] ss:$8 sps:$4 sm:$0xff]   ;;  %v1232_v5 = vld [vmem:[%s1479_s4 + $0xf0] ss:$8 sps:$4 sm:$0xff]   ;;  %v292_v10 = vld [vmem:[%s1496_s10] sm:$0xff] }
  0x64   : > { %705 = vmatpush1.bf16.msra.mxu0 %v1172_v25  ;;  %v1233_v6 = vld [vmem:[%s1479_s4 + $0x1f0] ss:$8 sps:$4 sm:$0xff]   ;;  %v293_v14 = vld [vmem:[%s1496_s10 + $0x8] sm:$0xff] }
  0x65   : > { %746 = vmatpush1.bf16.msra.mxu1 %v1173_v26  ;;  %706 = vmatprep.subr.bf16.mxu0 %v1174_v27 }
  0x66   : > { %747 = vmatprep.subr.bf16.mxu1 %v1176_v28 }
  0x68   : > { %707 = vmatpush1.bf16.msra.mxu0 %v1178_v29  ;;  %v1342_v29 = vmov (!%p1056_p8), 1966171168  }
  0x69   : > { %748 = vmatpush1.bf16.msra.mxu1 %v1179_v30  ;;  %708 = vmatprep.subr.bf16.mxu0 %v1180_v31  ;;  %v803_v30 = vunpack.c.l.s4 (!%p1056_p8), %v1342_v29  ;;  %v805_v31 = vlaneseq (!%p1056_p8) }
  0x6a   : > { %749 = vmatprep.subr.bf16.mxu1 %v1182_v32 }
  0x6b   : > { %vm820_vm1 = vcmp.lt.s32.totalorder (!%p1056_p8), %v805_v31, 256 }
  0x6c   : > { %709 = vmatpush1.bf16.msra.mxu0 %v1184_v33 }
  0x6d   : > { %750 = vmatpush1.bf16.msra.mxu1 %v1185_v34  ;;  %710 = vmatprep.subr.bf16.mxu0 %v1186_v35 }
  0x6e   : > { %751 = vmatprep.subr.bf16.mxu1 %v1188_v36  ;;  %v804_v36 = vunpack.c.0.s8 (!%p1056_p8), %v803_v30 }
  0x70   : > { %711 = vmatpush1.bf16.msra.mxu0 %v1190_v37  ;;  %v806_v37 = vshrl.u32 (!%p1056_p8), %v805_v31, 7 }
  0x71   : > { %752 = vmatpush1.bf16.msra.mxu1 %v1191_v38  ;;  %712 = vmatprep.subr.bf16.mxu0 %v1192_v39 }
  0x72   : > { %753 = vmatprep.subr.bf16.mxu1 %v1194_v40 }
  0x74   : > { %713 = vmatpush1.bf16.msra.mxu0 %v1196_v41 }
  0x75   : > { %754 = vmatpush1.bf16.msra.mxu1 %v1197_v42  ;;  %714 = vmatprep.subr.bf16.mxu0 %v1198_v43  ;;  %v807_v42 = vsub.s32 (!%p1056_p8), %v804_v36, %v806_v37 }
  0x76   : > { %755 = vmatprep.subr.bf16.mxu1 %v1200_v44 }
  0x78   : > { %715 = vmatpush1.bf16.msra.mxu0 %v1202_v45  ;;  %v784_v45 = vld [vmem:[%s1501_s16] sm:$0x3] (!%p1056_p8) }
  0x79   : > { %756 = vmatpush1.bf16.msra.mxu1 %v1203_v46  ;;  %716 = vmatprep.subr.bf16.mxu0 %v1204_v47 }
  0x7a   : > { %757 = vmatprep.subr.bf16.mxu1 %v1206_v48 }
  0x7c   : > { %717 = vmatpush1.bf16.msra.mxu0 %v1208_v52 }
  0x7d   : > { %758 = vmatpush1.bf16.msra.mxu1 %v1209_v53  ;;  %718 = vmatprep.subr.bf16.mxu0 %v1210_v55 }
  0x7e   : > { %759 = vmatprep.subr.bf16.mxu1 %v1212_v56 }
  0x80   : > { %719 = vmatpush1.bf16.msra.mxu0 %v1214_v57 }
  0x81   : > { %760 = vmatpush1.bf16.msra.mxu1 %v1215_v58  ;;  %720 = vmatprep.subr.bf16.mxu0 %v1216_v59 }
  0x82   : > { %761 = vmatprep.subr.bf16.mxu1 %v1218_v60 }
  0x84   : > { %721 = vmatpush1.bf16.msra.mxu0 %v1220_v61 }
  0x85   : > { %762 = vmatpush1.bf16.msra.mxu1 %v1221_v62  ;;  %722 = vmatprep.subr.bf16.mxu0 %v1222_v63 }
  0x86   : > { %763 = vmatprep.subr.bf16.mxu1 %v1224_v0 }
  0x88   : > { %723 = vmatpush1.bf16.msra.mxu0 %v1226_v1 }
  0x89   : > { %764 = vmatpush1.bf16.msra.mxu1 %v1227_v2  ;;  %724 = vmatprep.subr.bf16.mxu0 %v1228_v3 }
  0x8a   : > { %765 = vmatprep.subr.bf16.mxu1 %v1230_v4 }
  0x8c   : > { %725 = vmatpush1.bf16.msra.mxu0 %v1232_v5 }
  0x8d   : > { %766 = vmatpush1.bf16.msra.mxu1 %v1233_v6 }
  0x8f   : > { %727 = vmatmul.mubr.bf16.vlgmr.msra.gmra.mrb[0].mxu0 %v988_v7 }
  0x90   : > { %768 = vmatmul.mubr.bf16.vlgmr.msra.gmra.mrb[0].mxu1 %v990_v8 }
 0x162   : > { %v728_v9 = vpop.f32.mrb[0].mxu0 }
 0x163   : > { %v769_v11 = vpop.f32.mrb[0].mxu1  ;;  %v730_v13 = vpop.f32.mrb[1].mxu0  ;;  %783 = sbr.rel (%p1056_p8) target bundleno = 390 (0x186), region = 44 }
 0x164   : > { %v770_v12 = vadd.f32 %v769_v11, %v728_v9  ;;  %v771_v15 = vpop.f32.mrb[1].mxu1  ;;  %v732_v17 = vpop.f32.mrb[2].mxu0 }
 0x165   : > { %v772_v16 = vadd.f32 %v771_v15, %v730_v13  ;;  %v773_v18 = vpop.f32.mrb[2].mxu1  ;;  %v733_v20 = vpop.f32.mrb[3].mxu0 }
 0x166   : > { %v776_v19 = vadd.f32 %v770_v12, %v292_v10  ;;  %v774_v21 = vpop.f32.mrb[3].mxu1 }
 0x167   : > { %v777_v22 = vadd.f32 %v772_v16, %v293_v14 }
 0x168   : > { %778 = vst [vmem:[%s1496_s10] sm:$0xff] %v776_v19 }
 0x169   : > { %779 = vst [vmem:[%s1496_s10 + $0x8] sm:$0xff] %v777_v22 }
 0x16f   : > { %v785_v23 = vld [vmem:[%s1496_s10] sm:$0xff] }
 0x170   : > { %v786_v24 = vld [vmem:[%s1496_s10 + $0x8] sm:$0xff]  ;;  %v787_v25 = vrot.slane %v785_v23, 4 }
 0x171   : > { %v793_v26 = vrot.slane %v786_v24, 4 }
 0x172   : > { %v788_v27 = vadd.f32 %v787_v25, %v785_v23 }
 0x173   : > { %v794_v28 = vadd.f32 %v793_v26, %v786_v24 }
 0x174   : > { %v789_v32 = vrot.slane %v788_v27, 2 }
 0x175   : > { %v795_v33 = vrot.slane %v794_v28, 2 }
 0x176   : > { %v790_v34 = vadd.f32 %v789_v32, %v788_v27 }
 0x177   : > { %v796_v35 = vadd.f32 %v795_v33, %v794_v28 }
 0x178   : > { %v791_v38 = vrot.slane %v790_v34, 1 }
 0x179   : > { %v797_v39 = vrot.slane %v796_v35, 1 }
 0x17a   : > { %v792_v40 = vadd.f32 %v791_v38, %v790_v34 }
 0x17b   : > { %v798_v41 = vadd.f32 %v797_v39, %v796_v35 }
 0x17d   : > { %v801_v43 = vcombine.low %v792_v40, %v798_v41 }
 0x17f   : > { %v808_v44 = vrot.slane %v801_v43, %v807_v42 }
 0x181   : > { %v815_v46 = vrot.slane %v808_v44, %v807_v42 }
 0x183   : > { %v817_v47 = vadd.f32 %v815_v46, %v784_v45 }
 0x185   : > { %822 = vst.msk [vmem:[%s1501_s16] sm:$0x3] %vm820_vm1, %v817_v47 }
 0x186 PF: > { %s17_s19 = sadd.s32 1, %s1334_s19   ;;  %s1615_s12 = smov %s1310_s13 }
 0x187   : > { %p14_p9 = scmp.ge.s32.totalorder %s17_s19, 198   ;;  %s1616_s13 = smov %s1314_s14 }
 0x188   : > { %s1617_s14 = smov %s1430_s5  ;;  %s1618_s15 = smov %s1326_s17 }
 0x189   : > { %s1619_s16 = smov %s1330_s18  ;;  %s1620_s17 = smov %s1623_s21 }
 0x18a   : > { %s1621_s18 = smov %s1627_s22  ;;  %16 = sbr.rel (!%p14_p9) target bundleno = 5 (0x5), region = 95 }
 0x191   :  { %868 = vsyncpa [#allocation3], 1 }
 0x192   :  { %870 = vsyncpa [#allocation3 + $0x1], 1 }

// kernel: fpn1_forward.37
= control target key start
LH: loop header
LB: loop body
LE: loop exit
PB: predicated region body
PF: predicated region fallthrough
CT: control target
= control target key end

     0   :  { %s415_s9 = smov 0   ;;  %s417_s10 = smov 0   ;;  %s464_s0 = inlined_call_operand.vmem [shape: f32[8,1024], index: 0, kind: input, shape index: {}]   ;;  %s465_s1 = inlined_call_operand.vmem [shape: f32[1,1024], index: 1, kind: input, shape index: {}]   ;;  %s466_s2 = inlined_call_operand.vmem [shape: f32[1,1024], index: 2, kind: output, shape index: {}]  }
   0x1   :  { %s419_s11 = smov 0  }
   0x2 LB: > { %s24_s12 = sadd.s32 1, %s392_s10  ;;  %p341_p0 = scmp.ge.s32.totalorder %s396_s11, 1  ;;  %s396_s11 = sphi %s419_s11, %s12_s11   ;;  %s392_s10 = sphi %s417_s10, %s470_s10   ;;  %s388_s9 = sphi %s415_s9, %s469_s9  }
   0x3   : > { %p26_p1 = scmp.ge.s32.totalorder %s24_s12, 4  ;;  %p141_p2 = scmp.lt.s32.totalorder %s396_s11, 5 }
   0x5   : > { %s472_s12 = smov (%p26_p1, %s24_s12), 0  ;;  %p142_p3 = pnand %p341_p0, %p141_p2 }
   0x6   : > { %s342_s13 = sshll.u32 (!%p142_p3), %s388_s9, 1  ;;  %v194_v0 = vlaneseq (!%p142_p3)  ;;  %v398_v6 = vmov (!%p142_p3), 0.0   ;;  %v399_v22 = vmov (!%p142_p3), 1966171168  }
   0x7   : > { %145 = sbr.rel (%p142_p3) target bundleno = 47 (0x2f), region = 28  ;;  %p173_p4 = scmp.lt.s32.totalorder (!%p142_p3), %s342_s13, 7  ;;  %v243_v23 = vunpack.c.l.s4 (!%p142_p3), %v399_v22 }
   0x8   : > { %v205_v1 = vshrl.u32 (!%p142_p3), %v194_v0, 7  ;;  %vm433_vm0 = vcmp.lt.s32.totalorder (!%p142_p3), %v194_v0, 256 }
   0x9   : > { %v244_v28 = vunpack.c.0.s8 (!%p142_p3), %v243_v23 }
   0xa   : > { %v206_v3 = vsub.s32 (!%p142_p3), 0, %v205_v1  ;;  %v210_v4 = vsub.s32 (!%p142_p3), 1, %v205_v1  ;;  %vm221_vm1 = vcmp.lt.s32.totalorder (!%p142_p3), %v205_v1, 2 }
   0xb   : > { %v247_v33 = vsub.s32 (!%p142_p3), %v244_v28, %v205_v1 }
   0xe   : > { %s474_s13 = smov (!%p173_p4, %s342_s13), 7 }
   0xf   : > { %s343_s14 = sshll.u32 %s474_s13, 3  ;;  %s183_s17 = scalar_lea.vmem %s465_s1, %s474_s13 }
  0x10   : > { %s178_s20 = scalar_lea.vmem %s464_s0, %s343_s14  ;;  %s446_s23 = scalar_lea.vmem %s466_s2, %s474_s13  ;;  %v199_v5 = vld [vmem:[%s183_s17] sm:$0x3] }
  0x11   : > { %198 = vst.msk [vmem:[%s446_s23] sm:$0x3] %vm433_vm0, %v398_v6  ;;  %v200_v7 = vmul.f32 0.5, %v199_v5  ;;  %v201_v8 = vld [vmem:[%s178_s20] sm:$0xff]  ;;  %v202_v9 = vld [vmem:[%s178_s20 + $0x8] sm:$0xff] }
  0x13   : > { %v207_v10 = vrot.slane %v200_v7, %v206_v3  ;;  %v211_v11 = vrot.slane %v200_v7, %v210_v4 }
  0x15   : > { %v214_v12 = vsub.f32 %v201_v8, %v207_v10  ;;  %v215_v13 = vsub.f32 %v202_v9, %v211_v11 }
  0x17   : > { %v222_v14 = vsel %vm221_vm1, %v214_v12, 0.0  ;;  %v223_v15 = vsel %vm221_vm1, %v215_v13, 0.0 }
  0x18   : > { %v225_v16 = vmul.f32 %v222_v14, %v222_v14  ;;  %v226_v17 = vmul.f32 %v223_v15, %v223_v15  ;;  %v224_v36 = vld [vmem:[%s446_s23] sm:$0x3] }
  0x1a   : > { %v227_v18 = vrot.slane %v225_v16, 4  ;;  %v233_v19 = vrot.slane %v226_v17, 4 }
  0x1c   : > { %v228_v20 = vadd.f32 %v227_v18, %v225_v16  ;;  %v234_v21 = vadd.f32 %v233_v19, %v226_v17 }
  0x1e   : > { %v229_v24 = vrot.slane %v228_v20, 2  ;;  %v235_v25 = vrot.slane %v234_v21, 2 }
  0x20   : > { %v230_v26 = vadd.f32 %v229_v24, %v228_v20  ;;  %v236_v27 = vadd.f32 %v235_v25, %v234_v21 }
  0x22   : > { %v231_v29 = vrot.slane %v230_v26, 1  ;;  %v237_v30 = vrot.slane %v236_v27, 1 }
  0x24   : > { %v232_v31 = vadd.f32 %v231_v29, %v230_v26  ;;  %v238_v32 = vadd.f32 %v237_v30, %v236_v27 }
  0x26   : > { %v241_v34 = vcombine.low %v232_v31, %v238_v32 }
  0x28   : > { %v248_v35 = vrot.slane %v241_v34, %v247_v33 }
  0x2a   : > { %v255_v37 = vrot.slane %v248_v35, %v247_v33 }
  0x2c   : > { %v257_v38 = vadd.f32 %v255_v37, %v224_v36 }
  0x2e   : > { %262 = vst.msk [vmem:[%s446_s23] sm:$0x3] %vm433_vm0, %v257_v38 }
  0x2f PF: > { %s12_s11 = sadd.s32 1, %s396_s11   ;;  %s469_s9 = smov %s392_s10 }
  0x30   : > { %p9_p5 = scmp.ge.s32.totalorder %s12_s11, 6   ;;  %s470_s10 = smov %s472_s12 }
  0x32   :  { %11 = sbr.rel (!%p9_p5) target bundleno = 2 (0x2), region = 65 }

// kernel: fpn1_forward.38
= control target key start
LH: loop header
LB: loop body
LE: loop exit
PB: predicated region body
PF: predicated region fallthrough
CT: control target
= control target key end

     0   :  { %s601_s18 = smov 0   ;;  %s603_s19 = smov 0   ;;  %s653_s0 = inlined_call_operand.vmem [shape: f32[8,1024], index: 0, kind: input, shape index: {}]   ;;  %s654_s1 = inlined_call_operand.vmem [shape: f32[1,1024], index: 1, kind: input, shape index: {}]   ;;  %s655_s2 = inlined_call_operand.vmem [shape: f32[1,1024], index: 2, kind: input, shape index: {}]   ;;  %s656_s3 = inlined_call_operand.vmem [shape: f32[1,1024], index: 3, kind: input, shape index: {}]   ;;  %s657_s4 = inlined_call_operand.vmem [shape: f32[1,1024], index: 4, kind: input, shape index: {}]   ;;  %s658_s5 = inlined_call_operand.vmem [shape: f32[8,1024], index: 5, kind: output, shape index: {}]  }
   0x1   :  { %s605_s20 = smov 0  }
   0x2 LB: > { %s24_s21 = sadd.s32 1, %s565_s19  ;;  %p510_p0 = scmp.ge.s32.totalorder %s569_s20, 1  ;;  %s569_s20 = sphi %s605_s20, %s15_s20   ;;  %s565_s19 = sphi %s603_s19, %s660_s19   ;;  %s561_s18 = sphi %s601_s18, %s659_s18  }
   0x3   : > { %p25_p1 = scmp.ge.s32.totalorder %s24_s21, 4  ;;  %p248_p2 = scmp.lt.s32.totalorder %s569_s20, 5 }
   0x5   : > { %s662_s21 = smov (%p25_p1, %s24_s21), 0  ;;  %p249_p3 = pnand %p510_p0, %p248_p2 }
   0x6   : > { %s511_s22 = sshll.u32 (!%p249_p3), %s561_s18, 1  ;;  %v354_v3 = vlaneseq (!%p249_p3) }
   0x7   : > { %252 = sbr.rel (%p249_p3) target bundleno = 45 (0x2d), region = 40  ;;  %p303_p4 = scmp.lt.s32.totalorder (!%p249_p3), %s511_s22, 7 }
   0x8   : > { %v355_v4 = vshrl.u32 (!%p249_p3), %v354_v3, 7 }
   0xa   : > { %v356_v8 = vsub.s32 (!%p249_p3), 0, %v355_v4  ;;  %v360_v9 = vsub.s32 (!%p249_p3), 1, %v355_v4 }
   0xe   : > { %s664_s22 = smov (!%p303_p4, %s511_s22), 7 }
   0xf   : > { %s318_s25 = scalar_lea.vmem %s655_s2, %s664_s22  ;;  %s313_s28 = scalar_lea.vmem %s654_s1, %s664_s22 }
  0x10   : > { %v342_v0 = vld [vmem:[%s318_s25] sm:$0x3]  ;;  %s323_s6 = scalar_lea.vmem %s656_s3, %s664_s22  ;;  %s512_s7 = sshll.u32 %s664_s22, 3 }
  0x11   : > { %v343_v1 = vmul.f32 0.5, %v342_v0  ;;  %v340_v5 = vld [vmem:[%s313_s28] sm:$0x3]  ;;  %s308_s10 = scalar_lea.vmem %s653_s0, %s512_s7  ;;  %s328_s13 = scalar_lea.vmem %s657_s4, %s664_s22 }
  0x12   : > { %v346_v6 = vld [vmem:[%s323_s6] sm:$0x3]  ;;  %v341_v7 = vmul.f32 0.5, %v340_v5  ;;  %v352_v14 = vld [vmem:[%s308_s10 + $0x8] sm:$0xff]  ;;  %s338_s16 = scalar_lea.vmem %s658_s5, %s512_s7 }
  0x13   : > { %v344_v2 = vadd.f32 1e-05, %v343_v1  ;;  %v348_v12 = vld [vmem:[%s328_s13] sm:$0x3] }
  0x14   : > { %v351_v13 = vld [vmem:[%s308_s10] sm:$0xff] }
  0x15   : > { %545 = vrsqrt.f32 %v344_v2 }
  0x1f   : > { %v546_v10 = vpop.eup %545 }
  0x20   : > { %v347_v11 = vmul.f32 %v546_v10, %v346_v6 }
  0x22   : > { %v349_v15 = vmul.f32 %v347_v11, %v341_v7  ;;  %v357_v16 = vrot.slane %v347_v11, %v356_v8  ;;  %v361_v17 = vrot.slane %v347_v11, %v360_v9 }
  0x24   : > { %v350_v18 = vsub.f32 %v348_v12, %v349_v15  ;;  %v364_v19 = vmul.f32 %v357_v16, %v351_v13  ;;  %v365_v20 = vmul.f32 %v361_v17, %v352_v14 }
  0x26   : > { %v370_v21 = vrot.slane %v350_v18, %v356_v8  ;;  %v374_v22 = vrot.slane %v350_v18, %v360_v9 }
  0x28   : > { %v377_v23 = vadd.f32 %v370_v21, %v364_v19  ;;  %v378_v24 = vadd.f32 %v374_v22, %v365_v20 }
  0x2a   : > { %v379_v25 = vmax.f32 %v377_v23, 0.0  ;;  %v380_v26 = vmax.f32 %v378_v24, 0.0 }
  0x2c   : > { %381 = vst [vmem:[%s338_s16] sm:$0xff] %v379_v25  ;;  %382 = vst [vmem:[%s338_s16 + $0x8] sm:$0xff] %v380_v26 }
  0x2d PF: > { %s15_s20 = sadd.s32 1, %s569_s20   ;;  %s659_s18 = smov %s565_s19 }
  0x2e   : > { %p12_p5 = scmp.ge.s32.totalorder %s15_s20, 6   ;;  %s660_s19 = smov %s662_s21 }
  0x30   :  { %14 = sbr.rel (!%p12_p5) target bundleno = 2 (0x2), region = 82 }

// kernel: fpn1_forward.39
= control target key start
LH: loop header
LB: loop body
LE: loop exit
PB: predicated region body
PF: predicated region fallthrough
CT: control target
= control target key end

     0   :  { %s1183_s1 = inlined_call_operand.vmem [shape: bf16[1024,128], index: 1, kind: input, shape index: {}]   ;;  %s1184_s0 = inlined_call_operand.vmem [shape: bf16[8,1024], index: 0, kind: input, shape index: {}]   ;;  %s1185_s2 = inlined_call_operand.vmem [shape: f32[8,128], index: 2, kind: output, shape index: {}]  }
   0x1   :  { %v889_v0 = vld [vmem:[%s1183_s1 + $0x40] sm:$0xff]   ;;  %v893_v4 = vld [vmem:[%s1183_s1 + $0x48] sm:$0xff]   ;;  %v897_v8 = vld [vmem:[%s1183_s1 + $0x50] sm:$0xff]  }
   0x2   :  { %v890_v1 = vld [vmem:[%s1183_s1 + $0xc0] sm:$0xff]   ;;  %800 = vmatprep.subr.bf16.mxu0 %v889_v0  ;;  %v894_v5 = vld [vmem:[%s1183_s1 + $0xc8] sm:$0xff]   ;;  %v898_v9 = vld [vmem:[%s1183_s1 + $0xd0] sm:$0xff]  }
   0x3   :  { %v891_v2 = vld [vmem:[%s1183_s1] sm:$0xff]   ;;  %822 = vmatprep.subr.bf16.mxu1 %v890_v1  ;;  %v895_v6 = vld [vmem:[%s1183_s1 + $0x8] sm:$0xff]   ;;  %v899_v10 = vld [vmem:[%s1183_s1 + $0x10] sm:$0xff]  }
   0x4   :  { %v892_v3 = vld [vmem:[%s1183_s1 + $0x80] sm:$0xff]   ;;  %801 = vmatpush3.bf16.msra.mxu0 %v891_v2  ;;  %v896_v7 = vld [vmem:[%s1183_s1 + $0x88] sm:$0xff]   ;;  %v900_v11 = vld [vmem:[%s1183_s1 + $0x90] sm:$0xff]  }
   0x5   :  { %823 = vmatpush3.bf16.msra.mxu1 %v892_v3  ;;  %802 = vmatprep.subr.bf16.mxu0 %v893_v4  ;;  %v901_v12 = vld [vmem:[%s1183_s1 + $0x58] sm:$0xff]   ;;  %v905_v16 = vld [vmem:[%s1183_s1 + $0x60] sm:$0xff]   ;;  %v909_v20 = vld [vmem:[%s1183_s1 + $0x68] sm:$0xff]  }
   0x6   :  { %824 = vmatprep.subr.bf16.mxu1 %v894_v5  ;;  %v902_v13 = vld [vmem:[%s1183_s1 + $0xd8] sm:$0xff]   ;;  %v906_v17 = vld [vmem:[%s1183_s1 + $0xe0] sm:$0xff]   ;;  %v910_v21 = vld [vmem:[%s1183_s1 + $0xe8] sm:$0xff]  }
   0x7   :  { %v903_v14 = vld [vmem:[%s1183_s1 + $0x18] sm:$0xff]   ;;  %v907_v18 = vld [vmem:[%s1183_s1 + $0x20] sm:$0xff]   ;;  %v911_v22 = vld [vmem:[%s1183_s1 + $0x28] sm:$0xff]  }
   0x8   :  { %803 = vmatpush3.bf16.msra.mxu0 %v895_v6  ;;  %v904_v15 = vld [vmem:[%s1183_s1 + $0x98] sm:$0xff]   ;;  %v908_v19 = vld [vmem:[%s1183_s1 + $0xa0] sm:$0xff]   ;;  %v912_v23 = vld [vmem:[%s1183_s1 + $0xa8] sm:$0xff]  }
   0x9   :  { %825 = vmatpush3.bf16.msra.mxu1 %v896_v7  ;;  %804 = vmatprep.subr.bf16.mxu0 %v897_v8  ;;  %v913_v24 = vld [vmem:[%s1183_s1 + $0x70] sm:$0xff]   ;;  %v917_v28 = vld [vmem:[%s1183_s1 + $0x78] sm:$0xff]   ;;  %v18_v32 = vld [vmem:[%s1184_s0] sm:$0xff] }
   0xa   :  { %826 = vmatprep.subr.bf16.mxu1 %v898_v9  ;;  %v914_v25 = vld [vmem:[%s1183_s1 + $0xf0] sm:$0xff]   ;;  %v918_v29 = vld [vmem:[%s1183_s1 + $0xf8] sm:$0xff]   ;;  %v19_v33 = vld [vmem:[%s1184_s0 + $0x8] sm:$0xff]  ;;  %v728_v34 = vcombine.low %v18_v32, %v18_v32  ;;  %v729_v35 = vcombine.high %v18_v32, %v18_v32 }
   0xb   :  { %v915_v26 = vld [vmem:[%s1183_s1 + $0x30] sm:$0xff]   ;;  %v919_v30 = vld [vmem:[%s1183_s1 + $0x38] sm:$0xff]   ;;  %v730_v36 = vcombine.low %v19_v33, %v19_v33  ;;  %v731_v37 = vcombine.high %v19_v33, %v19_v33  ;;  %v925_v38 = vld [vmem:[%s1183_s1 + $0x140] sm:$0xff]  }
   0xc   :  { %805 = vmatpush3.bf16.msra.mxu0 %v899_v10  ;;  %v916_v27 = vld [vmem:[%s1183_s1 + $0xb0] sm:$0xff]   ;;  %v920_v31 = vld [vmem:[%s1183_s1 + $0xb8] sm:$0xff]   ;;  %v926_v39 = vld [vmem:[%s1183_s1 + $0x1c0] sm:$0xff]   ;;  %594 = vmatprep.mubr.bf16.mxu0 %v729_v35 }
   0xd   :  { %827 = vmatpush3.bf16.msra.mxu1 %v900_v11  ;;  %806 = vmatprep.subr.bf16.mxu0 %v901_v12  ;;  %v927_v40 = vld [vmem:[%s1183_s1 + $0x100] sm:$0xff]   ;;  %v929_v42 = vld [vmem:[%s1183_s1 + $0x148] sm:$0xff]   ;;  %v933_v46 = vld [vmem:[%s1183_s1 + $0x150] sm:$0xff]  }
   0xe   :  { %828 = vmatprep.subr.bf16.mxu1 %v902_v13  ;;  %634 = vmatprep.mubr.bf16.mxu1 %v731_v37  ;;  %v928_v41 = vld [vmem:[%s1183_s1 + $0x180] sm:$0xff]   ;;  %v930_v43 = vld [vmem:[%s1183_s1 + $0x1c8] sm:$0xff]   ;;  %v934_v47 = vld [vmem:[%s1183_s1 + $0x1d0] sm:$0xff]  }
   0xf   :  { %v931_v44 = vld [vmem:[%s1183_s1 + $0x108] sm:$0xff]   ;;  %v935_v48 = vld [vmem:[%s1183_s1 + $0x110] sm:$0xff]   ;;  %v937_v50 = vld [vmem:[%s1183_s1 + $0x158] sm:$0xff]  }
  0x10   :  { %807 = vmatpush3.bf16.msra.mxu0 %v903_v14  ;;  %v932_v45 = vld [vmem:[%s1183_s1 + $0x188] sm:$0xff]   ;;  %v936_v49 = vld [vmem:[%s1183_s1 + $0x190] sm:$0xff]   ;;  %v938_v51 = vld [vmem:[%s1183_s1 + $0x1d8] sm:$0xff]  }
  0x11   :  { %829 = vmatpush3.bf16.msra.mxu1 %v904_v15  ;;  %808 = vmatprep.subr.bf16.mxu0 %v905_v16  ;;  %v939_v52 = vld [vmem:[%s1183_s1 + $0x118] sm:$0xff]   ;;  %v941_v54 = vld [vmem:[%s1183_s1 + $0x160] sm:$0xff]   ;;  %v945_v58 = vld [vmem:[%s1183_s1 + $0x168] sm:$0xff]  }
  0x12   :  { %830 = vmatprep.subr.bf16.mxu1 %v906_v17  ;;  %v940_v53 = vld [vmem:[%s1183_s1 + $0x198] sm:$0xff]   ;;  %v942_v55 = vld [vmem:[%s1183_s1 + $0x1e0] sm:$0xff]   ;;  %v946_v59 = vld [vmem:[%s1183_s1 + $0x1e8] sm:$0xff]  }
  0x13   :  { %v943_v56 = vld [vmem:[%s1183_s1 + $0x120] sm:$0xff]   ;;  %v947_v60 = vld [vmem:[%s1183_s1 + $0x128] sm:$0xff]   ;;  %v949_v62 = vld [vmem:[%s1183_s1 + $0x170] sm:$0xff]  }
  0x14   :  { %809 = vmatpush3.bf16.msra.mxu0 %v907_v18  ;;  %v944_v57 = vld [vmem:[%s1183_s1 + $0x1a0] sm:$0xff]   ;;  %v948_v61 = vld [vmem:[%s1183_s1 + $0x1a8] sm:$0xff]   ;;  %v950_v63 = vld [vmem:[%s1183_s1 + $0x1f0] sm:$0xff]  }
  0x15   :  { %831 = vmatpush3.bf16.msra.mxu1 %v908_v19  ;;  %810 = vmatprep.subr.bf16.mxu0 %v909_v20  ;;  %v951_v0 = vld [vmem:[%s1183_s1 + $0x130] sm:$0xff]   ;;  %v953_v2 = vld [vmem:[%s1183_s1 + $0x178] sm:$0xff]  }
  0x16   :  { %832 = vmatprep.subr.bf16.mxu1 %v910_v21  ;;  %v952_v1 = vld [vmem:[%s1183_s1 + $0x1b0] sm:$0xff]   ;;  %v954_v3 = vld [vmem:[%s1183_s1 + $0x1f8] sm:$0xff]  }
  0x17   :  { %v955_v4 = vld [vmem:[%s1183_s1 + $0x138] sm:$0xff]   ;;  %v20_v6 = vld [vmem:[%s1184_s0 + $0x10] sm:$0xff] }
  0x18   :  { %811 = vmatpush3.bf16.msra.mxu0 %v911_v22  ;;  %v956_v5 = vld [vmem:[%s1183_s1 + $0x1b8] sm:$0xff]   ;;  %v732_v7 = vcombine.low %v20_v6, %v20_v6  ;;  %v733_v8 = vcombine.high %v20_v6, %v20_v6 }
  0x19   :  { %833 = vmatpush3.bf16.msra.mxu1 %v912_v23  ;;  %812 = vmatprep.subr.bf16.mxu0 %v913_v24  ;;  %v21_v9 = vld [vmem:[%s1184_s0 + $0x18] sm:$0xff] }
  0x1a   :  { %834 = vmatprep.subr.bf16.mxu1 %v914_v25  ;;  %v734_v10 = vcombine.low %v21_v9, %v21_v9  ;;  %v735_v11 = vcombine.high %v21_v9, %v21_v9 }
  0x1c   :  { %813 = vmatpush3.bf16.msra.mxu0 %v915_v26 }
  0x1d   :  { %835 = vmatpush3.bf16.msra.mxu1 %v916_v27  ;;  %814 = vmatprep.subr.bf16.mxu0 %v917_v28 }
  0x1e   :  { %836 = vmatprep.subr.bf16.mxu1 %v918_v29 }
  0x20   :  { %815 = vmatpush3.bf16.msra.mxu0 %v919_v30 }
  0x21   :  { %837 = vmatpush3.bf16.msra.mxu1 %v920_v31  ;;  %844 = vmatprep.subr.bf16.mxu0 %v925_v38 }
  0x22   :  { %866 = vmatprep.subr.bf16.mxu1 %v926_v39 }
  0x23   :  { %595 = vmatmul.mubr.bf16.vlgmr.msra.gmra.mrb[0].mxu0 %v728_v34 }
  0x24   :  { %635 = vmatmul.mubr.bf16.vlgmr.msra.gmra.mrb[0].mxu1 %v730_v36  ;;  %845 = vmatpush3.bf16.msra.mxu0 %v927_v40 }
  0x25   :  { %867 = vmatpush3.bf16.msra.mxu1 %v928_v41  ;;  %846 = vmatprep.subr.bf16.mxu0 %v929_v42 }
  0x26   :  { %868 = vmatprep.subr.bf16.mxu1 %v930_v43  ;;  %674 = vmatprep.mubr.bf16.mxu0 %v733_v8 }
  0x27   :  { %714 = vmatprep.mubr.bf16.mxu1 %v735_v11 }
  0x28   :  { %847 = vmatpush3.bf16.msra.mxu0 %v931_v44 }
  0x29   :  { %869 = vmatpush3.bf16.msra.mxu1 %v932_v45  ;;  %848 = vmatprep.subr.bf16.mxu0 %v933_v46 }
  0x2a   :  { %870 = vmatprep.subr.bf16.mxu1 %v934_v47 }
  0x2c   :  { %849 = vmatpush3.bf16.msra.mxu0 %v935_v48 }
  0x2d   :  { %871 = vmatpush3.bf16.msra.mxu1 %v936_v49  ;;  %850 = vmatprep.subr.bf16.mxu0 %v937_v50 }
  0x2e   :  { %872 = vmatprep.subr.bf16.mxu1 %v938_v51 }
  0x30   :  { %851 = vmatpush3.bf16.msra.mxu0 %v939_v52 }
  0x31   :  { %873 = vmatpush3.bf16.msra.mxu1 %v940_v53  ;;  %852 = vmatprep.subr.bf16.mxu0 %v941_v54 }
  0x32   :  { %874 = vmatprep.subr.bf16.mxu1 %v942_v55 }
  0x34   :  { %853 = vmatpush3.bf16.msra.mxu0 %v943_v56 }
  0x35   :  { %875 = vmatpush3.bf16.msra.mxu1 %v944_v57  ;;  %854 = vmatprep.subr.bf16.mxu0 %v945_v58 }
  0x36   :  { %876 = vmatprep.subr.bf16.mxu1 %v946_v59 }
  0x38   :  { %855 = vmatpush3.bf16.msra.mxu0 %v947_v60 }
  0x39   :  { %877 = vmatpush3.bf16.msra.mxu1 %v948_v61  ;;  %856 = vmatprep.subr.bf16.mxu0 %v949_v62 }
  0x3a   :  { %878 = vmatprep.subr.bf16.mxu1 %v950_v63 }
  0x3c   :  { %857 = vmatpush3.bf16.msra.mxu0 %v951_v0 }
  0x3d   :  { %879 = vmatpush3.bf16.msra.mxu1 %v952_v1  ;;  %858 = vmatprep.subr.bf16.mxu0 %v953_v2 }
  0x3e   :  { %880 = vmatprep.subr.bf16.mxu1 %v954_v3 }
  0x40   :  { %859 = vmatpush3.bf16.msra.mxu0 %v955_v4 }
  0x41   :  { %881 = vmatpush3.bf16.msra.mxu1 %v956_v5 }
  0x43   :  { %675 = vmatmul.mubr.bf16.vlgmr.msra.gmra.mrb[4].mxu0 %v732_v7 }
  0x44   :  { %715 = vmatmul.mubr.bf16.vlgmr.msra.gmra.mrb[4].mxu1 %v734_v10 }
  0xf6   :  { %v816_v12 = vpop.f32.mrb[0].mxu0 }
  0xf7   :  { %v838_v13 = vpop.f32.mrb[0].mxu1  ;;  %v817_v14 = vpop.f32.mrb[1].mxu0 }
  0xf8   :  { %v839_v15 = vpop.f32.mrb[1].mxu1  ;;  %v818_v16 = vadd.f32 %v817_v14, %v816_v12  ;;  %v819_v18 = vpop.f32.mrb[2].mxu0 }
  0xf9   :  { %v840_v17 = vadd.f32 %v839_v15, %v838_v13  ;;  %v841_v19 = vpop.f32.mrb[2].mxu1  ;;  %v820_v20 = vpop.f32.mrb[3].mxu0 }
  0xfa   :  { %v842_v21 = vpop.f32.mrb[3].mxu1 }
  0xfb   :  { %v637_v22 = vadd.f32 %v840_v17, %v818_v16 }
 0x116   :  { %v860_v23 = vpop.f32.mrb[4].mxu0 }
 0x117   :  { %v882_v24 = vpop.f32.mrb[4].mxu1  ;;  %v861_v25 = vpop.f32.mrb[5].mxu0 }
 0x118   :  { %v883_v26 = vpop.f32.mrb[5].mxu1  ;;  %v862_v27 = vadd.f32 %v861_v25, %v860_v23  ;;  %v863_v29 = vpop.f32.mrb[6].mxu0 }
 0x119   :  { %v884_v28 = vadd.f32 %v883_v26, %v882_v24  ;;  %v885_v30 = vpop.f32.mrb[6].mxu1  ;;  %v864_v31 = vpop.f32.mrb[7].mxu0 }
 0x11a   :  { %v886_v32 = vpop.f32.mrb[7].mxu1  ;;  %v677_v33 = vadd.f32 %v862_v27, %v637_v22 }
 0x11c   :  { %v717_v34 = vadd.f32 %v884_v28, %v677_v33 }
 0x11e   :  { %723 = vst [vmem:[%s1185_s2] sm:$0xff] %v717_v34 }

// kernel: fpn1_forward.40
= control target key start
LH: loop header
LB: loop body
LE: loop exit
PB: predicated region body
PF: predicated region fallthrough
CT: control target
= control target key end

     0   :  { %s631_s1 = inlined_call_operand.vmem [shape: bf16[512,128], index: 1, kind: input, shape index: {}]   ;;  %s632_s0 = inlined_call_operand.vmem [shape: bf16[8,512], index: 0, kind: input, shape index: {}]   ;;  %s633_s2 = inlined_call_operand.vmem [shape: f32[8,128], index: 2, kind: input, shape index: {}]   ;;  %s634_s3 = inlined_call_operand.vmem [shape: f32[8,128], index: 3, kind: output, shape index: {}]  }
   0x1   :  { %v467_v0 = vld [vmem:[%s631_s1 + $0x40] sm:$0xff]   ;;  %v471_v4 = vld [vmem:[%s631_s1 + $0x48] sm:$0xff]   ;;  %v475_v8 = vld [vmem:[%s631_s1 + $0x50] sm:$0xff]  }
   0x2   :  { %v468_v1 = vld [vmem:[%s631_s1 + $0xc0] sm:$0xff]   ;;  %422 = vmatprep.subr.bf16.mxu0 %v467_v0  ;;  %v472_v5 = vld [vmem:[%s631_s1 + $0xc8] sm:$0xff]   ;;  %v476_v9 = vld [vmem:[%s631_s1 + $0xd0] sm:$0xff]  }
   0x3   :  { %v469_v2 = vld [vmem:[%s631_s1] sm:$0xff]   ;;  %444 = vmatprep.subr.bf16.mxu1 %v468_v1  ;;  %v473_v6 = vld [vmem:[%s631_s1 + $0x8] sm:$0xff]   ;;  %v477_v10 = vld [vmem:[%s631_s1 + $0x10] sm:$0xff]  }
   0x4   :  { %v470_v3 = vld [vmem:[%s631_s1 + $0x80] sm:$0xff]   ;;  %423 = vmatpush3.bf16.msra.mxu0 %v469_v2  ;;  %v474_v7 = vld [vmem:[%s631_s1 + $0x88] sm:$0xff]   ;;  %v478_v11 = vld [vmem:[%s631_s1 + $0x90] sm:$0xff]  }
   0x5   :  { %445 = vmatpush3.bf16.msra.mxu1 %v470_v3  ;;  %424 = vmatprep.subr.bf16.mxu0 %v471_v4  ;;  %v479_v12 = vld [vmem:[%s631_s1 + $0x58] sm:$0xff]   ;;  %v483_v16 = vld [vmem:[%s631_s1 + $0x60] sm:$0xff]   ;;  %v487_v20 = vld [vmem:[%s631_s1 + $0x68] sm:$0xff]  }
   0x6   :  { %446 = vmatprep.subr.bf16.mxu1 %v472_v5  ;;  %v480_v13 = vld [vmem:[%s631_s1 + $0xd8] sm:$0xff]   ;;  %v484_v17 = vld [vmem:[%s631_s1 + $0xe0] sm:$0xff]   ;;  %v488_v21 = vld [vmem:[%s631_s1 + $0xe8] sm:$0xff]  }
   0x7   :  { %v481_v14 = vld [vmem:[%s631_s1 + $0x18] sm:$0xff]   ;;  %v485_v18 = vld [vmem:[%s631_s1 + $0x20] sm:$0xff]   ;;  %v489_v22 = vld [vmem:[%s631_s1 + $0x28] sm:$0xff]  }
   0x8   :  { %425 = vmatpush3.bf16.msra.mxu0 %v473_v6  ;;  %v482_v15 = vld [vmem:[%s631_s1 + $0x98] sm:$0xff]   ;;  %v486_v19 = vld [vmem:[%s631_s1 + $0xa0] sm:$0xff]   ;;  %v490_v23 = vld [vmem:[%s631_s1 + $0xa8] sm:$0xff]  }
   0x9   :  { %447 = vmatpush3.bf16.msra.mxu1 %v474_v7  ;;  %426 = vmatprep.subr.bf16.mxu0 %v475_v8  ;;  %v491_v24 = vld [vmem:[%s631_s1 + $0x70] sm:$0xff]   ;;  %v495_v28 = vld [vmem:[%s631_s1 + $0x78] sm:$0xff]   ;;  %v21_v32 = vld [vmem:[%s632_s0] sm:$0xff] }
   0xa   :  { %448 = vmatprep.subr.bf16.mxu1 %v476_v9  ;;  %v492_v25 = vld [vmem:[%s631_s1 + $0xf0] sm:$0xff]   ;;  %v496_v29 = vld [vmem:[%s631_s1 + $0xf8] sm:$0xff]   ;;  %v22_v33 = vld [vmem:[%s632_s0 + $0x8] sm:$0xff]  ;;  %v386_v34 = vcombine.low %v21_v32, %v21_v32  ;;  %v387_v35 = vcombine.high %v21_v32, %v21_v32 }
   0xb   :  { %v493_v26 = vld [vmem:[%s631_s1 + $0x30] sm:$0xff]   ;;  %v497_v30 = vld [vmem:[%s631_s1 + $0x38] sm:$0xff]   ;;  %v388_v36 = vcombine.low %v22_v33, %v22_v33  ;;  %v389_v37 = vcombine.high %v22_v33, %v22_v33  ;;  %v379_v49 = vld [vmem:[%s633_s2] sm:$0xff] }
   0xc   :  { %427 = vmatpush3.bf16.msra.mxu0 %v477_v10  ;;  %v494_v27 = vld [vmem:[%s631_s1 + $0xb0] sm:$0xff]   ;;  %v498_v31 = vld [vmem:[%s631_s1 + $0xb8] sm:$0xff]   ;;  %325 = vmatprep.mubr.bf16.mxu0 %v387_v35 }
   0xd   :  { %449 = vmatpush3.bf16.msra.mxu1 %v478_v11  ;;  %428 = vmatprep.subr.bf16.mxu0 %v479_v12 }
   0xe   :  { %450 = vmatprep.subr.bf16.mxu1 %v480_v13  ;;  %365 = vmatprep.mubr.bf16.mxu1 %v389_v37 }
  0x10   :  { %429 = vmatpush3.bf16.msra.mxu0 %v481_v14 }
  0x11   :  { %451 = vmatpush3.bf16.msra.mxu1 %v482_v15  ;;  %430 = vmatprep.subr.bf16.mxu0 %v483_v16 }
  0x12   :  { %452 = vmatprep.subr.bf16.mxu1 %v484_v17 }
  0x14   :  { %431 = vmatpush3.bf16.msra.mxu0 %v485_v18 }
  0x15   :  { %453 = vmatpush3.bf16.msra.mxu1 %v486_v19  ;;  %432 = vmatprep.subr.bf16.mxu0 %v487_v20 }
  0x16   :  { %454 = vmatprep.subr.bf16.mxu1 %v488_v21 }
  0x18   :  { %433 = vmatpush3.bf16.msra.mxu0 %v489_v22 }
  0x19   :  { %455 = vmatpush3.bf16.msra.mxu1 %v490_v23  ;;  %434 = vmatprep.subr.bf16.mxu0 %v491_v24 }
  0x1a   :  { %456 = vmatprep.subr.bf16.mxu1 %v492_v25 }
  0x1c   :  { %435 = vmatpush3.bf16.msra.mxu0 %v493_v26 }
  0x1d   :  { %457 = vmatpush3.bf16.msra.mxu1 %v494_v27  ;;  %436 = vmatprep.subr.bf16.mxu0 %v495_v28 }
  0x1e   :  { %458 = vmatprep.subr.bf16.mxu1 %v496_v29 }
  0x20   :  { %437 = vmatpush3.bf16.msra.mxu0 %v497_v30 }
  0x21   :  { %459 = vmatpush3.bf16.msra.mxu1 %v498_v31 }
  0x23   :  { %326 = vmatmul.mubr.bf16.vlgmr.msra.gmra.mrb[0].mxu0 %v386_v34 }
  0x24   :  { %366 = vmatmul.mubr.bf16.vlgmr.msra.gmra.mrb[0].mxu1 %v388_v36 }
  0xf6   :  { %v438_v38 = vpop.f32.mrb[0].mxu0 }
  0xf7   :  { %v460_v39 = vpop.f32.mrb[0].mxu1  ;;  %v439_v40 = vpop.f32.mrb[1].mxu0 }
  0xf8   :  { %v461_v41 = vpop.f32.mrb[1].mxu1  ;;  %v440_v42 = vadd.f32 %v439_v40, %v438_v38  ;;  %v441_v44 = vpop.f32.mrb[2].mxu0 }
  0xf9   :  { %v462_v43 = vadd.f32 %v461_v41, %v460_v39  ;;  %v463_v45 = vpop.f32.mrb[2].mxu1  ;;  %v442_v46 = vpop.f32.mrb[3].mxu0 }
  0xfa   :  { %v464_v47 = vpop.f32.mrb[3].mxu1 }
  0xfb   :  { %v368_v48 = vadd.f32 %v462_v43, %v440_v42 }
  0xfd   :  { %v380_v50 = vadd.f32 %v379_v49, %v368_v48 }
  0xff   :  { %381 = vst [vmem:[%s634_s3] sm:$0xff] %v380_v50 }

// kernel: fpn1_forward.41
= control target key start
LH: loop header
LB: loop body
LE: loop exit
PB: predicated region body
PF: predicated region fallthrough
CT: control target
= control target key end

     0   :  { %s450_s1 = inlined_call_operand.vmem [shape: bf16[256,128], index: 1, kind: input, shape index: {}]   ;;  %s451_s0 = inlined_call_operand.vmem [shape: bf16[32,256], index: 0, kind: input, shape index: {}]   ;;  %s452_s2 = inlined_call_operand.vmem [shape: f32[32,128], index: 2, kind: input, shape index: {}]   ;;  %s453_s3 = inlined_call_operand.vmem [shape: f32[32,128], index: 3, kind: output, shape index: {}]  }
   0x1   :  { %v324_v0 = vld [vmem:[%s450_s1 + $0x40] sm:$0xff]   ;;  %v326_v2 = vld [vmem:[%s450_s1 + $0x48] sm:$0xff]   ;;  %v328_v4 = vld [vmem:[%s450_s1 + $0x50] sm:$0xff]  }
   0x2   :  { %v325_v1 = vld [vmem:[%s450_s1] sm:$0xff]   ;;  %279 = vmatprep.subr.bf16.mxu0 %v324_v0  ;;  %307 = vmatprep.subr.bf16.mxu1 %v324_v0  ;;  %v327_v3 = vld [vmem:[%s450_s1 + $0x8] sm:$0xff]   ;;  %v329_v5 = vld [vmem:[%s450_s1 + $0x10] sm:$0xff]  }
   0x3   :  { %280 = vmatpush3.bf16.msra.mxu0 %v325_v1  ;;  %315 = vmatpush3.bf16.msra.mxu1 %v325_v1  ;;  %v330_v6 = vld [vmem:[%s450_s1 + $0x58] sm:$0xff]   ;;  %v332_v8 = vld [vmem:[%s450_s1 + $0x60] sm:$0xff]   ;;  %v334_v10 = vld [vmem:[%s450_s1 + $0x68] sm:$0xff]  }
   0x4   :  { %281 = vmatprep.subr.bf16.mxu0 %v326_v2  ;;  %308 = vmatprep.subr.bf16.mxu1 %v326_v2  ;;  %v331_v7 = vld [vmem:[%s450_s1 + $0x18] sm:$0xff]   ;;  %v333_v9 = vld [vmem:[%s450_s1 + $0x20] sm:$0xff]   ;;  %v335_v13 = vld [vmem:[%s450_s1 + $0x28] sm:$0xff]  }
   0x5   :  { %v342_v11 = vld [vmem:[%s451_s0 + $0x4] ss:$8 sps:$4 sm:$0xff]   ;;  %v345_v12 = vld [vmem:[%s451_s0 + $0x14] ss:$8 sps:$4 sm:$0xff]   ;;  %v340_v18 = vld [vmem:[%s451_s0] ss:$8 sps:$4 sm:$0xff]  }
   0x6   :  { %v336_v14 = vld [vmem:[%s450_s1 + $0x70] sm:$0xff]   ;;  %211 = vmatprep.mubr.bf16.mxu0 %v342_v11  ;;  %219 = vmatprep.mubr.bf16.mxu1 %v345_v12  ;;  %v338_v16 = vld [vmem:[%s450_s1 + $0x78] sm:$0xff]   ;;  %v243_v28 = vld [vmem:[%s452_s2] sm:$0xff] }
   0x7   :  { %282 = vmatpush3.bf16.msra.mxu0 %v327_v3  ;;  %316 = vmatpush3.bf16.msra.mxu1 %v327_v3  ;;  %v337_v15 = vld [vmem:[%s450_s1 + $0x30] sm:$0xff]   ;;  %v339_v17 = vld [vmem:[%s450_s1 + $0x38] sm:$0xff]   ;;  %v244_v34 = vld [vmem:[%s452_s2 + $0x8] sm:$0xff] }
   0x8   :  { %283 = vmatprep.subr.bf16.mxu0 %v328_v4  ;;  %309 = vmatprep.subr.bf16.mxu1 %v328_v4  ;;  %v343_v19 = vld [vmem:[%s451_s0 + $0x10] ss:$8 sps:$4 sm:$0xff]  }
   0x9   :  { %v245_v29 = vld [vmem:[%s452_s2 + $0x10] sm:$0xff]  ;;  %v246_v35 = vld [vmem:[%s452_s2 + $0x18] sm:$0xff] }
   0xb   :  { %284 = vmatpush3.bf16.msra.mxu0 %v329_v5  ;;  %317 = vmatpush3.bf16.msra.mxu1 %v329_v5 }
   0xc   :  { %285 = vmatprep.subr.bf16.mxu0 %v330_v6  ;;  %310 = vmatprep.subr.bf16.mxu1 %v330_v6 }
   0xf   :  { %286 = vmatpush3.bf16.msra.mxu0 %v331_v7  ;;  %318 = vmatpush3.bf16.msra.mxu1 %v331_v7 }
  0x10   :  { %287 = vmatprep.subr.bf16.mxu0 %v332_v8  ;;  %311 = vmatprep.subr.bf16.mxu1 %v332_v8 }
  0x13   :  { %288 = vmatpush3.bf16.msra.mxu0 %v333_v9  ;;  %319 = vmatpush3.bf16.msra.mxu1 %v333_v9 }
  0x14   :  { %289 = vmatprep.subr.bf16.mxu0 %v334_v10  ;;  %312 = vmatprep.subr.bf16.mxu1 %v334_v10 }
  0x17   :  { %290 = vmatpush3.bf16.msra.mxu0 %v335_v13  ;;  %320 = vmatpush3.bf16.msra.mxu1 %v335_v13 }
  0x18   :  { %291 = vmatprep.subr.bf16.mxu0 %v336_v14  ;;  %313 = vmatprep.subr.bf16.mxu1 %v336_v14 }
  0x1b   :  { %292 = vmatpush3.bf16.msra.mxu0 %v337_v15  ;;  %321 = vmatpush3.bf16.msra.mxu1 %v337_v15 }
  0x1c   :  { %293 = vmatprep.subr.bf16.mxu0 %v338_v16  ;;  %314 = vmatprep.subr.bf16.mxu1 %v338_v16 }
  0x1f   :  { %294 = vmatpush3.bf16.msra.mxu0 %v339_v17  ;;  %322 = vmatpush3.bf16.msra.mxu1 %v339_v17 }
  0x22   :  { %212 = vmatmul.mubr.bf16.vlgmr.msra.gmra.mrb[0].mxu0 %v340_v18  ;;  %220 = vmatmul.mubr.bf16.vlgmr.msra.gmra.mrb[0].mxu1 %v343_v19 }
  0xf5   :  { %v295_v20 = vpop.f32.mrb[0].mxu0  ;;  %v301_v21 = vpop.f32.mrb[0].mxu1 }
  0xf6   :  { %v296_v22 = vpop.f32.mrb[1].mxu0  ;;  %v302_v23 = vpop.f32.mrb[1].mxu1 }
  0xf7   :  { %v297_v24 = vadd.f32 %v296_v22, %v295_v20  ;;  %v303_v25 = vadd.f32 %v302_v23, %v301_v21  ;;  %v298_v26 = vpop.f32.mrb[2].mxu0  ;;  %v304_v27 = vpop.f32.mrb[2].mxu1 }
  0xf8   :  { %v299_v30 = vpop.f32.mrb[3].mxu0  ;;  %v305_v31 = vpop.f32.mrb[3].mxu1 }
  0xf9   :  { %v300_v32 = vadd.f32 %v299_v30, %v298_v26  ;;  %v306_v33 = vadd.f32 %v305_v31, %v304_v27  ;;  %v247_v36 = vadd.f32 %v297_v24, %v243_v28  ;;  %v249_v37 = vadd.f32 %v303_v25, %v245_v29 }
  0xfb   :  { %251 = vst [vmem:[%s453_s3] sm:$0xff] %v247_v36  ;;  %253 = vst [vmem:[%s453_s3 + $0x10] sm:$0xff] %v249_v37  ;;  %v248_v38 = vadd.f32 %v300_v32, %v244_v34  ;;  %v250_v39 = vadd.f32 %v306_v33, %v246_v35 }
  0xfd   :  { %252 = vst [vmem:[%s453_s3 + $0x8] sm:$0xff] %v248_v38  ;;  %254 = vst [vmem:[%s453_s3 + $0x18] sm:$0xff] %v250_v39 }

// kernel: fpn1_forward.42
= control target key start
LH: loop header
LB: loop body
LE: loop exit
PB: predicated region body
PF: predicated region fallthrough
CT: control target
= control target key end

     0   :  { %s640_s1 = inlined_call_operand.vmem [shape: bf16[128,128], index: 1, kind: input, shape index: {}]   ;;  %s641_s0 = inlined_call_operand.vmem [shape: bf16[128,128], index: 0, kind: input, shape index: {}]   ;;  %s642_s2 = inlined_call_operand.vmem [shape: f32[128,128], index: 2, kind: input, shape index: {}]   ;;  %s643_s3 = inlined_call_operand.vmem [shape: f32[128,128], index: 3, kind: output, shape index: {}]  }
   0x1   :  { %v460_v0 = vld [vmem:[%s640_s1] sm:$0xff]   ;;  %v461_v1 = vld [vmem:[%s640_s1 + $0x8] sm:$0xff]   ;;  %v462_v2 = vld [vmem:[%s640_s1 + $0x10] sm:$0xff]  }
   0x2   :  { %411 = vmatprep.subr.bf16.mxu0 %v460_v0  ;;  %443 = vmatprep.subr.bf16.mxu1 %v460_v0  ;;  %v463_v3 = vld [vmem:[%s640_s1 + $0x18] sm:$0xff]   ;;  %v468_v4 = vld [vmem:[%s641_s0] sm:$0xff]   ;;  %v465_v7 = vld [vmem:[%s640_s1 + $0x28] sm:$0xff]  }
   0x3   :  { %412 = vmatpush3.bf16.msra.mxu0 %v460_v0  ;;  %451 = vmatpush3.bf16.msra.mxu1 %v460_v0  ;;  %v469_v5 = vld [vmem:[%s641_s0 + $0x20] sm:$0xff]   ;;  %v466_v8 = vld [vmem:[%s640_s1 + $0x30] sm:$0xff]   ;;  %v467_v9 = vld [vmem:[%s640_s1 + $0x38] sm:$0xff]  }
   0x4   :  { %413 = vmatprep.subr.bf16.mxu0 %v461_v1  ;;  %444 = vmatprep.subr.bf16.mxu1 %v461_v1  ;;  %v464_v6 = vld [vmem:[%s640_s1 + $0x20] sm:$0xff]   ;;  %v470_v10 = vld [vmem:[%s641_s0 + $0x8] sm:$0xff]   ;;  %v472_v12 = vld [vmem:[%s641_s0 + $0x10] sm:$0xff]  }
   0x5   :  { %427 = vmatprep.mubr.bf16.mxu0 %v468_v4  ;;  %435 = vmatprep.mubr.bf16.mxu1 %v469_v5  ;;  %v471_v11 = vld [vmem:[%s641_s0 + $0x28] sm:$0xff]   ;;  %v473_v13 = vld [vmem:[%s641_s0 + $0x30] sm:$0xff]   ;;  %v474_v14 = vld [vmem:[%s641_s0 + $0x18] sm:$0xff]  }
   0x6   :  { %v475_v15 = vld [vmem:[%s641_s0 + $0x38] sm:$0xff]   ;;  %v329_v17 = vld [vmem:[%s642_s2 + $0x10] sm:$0xff]  ;;  %v327_v21 = vld [vmem:[%s642_s2] sm:$0xff] }
   0x7   :  { %414 = vmatpush3.bf16.msra.mxu0 %v461_v1  ;;  %452 = vmatpush3.bf16.msra.mxu1 %v461_v1  ;;  %v337_v19 = vld [vmem:[%s642_s2 + $0x50] sm:$0xff]  ;;  %v335_v23 = vld [vmem:[%s642_s2 + $0x40] sm:$0xff]  ;;  %v330_v25 = vld [vmem:[%s642_s2 + $0x18] sm:$0xff] }
   0x8   :  { %415 = vmatprep.subr.bf16.mxu0 %v462_v2  ;;  %445 = vmatprep.subr.bf16.mxu1 %v462_v2  ;;  %v338_v27 = vld [vmem:[%s642_s2 + $0x58] sm:$0xff]  ;;  %v328_v31 = vld [vmem:[%s642_s2 + $0x8] sm:$0xff]  ;;  %v333_v41 = vld [vmem:[%s642_s2 + $0x30] sm:$0xff] }
   0x9   :  { %v336_v33 = vld [vmem:[%s642_s2 + $0x48] sm:$0xff]  ;;  %v341_v43 = vld [vmem:[%s642_s2 + $0x70] sm:$0xff]  ;;  %v331_v45 = vld [vmem:[%s642_s2 + $0x20] sm:$0xff] }
   0xa   :  { %v339_v47 = vld [vmem:[%s642_s2 + $0x60] sm:$0xff]  ;;  %v334_v49 = vld [vmem:[%s642_s2 + $0x38] sm:$0xff]  ;;  %v332_v55 = vld [vmem:[%s642_s2 + $0x28] sm:$0xff] }
   0xb   :  { %416 = vmatpush3.bf16.msra.mxu0 %v462_v2  ;;  %453 = vmatpush3.bf16.msra.mxu1 %v462_v2  ;;  %v342_v51 = vld [vmem:[%s642_s2 + $0x78] sm:$0xff]  ;;  %v340_v57 = vld [vmem:[%s642_s2 + $0x68] sm:$0xff] }
   0xc   :  { %417 = vmatprep.subr.bf16.mxu0 %v463_v3  ;;  %446 = vmatprep.subr.bf16.mxu1 %v463_v3 }
   0xf   :  { %418 = vmatpush3.bf16.msra.mxu0 %v463_v3  ;;  %454 = vmatpush3.bf16.msra.mxu1 %v463_v3 }
  0x10   :  { %419 = vmatprep.subr.bf16.mxu0 %v464_v6  ;;  %447 = vmatprep.subr.bf16.mxu1 %v464_v6 }
  0x13   :  { %420 = vmatpush3.bf16.msra.mxu0 %v464_v6  ;;  %455 = vmatpush3.bf16.msra.mxu1 %v464_v6 }
  0x14   :  { %421 = vmatprep.subr.bf16.mxu0 %v465_v7  ;;  %448 = vmatprep.subr.bf16.mxu1 %v465_v7 }
  0x17   :  { %422 = vmatpush3.bf16.msra.mxu0 %v465_v7  ;;  %456 = vmatpush3.bf16.msra.mxu1 %v465_v7 }
  0x18   :  { %423 = vmatprep.subr.bf16.mxu0 %v466_v8  ;;  %449 = vmatprep.subr.bf16.mxu1 %v466_v8 }
  0x1b   :  { %424 = vmatpush3.bf16.msra.mxu0 %v466_v8  ;;  %457 = vmatpush3.bf16.msra.mxu1 %v466_v8 }
  0x1c   :  { %425 = vmatprep.subr.bf16.mxu0 %v467_v9  ;;  %450 = vmatprep.subr.bf16.mxu1 %v467_v9 }
  0x1f   :  { %426 = vmatpush3.bf16.msra.mxu0 %v467_v9  ;;  %458 = vmatpush3.bf16.msra.mxu1 %v467_v9 }
  0x22   :  { %428 = vmatmul.mubr.bf16.vlgmr.msra.gmra.mrb[0].mxu0 %v470_v10  ;;  %436 = vmatmul.mubr.bf16.vlgmr.msra.gmra.mrb[0].mxu1 %v471_v11 }
  0x23   :  { %431 = vmatprep.mubr.bf16.mxu0 %v472_v12  ;;  %439 = vmatprep.mubr.bf16.mxu1 %v473_v13 }
  0x2a   :  { %432 = vmatmul.mubr.bf16.gmra.mrb[4].mxu0 %v474_v14  ;;  %440 = vmatmul.mubr.bf16.gmra.mrb[4].mxu1 %v475_v15 }
  0xf5   :  { %v429_v16 = vpop.f32.mrb[0].mxu0  ;;  %v437_v18 = vpop.f32.mrb[0].mxu1 }
  0xf6   :  { %v213_v20 = vpop.f32.mrb[1].mxu0  ;;  %v245_v22 = vpop.f32.mrb[1].mxu1  ;;  %v345_v28 = vadd.f32 %v429_v16, %v329_v17  ;;  %v353_v29 = vadd.f32 %v437_v18, %v337_v19 }
  0xf7   :  { %v430_v24 = vpop.f32.mrb[2].mxu0  ;;  %v438_v26 = vpop.f32.mrb[2].mxu1  ;;  %v343_v34 = vadd.f32 %v327_v21, %v213_v20  ;;  %v351_v35 = vadd.f32 %v335_v23, %v245_v22 }
  0xf8   :  { %v216_v30 = vpop.f32.mrb[3].mxu0  ;;  %v248_v32 = vpop.f32.mrb[3].mxu1  ;;  %361 = vst [vmem:[%s643_s3 + $0x10] sm:$0xff] %v345_v28  ;;  %369 = vst [vmem:[%s643_s3 + $0x50] sm:$0xff] %v353_v29  ;;  %v346_v36 = vadd.f32 %v430_v24, %v330_v25  ;;  %v354_v37 = vadd.f32 %v438_v26, %v338_v27 }
  0xf9   :  { %359 = vst [vmem:[%s643_s3] sm:$0xff] %v343_v34  ;;  %367 = vst [vmem:[%s643_s3 + $0x40] sm:$0xff] %v351_v35  ;;  %v344_v38 = vadd.f32 %v328_v31, %v216_v30  ;;  %v352_v39 = vadd.f32 %v336_v33, %v248_v32 }
  0xfa   :  { %362 = vst [vmem:[%s643_s3 + $0x18] sm:$0xff] %v346_v36  ;;  %370 = vst [vmem:[%s643_s3 + $0x58] sm:$0xff] %v354_v37 }
  0xfb   :  { %360 = vst [vmem:[%s643_s3 + $0x8] sm:$0xff] %v344_v38  ;;  %368 = vst [vmem:[%s643_s3 + $0x48] sm:$0xff] %v352_v39 }
  0xfd   :  { %v433_v40 = vpop.f32.mrb[4].mxu0  ;;  %v441_v42 = vpop.f32.mrb[4].mxu1 }
  0xfe   :  { %v229_v44 = vpop.f32.mrb[5].mxu0  ;;  %v261_v46 = vpop.f32.mrb[5].mxu1  ;;  %v349_v52 = vadd.f32 %v433_v40, %v333_v41  ;;  %v357_v53 = vadd.f32 %v441_v42, %v341_v43 }
  0xff   :  { %v434_v48 = vpop.f32.mrb[6].mxu0  ;;  %v442_v50 = vpop.f32.mrb[6].mxu1  ;;  %v347_v58 = vadd.f32 %v331_v45, %v229_v44  ;;  %v355_v59 = vadd.f32 %v339_v47, %v261_v46 }
 0x100   :  { %v232_v54 = vpop.f32.mrb[7].mxu0  ;;  %v264_v56 = vpop.f32.mrb[7].mxu1  ;;  %365 = vst [vmem:[%s643_s3 + $0x30] sm:$0xff] %v349_v52  ;;  %373 = vst [vmem:[%s643_s3 + $0x70] sm:$0xff] %v357_v53  ;;  %v350_v60 = vadd.f32 %v434_v48, %v334_v49  ;;  %v358_v61 = vadd.f32 %v442_v50, %v342_v51 }
 0x101   :  { %363 = vst [vmem:[%s643_s3 + $0x20] sm:$0xff] %v347_v58  ;;  %371 = vst [vmem:[%s643_s3 + $0x60] sm:$0xff] %v355_v59  ;;  %v348_v62 = vadd.f32 %v332_v55, %v232_v54  ;;  %v356_v63 = vadd.f32 %v340_v57, %v264_v56 }
 0x102   :  { %366 = vst [vmem:[%s643_s3 + $0x38] sm:$0xff] %v350_v60  ;;  %374 = vst [vmem:[%s643_s3 + $0x78] sm:$0xff] %v358_v61 }
 0x103   :  { %364 = vst [vmem:[%s643_s3 + $0x28] sm:$0xff] %v348_v62  ;;  %372 = vst [vmem:[%s643_s3 + $0x68] sm:$0xff] %v356_v63 }

// kernel: fpn1_forward.43
= control target key start
LH: loop header
LB: loop body
LE: loop exit
PB: predicated region body
PF: predicated region fallthrough
CT: control target
= control target key end

     0   :  { %s1888_s1 = inlined_call_operand.vmem [shape: bf16[128,128], index: 1, kind: input, shape index: {}]   ;;  %s1889_s0 = inlined_call_operand.vmem [shape: bf16[512,128], index: 0, kind: input, shape index: {}]   ;;  %s1890_s2 = inlined_call_operand.vmem [shape: f32[512,128], index: 2, kind: input, shape index: {}]   ;;  %s1891_s3 = inlined_call_operand.vmem [shape: f32[512,128], index: 3, kind: output, shape index: {}]  }
   0x1   :  { %v1324_v0 = vld [vmem:[%s1888_s1] sm:$0xff]   ;;  %v1325_v1 = vld [vmem:[%s1888_s1 + $0x8] sm:$0xff]   ;;  %v1326_v2 = vld [vmem:[%s1888_s1 + $0x10] sm:$0xff]  }
   0x2   :  { %1227 = vmatprep.subr.bf16.mxu0 %v1324_v0  ;;  %1307 = vmatprep.subr.bf16.mxu1 %v1324_v0  ;;  %v1327_v3 = vld [vmem:[%s1888_s1 + $0x18] sm:$0xff]   ;;  %v1332_v4 = vld [vmem:[%s1889_s0] sm:$0xff]   ;;  %v1329_v7 = vld [vmem:[%s1888_s1 + $0x28] sm:$0xff]  }
   0x3   :  { %1228 = vmatpush3.bf16.msra.mxu0 %v1324_v0  ;;  %1315 = vmatpush3.bf16.msra.mxu1 %v1324_v0  ;;  %v1333_v5 = vld [vmem:[%s1889_s0 + $0x80] sm:$0xff]   ;;  %v1330_v8 = vld [vmem:[%s1888_s1 + $0x30] sm:$0xff]   ;;  %v1331_v9 = vld [vmem:[%s1888_s1 + $0x38] sm:$0xff]  }
   0x4   :  { %1229 = vmatprep.subr.bf16.mxu0 %v1325_v1  ;;  %1308 = vmatprep.subr.bf16.mxu1 %v1325_v1  ;;  %v1328_v6 = vld [vmem:[%s1888_s1 + $0x20] sm:$0xff]   ;;  %v1334_v10 = vld [vmem:[%s1889_s0 + $0x8] sm:$0xff]   ;;  %v1336_v12 = vld [vmem:[%s1889_s0 + $0x10] sm:$0xff]  }
   0x5   :  { %1243 = vmatprep.mubr.bf16.mxu0 %v1332_v4  ;;  %1275 = vmatprep.mubr.bf16.mxu1 %v1333_v5  ;;  %v1335_v11 = vld [vmem:[%s1889_s0 + $0x88] sm:$0xff]   ;;  %v1337_v13 = vld [vmem:[%s1889_s0 + $0x90] sm:$0xff]   ;;  %v1338_v14 = vld [vmem:[%s1889_s0 + $0x18] sm:$0xff]  }
   0x6   :  { %v1339_v15 = vld [vmem:[%s1889_s0 + $0x98] sm:$0xff]   ;;  %v1340_v16 = vld [vmem:[%s1889_s0 + $0x20] sm:$0xff]   ;;  %v1342_v18 = vld [vmem:[%s1889_s0 + $0x28] sm:$0xff]  }
   0x7   :  { %1230 = vmatpush3.bf16.msra.mxu0 %v1325_v1  ;;  %1316 = vmatpush3.bf16.msra.mxu1 %v1325_v1  ;;  %v1341_v17 = vld [vmem:[%s1889_s0 + $0xa0] sm:$0xff]   ;;  %v1343_v19 = vld [vmem:[%s1889_s0 + $0xa8] sm:$0xff]   ;;  %v1344_v20 = vld [vmem:[%s1889_s0 + $0x30] sm:$0xff]  }
   0x8   :  { %1231 = vmatprep.subr.bf16.mxu0 %v1326_v2  ;;  %1309 = vmatprep.subr.bf16.mxu1 %v1326_v2  ;;  %v1345_v21 = vld [vmem:[%s1889_s0 + $0xb0] sm:$0xff]   ;;  %v1346_v22 = vld [vmem:[%s1889_s0 + $0x38] sm:$0xff]   ;;  %v1348_v24 = vld [vmem:[%s1889_s0 + $0x40] sm:$0xff]  }
   0x9   :  { %v1347_v23 = vld [vmem:[%s1889_s0 + $0xb8] sm:$0xff]   ;;  %v1349_v25 = vld [vmem:[%s1889_s0 + $0xc0] sm:$0xff]   ;;  %v1350_v26 = vld [vmem:[%s1889_s0 + $0x48] sm:$0xff]  }
   0xa   :  { %v1351_v27 = vld [vmem:[%s1889_s0 + $0xc8] sm:$0xff]   ;;  %v1352_v28 = vld [vmem:[%s1889_s0 + $0x50] sm:$0xff]   ;;  %v1354_v30 = vld [vmem:[%s1889_s0 + $0x58] sm:$0xff]  }
   0xb   :  { %1232 = vmatpush3.bf16.msra.mxu0 %v1326_v2  ;;  %1317 = vmatpush3.bf16.msra.mxu1 %v1326_v2  ;;  %v1353_v29 = vld [vmem:[%s1889_s0 + $0xd0] sm:$0xff]   ;;  %v1355_v31 = vld [vmem:[%s1889_s0 + $0xd8] sm:$0xff]   ;;  %v1356_v32 = vld [vmem:[%s1889_s0 + $0x60] sm:$0xff]  }
   0xc   :  { %1233 = vmatprep.subr.bf16.mxu0 %v1327_v3  ;;  %1310 = vmatprep.subr.bf16.mxu1 %v1327_v3  ;;  %v1357_v33 = vld [vmem:[%s1889_s0 + $0xe0] sm:$0xff]   ;;  %v1358_v34 = vld [vmem:[%s1889_s0 + $0x68] sm:$0xff]   ;;  %v1360_v36 = vld [vmem:[%s1889_s0 + $0x70] sm:$0xff]  }
   0xd   :  { %v1359_v35 = vld [vmem:[%s1889_s0 + $0xe8] sm:$0xff]   ;;  %v1361_v37 = vld [vmem:[%s1889_s0 + $0xf0] sm:$0xff]   ;;  %v1362_v38 = vld [vmem:[%s1889_s0 + $0x78] sm:$0xff]  }
   0xe   :  { %v1363_v39 = vld [vmem:[%s1889_s0 + $0xf8] sm:$0xff]   ;;  %v953_v41 = vld [vmem:[%s1890_s2 + $0x10] sm:$0xff]  ;;  %v951_v45 = vld [vmem:[%s1890_s2] sm:$0xff] }
   0xf   :  { %1234 = vmatpush3.bf16.msra.mxu0 %v1327_v3  ;;  %1318 = vmatpush3.bf16.msra.mxu1 %v1327_v3  ;;  %v985_v43 = vld [vmem:[%s1890_s2 + $0x110] sm:$0xff]  ;;  %v983_v47 = vld [vmem:[%s1890_s2 + $0x100] sm:$0xff]  ;;  %v954_v49 = vld [vmem:[%s1890_s2 + $0x18] sm:$0xff] }
  0x10   :  { %1235 = vmatprep.subr.bf16.mxu0 %v1328_v6  ;;  %1311 = vmatprep.subr.bf16.mxu1 %v1328_v6  ;;  %v986_v51 = vld [vmem:[%s1890_s2 + $0x118] sm:$0xff]  ;;  %v952_v55 = vld [vmem:[%s1890_s2 + $0x8] sm:$0xff]  ;;  %v957_v1 = vld [vmem:[%s1890_s2 + $0x30] sm:$0xff] }
  0x11   :  { %v984_v57 = vld [vmem:[%s1890_s2 + $0x108] sm:$0xff]  ;;  %v989_v3 = vld [vmem:[%s1890_s2 + $0x130] sm:$0xff]  ;;  %v955_v5 = vld [vmem:[%s1890_s2 + $0x20] sm:$0xff] }
  0x13   :  { %1236 = vmatpush3.bf16.msra.mxu0 %v1328_v6  ;;  %1319 = vmatpush3.bf16.msra.mxu1 %v1328_v6 }
  0x14   :  { %1237 = vmatprep.subr.bf16.mxu0 %v1329_v7  ;;  %1312 = vmatprep.subr.bf16.mxu1 %v1329_v7 }
  0x17   :  { %1238 = vmatpush3.bf16.msra.mxu0 %v1329_v7  ;;  %1320 = vmatpush3.bf16.msra.mxu1 %v1329_v7  ;;  %v987_v7 = vld [vmem:[%s1890_s2 + $0x120] sm:$0xff] }
  0x18   :  { %1239 = vmatprep.subr.bf16.mxu0 %v1330_v8  ;;  %1313 = vmatprep.subr.bf16.mxu1 %v1330_v8 }
  0x1b   :  { %1240 = vmatpush3.bf16.msra.mxu0 %v1330_v8  ;;  %1321 = vmatpush3.bf16.msra.mxu1 %v1330_v8 }
  0x1c   :  { %1241 = vmatprep.subr.bf16.mxu0 %v1331_v9  ;;  %1314 = vmatprep.subr.bf16.mxu1 %v1331_v9 }
  0x1f   :  { %1242 = vmatpush3.bf16.msra.mxu0 %v1331_v9  ;;  %1322 = vmatpush3.bf16.msra.mxu1 %v1331_v9  ;;  %v958_v9 = vld [vmem:[%s1890_s2 + $0x38] sm:$0xff] }
  0x22   :  { %1244 = vmatmul.mubr.bf16.vlgmr.msra.gmra.mrb[0].mxu0 %v1334_v10  ;;  %1276 = vmatmul.mubr.bf16.vlgmr.msra.gmra.mrb[0].mxu1 %v1335_v11  ;;  %v990_v11 = vld [vmem:[%s1890_s2 + $0x138] sm:$0xff] }
  0x23   :  { %1247 = vmatprep.mubr.bf16.mxu0 %v1336_v12  ;;  %1279 = vmatprep.mubr.bf16.mxu1 %v1337_v13 }
  0x2a   :  { %1248 = vmatmul.mubr.bf16.gmra.mrb[4].mxu0 %v1338_v14  ;;  %1280 = vmatmul.mubr.bf16.gmra.mrb[4].mxu1 %v1339_v15  ;;  %v956_v15 = vld [vmem:[%s1890_s2 + $0x28] sm:$0xff] }
  0x2b   :  { %1251 = vmatprep.mubr.bf16.mxu0 %v1340_v16  ;;  %1283 = vmatprep.mubr.bf16.mxu1 %v1341_v17  ;;  %v988_v17 = vld [vmem:[%s1890_s2 + $0x128] sm:$0xff] }
  0x32   :  { %1252 = vmatmul.mubr.bf16.gmra.mrb[8].mxu0 %v1342_v18  ;;  %1284 = vmatmul.mubr.bf16.gmra.mrb[8].mxu1 %v1343_v19 }
  0x33   :  { %1255 = vmatprep.mubr.bf16.mxu0 %v1344_v20  ;;  %1287 = vmatprep.mubr.bf16.mxu1 %v1345_v21 }
  0x3a   :  { %1256 = vmatmul.mubr.bf16.gmra.mrb[12].mxu0 %v1346_v22  ;;  %1288 = vmatmul.mubr.bf16.gmra.mrb[12].mxu1 %v1347_v23 }
  0x3b   :  { %1259 = vmatprep.mubr.bf16.mxu0 %v1348_v24  ;;  %1291 = vmatprep.mubr.bf16.mxu1 %v1349_v25  ;;  %v961_v25 = vld [vmem:[%s1890_s2 + $0x50] sm:$0xff] }
  0x42   :  { %1260 = vmatmul.mubr.bf16.gmra.mrb[16].mxu0 %v1350_v26  ;;  %1292 = vmatmul.mubr.bf16.gmra.mrb[16].mxu1 %v1351_v27  ;;  %v993_v27 = vld [vmem:[%s1890_s2 + $0x150] sm:$0xff] }
  0x43   :  { %1263 = vmatprep.mubr.bf16.mxu0 %v1352_v28  ;;  %1295 = vmatprep.mubr.bf16.mxu1 %v1353_v29  ;;  %v959_v29 = vld [vmem:[%s1890_s2 + $0x40] sm:$0xff] }
  0x4a   :  { %1264 = vmatmul.mubr.bf16.gmra.mrb[20].mxu0 %v1354_v30  ;;  %1296 = vmatmul.mubr.bf16.gmra.mrb[20].mxu1 %v1355_v31  ;;  %v991_v31 = vld [vmem:[%s1890_s2 + $0x140] sm:$0xff] }
  0x4b   :  { %1267 = vmatprep.mubr.bf16.mxu0 %v1356_v32  ;;  %1299 = vmatprep.mubr.bf16.mxu1 %v1357_v33  ;;  %v962_v33 = vld [vmem:[%s1890_s2 + $0x58] sm:$0xff] }
  0x52   :  { %1268 = vmatmul.mubr.bf16.gmra.mrb[24].mxu0 %v1358_v34  ;;  %1300 = vmatmul.mubr.bf16.gmra.mrb[24].mxu1 %v1359_v35  ;;  %v994_v35 = vld [vmem:[%s1890_s2 + $0x158] sm:$0xff] }
  0x53   :  { %1271 = vmatprep.mubr.bf16.mxu0 %v1360_v36  ;;  %1303 = vmatprep.mubr.bf16.mxu1 %v1361_v37 }
  0x5a   :  { %1272 = vmatmul.mubr.bf16.gmra.mrb[28].mxu0 %v1362_v38  ;;  %1304 = vmatmul.mubr.bf16.gmra.mrb[28].mxu1 %v1363_v39  ;;  %v960_v39 = vld [vmem:[%s1890_s2 + $0x48] sm:$0xff] }
  0xf5   :  { %v1245_v40 = vpop.f32.mrb[0].mxu0  ;;  %v1277_v42 = vpop.f32.mrb[0].mxu1 }
  0xf6   :  { %v501_v44 = vpop.f32.mrb[1].mxu0  ;;  %v629_v46 = vpop.f32.mrb[1].mxu1  ;;  %v1017_v52 = vadd.f32 %v1245_v40, %v953_v41  ;;  %v1049_v53 = vadd.f32 %v1277_v42, %v985_v43  ;;  %v992_v41 = vld [vmem:[%s1890_s2 + $0x148] sm:$0xff] }
  0xf7   :  { %v1246_v48 = vpop.f32.mrb[2].mxu0  ;;  %v1278_v50 = vpop.f32.mrb[2].mxu1  ;;  %v1015_v58 = vadd.f32 %v951_v45, %v501_v44  ;;  %v1047_v59 = vadd.f32 %v983_v47, %v629_v46 }
  0xf8   :  { %v504_v54 = vpop.f32.mrb[3].mxu0  ;;  %v632_v56 = vpop.f32.mrb[3].mxu1  ;;  %1081 = vst [vmem:[%s1891_s3 + $0x10] sm:$0xff] %v1017_v52  ;;  %1113 = vst [vmem:[%s1891_s3 + $0x110] sm:$0xff] %v1049_v53  ;;  %v1018_v60 = vadd.f32 %v1246_v48, %v954_v49  ;;  %v1050_v61 = vadd.f32 %v1278_v50, %v986_v51  ;;  %v965_v49 = vld [vmem:[%s1890_s2 + $0x70] sm:$0xff]  ;;  %v963_v53 = vld [vmem:[%s1890_s2 + $0x60] sm:$0xff] }
  0xf9   :  { %1079 = vst [vmem:[%s1891_s3] sm:$0xff] %v1015_v58  ;;  %1111 = vst [vmem:[%s1891_s3 + $0x100] sm:$0xff] %v1047_v59  ;;  %v1016_v62 = vadd.f32 %v952_v55, %v504_v54  ;;  %v1048_v63 = vadd.f32 %v984_v57, %v632_v56  ;;  %v997_v51 = vld [vmem:[%s1890_s2 + $0x170] sm:$0xff]  ;;  %v995_v55 = vld [vmem:[%s1890_s2 + $0x160] sm:$0xff] }
  0xfa   :  { %1082 = vst [vmem:[%s1891_s3 + $0x18] sm:$0xff] %v1018_v60  ;;  %1114 = vst [vmem:[%s1891_s3 + $0x118] sm:$0xff] %v1050_v61  ;;  %v966_v57 = vld [vmem:[%s1890_s2 + $0x78] sm:$0xff] }
  0xfb   :  { %1080 = vst [vmem:[%s1891_s3 + $0x8] sm:$0xff] %v1016_v62  ;;  %1112 = vst [vmem:[%s1891_s3 + $0x108] sm:$0xff] %v1048_v63  ;;  %v998_v59 = vld [vmem:[%s1890_s2 + $0x178] sm:$0xff]  ;;  %v964_v63 = vld [vmem:[%s1890_s2 + $0x68] sm:$0xff] }
  0xfd   :  { %v1249_v0 = vpop.f32.mrb[4].mxu0  ;;  %v1281_v2 = vpop.f32.mrb[4].mxu1 }
  0xfe   :  { %v517_v4 = vpop.f32.mrb[5].mxu0  ;;  %v645_v6 = vpop.f32.mrb[5].mxu1  ;;  %v1021_v12 = vadd.f32 %v1249_v0, %v957_v1  ;;  %v1053_v13 = vadd.f32 %v1281_v2, %v989_v3  ;;  %v996_v1 = vld [vmem:[%s1890_s2 + $0x168] sm:$0xff] }
  0xff   :  { %v1250_v8 = vpop.f32.mrb[6].mxu0  ;;  %v1282_v10 = vpop.f32.mrb[6].mxu1  ;;  %v1019_v18 = vadd.f32 %v955_v5, %v517_v4  ;;  %v1051_v19 = vadd.f32 %v987_v7, %v645_v6 }
 0x100   :  { %v520_v14 = vpop.f32.mrb[7].mxu0  ;;  %v648_v16 = vpop.f32.mrb[7].mxu1  ;;  %1085 = vst [vmem:[%s1891_s3 + $0x30] sm:$0xff] %v1021_v12  ;;  %1117 = vst [vmem:[%s1891_s3 + $0x130] sm:$0xff] %v1053_v13  ;;  %v1022_v20 = vadd.f32 %v1250_v8, %v958_v9  ;;  %v1054_v21 = vadd.f32 %v1282_v10, %v990_v11  ;;  %v969_v9 = vld [vmem:[%s1890_s2 + $0x90] sm:$0xff]  ;;  %v967_v13 = vld [vmem:[%s1890_s2 + $0x80] sm:$0xff] }
 0x101   :  { %1083 = vst [vmem:[%s1891_s3 + $0x20] sm:$0xff] %v1019_v18  ;;  %1115 = vst [vmem:[%s1891_s3 + $0x120] sm:$0xff] %v1051_v19  ;;  %v1020_v22 = vadd.f32 %v956_v15, %v520_v14  ;;  %v1052_v23 = vadd.f32 %v988_v17, %v648_v16  ;;  %v1001_v11 = vld [vmem:[%s1890_s2 + $0x190] sm:$0xff]  ;;  %v999_v15 = vld [vmem:[%s1890_s2 + $0x180] sm:$0xff] }
 0x102   :  { %1086 = vst [vmem:[%s1891_s3 + $0x38] sm:$0xff] %v1022_v20  ;;  %1118 = vst [vmem:[%s1891_s3 + $0x138] sm:$0xff] %v1054_v21  ;;  %v970_v17 = vld [vmem:[%s1890_s2 + $0x98] sm:$0xff] }
 0x103   :  { %1084 = vst [vmem:[%s1891_s3 + $0x28] sm:$0xff] %v1020_v22  ;;  %1116 = vst [vmem:[%s1891_s3 + $0x128] sm:$0xff] %v1052_v23  ;;  %v1002_v19 = vld [vmem:[%s1890_s2 + $0x198] sm:$0xff]  ;;  %v968_v23 = vld [vmem:[%s1890_s2 + $0x88] sm:$0xff] }
 0x105   :  { %v1253_v24 = vpop.f32.mrb[8].mxu0  ;;  %v1285_v26 = vpop.f32.mrb[8].mxu1 }
 0x106   :  { %v533_v28 = vpop.f32.mrb[9].mxu0  ;;  %v661_v30 = vpop.f32.mrb[9].mxu1  ;;  %v1025_v36 = vadd.f32 %v1253_v24, %v961_v25  ;;  %v1057_v37 = vadd.f32 %v1285_v26, %v993_v27  ;;  %v1000_v25 = vld [vmem:[%s1890_s2 + $0x188] sm:$0xff] }
 0x107   :  { %v1254_v32 = vpop.f32.mrb[10].mxu0  ;;  %v1286_v34 = vpop.f32.mrb[10].mxu1  ;;  %v1023_v42 = vadd.f32 %v959_v29, %v533_v28  ;;  %v1055_v43 = vadd.f32 %v991_v31, %v661_v30 }
 0x108   :  { %v536_v38 = vpop.f32.mrb[11].mxu0  ;;  %v664_v40 = vpop.f32.mrb[11].mxu1  ;;  %1089 = vst [vmem:[%s1891_s3 + $0x50] sm:$0xff] %v1025_v36  ;;  %1121 = vst [vmem:[%s1891_s3 + $0x150] sm:$0xff] %v1057_v37  ;;  %v1026_v44 = vadd.f32 %v1254_v32, %v962_v33  ;;  %v1058_v45 = vadd.f32 %v1286_v34, %v994_v35  ;;  %v973_v33 = vld [vmem:[%s1890_s2 + $0xb0] sm:$0xff]  ;;  %v971_v37 = vld [vmem:[%s1890_s2 + $0xa0] sm:$0xff] }
 0x109   :  { %1087 = vst [vmem:[%s1891_s3 + $0x40] sm:$0xff] %v1023_v42  ;;  %1119 = vst [vmem:[%s1891_s3 + $0x140] sm:$0xff] %v1055_v43  ;;  %v1024_v46 = vadd.f32 %v960_v39, %v536_v38  ;;  %v1056_v47 = vadd.f32 %v992_v41, %v664_v40  ;;  %v1005_v35 = vld [vmem:[%s1890_s2 + $0x1b0] sm:$0xff]  ;;  %v1003_v39 = vld [vmem:[%s1890_s2 + $0x1a0] sm:$0xff] }
 0x10a   :  { %1090 = vst [vmem:[%s1891_s3 + $0x58] sm:$0xff] %v1026_v44  ;;  %1122 = vst [vmem:[%s1891_s3 + $0x158] sm:$0xff] %v1058_v45  ;;  %v974_v41 = vld [vmem:[%s1890_s2 + $0xb8] sm:$0xff] }
 0x10b   :  { %1088 = vst [vmem:[%s1891_s3 + $0x48] sm:$0xff] %v1024_v46  ;;  %1120 = vst [vmem:[%s1891_s3 + $0x148] sm:$0xff] %v1056_v47  ;;  %v1006_v43 = vld [vmem:[%s1890_s2 + $0x1b8] sm:$0xff]  ;;  %v972_v47 = vld [vmem:[%s1890_s2 + $0xa8] sm:$0xff] }
 0x10d   :  { %v1257_v48 = vpop.f32.mrb[12].mxu0  ;;  %v1289_v50 = vpop.f32.mrb[12].mxu1 }
 0x10e   :  { %v549_v52 = vpop.f32.mrb[13].mxu0  ;;  %v677_v54 = vpop.f32.mrb[13].mxu1  ;;  %v1029_v60 = vadd.f32 %v1257_v48, %v965_v49  ;;  %v1061_v61 = vadd.f32 %v1289_v50, %v997_v51  ;;  %v1004_v49 = vld [vmem:[%s1890_s2 + $0x1a8] sm:$0xff] }
 0x10f   :  { %v1258_v56 = vpop.f32.mrb[14].mxu0  ;;  %v1290_v58 = vpop.f32.mrb[14].mxu1  ;;  %v1027_v2 = vadd.f32 %v963_v53, %v549_v52  ;;  %v1059_v3 = vadd.f32 %v995_v55, %v677_v54 }
 0x110   :  { %v552_v62 = vpop.f32.mrb[15].mxu0  ;;  %v680_v0 = vpop.f32.mrb[15].mxu1  ;;  %1093 = vst [vmem:[%s1891_s3 + $0x70] sm:$0xff] %v1029_v60  ;;  %1125 = vst [vmem:[%s1891_s3 + $0x170] sm:$0xff] %v1061_v61  ;;  %v1030_v4 = vadd.f32 %v1258_v56, %v966_v57  ;;  %v1062_v5 = vadd.f32 %v1290_v58, %v998_v59  ;;  %v977_v57 = vld [vmem:[%s1890_s2 + $0xd0] sm:$0xff]  ;;  %v975_v61 = vld [vmem:[%s1890_s2 + $0xc0] sm:$0xff] }
 0x111   :  { %1091 = vst [vmem:[%s1891_s3 + $0x60] sm:$0xff] %v1027_v2  ;;  %1123 = vst [vmem:[%s1891_s3 + $0x160] sm:$0xff] %v1059_v3  ;;  %v1028_v6 = vadd.f32 %v964_v63, %v552_v62  ;;  %v1060_v7 = vadd.f32 %v996_v1, %v680_v0  ;;  %v1009_v59 = vld [vmem:[%s1890_s2 + $0x1d0] sm:$0xff]  ;;  %v1007_v63 = vld [vmem:[%s1890_s2 + $0x1c0] sm:$0xff] }
 0x112   :  { %1094 = vst [vmem:[%s1891_s3 + $0x78] sm:$0xff] %v1030_v4  ;;  %1126 = vst [vmem:[%s1891_s3 + $0x178] sm:$0xff] %v1062_v5  ;;  %v978_v1 = vld [vmem:[%s1890_s2 + $0xd8] sm:$0xff] }
 0x113   :  { %1092 = vst [vmem:[%s1891_s3 + $0x68] sm:$0xff] %v1028_v6  ;;  %1124 = vst [vmem:[%s1891_s3 + $0x168] sm:$0xff] %v1060_v7  ;;  %v1010_v3 = vld [vmem:[%s1890_s2 + $0x1d8] sm:$0xff]  ;;  %v976_v7 = vld [vmem:[%s1890_s2 + $0xc8] sm:$0xff] }
 0x115   :  { %v1261_v8 = vpop.f32.mrb[16].mxu0  ;;  %v1293_v10 = vpop.f32.mrb[16].mxu1 }
 0x116   :  { %v565_v12 = vpop.f32.mrb[17].mxu0  ;;  %v693_v14 = vpop.f32.mrb[17].mxu1  ;;  %v1033_v20 = vadd.f32 %v1261_v8, %v969_v9  ;;  %v1065_v21 = vadd.f32 %v1293_v10, %v1001_v11  ;;  %v1008_v9 = vld [vmem:[%s1890_s2 + $0x1c8] sm:$0xff] }
 0x117   :  { %v1262_v16 = vpop.f32.mrb[18].mxu0  ;;  %v1294_v18 = vpop.f32.mrb[18].mxu1  ;;  %v1031_v26 = vadd.f32 %v967_v13, %v565_v12  ;;  %v1063_v27 = vadd.f32 %v999_v15, %v693_v14 }
 0x118   :  { %v568_v22 = vpop.f32.mrb[19].mxu0  ;;  %v696_v24 = vpop.f32.mrb[19].mxu1  ;;  %1097 = vst [vmem:[%s1891_s3 + $0x90] sm:$0xff] %v1033_v20  ;;  %1129 = vst [vmem:[%s1891_s3 + $0x190] sm:$0xff] %v1065_v21  ;;  %v1034_v28 = vadd.f32 %v1262_v16, %v970_v17  ;;  %v1066_v29 = vadd.f32 %v1294_v18, %v1002_v19  ;;  %v981_v17 = vld [vmem:[%s1890_s2 + $0xf0] sm:$0xff]  ;;  %v979_v21 = vld [vmem:[%s1890_s2 + $0xe0] sm:$0xff] }
 0x119   :  { %1095 = vst [vmem:[%s1891_s3 + $0x80] sm:$0xff] %v1031_v26  ;;  %1127 = vst [vmem:[%s1891_s3 + $0x180] sm:$0xff] %v1063_v27  ;;  %v1032_v30 = vadd.f32 %v968_v23, %v568_v22  ;;  %v1064_v31 = vadd.f32 %v1000_v25, %v696_v24  ;;  %v1013_v19 = vld [vmem:[%s1890_s2 + $0x1f0] sm:$0xff]  ;;  %v1011_v23 = vld [vmem:[%s1890_s2 + $0x1e0] sm:$0xff] }
 0x11a   :  { %1098 = vst [vmem:[%s1891_s3 + $0x98] sm:$0xff] %v1034_v28  ;;  %1130 = vst [vmem:[%s1891_s3 + $0x198] sm:$0xff] %v1066_v29  ;;  %v982_v25 = vld [vmem:[%s1890_s2 + $0xf8] sm:$0xff] }
 0x11b   :  { %1096 = vst [vmem:[%s1891_s3 + $0x88] sm:$0xff] %v1032_v30  ;;  %1128 = vst [vmem:[%s1891_s3 + $0x188] sm:$0xff] %v1064_v31  ;;  %v1014_v27 = vld [vmem:[%s1890_s2 + $0x1f8] sm:$0xff]  ;;  %v980_v31 = vld [vmem:[%s1890_s2 + $0xe8] sm:$0xff] }
 0x11d   :  { %v1265_v32 = vpop.f32.mrb[20].mxu0  ;;  %v1297_v34 = vpop.f32.mrb[20].mxu1 }
 0x11e   :  { %v581_v36 = vpop.f32.mrb[21].mxu0  ;;  %v709_v38 = vpop.f32.mrb[21].mxu1  ;;  %v1037_v44 = vadd.f32 %v1265_v32, %v973_v33  ;;  %v1069_v45 = vadd.f32 %v1297_v34, %v1005_v35  ;;  %v1012_v33 = vld [vmem:[%s1890_s2 + $0x1e8] sm:$0xff] }
 0x11f   :  { %v1266_v40 = vpop.f32.mrb[22].mxu0  ;;  %v1298_v42 = vpop.f32.mrb[22].mxu1  ;;  %v1035_v50 = vadd.f32 %v971_v37, %v581_v36  ;;  %v1067_v51 = vadd.f32 %v1003_v39, %v709_v38 }
 0x120   :  { %v584_v46 = vpop.f32.mrb[23].mxu0  ;;  %v712_v48 = vpop.f32.mrb[23].mxu1  ;;  %1101 = vst [vmem:[%s1891_s3 + $0xb0] sm:$0xff] %v1037_v44  ;;  %1133 = vst [vmem:[%s1891_s3 + $0x1b0] sm:$0xff] %v1069_v45  ;;  %v1038_v52 = vadd.f32 %v1266_v40, %v974_v41  ;;  %v1070_v53 = vadd.f32 %v1298_v42, %v1006_v43 }
 0x121   :  { %1099 = vst [vmem:[%s1891_s3 + $0xa0] sm:$0xff] %v1035_v50  ;;  %1131 = vst [vmem:[%s1891_s3 + $0x1a0] sm:$0xff] %v1067_v51  ;;  %v1036_v54 = vadd.f32 %v972_v47, %v584_v46  ;;  %v1068_v55 = vadd.f32 %v1004_v49, %v712_v48 }
 0x122   :  { %1102 = vst [vmem:[%s1891_s3 + $0xb8] sm:$0xff] %v1038_v52  ;;  %1134 = vst [vmem:[%s1891_s3 + $0x1b8] sm:$0xff] %v1070_v53 }
 0x123   :  { %1100 = vst [vmem:[%s1891_s3 + $0xa8] sm:$0xff] %v1036_v54  ;;  %1132 = vst [vmem:[%s1891_s3 + $0x1a8] sm:$0xff] %v1068_v55 }
 0x125   :  { %v1269_v56 = vpop.f32.mrb[24].mxu0  ;;  %v1301_v58 = vpop.f32.mrb[24].mxu1 }
 0x126   :  { %v597_v60 = vpop.f32.mrb[25].mxu0  ;;  %v725_v62 = vpop.f32.mrb[25].mxu1  ;;  %v1041_v4 = vadd.f32 %v1269_v56, %v977_v57  ;;  %v1073_v5 = vadd.f32 %v1301_v58, %v1009_v59 }
 0x127   :  { %v1270_v0 = vpop.f32.mrb[26].mxu0  ;;  %v1302_v2 = vpop.f32.mrb[26].mxu1  ;;  %v1039_v10 = vadd.f32 %v975_v61, %v597_v60  ;;  %v1071_v11 = vadd.f32 %v1007_v63, %v725_v62 }
 0x128   :  { %v600_v6 = vpop.f32.mrb[27].mxu0  ;;  %v728_v8 = vpop.f32.mrb[27].mxu1  ;;  %1105 = vst [vmem:[%s1891_s3 + $0xd0] sm:$0xff] %v1041_v4  ;;  %1137 = vst [vmem:[%s1891_s3 + $0x1d0] sm:$0xff] %v1073_v5  ;;  %v1042_v12 = vadd.f32 %v1270_v0, %v978_v1  ;;  %v1074_v13 = vadd.f32 %v1302_v2, %v1010_v3 }
 0x129   :  { %1103 = vst [vmem:[%s1891_s3 + $0xc0] sm:$0xff] %v1039_v10  ;;  %1135 = vst [vmem:[%s1891_s3 + $0x1c0] sm:$0xff] %v1071_v11  ;;  %v1040_v14 = vadd.f32 %v976_v7, %v600_v6  ;;  %v1072_v15 = vadd.f32 %v1008_v9, %v728_v8 }
 0x12a   :  { %1106 = vst [vmem:[%s1891_s3 + $0xd8] sm:$0xff] %v1042_v12  ;;  %1138 = vst [vmem:[%s1891_s3 + $0x1d8] sm:$0xff] %v1074_v13 }
 0x12b   :  { %1104 = vst [vmem:[%s1891_s3 + $0xc8] sm:$0xff] %v1040_v14  ;;  %1136 = vst [vmem:[%s1891_s3 + $0x1c8] sm:$0xff] %v1072_v15 }
 0x12d   :  { %v1273_v16 = vpop.f32.mrb[28].mxu0  ;;  %v1305_v18 = vpop.f32.mrb[28].mxu1 }
 0x12e   :  { %v613_v20 = vpop.f32.mrb[29].mxu0  ;;  %v741_v22 = vpop.f32.mrb[29].mxu1  ;;  %v1045_v28 = vadd.f32 %v1273_v16, %v981_v17  ;;  %v1077_v29 = vadd.f32 %v1305_v18, %v1013_v19 }
 0x12f   :  { %v1274_v24 = vpop.f32.mrb[30].mxu0  ;;  %v1306_v26 = vpop.f32.mrb[30].mxu1  ;;  %v1043_v34 = vadd.f32 %v979_v21, %v613_v20  ;;  %v1075_v35 = vadd.f32 %v1011_v23, %v741_v22 }
 0x130   :  { %v616_v30 = vpop.f32.mrb[31].mxu0  ;;  %v744_v32 = vpop.f32.mrb[31].mxu1  ;;  %1109 = vst [vmem:[%s1891_s3 + $0xf0] sm:$0xff] %v1045_v28  ;;  %1141 = vst [vmem:[%s1891_s3 + $0x1f0] sm:$0xff] %v1077_v29  ;;  %v1046_v36 = vadd.f32 %v1274_v24, %v982_v25  ;;  %v1078_v37 = vadd.f32 %v1306_v26, %v1014_v27 }
 0x131   :  { %1107 = vst [vmem:[%s1891_s3 + $0xe0] sm:$0xff] %v1043_v34  ;;  %1139 = vst [vmem:[%s1891_s3 + $0x1e0] sm:$0xff] %v1075_v35  ;;  %v1044_v38 = vadd.f32 %v980_v31, %v616_v30  ;;  %v1076_v39 = vadd.f32 %v1012_v33, %v744_v32 }
 0x132   :  { %1110 = vst [vmem:[%s1891_s3 + $0xf8] sm:$0xff] %v1046_v36  ;;  %1142 = vst [vmem:[%s1891_s3 + $0x1f8] sm:$0xff] %v1078_v37 }
 0x133   :  { %1108 = vst [vmem:[%s1891_s3 + $0xe8] sm:$0xff] %v1044_v38  ;;  %1140 = vst [vmem:[%s1891_s3 + $0x1e8] sm:$0xff] %v1076_v39 }

// kernel: fpn1_forward.47
= control target key start
LH: loop header
LB: loop body
LE: loop exit
PB: predicated region body
PF: predicated region fallthrough
CT: control target
= control target key end

     0   :  { %v3185_v0 = vmov 0   ;;  %s4335_s1 = inlined_call_operand.vmem [shape: bf16[640,128], index: 1, kind: input, shape index: {}]   ;;  %s4336_s0 = inlined_call_operand.vmem [shape: bf16[512,640], index: 0, kind: input, shape index: {}]   ;;  %s4337_s2 = inlined_call_operand.vmem [shape: f32[512,128], index: 2, kind: output, shape index: {}]  }
   0x1   :  { %1488 = vmatprep.subr.bf16.mxu0 %v3185_v0  ;;  %2807 = vmatprep.subr.bf16.mxu1 %v3185_v0  ;;  %v2921_v1 = vld [vmem:[%s4335_s1] sm:$0xff]   ;;  %v2922_v2 = vld [vmem:[%s4335_s1 + $0x8] sm:$0xff]   ;;  %v2923_v3 = vld [vmem:[%s4335_s1 + $0x10] sm:$0xff]  }
   0x2   :  { %1489 = vmatpush1.bf16.msra.mxu0 %v2921_v1  ;;  %2823 = vmatpush1.bf16.msra.mxu1 %v2921_v1  ;;  %v2924_v4 = vld [vmem:[%s4335_s1 + $0x18] sm:$0xff]   ;;  %v2925_v5 = vld [vmem:[%s4335_s1 + $0x20] sm:$0xff]   ;;  %v2926_v7 = vld [vmem:[%s4335_s1 + $0x28] sm:$0xff]  }
   0x3   :  { %1490 = vmatprep.subr.bf16.mxu0 %v3185_v0  ;;  %2808 = vmatprep.subr.bf16.mxu1 %v3185_v0  ;;  %v2939_v6 = vld [vmem:[%s4336_s0 + $0x4] ss:$20 sps:$4 sm:$0xff]   ;;  %v2927_v9 = vld [vmem:[%s4335_s1 + $0x30] sm:$0xff]   ;;  %v2930_v12 = vld [vmem:[%s4335_s1 + $0x48] sm:$0xff]  }
   0x4   :  { %v2942_v8 = vld [vmem:[%s4336_s0 + $0x144] ss:$20 sps:$4 sm:$0xff]   ;;  %1520 = vmatprep.mubr.bf16.mxu0 %v2939_v6  ;;  %v2931_v13 = vld [vmem:[%s4335_s1 + $0x50] sm:$0xff]   ;;  %v2934_v16 = vld [vmem:[%s4335_s1 + $0x68] sm:$0xff]  }
   0x5   :  { %1584 = vmatprep.mubr.bf16.mxu1 %v2942_v8  ;;  %v2928_v10 = vld [vmem:[%s4335_s1 + $0x38] sm:$0xff]   ;;  %v2929_v11 = vld [vmem:[%s4335_s1 + $0x40] sm:$0xff]   ;;  %v2935_v17 = vld [vmem:[%s4335_s1 + $0x70] sm:$0xff]  }
   0x6   :  { %1491 = vmatpush1.bf16.msra.mxu0 %v2922_v2  ;;  %2824 = vmatpush1.bf16.msra.mxu1 %v2922_v2  ;;  %v2932_v14 = vld [vmem:[%s4335_s1 + $0x58] sm:$0xff]   ;;  %v2933_v15 = vld [vmem:[%s4335_s1 + $0x60] sm:$0xff]   ;;  %v2969_v25 = vld [vmem:[%s4335_s1 + $0x108] sm:$0xff]  }
   0x7   :  { %1492 = vmatprep.subr.bf16.mxu0 %v3185_v0  ;;  %2809 = vmatprep.subr.bf16.mxu1 %v3185_v0  ;;  %v2936_v18 = vld [vmem:[%s4335_s1 + $0x78] sm:$0xff]   ;;  %v2944_v19 = vld [vmem:[%s4335_s1 + $0x100] sm:$0xff]   ;;  %v2945_v26 = vld [vmem:[%s4335_s1 + $0x88] sm:$0xff]  }
   0x8   :  { %v2937_v20 = vld [vmem:[%s4336_s0] ss:$20 sps:$4 sm:$0xff]   ;;  %v2950_v28 = vld [vmem:[%s4336_s0 + $0x28] ss:$20 sps:$4 sm:$0xff]   ;;  %v2958_v35 = vld [vmem:[%s4336_s0 + $0x50] ss:$20 sps:$4 sm:$0xff]  }
   0x9   :  { %v2940_v21 = vld [vmem:[%s4336_s0 + $0x140] ss:$20 sps:$4 sm:$0xff]   ;;  %v2951_v29 = vld [vmem:[%s4336_s0 + $0x168] ss:$20 sps:$4 sm:$0xff]   ;;  %v2959_v36 = vld [vmem:[%s4336_s0 + $0x190] ss:$20 sps:$4 sm:$0xff]  }
   0xa   :  { %1493 = vmatpush1.bf16.msra.mxu0 %v2923_v3  ;;  %2825 = vmatpush1.bf16.msra.mxu1 %v2923_v3  ;;  %v2943_v22 = vld [vmem:[%s4335_s1 + $0x80] sm:$0xff]   ;;  %v2994_v27 = vld [vmem:[%s4335_s1 + $0x110] sm:$0xff]   ;;  %v3016_v33 = vld [vmem:[%s4335_s1 + $0x118] sm:$0xff]  }
   0xb   :  { %1494 = vmatprep.subr.bf16.mxu0 %v3185_v0  ;;  %2810 = vmatprep.subr.bf16.mxu1 %v3185_v0  ;;  %v2946_v23 = vld [vmem:[%s4336_s0 + $0x2c] ss:$20 sps:$4 sm:$0xff]   ;;  %v2952_v30 = vld [vmem:[%s4335_s1 + $0x90] sm:$0xff]   ;;  %v2953_v34 = vld [vmem:[%s4335_s1 + $0x98] sm:$0xff]  }
   0xc   :  { %v2948_v24 = vld [vmem:[%s4336_s0 + $0x16c] ss:$20 sps:$4 sm:$0xff]   ;;  %v2954_v31 = vld [vmem:[%s4336_s0 + $0x54] ss:$20 sps:$4 sm:$0xff]   ;;  %v2962_v38 = vld [vmem:[%s4336_s0 + $0x7c] ss:$20 sps:$4 sm:$0xff]  }
   0xd   :  { %v2956_v32 = vld [vmem:[%s4336_s0 + $0x194] ss:$20 sps:$4 sm:$0xff]   ;;  %v2960_v37 = vld [vmem:[%s4335_s1 + $0xa0] sm:$0xff]   ;;  %v2964_v39 = vld [vmem:[%s4336_s0 + $0x1bc] ss:$20 sps:$4 sm:$0xff]  }
   0xe   :  { %1495 = vmatpush1.bf16.msra.mxu0 %v2924_v4  ;;  %2826 = vmatpush1.bf16.msra.mxu1 %v2924_v4  ;;  %v3035_v40 = vld [vmem:[%s4335_s1 + $0x120] sm:$0xff]   ;;  %v2961_v41 = vld [vmem:[%s4335_s1 + $0xa8] sm:$0xff]   ;;  %v2968_v45 = vld [vmem:[%s4335_s1 + $0xb0] sm:$0xff]  }
   0xf   :  { %1496 = vmatprep.subr.bf16.mxu0 %v3185_v0  ;;  %2811 = vmatprep.subr.bf16.mxu1 %v3185_v0  ;;  %v3054_v42 = vld [vmem:[%s4335_s1 + $0x128] sm:$0xff]   ;;  %v2971_v46 = vld [vmem:[%s4336_s0 + $0xa4] ss:$20 sps:$4 sm:$0xff]   ;;  %v3073_v48 = vld [vmem:[%s4335_s1 + $0x130] sm:$0xff]  }
  0x10   :  { %v2966_v43 = vld [vmem:[%s4336_s0 + $0x78] ss:$20 sps:$4 sm:$0xff]   ;;  %v2975_v50 = vld [vmem:[%s4336_s0 + $0xa0] ss:$20 sps:$4 sm:$0xff]   ;;  %v2983_v56 = vld [vmem:[%s4336_s0 + $0xc8] ss:$20 sps:$4 sm:$0xff]  }
  0x11   :  { %v2967_v44 = vld [vmem:[%s4336_s0 + $0x1b8] ss:$20 sps:$4 sm:$0xff]   ;;  %v2976_v51 = vld [vmem:[%s4336_s0 + $0x1e0] ss:$20 sps:$4 sm:$0xff]   ;;  %v2984_v57 = vld [vmem:[%s4336_s0 + $0x208] ss:$20 sps:$4 sm:$0xff]  }
  0x12   :  { %1497 = vmatpush1.bf16.msra.mxu0 %v2925_v5  ;;  %2827 = vmatpush1.bf16.msra.mxu1 %v2925_v5  ;;  %v2973_v47 = vld [vmem:[%s4336_s0 + $0x1e4] ss:$20 sps:$4 sm:$0xff]   ;;  %v2979_v53 = vld [vmem:[%s4336_s0 + $0xcc] ss:$20 sps:$4 sm:$0xff]   ;;  %v2985_v58 = vld [vmem:[%s4335_s1 + $0xd0] sm:$0xff]  }
  0x13   :  { %1498 = vmatprep.subr.bf16.mxu0 %v3185_v0  ;;  %2812 = vmatprep.subr.bf16.mxu1 %v3185_v0  ;;  %v2970_v49 = vld [vmem:[%s4335_s1 + $0xb8] sm:$0xff]   ;;  %v2977_v52 = vld [vmem:[%s4335_s1 + $0xc0] sm:$0xff]   ;;  %v2978_v55 = vld [vmem:[%s4335_s1 + $0xc8] sm:$0xff]  }
  0x14   :  { %v2981_v54 = vld [vmem:[%s4336_s0 + $0x20c] ss:$20 sps:$4 sm:$0xff]   ;;  %v2987_v59 = vld [vmem:[%s4336_s0 + $0xf4] ss:$20 sps:$4 sm:$0xff]   ;;  %v3092_v61 = vld [vmem:[%s4335_s1 + $0x138] sm:$0xff]  }
  0x15   :  { %v2989_v60 = vld [vmem:[%s4336_s0 + $0x234] ss:$20 sps:$4 sm:$0xff]   ;;  %v2986_v62 = vld [vmem:[%s4335_s1 + $0xd8] sm:$0xff]   ;;  %v2991_v63 = vld [vmem:[%s4336_s0 + $0xf0] ss:$20 sps:$4 sm:$0xff]  }
  0x16   :  { %1499 = vmatpush1.bf16.msra.mxu0 %v2926_v7  ;;  %2828 = vmatpush1.bf16.msra.mxu1 %v2926_v7  ;;  %v2992_v1 = vld [vmem:[%s4336_s0 + $0x230] ss:$20 sps:$4 sm:$0xff]   ;;  %v2995_v5 = vld [vmem:[%s4335_s1 + $0xe8] sm:$0xff]  }
  0x17   :  { %1500 = vmatprep.subr.bf16.mxu0 %v3185_v0  ;;  %2813 = vmatprep.subr.bf16.mxu1 %v3185_v0  ;;  %v2993_v2 = vld [vmem:[%s4335_s1 + $0xe0] sm:$0xff]   ;;  %v2996_v3 = vld [vmem:[%s4336_s0 + $0x11c] ss:$20 sps:$4 sm:$0xff]   ;;  %v3000_v6 = vld [vmem:[%s4336_s0 + $0x118] ss:$20 sps:$4 sm:$0xff]  }
  0x18   :  { %v2998_v4 = vld [vmem:[%s4336_s0 + $0x25c] ss:$20 sps:$4 sm:$0xff]   ;;  %v3001_v7 = vld [vmem:[%s4336_s0 + $0x258] ss:$20 sps:$4 sm:$0xff]  }
  0x19   :  { %v3002_v8 = vld [vmem:[%s4335_s1 + $0xf0] sm:$0xff]  }
  0x1a   :  { %1501 = vmatpush1.bf16.msra.mxu0 %v2927_v9  ;;  %2829 = vmatpush1.bf16.msra.mxu1 %v2927_v9  ;;  %v3004_v9 = vld [vmem:[%s4336_s0 + $0x284] ss:$20 sps:$4 sm:$0xff]  }
  0x1b   :  { %1502 = vmatprep.subr.bf16.mxu0 %v3185_v0  ;;  %2814 = vmatprep.subr.bf16.mxu1 %v3185_v0 }
  0x1e   :  { %1503 = vmatpush1.bf16.msra.mxu0 %v2928_v10  ;;  %2830 = vmatpush1.bf16.msra.mxu1 %v2928_v10  ;;  %v3008_v10 = vld [vmem:[%s4336_s0 + $0xc] ss:$20 sps:$4 sm:$0xff]  }
  0x1f   :  { %1504 = vmatprep.subr.bf16.mxu0 %v3185_v0  ;;  %2815 = vmatprep.subr.bf16.mxu1 %v3185_v0 }
  0x22   :  { %1505 = vmatpush1.bf16.msra.mxu0 %v2929_v11  ;;  %2831 = vmatpush1.bf16.msra.mxu1 %v2929_v11  ;;  %v3003_v11 = vld [vmem:[%s4335_s1 + $0xf8] sm:$0xff]  }
  0x23   :  { %1506 = vmatprep.subr.bf16.mxu0 %v3185_v0  ;;  %2816 = vmatprep.subr.bf16.mxu1 %v3185_v0 }
  0x26   :  { %1507 = vmatpush1.bf16.msra.mxu0 %v2930_v12  ;;  %2832 = vmatpush1.bf16.msra.mxu1 %v2930_v12  ;;  %v3006_v12 = vld [vmem:[%s4336_s0 + $0x8] ss:$20 sps:$4 sm:$0xff]  }
  0x27   :  { %1508 = vmatprep.subr.bf16.mxu0 %v3185_v0  ;;  %2817 = vmatprep.subr.bf16.mxu1 %v3185_v0 }
  0x2a   :  { %1509 = vmatpush1.bf16.msra.mxu0 %v2931_v13  ;;  %2833 = vmatpush1.bf16.msra.mxu1 %v2931_v13  ;;  %v3009_v13 = vld [vmem:[%s4336_s0 + $0x280] ss:$20 sps:$4 sm:$0xff]  }
  0x2b   :  { %1510 = vmatprep.subr.bf16.mxu0 %v3185_v0  ;;  %2818 = vmatprep.subr.bf16.mxu1 %v3185_v0 }
  0x2e   :  { %1511 = vmatpush1.bf16.msra.mxu0 %v2932_v14  ;;  %2834 = vmatpush1.bf16.msra.mxu1 %v2932_v14  ;;  %v3010_v14 = vld [vmem:[%s4336_s0 + $0x2ac] ss:$20 sps:$4 sm:$0xff]  }
  0x2f   :  { %1512 = vmatprep.subr.bf16.mxu0 %v3185_v0  ;;  %2819 = vmatprep.subr.bf16.mxu1 %v3185_v0 }
  0x32   :  { %1513 = vmatpush1.bf16.msra.mxu0 %v2933_v15  ;;  %2835 = vmatpush1.bf16.msra.mxu1 %v2933_v15  ;;  %v3012_v15 = vld [vmem:[%s4336_s0 + $0x34] ss:$20 sps:$4 sm:$0xff]  }
  0x33   :  { %1514 = vmatprep.subr.bf16.mxu0 %v3185_v0  ;;  %2820 = vmatprep.subr.bf16.mxu1 %v3185_v0 }
  0x36   :  { %1515 = vmatpush1.bf16.msra.mxu0 %v2934_v16  ;;  %2836 = vmatpush1.bf16.msra.mxu1 %v2934_v16  ;;  %v3015_v16 = vld [vmem:[%s4336_s0 + $0x30] ss:$20 sps:$4 sm:$0xff]  }
  0x37   :  { %1516 = vmatprep.subr.bf16.mxu0 %v3185_v0  ;;  %2821 = vmatprep.subr.bf16.mxu1 %v3185_v0 }
  0x3a   :  { %1517 = vmatpush1.bf16.msra.mxu0 %v2935_v17  ;;  %2837 = vmatpush1.bf16.msra.mxu1 %v2935_v17  ;;  %v3017_v17 = vld [vmem:[%s4336_s0 + $0x2d4] ss:$20 sps:$4 sm:$0xff]  }
  0x3b   :  { %1518 = vmatprep.subr.bf16.mxu0 %v3185_v0  ;;  %2822 = vmatprep.subr.bf16.mxu1 %v3185_v0 }
  0x3e   :  { %1519 = vmatpush1.bf16.msra.mxu0 %v2936_v18  ;;  %2838 = vmatpush1.bf16.msra.mxu1 %v2936_v18  ;;  %v3019_v18 = vld [vmem:[%s4336_s0 + $0x5c] ss:$20 sps:$4 sm:$0xff]  }
  0x3f   :  { %1777 = vmatprep.subr.bf16.mxu0 %v3185_v0  ;;  %2727 = vmatprep.subr.bf16.mxu1 %v2944_v19 }
  0x41   :  { %1521 = vmatmul.mubr.bf16.vlgmr.msra.gmra.mrb[0].mxu0 %v2937_v20  ;;  %1585 = vmatmul.mubr.bf16.vlgmr.msra.gmra.mrb[0].mxu1 %v2940_v21  ;;  %v3022_v20 = vld [vmem:[%s4336_s0 + $0x58] ss:$20 sps:$4 sm:$0xff]   ;;  %v3023_v21 = vld [vmem:[%s4336_s0 + $0x2fc] ss:$20 sps:$4 sm:$0xff]  }
  0x42   :  { %1778 = vmatpush1.bf16.msra.mxu0 %v2943_v22  ;;  %2728 = vmatpush3.bf16.msra.mxu1 %v2944_v19  ;;  %v3021_v19 = vld [vmem:[%s4336_s0 + $0x2d0] ss:$20 sps:$4 sm:$0xff]  }
  0x43   :  { %1779 = vmatprep.subr.bf16.mxu0 %v3185_v0  ;;  %1528 = vmatprep.mubr.bf16.mxu0 %v2946_v23  ;;  %v3025_v22 = vld [vmem:[%s4336_s0 + $0x84] ss:$20 sps:$4 sm:$0xff]  }
  0x44   :  { %1592 = vmatprep.mubr.bf16.mxu1 %v2948_v24  ;;  %2729 = vmatprep.subr.bf16.mxu1 %v2969_v25  ;;  %v3027_v23 = vld [vmem:[%s4336_s0 + $0x2f8] ss:$20 sps:$4 sm:$0xff]   ;;  %v3028_v24 = vld [vmem:[%s4336_s0 + $0x80] ss:$20 sps:$4 sm:$0xff]  }
  0x46   :  { %1780 = vmatpush1.bf16.msra.mxu0 %v2945_v26  ;;  %2730 = vmatpush3.bf16.msra.mxu1 %v2969_v25  ;;  %v3029_v25 = vld [vmem:[%s4336_s0 + $0x324] ss:$20 sps:$4 sm:$0xff]   ;;  %v3031_v26 = vld [vmem:[%s4336_s0 + $0xac] ss:$20 sps:$4 sm:$0xff]  }
  0x47   :  { %1781 = vmatprep.subr.bf16.mxu0 %v3185_v0  ;;  %2731 = vmatprep.subr.bf16.mxu1 %v2994_v27 }
  0x49   :  { %1529 = vmatmul.mubr.bf16.gmra.mrb[4].mxu0 %v2950_v28  ;;  %1593 = vmatmul.mubr.bf16.gmra.mrb[4].mxu1 %v2951_v29  ;;  %v3034_v28 = vld [vmem:[%s4336_s0 + $0xa8] ss:$20 sps:$4 sm:$0xff]   ;;  %v3036_v29 = vld [vmem:[%s4336_s0 + $0x34c] ss:$20 sps:$4 sm:$0xff]  }
  0x4a   :  { %1782 = vmatpush1.bf16.msra.mxu0 %v2952_v30  ;;  %1536 = vmatprep.mubr.bf16.mxu0 %v2954_v31  ;;  %v3038_v30 = vld [vmem:[%s4336_s0 + $0xd4] ss:$20 sps:$4 sm:$0xff]  }
  0x4b   :  { %1783 = vmatprep.subr.bf16.mxu0 %v3185_v0  ;;  %1600 = vmatprep.mubr.bf16.mxu1 %v2956_v32  ;;  %v3040_v31 = vld [vmem:[%s4336_s0 + $0x348] ss:$20 sps:$4 sm:$0xff]   ;;  %v3041_v32 = vld [vmem:[%s4336_s0 + $0xd0] ss:$20 sps:$4 sm:$0xff]  }
  0x4c   :  { %2732 = vmatpush3.bf16.msra.mxu1 %v2994_v27  ;;  %v3033_v27 = vld [vmem:[%s4336_s0 + $0x320] ss:$20 sps:$4 sm:$0xff]  }
  0x4d   :  { %2733 = vmatprep.subr.bf16.mxu1 %v3016_v33 }
  0x4e   :  { %1784 = vmatpush1.bf16.msra.mxu0 %v2953_v34  ;;  %v3044_v34 = vld [vmem:[%s4336_s0 + $0xfc] ss:$20 sps:$4 sm:$0xff]  }
  0x4f   :  { %1785 = vmatprep.subr.bf16.mxu0 %v3185_v0 }
  0x50   :  { %2734 = vmatpush3.bf16.msra.mxu1 %v3016_v33  ;;  %v3042_v33 = vld [vmem:[%s4336_s0 + $0x374] ss:$20 sps:$4 sm:$0xff]  }
  0x51   :  { %1537 = vmatmul.mubr.bf16.gmra.mrb[8].mxu0 %v2958_v35  ;;  %1601 = vmatmul.mubr.bf16.gmra.mrb[8].mxu1 %v2959_v36  ;;  %v3046_v35 = vld [vmem:[%s4336_s0 + $0x370] ss:$20 sps:$4 sm:$0xff]   ;;  %v3047_v36 = vld [vmem:[%s4336_s0 + $0xf8] ss:$20 sps:$4 sm:$0xff]  }
  0x52   :  { %1786 = vmatpush1.bf16.msra.mxu0 %v2960_v37  ;;  %1544 = vmatprep.mubr.bf16.mxu0 %v2962_v38  ;;  %v3048_v37 = vld [vmem:[%s4336_s0 + $0x39c] ss:$20 sps:$4 sm:$0xff]   ;;  %v3050_v38 = vld [vmem:[%s4336_s0 + $0x124] ss:$20 sps:$4 sm:$0xff]  }
  0x53   :  { %1787 = vmatprep.subr.bf16.mxu0 %v3185_v0  ;;  %1608 = vmatprep.mubr.bf16.mxu1 %v2964_v39  ;;  %v3052_v39 = vld [vmem:[%s4336_s0 + $0x398] ss:$20 sps:$4 sm:$0xff]  }
  0x54   :  { %2735 = vmatprep.subr.bf16.mxu1 %v3035_v40 }
  0x55   :  { %2736 = vmatpush3.bf16.msra.mxu1 %v3035_v40  ;;  %v3053_v40 = vld [vmem:[%s4336_s0 + $0x120] ss:$20 sps:$4 sm:$0xff]  }
  0x56   :  { %1788 = vmatpush1.bf16.msra.mxu0 %v2961_v41  ;;  %2737 = vmatprep.subr.bf16.mxu1 %v3054_v42  ;;  %v3055_v41 = vld [vmem:[%s4336_s0 + $0x3c4] ss:$20 sps:$4 sm:$0xff]  }
  0x57   :  { %1789 = vmatprep.subr.bf16.mxu0 %v3185_v0 }
  0x59   :  { %1545 = vmatmul.mubr.bf16.gmra.mrb[12].mxu0 %v2966_v43  ;;  %1609 = vmatmul.mubr.bf16.gmra.mrb[12].mxu1 %v2967_v44  ;;  %v3059_v43 = vld [vmem:[%s4336_s0 + $0x3c0] ss:$20 sps:$4 sm:$0xff]   ;;  %v3060_v44 = vld [vmem:[%s4336_s0 + $0x148] ss:$20 sps:$4 sm:$0xff]  }
  0x5a   :  { %1790 = vmatpush1.bf16.msra.mxu0 %v2968_v45  ;;  %1552 = vmatprep.mubr.bf16.mxu0 %v2971_v46  ;;  %v3061_v45 = vld [vmem:[%s4336_s0 + $0x3ec] ss:$20 sps:$4 sm:$0xff]   ;;  %v3063_v46 = vld [vmem:[%s4336_s0 + $0x174] ss:$20 sps:$4 sm:$0xff]  }
  0x5b   :  { %1791 = vmatprep.subr.bf16.mxu0 %v3185_v0  ;;  %1616 = vmatprep.mubr.bf16.mxu1 %v2973_v47  ;;  %v3065_v47 = vld [vmem:[%s4336_s0 + $0x3e8] ss:$20 sps:$4 sm:$0xff]  }
  0x5c   :  { %2738 = vmatpush3.bf16.msra.mxu1 %v3054_v42  ;;  %v3057_v42 = vld [vmem:[%s4336_s0 + $0x14c] ss:$20 sps:$4 sm:$0xff]  }
  0x5d   :  { %2739 = vmatprep.subr.bf16.mxu1 %v3073_v48 }
  0x5e   :  { %1792 = vmatpush1.bf16.msra.mxu0 %v2970_v49  ;;  %v3067_v49 = vld [vmem:[%s4336_s0 + $0x414] ss:$20 sps:$4 sm:$0xff]  }
  0x5f   :  { %1793 = vmatprep.subr.bf16.mxu0 %v3185_v0 }
  0x60   :  { %2740 = vmatpush3.bf16.msra.mxu1 %v3073_v48  ;;  %v3066_v48 = vld [vmem:[%s4336_s0 + $0x170] ss:$20 sps:$4 sm:$0xff]  }
  0x61   :  { %1553 = vmatmul.mubr.bf16.gmra.mrb[16].mxu0 %v2975_v50  ;;  %1617 = vmatmul.mubr.bf16.gmra.mrb[16].mxu1 %v2976_v51  ;;  %v3069_v50 = vld [vmem:[%s4336_s0 + $0x19c] ss:$20 sps:$4 sm:$0xff]  }
  0x62   :  { %1794 = vmatpush1.bf16.msra.mxu0 %v2977_v52  ;;  %1560 = vmatprep.mubr.bf16.mxu0 %v2979_v53  ;;  %v3071_v51 = vld [vmem:[%s4336_s0 + $0x410] ss:$20 sps:$4 sm:$0xff]   ;;  %v3072_v52 = vld [vmem:[%s4336_s0 + $0x198] ss:$20 sps:$4 sm:$0xff]  }
  0x63   :  { %1795 = vmatprep.subr.bf16.mxu0 %v3185_v0  ;;  %1624 = vmatprep.mubr.bf16.mxu1 %v2981_v54  ;;  %v3074_v53 = vld [vmem:[%s4336_s0 + $0x43c] ss:$20 sps:$4 sm:$0xff]   ;;  %v3076_v54 = vld [vmem:[%s4336_s0 + $0x1c4] ss:$20 sps:$4 sm:$0xff]  }
  0x64   :  { %2741 = vmatprep.subr.bf16.mxu1 %v3092_v61 }
  0x65   :  { %2742 = vmatpush3.bf16.msra.mxu1 %v3092_v61  ;;  %v3086_v61 = vld [vmem:[%s4336_s0 + $0x48c] ss:$20 sps:$4 sm:$0xff]  }
  0x66   :  { %1796 = vmatpush1.bf16.msra.mxu0 %v2978_v55  ;;  %v3078_v55 = vld [vmem:[%s4336_s0 + $0x438] ss:$20 sps:$4 sm:$0xff]  }
  0x67   :  { %1797 = vmatprep.subr.bf16.mxu0 %v3185_v0 }
  0x69   :  { %1561 = vmatmul.mubr.bf16.gmra.mrb[20].mxu0 %v2983_v56  ;;  %1625 = vmatmul.mubr.bf16.gmra.mrb[20].mxu1 %v2984_v57  ;;  %v3079_v56 = vld [vmem:[%s4336_s0 + $0x1c0] ss:$20 sps:$4 sm:$0xff]   ;;  %v3080_v57 = vld [vmem:[%s4336_s0 + $0x464] ss:$20 sps:$4 sm:$0xff]  }
  0x6a   :  { %1798 = vmatpush1.bf16.msra.mxu0 %v2985_v58  ;;  %1568 = vmatprep.mubr.bf16.mxu0 %v2987_v59  ;;  %v3082_v58 = vld [vmem:[%s4336_s0 + $0x1ec] ss:$20 sps:$4 sm:$0xff]  }
  0x6b   :  { %1799 = vmatprep.subr.bf16.mxu0 %v3185_v0  ;;  %1632 = vmatprep.mubr.bf16.mxu1 %v2989_v60  ;;  %v3084_v59 = vld [vmem:[%s4336_s0 + $0x460] ss:$20 sps:$4 sm:$0xff]   ;;  %v3085_v60 = vld [vmem:[%s4336_s0 + $0x1e8] ss:$20 sps:$4 sm:$0xff]  }
  0x6e   :  { %1800 = vmatpush1.bf16.msra.mxu0 %v2986_v62  ;;  %v3088_v62 = vld [vmem:[%s4336_s0 + $0x214] ss:$20 sps:$4 sm:$0xff]  }
  0x6f   :  { %1801 = vmatprep.subr.bf16.mxu0 %v3185_v0 }
  0x71   :  { %1569 = vmatmul.mubr.bf16.gmra.mrb[24].mxu0 %v2991_v63  ;;  %1633 = vmatmul.mubr.bf16.gmra.mrb[24].mxu1 %v2992_v1  ;;  %v3090_v63 = vld [vmem:[%s4336_s0 + $0x488] ss:$20 sps:$4 sm:$0xff]   ;;  %v3091_v1 = vld [vmem:[%s4336_s0 + $0x210] ss:$20 sps:$4 sm:$0xff]  }
  0x72   :  { %1802 = vmatpush1.bf16.msra.mxu0 %v2993_v2  ;;  %1576 = vmatprep.mubr.bf16.mxu0 %v2996_v3  ;;  %v3093_v2 = vld [vmem:[%s4336_s0 + $0x4b4] ss:$20 sps:$4 sm:$0xff]   ;;  %v3095_v3 = vld [vmem:[%s4336_s0 + $0x23c] ss:$20 sps:$4 sm:$0xff]  }
  0x73   :  { %1803 = vmatprep.subr.bf16.mxu0 %v3185_v0  ;;  %1640 = vmatprep.mubr.bf16.mxu1 %v2998_v4  ;;  %v3097_v4 = vld [vmem:[%s4336_s0 + $0x4b0] ss:$20 sps:$4 sm:$0xff]  }
  0x76   :  { %1804 = vmatpush1.bf16.msra.mxu0 %v2995_v5  ;;  %v3098_v5 = vld [vmem:[%s4336_s0 + $0x238] ss:$20 sps:$4 sm:$0xff]  }
  0x77   :  { %1805 = vmatprep.subr.bf16.mxu0 %v3185_v0 }
  0x79   :  { %1577 = vmatmul.mubr.bf16.gmra.mrb[28].mxu0 %v3000_v6  ;;  %1641 = vmatmul.mubr.bf16.gmra.mrb[28].mxu1 %v3001_v7  ;;  %v3099_v6 = vld [vmem:[%s4336_s0 + $0x4dc] ss:$20 sps:$4 sm:$0xff]   ;;  %v3101_v7 = vld [vmem:[%s4336_s0 + $0x264] ss:$20 sps:$4 sm:$0xff]  }
  0x7a   :  { %1806 = vmatpush1.bf16.msra.mxu0 %v3002_v8  ;;  %1648 = vmatprep.mubr.bf16.mxu1 %v3004_v9  ;;  %v3103_v8 = vld [vmem:[%s4336_s0 + $0x4d8] ss:$20 sps:$4 sm:$0xff]   ;;  %v3104_v9 = vld [vmem:[%s4336_s0 + $0x260] ss:$20 sps:$4 sm:$0xff]  }
  0x7b   :  { %1807 = vmatprep.subr.bf16.mxu0 %v3185_v0  ;;  %1809 = vmatprep.mubr.bf16.mxu0 %v3008_v10  ;;  %v3014_v0 = vld [vmem:[%s4336_s0 + $0x2a8] ss:$20 sps:$4 sm:$0xff]   ;;  %v3105_v10 = vld [vmem:[%s4336_s0 + $0x28c] ss:$20 sps:$4 sm:$0xff]  }
  0x7e   :  { %1808 = vmatpush1.bf16.msra.mxu0 %v3003_v11  ;;  %v3107_v11 = vld [vmem:[%s4336_s0 + $0x10] ss:$20 sps:$4 sm:$0xff]  }
  0x81   :  { %1649 = vmatmul.mubr.bf16.gmra.mrb[32].mxu1 %v3009_v13  ;;  %1810 = vmatmul.mubr.bf16.vlgmr.msra.gmra.mrb[0].mxu0 %v3006_v12  ;;  %v3108_v12 = vld [vmem:[%s4336_s0 + $0x288] ss:$20 sps:$4 sm:$0xff]   ;;  %v3109_v13 = vld [vmem:[%s4336_s0 + $0x38] ss:$20 sps:$4 sm:$0xff]  }
  0x82   :  { %1656 = vmatprep.mubr.bf16.mxu1 %v3010_v14  ;;  %1817 = vmatprep.mubr.bf16.mxu0 %v3012_v15  ;;  %v3110_v14 = vld [vmem:[%s4336_s0 + $0x2b4] ss:$20 sps:$4 sm:$0xff]  }
  0x83   :  { %v3112_v15 = vld [vmem:[%s4336_s0 + $0x60] ss:$20 sps:$4 sm:$0xff]  }
  0x89   :  { %1657 = vmatmul.mubr.bf16.gmra.mrb[36].mxu1 %v3014_v0  ;;  %1818 = vmatmul.mubr.bf16.gmra.mrb[4].mxu0 %v3015_v16  ;;  %v3113_v0 = vld [vmem:[%s4336_s0 + $0x2b0] ss:$20 sps:$4 sm:$0xff]   ;;  %v3114_v16 = vld [vmem:[%s4336_s0 + $0x88] ss:$20 sps:$4 sm:$0xff]  }
  0x8a   :  { %1664 = vmatprep.mubr.bf16.mxu1 %v3017_v17  ;;  %1825 = vmatprep.mubr.bf16.mxu0 %v3019_v18  ;;  %v3115_v17 = vld [vmem:[%s4336_s0 + $0x2dc] ss:$20 sps:$4 sm:$0xff]  }
  0x8b   :  { %v3117_v18 = vld [vmem:[%s4336_s0 + $0xb0] ss:$20 sps:$4 sm:$0xff]  }
  0x91   :  { %1665 = vmatmul.mubr.bf16.gmra.mrb[40].mxu1 %v3021_v19  ;;  %1826 = vmatmul.mubr.bf16.gmra.mrb[8].mxu0 %v3022_v20  ;;  %v3118_v19 = vld [vmem:[%s4336_s0 + $0x2d8] ss:$20 sps:$4 sm:$0xff]  }
  0x92   :  { %1672 = vmatprep.mubr.bf16.mxu1 %v3023_v21  ;;  %1833 = vmatprep.mubr.bf16.mxu0 %v3025_v22  ;;  %v3119_v20 = vld [vmem:[%s4336_s0 + $0xd8] ss:$20 sps:$4 sm:$0xff]   ;;  %v3122_v22 = vld [vmem:[%s4336_s0 + $0x100] ss:$20 sps:$4 sm:$0xff]  }
  0x93   :  { %v3120_v21 = vld [vmem:[%s4336_s0 + $0x304] ss:$20 sps:$4 sm:$0xff]  }
  0x99   :  { %1673 = vmatmul.mubr.bf16.gmra.mrb[44].mxu1 %v3027_v23  ;;  %1834 = vmatmul.mubr.bf16.gmra.mrb[12].mxu0 %v3028_v24 }
  0x9a   :  { %1680 = vmatprep.mubr.bf16.mxu1 %v3029_v25  ;;  %1841 = vmatprep.mubr.bf16.mxu0 %v3031_v26  ;;  %v3123_v25 = vld [vmem:[%s4336_s0 + $0x300] ss:$20 sps:$4 sm:$0xff]   ;;  %v3124_v26 = vld [vmem:[%s4336_s0 + $0x128] ss:$20 sps:$4 sm:$0xff]  }
  0xa1   :  { %1681 = vmatmul.mubr.bf16.gmra.mrb[48].mxu1 %v3033_v27  ;;  %1842 = vmatmul.mubr.bf16.gmra.mrb[16].mxu0 %v3034_v28  ;;  %v3125_v28 = vld [vmem:[%s4336_s0 + $0x32c] ss:$20 sps:$4 sm:$0xff]  }
  0xa2   :  { %1688 = vmatprep.mubr.bf16.mxu1 %v3036_v29  ;;  %1849 = vmatprep.mubr.bf16.mxu0 %v3038_v30  ;;  %v3127_v29 = vld [vmem:[%s4336_s0 + $0x150] ss:$20 sps:$4 sm:$0xff]  }
  0xa9   :  { %1689 = vmatmul.mubr.bf16.gmra.mrb[52].mxu1 %v3040_v31  ;;  %1850 = vmatmul.mubr.bf16.gmra.mrb[20].mxu0 %v3041_v32 }
  0xaa   :  { %1696 = vmatprep.mubr.bf16.mxu1 %v3042_v33  ;;  %1857 = vmatprep.mubr.bf16.mxu0 %v3044_v34  ;;  %v3128_v33 = vld [vmem:[%s4336_s0 + $0x328] ss:$20 sps:$4 sm:$0xff]   ;;  %v3129_v34 = vld [vmem:[%s4336_s0 + $0x178] ss:$20 sps:$4 sm:$0xff]  }
  0xb1   :  { %1697 = vmatmul.mubr.bf16.gmra.mrb[56].mxu1 %v3046_v35  ;;  %1858 = vmatmul.mubr.bf16.gmra.mrb[24].mxu0 %v3047_v36  ;;  %v3130_v36 = vld [vmem:[%s4336_s0 + $0x354] ss:$20 sps:$4 sm:$0xff]  }
  0xb2   :  { %1704 = vmatprep.mubr.bf16.mxu1 %v3048_v37  ;;  %1865 = vmatprep.mubr.bf16.mxu0 %v3050_v38  ;;  %v3132_v37 = vld [vmem:[%s4336_s0 + $0x1a0] ss:$20 sps:$4 sm:$0xff]  }
  0xb9   :  { %1705 = vmatmul.mubr.bf16.gmra.mrb[60].mxu1 %v3052_v39  ;;  %1866 = vmatmul.mubr.bf16.gmra.mrb[28].mxu0 %v3053_v40 }
  0xba   :  { %1712 = vmatprep.mubr.bf16.mxu1 %v3055_v41  ;;  %1873 = vmatprep.mubr.bf16.mxu0 %v3057_v42  ;;  %v3133_v41 = vld [vmem:[%s4336_s0 + $0x350] ss:$20 sps:$4 sm:$0xff]   ;;  %v3134_v42 = vld [vmem:[%s4336_s0 + $0x1c8] ss:$20 sps:$4 sm:$0xff]  }
  0xc1   :  { %1713 = vmatmul.mubr.bf16.gmra.mrb[64].mxu1 %v3059_v43  ;;  %1874 = vmatmul.mubr.bf16.gmra.mrb[32].mxu0 %v3060_v44  ;;  %v3135_v44 = vld [vmem:[%s4336_s0 + $0x37c] ss:$20 sps:$4 sm:$0xff]  }
  0xc2   :  { %1720 = vmatprep.mubr.bf16.mxu1 %v3061_v45  ;;  %1881 = vmatprep.mubr.bf16.mxu0 %v3063_v46  ;;  %v3137_v45 = vld [vmem:[%s4336_s0 + $0x1f0] ss:$20 sps:$4 sm:$0xff]  }
  0xc9   :  { %1721 = vmatmul.mubr.bf16.gmra.mrb[68].mxu1 %v3065_v47  ;;  %1882 = vmatmul.mubr.bf16.gmra.mrb[36].mxu0 %v3066_v48 }
  0xca   :  { %1728 = vmatprep.mubr.bf16.mxu1 %v3067_v49  ;;  %1889 = vmatprep.mubr.bf16.mxu0 %v3069_v50  ;;  %v3138_v49 = vld [vmem:[%s4336_s0 + $0x378] ss:$20 sps:$4 sm:$0xff]  }
  0xcb   :  { %v3139_v50 = vld [vmem:[%s4336_s0 + $0x218] ss:$20 sps:$4 sm:$0xff]  }
  0xd1   :  { %1729 = vmatmul.mubr.bf16.gmra.mrb[72].mxu1 %v3071_v51  ;;  %1890 = vmatmul.mubr.bf16.gmra.mrb[40].mxu0 %v3072_v52  ;;  %v3140_v52 = vld [vmem:[%s4336_s0 + $0x3a4] ss:$20 sps:$4 sm:$0xff]  }
  0xd2   :  { %1736 = vmatprep.mubr.bf16.mxu1 %v3074_v53  ;;  %1897 = vmatprep.mubr.bf16.mxu0 %v3076_v54  ;;  %v3142_v53 = vld [vmem:[%s4336_s0 + $0x240] ss:$20 sps:$4 sm:$0xff]  }
  0xd9   :  { %1737 = vmatmul.mubr.bf16.gmra.mrb[76].mxu1 %v3078_v55  ;;  %1898 = vmatmul.mubr.bf16.gmra.mrb[44].mxu0 %v3079_v56 }
  0xda   :  { %1744 = vmatprep.mubr.bf16.mxu1 %v3080_v57  ;;  %1905 = vmatprep.mubr.bf16.mxu0 %v3082_v58  ;;  %v3143_v57 = vld [vmem:[%s4336_s0 + $0x3a0] ss:$20 sps:$4 sm:$0xff]   ;;  %v3144_v58 = vld [vmem:[%s4336_s0 + $0x268] ss:$20 sps:$4 sm:$0xff]  }
  0xe1   :  { %1745 = vmatmul.mubr.bf16.gmra.mrb[80].mxu1 %v3084_v59  ;;  %1906 = vmatmul.mubr.bf16.gmra.mrb[48].mxu0 %v3085_v60  ;;  %v3145_v60 = vld [vmem:[%s4336_s0 + $0x3cc] ss:$20 sps:$4 sm:$0xff]  }
  0xe2   :  { %1752 = vmatprep.mubr.bf16.mxu1 %v3086_v61  ;;  %1913 = vmatprep.mubr.bf16.mxu0 %v3088_v62  ;;  %v3147_v61 = vld [vmem:[%s4336_s0 + $0x290] ss:$20 sps:$4 sm:$0xff]  }
  0xe9   :  { %1753 = vmatmul.mubr.bf16.gmra.mrb[84].mxu1 %v3090_v63  ;;  %1914 = vmatmul.mubr.bf16.gmra.mrb[52].mxu0 %v3091_v1 }
  0xea   :  { %1760 = vmatprep.mubr.bf16.mxu1 %v3093_v2  ;;  %1921 = vmatprep.mubr.bf16.mxu0 %v3095_v3  ;;  %v3148_v2 = vld [vmem:[%s4336_s0 + $0x3c8] ss:$20 sps:$4 sm:$0xff]   ;;  %v3149_v3 = vld [vmem:[%s4336_s0 + $0x2b8] ss:$20 sps:$4 sm:$0xff]  }
  0xf1   :  { %1761 = vmatmul.mubr.bf16.gmra.mrb[88].mxu1 %v3097_v4  ;;  %1922 = vmatmul.mubr.bf16.gmra.mrb[56].mxu0 %v3098_v5  ;;  %v3150_v5 = vld [vmem:[%s4336_s0 + $0x3f4] ss:$20 sps:$4 sm:$0xff]  }
  0xf2   :  { %1768 = vmatprep.mubr.bf16.mxu1 %v3099_v6  ;;  %1929 = vmatprep.mubr.bf16.mxu0 %v3101_v7  ;;  %v3152_v6 = vld [vmem:[%s4336_s0 + $0x2e0] ss:$20 sps:$4 sm:$0xff]  }
  0xf9   :  { %1769 = vmatmul.mubr.bf16.gmra.mrb[92].mxu1 %v3103_v8  ;;  %1930 = vmatmul.mubr.bf16.gmra.mrb[60].mxu0 %v3104_v9 }
  0xfa   :  { %1937 = vmatprep.mubr.bf16.mxu0 %v3105_v10  ;;  %2743 = vmatprep.mubr.bf16.mxu1 %v3107_v11  ;;  %v3153_v10 = vld [vmem:[%s4336_s0 + $0x3f0] ss:$20 sps:$4 sm:$0xff]   ;;  %v3154_v11 = vld [vmem:[%s4336_s0 + $0x308] ss:$20 sps:$4 sm:$0xff]  }
 0x101   :  { %1938 = vmatmul.mubr.bf16.gmra.mrb[64].mxu0 %v3108_v12  ;;  %2744 = vmatmul.mubr.bf16.vlgmr.msra.gmra.mrb[96].mxu1 %v3109_v13  ;;  %v3155_v13 = vld [vmem:[%s4336_s0 + $0x41c] ss:$20 sps:$4 sm:$0xff]  }
 0x102   :  { %1945 = vmatprep.mubr.bf16.mxu0 %v3110_v14  ;;  %2747 = vmatprep.mubr.bf16.mxu1 %v3112_v15  ;;  %v3157_v14 = vld [vmem:[%s4336_s0 + $0x330] ss:$20 sps:$4 sm:$0xff]  }
 0x109   :  { %1946 = vmatmul.mubr.bf16.gmra.mrb[68].mxu0 %v3113_v0  ;;  %2748 = vmatmul.mubr.bf16.gmra.mrb[100].mxu1 %v3114_v16 }
 0x10a   :  { %1953 = vmatprep.mubr.bf16.mxu0 %v3115_v17  ;;  %2751 = vmatprep.mubr.bf16.mxu1 %v3117_v18  ;;  %v3158_v17 = vld [vmem:[%s4336_s0 + $0x418] ss:$20 sps:$4 sm:$0xff]  }
 0x10b   :  { %v3159_v18 = vld [vmem:[%s4336_s0 + $0x358] ss:$20 sps:$4 sm:$0xff]  }
 0x111   :  { %1954 = vmatmul.mubr.bf16.gmra.mrb[72].mxu0 %v3118_v19  ;;  %2752 = vmatmul.mubr.bf16.gmra.mrb[104].mxu1 %v3119_v20  ;;  %v3160_v20 = vld [vmem:[%s4336_s0 + $0x444] ss:$20 sps:$4 sm:$0xff]  }
 0x112   :  { %1961 = vmatprep.mubr.bf16.mxu0 %v3120_v21  ;;  %2755 = vmatprep.mubr.bf16.mxu1 %v3122_v22  ;;  %v3162_v21 = vld [vmem:[%s4336_s0 + $0x380] ss:$20 sps:$4 sm:$0xff]  }
 0x114   :  { %v3699_v23 = vpop.f32.mrb[0].mxu1 }
 0x115   :  { %v1588_v24 = vpop.f32.mrb[1].mxu1 }
 0x116   :  { %v3707_v27 = vpop.f32.mrb[2].mxu1 }
 0x117   :  { %v1591_v30 = vpop.f32.mrb[3].mxu1 }
 0x118   :  { %v3164_v30 = vld [vmem:[%s4336_s0 + $0x3a8] ss:$20 sps:$4 sm:$0xff]  }
 0x119   :  { %1962 = vmatmul.mubr.bf16.gmra.mrb[76].mxu0 %v3123_v25  ;;  %2756 = vmatmul.mubr.bf16.gmra.mrb[108].mxu1 %v3124_v26 }
 0x11a   :  { %1969 = vmatprep.mubr.bf16.mxu0 %v3125_v28  ;;  %2759 = vmatprep.mubr.bf16.mxu1 %v3127_v29  ;;  %v3163_v29 = vld [vmem:[%s4336_s0 + $0x440] ss:$20 sps:$4 sm:$0xff]  }
 0x11c   :  { %v3715_v31 = vpop.f32.mrb[4].mxu1 }
 0x11d   :  { %v1596_v32 = vpop.f32.mrb[5].mxu1 }
 0x11e   :  { %v3723_v35 = vpop.f32.mrb[6].mxu1 }
 0x11f   :  { %v1599_v38 = vpop.f32.mrb[7].mxu1 }
 0x121   :  { %1970 = vmatmul.mubr.bf16.gmra.mrb[80].mxu0 %v3128_v33  ;;  %2760 = vmatmul.mubr.bf16.gmra.mrb[112].mxu1 %v3129_v34  ;;  %v3165_v34 = vld [vmem:[%s4336_s0 + $0x46c] ss:$20 sps:$4 sm:$0xff]  }
 0x122   :  { %1977 = vmatprep.mubr.bf16.mxu0 %v3130_v36  ;;  %2763 = vmatprep.mubr.bf16.mxu1 %v3132_v37  ;;  %v3167_v36 = vld [vmem:[%s4336_s0 + $0x3d0] ss:$20 sps:$4 sm:$0xff]  }
 0x124   :  { %v3731_v39 = vpop.f32.mrb[8].mxu1 }
 0x125   :  { %v1604_v40 = vpop.f32.mrb[9].mxu1 }
 0x126   :  { %v3739_v43 = vpop.f32.mrb[10].mxu1 }
 0x127   :  { %v1607_v46 = vpop.f32.mrb[11].mxu1 }
 0x128   :  { %v3169_v46 = vld [vmem:[%s4336_s0 + $0x3f8] ss:$20 sps:$4 sm:$0xff]  }
 0x129   :  { %1978 = vmatmul.mubr.bf16.gmra.mrb[84].mxu0 %v3133_v41  ;;  %2764 = vmatmul.mubr.bf16.gmra.mrb[116].mxu1 %v3134_v42 }
 0x12a   :  { %1985 = vmatprep.mubr.bf16.mxu0 %v3135_v44  ;;  %2767 = vmatprep.mubr.bf16.mxu1 %v3137_v45  ;;  %v3168_v45 = vld [vmem:[%s4336_s0 + $0x468] ss:$20 sps:$4 sm:$0xff]  }
 0x12c   :  { %v3747_v47 = vpop.f32.mrb[12].mxu1 }
 0x12d   :  { %v1612_v48 = vpop.f32.mrb[13].mxu1 }
 0x12e   :  { %v3755_v51 = vpop.f32.mrb[14].mxu1 }
 0x12f   :  { %v1615_v54 = vpop.f32.mrb[15].mxu1 }
 0x131   :  { %1986 = vmatmul.mubr.bf16.gmra.mrb[88].mxu0 %v3138_v49  ;;  %2768 = vmatmul.mubr.bf16.gmra.mrb[120].mxu1 %v3139_v50  ;;  %v3170_v50 = vld [vmem:[%s4336_s0 + $0x494] ss:$20 sps:$4 sm:$0xff]  }
 0x132   :  { %1993 = vmatprep.mubr.bf16.mxu0 %v3140_v52  ;;  %2771 = vmatprep.mubr.bf16.mxu1 %v3142_v53  ;;  %v3172_v52 = vld [vmem:[%s4336_s0 + $0x420] ss:$20 sps:$4 sm:$0xff]  }
 0x134   :  { %v3763_v55 = vpop.f32.mrb[16].mxu1 }
 0x135   :  { %v1620_v56 = vpop.f32.mrb[17].mxu1 }
 0x136   :  { %v3771_v59 = vpop.f32.mrb[18].mxu1 }
 0x137   :  { %v1623_v62 = vpop.f32.mrb[19].mxu1 }
 0x138   :  { %v3174_v62 = vld [vmem:[%s4336_s0 + $0x448] ss:$20 sps:$4 sm:$0xff]  }
 0x139   :  { %1994 = vmatmul.mubr.bf16.gmra.mrb[92].mxu0 %v3143_v57  ;;  %2772 = vmatmul.mubr.bf16.gmra.mrb[124].mxu1 %v3144_v58 }
 0x13a   :  { %2001 = vmatprep.mubr.bf16.mxu0 %v3145_v60  ;;  %2775 = vmatprep.mubr.bf16.mxu1 %v3147_v61  ;;  %v3173_v61 = vld [vmem:[%s4336_s0 + $0x490] ss:$20 sps:$4 sm:$0xff]  }
 0x13c   :  { %v3779_v63 = vpop.f32.mrb[20].mxu1 }
 0x13d   :  { %v1628_v1 = vpop.f32.mrb[21].mxu1 }
 0x13e   :  { %v3787_v4 = vpop.f32.mrb[22].mxu1 }
 0x13f   :  { %v1631_v7 = vpop.f32.mrb[23].mxu1 }
 0x141   :  { %2002 = vmatmul.mubr.bf16.gmra.mrb[96].mxu0 %v3148_v2  ;;  %2776 = vmatmul.mubr.bf16.gmra.mrb[128].mxu1 %v3149_v3  ;;  %v3175_v3 = vld [vmem:[%s4336_s0 + $0x4bc] ss:$20 sps:$4 sm:$0xff]  }
 0x142   :  { %2009 = vmatprep.mubr.bf16.mxu0 %v3150_v5  ;;  %2779 = vmatprep.mubr.bf16.mxu1 %v3152_v6  ;;  %v3177_v5 = vld [vmem:[%s4336_s0 + $0x470] ss:$20 sps:$4 sm:$0xff]  }
 0x144   :  { %v3795_v8 = vpop.f32.mrb[24].mxu1 }
 0x145   :  { %v1636_v9 = vpop.f32.mrb[25].mxu1 }
 0x146   :  { %v3803_v12 = vpop.f32.mrb[26].mxu1 }
 0x147   :  { %v1639_v15 = vpop.f32.mrb[27].mxu1 }
 0x148   :  { %v3179_v15 = vld [vmem:[%s4336_s0 + $0x498] ss:$20 sps:$4 sm:$0xff]  }
 0x149   :  { %2010 = vmatmul.mubr.bf16.gmra.mrb[100].mxu0 %v3153_v10  ;;  %2780 = vmatmul.mubr.bf16.gmra.mrb[132].mxu1 %v3154_v11 }
 0x14a   :  { %2017 = vmatprep.mubr.bf16.mxu0 %v3155_v13  ;;  %2783 = vmatprep.mubr.bf16.mxu1 %v3157_v14  ;;  %v3178_v14 = vld [vmem:[%s4336_s0 + $0x4b8] ss:$20 sps:$4 sm:$0xff]  }
 0x14c   :  { %v3811_v0 = vpop.f32.mrb[28].mxu1 }
 0x14d   :  { %v1644_v16 = vpop.f32.mrb[29].mxu1 }
 0x14e   :  { %v3819_v19 = vpop.f32.mrb[30].mxu1 }
 0x14f   :  { %v1647_v22 = vpop.f32.mrb[31].mxu1 }
 0x151   :  { %2018 = vmatmul.mubr.bf16.gmra.mrb[104].mxu0 %v3158_v17  ;;  %2784 = vmatmul.mubr.bf16.gmra.mrb[136].mxu1 %v3159_v18  ;;  %v3180_v18 = vld [vmem:[%s4336_s0 + $0x4e4] ss:$20 sps:$4 sm:$0xff]  }
 0x152   :  { %2025 = vmatprep.mubr.bf16.mxu0 %v3160_v20  ;;  %2787 = vmatprep.mubr.bf16.mxu1 %v3162_v21  ;;  %v3182_v20 = vld [vmem:[%s4336_s0 + $0x4c0] ss:$20 sps:$4 sm:$0xff]  }
 0x154   :  { %v3827_v24 = vpop.f32.mrb[32].mxu1  ;;  %v3829_v25 = vpop.f32.mrb[0].mxu0 }
 0x155   :  { %v1652_v26 = vpop.f32.mrb[33].mxu1  ;;  %v1813_v28 = vpop.f32.mrb[1].mxu0 }
 0x156   :  { %v3837_v32 = vpop.f32.mrb[34].mxu1  ;;  %v3839_v33 = vpop.f32.mrb[2].mxu0 }
 0x157   :  { %v1655_v37 = vpop.f32.mrb[35].mxu1  ;;  %v1816_v38 = vpop.f32.mrb[3].mxu0 }
 0x159   :  { %2026 = vmatmul.mubr.bf16.gmra.mrb[108].mxu0 %v3163_v29  ;;  %2788 = vmatmul.mubr.bf16.gmra.mrb[140].mxu1 %v3164_v30 }
 0x15a   :  { %2033 = vmatprep.mubr.bf16.mxu0 %v3165_v34  ;;  %2791 = vmatprep.mubr.bf16.mxu1 %v3167_v36  ;;  %v3183_v34 = vld [vmem:[%s4336_s0 + $0x4e0] ss:$20 sps:$4 sm:$0xff]   ;;  %v3184_v36 = vld [vmem:[%s4336_s0 + $0x4e8] ss:$20 sps:$4 sm:$0xff]  }
 0x15c   :  { %v3847_v40 = vpop.f32.mrb[36].mxu1  ;;  %v3849_v41 = vpop.f32.mrb[4].mxu0 }
 0x15d   :  { %v1660_v42 = vpop.f32.mrb[37].mxu1  ;;  %v1821_v44 = vpop.f32.mrb[5].mxu0 }
 0x15e   :  { %v3857_v48 = vpop.f32.mrb[38].mxu1  ;;  %v3859_v49 = vpop.f32.mrb[6].mxu0 }
 0x15f   :  { %v1663_v53 = vpop.f32.mrb[39].mxu1  ;;  %v1824_v54 = vpop.f32.mrb[7].mxu0 }
 0x161   :  { %2034 = vmatmul.mubr.bf16.gmra.mrb[112].mxu0 %v3168_v45  ;;  %2792 = vmatmul.mubr.bf16.gmra.mrb[144].mxu1 %v3169_v46 }
 0x162   :  { %2041 = vmatprep.mubr.bf16.mxu0 %v3170_v50  ;;  %2795 = vmatprep.mubr.bf16.mxu1 %v3172_v52 }
 0x164   :  { %v3867_v56 = vpop.f32.mrb[40].mxu1  ;;  %v3869_v57 = vpop.f32.mrb[8].mxu0 }
 0x165   :  { %v1668_v58 = vpop.f32.mrb[41].mxu1  ;;  %v1829_v60 = vpop.f32.mrb[9].mxu0 }
 0x166   :  { %v3877_v1 = vpop.f32.mrb[42].mxu1  ;;  %v3879_v2 = vpop.f32.mrb[10].mxu0 }
 0x167   :  { %v1671_v6 = vpop.f32.mrb[43].mxu1  ;;  %v1832_v7 = vpop.f32.mrb[11].mxu0 }
 0x169   :  { %2042 = vmatmul.mubr.bf16.gmra.mrb[116].mxu0 %v3173_v61  ;;  %2796 = vmatmul.mubr.bf16.gmra.mrb[148].mxu1 %v3174_v62 }
 0x16a   :  { %2049 = vmatprep.mubr.bf16.mxu0 %v3175_v3  ;;  %2799 = vmatprep.mubr.bf16.mxu1 %v3177_v5 }
 0x16c   :  { %v3887_v9 = vpop.f32.mrb[44].mxu1  ;;  %v3889_v10 = vpop.f32.mrb[12].mxu0 }
 0x16d   :  { %v1676_v11 = vpop.f32.mrb[45].mxu1  ;;  %v1837_v13 = vpop.f32.mrb[13].mxu0 }
 0x16e   :  { %v3897_v16 = vpop.f32.mrb[46].mxu1  ;;  %v3899_v17 = vpop.f32.mrb[14].mxu0 }
 0x16f   :  { %v1679_v21 = vpop.f32.mrb[47].mxu1  ;;  %v1840_v22 = vpop.f32.mrb[15].mxu0 }
 0x171   :  { %2050 = vmatmul.mubr.bf16.gmra.mrb[120].mxu0 %v3178_v14  ;;  %2800 = vmatmul.mubr.bf16.gmra.mrb[152].mxu1 %v3179_v15 }
 0x172   :  { %2057 = vmatprep.mubr.bf16.mxu0 %v3180_v18  ;;  %2803 = vmatprep.mubr.bf16.mxu1 %v3182_v20 }
 0x174   :  { %v3907_v26 = vpop.f32.mrb[48].mxu1  ;;  %v3909_v28 = vpop.f32.mrb[16].mxu0 }
 0x175   :  { %v1684_v29 = vpop.f32.mrb[49].mxu1  ;;  %v1845_v30 = vpop.f32.mrb[17].mxu0 }
 0x176   :  { %v3917_v37 = vpop.f32.mrb[50].mxu1  ;;  %v3919_v38 = vpop.f32.mrb[18].mxu0 }
 0x177   :  { %v1687_v42 = vpop.f32.mrb[51].mxu1  ;;  %v1848_v44 = vpop.f32.mrb[19].mxu0 }
 0x179   :  { %2058 = vmatmul.mubr.bf16.gmra.mrb[124].mxu0 %v3183_v34  ;;  %2804 = vmatmul.mubr.bf16.gmra.mrb[156].mxu1 %v3184_v36 }
 0x17c   :  { %v3921_v45 = vpop.f32.mrb[52].mxu1  ;;  %v3923_v46 = vpop.f32.mrb[20].mxu0 }
 0x17d   :  { %v1692_v50 = vpop.f32.mrb[53].mxu1  ;;  %v1853_v52 = vpop.f32.mrb[21].mxu0 }
 0x17e   :  { %v3925_v53 = vpop.f32.mrb[54].mxu1  ;;  %v3927_v54 = vpop.f32.mrb[22].mxu0 }
 0x17f   :  { %v1695_v58 = vpop.f32.mrb[55].mxu1  ;;  %v1856_v60 = vpop.f32.mrb[23].mxu0 }
 0x184   :  { %v3929_v61 = vpop.f32.mrb[56].mxu1  ;;  %v3931_v62 = vpop.f32.mrb[24].mxu0 }
 0x185   :  { %v1700_v3 = vpop.f32.mrb[57].mxu1  ;;  %v1861_v5 = vpop.f32.mrb[25].mxu0 }
 0x186   :  { %v3933_v6 = vpop.f32.mrb[58].mxu1  ;;  %v3935_v7 = vpop.f32.mrb[26].mxu0 }
 0x187   :  { %v1703_v11 = vpop.f32.mrb[59].mxu1  ;;  %v1864_v13 = vpop.f32.mrb[27].mxu0 }
 0x18c   :  { %v3937_v14 = vpop.f32.mrb[60].mxu1  ;;  %v3939_v15 = vpop.f32.mrb[28].mxu0 }
 0x18d   :  { %v1708_v18 = vpop.f32.mrb[61].mxu1  ;;  %v1869_v20 = vpop.f32.mrb[29].mxu0 }
 0x18e   :  { %v3941_v21 = vpop.f32.mrb[62].mxu1  ;;  %v3943_v22 = vpop.f32.mrb[30].mxu0 }
 0x18f   :  { %v1711_v29 = vpop.f32.mrb[63].mxu1  ;;  %v1872_v30 = vpop.f32.mrb[31].mxu0 }
 0x194   :  { %v3945_v34 = vpop.f32.mrb[64].mxu1  ;;  %v1875_v36 = vpop.f32.mrb[32].mxu0 }
 0x195   :  { %v3948_v42 = vadd.f32 %v1875_v36, %v3699_v23  ;;  %v1716_v44 = vpop.f32.mrb[65].mxu1  ;;  %v1877_v50 = vpop.f32.mrb[33].mxu0 }
 0x196   :  { %v3950_v52 = vpop.f32.mrb[66].mxu1  ;;  %v1878_v58 = vpop.f32.mrb[34].mxu0 }
 0x197   :  { %v3953_v60 = vadd.f32 %v1878_v58, %v3707_v27  ;;  %v1719_v3 = vpop.f32.mrb[67].mxu1  ;;  %v1880_v5 = vpop.f32.mrb[35].mxu0 }
 0x19c   :  { %v3955_v11 = vpop.f32.mrb[68].mxu1  ;;  %v1883_v13 = vpop.f32.mrb[36].mxu0 }
 0x19d   :  { %4338 = vst [vmem:[#allocation2_spill] sm:$0xff] %v3955_v11  ;;  %v3958_v18 = vadd.f32 %v1883_v13, %v3715_v31  ;;  %v1724_v20 = vpop.f32.mrb[69].mxu1  ;;  %v1885_v29 = vpop.f32.mrb[37].mxu0 }
 0x19e   :  { %v3960_v23 = vpop.f32.mrb[70].mxu1  ;;  %v1886_v30 = vpop.f32.mrb[38].mxu0 }
 0x19f   :  { %4339 = vst [vmem:[#allocation3_spill] sm:$0xff] %v3960_v23  ;;  %v3963_v36 = vadd.f32 %v1886_v30, %v3723_v35  ;;  %v1727_v44 = vpop.f32.mrb[71].mxu1  ;;  %v1888_v50 = vpop.f32.mrb[39].mxu0 }
 0x1a4   :  { %v3965_v27 = vpop.f32.mrb[72].mxu1  ;;  %v1891_v58 = vpop.f32.mrb[40].mxu0 }
 0x1a5   :  { %4340 = vst [vmem:[#allocation4_spill] sm:$0xff] %v3965_v27  ;;  %v3968_v3 = vadd.f32 %v1891_v58, %v3731_v39  ;;  %v1732_v5 = vpop.f32.mrb[73].mxu1  ;;  %v1893_v11 = vpop.f32.mrb[41].mxu0 }
 0x1a6   :  { %v3970_v31 = vpop.f32.mrb[74].mxu1  ;;  %v1894_v13 = vpop.f32.mrb[42].mxu0 }
 0x1a7   :  { %4341 = vst [vmem:[#allocation5_spill] sm:$0xff] %v3970_v31  ;;  %v3973_v20 = vadd.f32 %v1894_v13, %v3739_v43  ;;  %v1735_v29 = vpop.f32.mrb[75].mxu1  ;;  %v1896_v23 = vpop.f32.mrb[43].mxu0 }
 0x1ac   :  { %v3975_v35 = vpop.f32.mrb[76].mxu1  ;;  %v1899_v30 = vpop.f32.mrb[44].mxu0 }
 0x1ad   :  { %4342 = vst [vmem:[#allocation6_spill] sm:$0xff] %v3975_v35  ;;  %v3978_v44 = vadd.f32 %v1899_v30, %v3747_v47  ;;  %v1740_v50 = vpop.f32.mrb[77].mxu1  ;;  %v1901_v27 = vpop.f32.mrb[45].mxu0 }
 0x1ae   :  { %v3980_v39 = vpop.f32.mrb[78].mxu1  ;;  %v1902_v58 = vpop.f32.mrb[46].mxu0 }
 0x1af   :  { %4343 = vst [vmem:[#allocation7_spill] sm:$0xff] %v3980_v39  ;;  %v3983_v11 = vadd.f32 %v1902_v58, %v3755_v51  ;;  %v1743_v5 = vpop.f32.mrb[79].mxu1  ;;  %v1904_v31 = vpop.f32.mrb[47].mxu0 }
 0x1b4   :  { %v3985_v43 = vpop.f32.mrb[80].mxu1  ;;  %v1907_v13 = vpop.f32.mrb[48].mxu0 }
 0x1b5   :  { %4344 = vst [vmem:[#allocation8_spill] sm:$0xff] %v3985_v43  ;;  %v3988_v23 = vadd.f32 %v1907_v13, %v3763_v55  ;;  %v1748_v29 = vpop.f32.mrb[81].mxu1  ;;  %v1909_v35 = vpop.f32.mrb[49].mxu0 }
 0x1b6   :  { %v3990_v47 = vpop.f32.mrb[82].mxu1  ;;  %v1910_v30 = vpop.f32.mrb[50].mxu0 }
 0x1b7   :  { %4345 = vst [vmem:[#allocation9_spill] sm:$0xff] %v3990_v47  ;;  %v3993_v27 = vadd.f32 %v1910_v30, %v3771_v59  ;;  %v1751_v50 = vpop.f32.mrb[83].mxu1  ;;  %v1912_v39 = vpop.f32.mrb[51].mxu0 }
 0x1bc   :  { %v3995_v51 = vpop.f32.mrb[84].mxu1  ;;  %v1915_v58 = vpop.f32.mrb[52].mxu0 }
 0x1bd   :  { %4346 = vst [vmem:[#allocation10_spill] sm:$0xff] %v3995_v51  ;;  %v3998_v31 = vadd.f32 %v1915_v58, %v3779_v63  ;;  %v1756_v5 = vpop.f32.mrb[85].mxu1  ;;  %v1917_v43 = vpop.f32.mrb[53].mxu0 }
 0x1be   :  { %v4000_v55 = vpop.f32.mrb[86].mxu1  ;;  %v1918_v13 = vpop.f32.mrb[54].mxu0 }
 0x1bf   :  { %4347 = vst [vmem:[#allocation11_spill] sm:$0xff] %v4000_v55  ;;  %v4003_v35 = vadd.f32 %v1918_v13, %v3787_v4  ;;  %v1759_v29 = vpop.f32.mrb[87].mxu1  ;;  %v1920_v47 = vpop.f32.mrb[55].mxu0 }
 0x1c4   :  { %v4005_v59 = vpop.f32.mrb[88].mxu1  ;;  %v1923_v30 = vpop.f32.mrb[56].mxu0 }
 0x1c5   :  { %4348 = vst [vmem:[#allocation12_spill] sm:$0xff] %v4005_v59  ;;  %v4008_v39 = vadd.f32 %v1923_v30, %v3795_v8  ;;  %v1764_v50 = vpop.f32.mrb[89].mxu1  ;;  %v1925_v51 = vpop.f32.mrb[57].mxu0 }
 0x1c6   :  { %v4010_v63 = vpop.f32.mrb[90].mxu1  ;;  %v1926_v58 = vpop.f32.mrb[58].mxu0 }
 0x1c7   :  { %4349 = vst [vmem:[#allocation13_spill] sm:$0xff] %v4010_v63  ;;  %v4013_v43 = vadd.f32 %v1926_v58, %v3803_v12  ;;  %v1767_v5 = vpop.f32.mrb[91].mxu1  ;;  %v1928_v55 = vpop.f32.mrb[59].mxu0 }
 0x1cc   :  { %v4015_v4 = vpop.f32.mrb[92].mxu1  ;;  %v1931_v13 = vpop.f32.mrb[60].mxu0 }
 0x1cd   :  { %4350 = vst [vmem:[#allocation14_spill] sm:$0xff] %v4015_v4  ;;  %v4018_v47 = vadd.f32 %v1931_v13, %v3811_v0  ;;  %v1772_v29 = vpop.f32.mrb[93].mxu1  ;;  %v1933_v59 = vpop.f32.mrb[61].mxu0 }
 0x1ce   :  { %v4020_v8 = vpop.f32.mrb[94].mxu1  ;;  %v1934_v30 = vpop.f32.mrb[62].mxu0 }
 0x1cf   :  { %4351 = vst [vmem:[#allocation15_spill] sm:$0xff] %v4020_v8  ;;  %v4023_v51 = vadd.f32 %v1934_v30, %v3819_v19  ;;  %v1775_v50 = vpop.f32.mrb[95].mxu1  ;;  %v1936_v63 = vpop.f32.mrb[63].mxu0 }
 0x1d4   :  { %v1939_v12 = vpop.f32.mrb[64].mxu0  ;;  %v2745_v58 = vpop.f32.mrb[96].mxu1 }
 0x1d5   :  { %v4026_v55 = vadd.f32 %v1939_v12, %v3827_v24  ;;  %v2109_v5 = vadd.f32 %v2745_v58, %v3849_v41  ;;  %v1941_v4 = vpop.f32.mrb[65].mxu0  ;;  %v2100_v0 = vpop.f32.mrb[97].mxu1 }
 0x1d6   :  { %v2101_v13 = vadd.f32 %v2100_v0, %v3829_v25  ;;  %v1942_v59 = vpop.f32.mrb[66].mxu0  ;;  %v2746_v29 = vpop.f32.mrb[98].mxu1 }
 0x1d7   :  { %v4031_v8 = vadd.f32 %v1942_v59, %v3837_v32  ;;  %v2112_v19 = vadd.f32 %v2746_v29, %v3859_v49  ;;  %v1944_v30 = vpop.f32.mrb[67].mxu0  ;;  %v2103_v63 = vpop.f32.mrb[99].mxu1  ;;  %2421 = vst [vmem:[%s4337_s2 + $0x10] sm:$0xff] %v2109_v5 }
 0x1d8   :  { %v2104_v50 = vadd.f32 %v2103_v63, %v3839_v33  ;;  %2419 = vst [vmem:[%s4337_s2] sm:$0xff] %v2101_v13 }
 0x1d9   :  { %2422 = vst [vmem:[%s4337_s2 + $0x18] sm:$0xff] %v2112_v19 }
 0x1da   :  { %2420 = vst [vmem:[%s4337_s2 + $0x8] sm:$0xff] %v2104_v50 }
 0x1dc   :  { %v1947_v24 = vpop.f32.mrb[68].mxu0  ;;  %v2749_v25 = vpop.f32.mrb[100].mxu1 }
 0x1dd   :  { %v4048_v32 = vadd.f32 %v1947_v24, %v3847_v40  ;;  %v2125_v33 = vadd.f32 %v2749_v25, %v3889_v10  ;;  %v1949_v41 = vpop.f32.mrb[69].mxu0  ;;  %v2116_v49 = vpop.f32.mrb[101].mxu1 }
 0x1de   :  { %v2117_v4 = vadd.f32 %v2116_v49, %v3869_v57  ;;  %v1950_v12 = vpop.f32.mrb[70].mxu0  ;;  %v2750_v58 = vpop.f32.mrb[102].mxu1 }
 0x1df   :  { %v4053_v5 = vadd.f32 %v1950_v12, %v3857_v48  ;;  %v2128_v0 = vadd.f32 %v2750_v58, %v3899_v17  ;;  %v1952_v13 = vpop.f32.mrb[71].mxu0  ;;  %v2119_v59 = vpop.f32.mrb[103].mxu1  ;;  %2425 = vst [vmem:[%s4337_s2 + $0x30] sm:$0xff] %v2125_v33 }
 0x1e0   :  { %v2120_v29 = vadd.f32 %v2119_v59, %v3879_v2  ;;  %2423 = vst [vmem:[%s4337_s2 + $0x20] sm:$0xff] %v2117_v4 }
 0x1e1   :  { %2426 = vst [vmem:[%s4337_s2 + $0x38] sm:$0xff] %v2128_v0 }
 0x1e2   :  { %2424 = vst [vmem:[%s4337_s2 + $0x28] sm:$0xff] %v2120_v29 }
 0x1e4   :  { %v1955_v40 = vpop.f32.mrb[72].mxu0  ;;  %v2753_v48 = vpop.f32.mrb[104].mxu1 }
 0x1e5   :  { %v4070_v57 = vadd.f32 %v1955_v40, %v3867_v56  ;;  %v2141_v2 = vadd.f32 %v2753_v48, %v3923_v46  ;;  %v1957_v10 = vpop.f32.mrb[73].mxu0  ;;  %v2132_v17 = vpop.f32.mrb[105].mxu1 }
 0x1e6   :  { %v2133_v19 = vadd.f32 %v2132_v17, %v3909_v28  ;;  %v1958_v30 = vpop.f32.mrb[74].mxu0  ;;  %v2754_v63 = vpop.f32.mrb[106].mxu1 }
 0x1e7   :  { %v4075_v50 = vadd.f32 %v1958_v30, %v3877_v1  ;;  %v2144_v24 = vadd.f32 %v2754_v63, %v3927_v54  ;;  %v1960_v25 = vpop.f32.mrb[75].mxu0  ;;  %v2135_v33 = vpop.f32.mrb[107].mxu1  ;;  %2429 = vst [vmem:[%s4337_s2 + $0x50] sm:$0xff] %v2141_v2 }
 0x1e8   :  { %v2136_v41 = vadd.f32 %v2135_v33, %v3919_v38  ;;  %2427 = vst [vmem:[%s4337_s2 + $0x40] sm:$0xff] %v2133_v19 }
 0x1e9   :  { %2430 = vst [vmem:[%s4337_s2 + $0x58] sm:$0xff] %v2144_v24 }
 0x1ea   :  { %2428 = vst [vmem:[%s4337_s2 + $0x48] sm:$0xff] %v2136_v41 }
 0x1ec   :  { %v1963_v56 = vpop.f32.mrb[76].mxu0  ;;  %v2757_v1 = vpop.f32.mrb[108].mxu1 }
 0x1ed   :  { %v4092_v28 = vadd.f32 %v1963_v56, %v3887_v9  ;;  %v2157_v38 = vadd.f32 %v2757_v1, %v3939_v15  ;;  %v1965_v46 = vpop.f32.mrb[77].mxu0  ;;  %v2148_v54 = vpop.f32.mrb[109].mxu1 }
 0x1ee   :  { %v2149_v49 = vadd.f32 %v2148_v54, %v3931_v62  ;;  %v1966_v4 = vpop.f32.mrb[78].mxu0  ;;  %v2758_v12 = vpop.f32.mrb[110].mxu1 }
 0x1ef   :  { %v4097_v58 = vadd.f32 %v1966_v4, %v3897_v16  ;;  %v2160_v0 = vadd.f32 %v2758_v12, %v3943_v22  ;;  %v1968_v13 = vpop.f32.mrb[79].mxu0  ;;  %v2151_v59 = vpop.f32.mrb[111].mxu1  ;;  %2433 = vst [vmem:[%s4337_s2 + $0x70] sm:$0xff] %v2157_v38 }
 0x1f0   :  { %v2152_v29 = vadd.f32 %v2151_v59, %v3935_v7  ;;  %2431 = vst [vmem:[%s4337_s2 + $0x60] sm:$0xff] %v2149_v49 }
 0x1f1   :  { %2434 = vst [vmem:[%s4337_s2 + $0x78] sm:$0xff] %v2160_v0 }
 0x1f2   :  { %2432 = vst [vmem:[%s4337_s2 + $0x68] sm:$0xff] %v2152_v29 }
 0x1f4   :  { %v1971_v9 = vpop.f32.mrb[80].mxu0  ;;  %v2761_v16 = vpop.f32.mrb[112].mxu1 }
 0x1f5   :  { %v4114_v62 = vadd.f32 %v1971_v9, %v3907_v26  ;;  %v2173_v7 = vadd.f32 %v2761_v16, %v3958_v18  ;;  %v1973_v15 = vpop.f32.mrb[81].mxu0  ;;  %v2164_v22 = vpop.f32.mrb[113].mxu1 }
 0x1f6   :  { %v2165_v40 = vadd.f32 %v2164_v22, %v3948_v42  ;;  %v1974_v48 = vpop.f32.mrb[82].mxu0  ;;  %v2762_v2 = vpop.f32.mrb[114].mxu1 }
 0x1f7   :  { %v4119_v10 = vadd.f32 %v1974_v48, %v3917_v37  ;;  %v2176_v17 = vadd.f32 %v2762_v2, %v3963_v36  ;;  %v1976_v19 = vpop.f32.mrb[83].mxu0  ;;  %v2167_v30 = vpop.f32.mrb[115].mxu1  ;;  %2437 = vst [vmem:[%s4337_s2 + $0x90] sm:$0xff] %v2173_v7 }
 0x1f8   :  { %v2168_v63 = vadd.f32 %v2167_v30, %v3953_v60  ;;  %2435 = vst [vmem:[%s4337_s2 + $0x80] sm:$0xff] %v2165_v40 }
 0x1f9   :  { %2438 = vst [vmem:[%s4337_s2 + $0x98] sm:$0xff] %v2176_v17 }
 0x1fa   :  { %2436 = vst [vmem:[%s4337_s2 + $0x88] sm:$0xff] %v2168_v63 }
 0x1fc   :  { %v1979_v26 = vpop.f32.mrb[84].mxu0  ;;  %v2765_v37 = vpop.f32.mrb[116].mxu1 }
 0x1fd   :  { %v4136_v42 = vadd.f32 %v1979_v26, %v3921_v45  ;;  %v2189_v60 = vadd.f32 %v2765_v37, %v3978_v44  ;;  %v1981_v18 = vpop.f32.mrb[85].mxu0  ;;  %v2180_v36 = vpop.f32.mrb[117].mxu1 }
 0x1fe   :  { %v2181_v24 = vadd.f32 %v2180_v36, %v3968_v3  ;;  %v1982_v25 = vpop.f32.mrb[86].mxu0  ;;  %v2766_v33 = vpop.f32.mrb[118].mxu1 }
 0x1ff   :  { %v4141_v41 = vadd.f32 %v1982_v25, %v3925_v53  ;;  %v2192_v56 = vadd.f32 %v2766_v33, %v3983_v11  ;;  %v1984_v1 = vpop.f32.mrb[87].mxu0  ;;  %v2183_v38 = vpop.f32.mrb[119].mxu1  ;;  %2441 = vst [vmem:[%s4337_s2 + $0xb0] sm:$0xff] %v2189_v60 }
 0x200   :  { %v2184_v46 = vadd.f32 %v2183_v38, %v3973_v20  ;;  %2439 = vst [vmem:[%s4337_s2 + $0xa0] sm:$0xff] %v2181_v24 }
 0x201   :  { %2442 = vst [vmem:[%s4337_s2 + $0xb8] sm:$0xff] %v2192_v56  ;;  %v4353_v56 = vld [vmem:[#allocation3_spill] sm:$0xff] }
 0x202   :  { %2440 = vst [vmem:[%s4337_s2 + $0xa8] sm:$0xff] %v2184_v46 }
 0x204   :  { %v1987_v45 = vpop.f32.mrb[88].mxu0  ;;  %v2769_v53 = vpop.f32.mrb[120].mxu1 }
 0x205   :  { %v4158_v3 = vadd.f32 %v1987_v45, %v3929_v61  ;;  %v2205_v20 = vadd.f32 %v2769_v53, %v3998_v31  ;;  %v1989_v44 = vpop.f32.mrb[89].mxu0  ;;  %v2196_v11 = vpop.f32.mrb[121].mxu1 }
 0x206   :  { %v2197_v54 = vadd.f32 %v2196_v11, %v3988_v23  ;;  %v1990_v49 = vpop.f32.mrb[90].mxu0  ;;  %v2770_v4 = vpop.f32.mrb[122].mxu1 }
 0x207   :  { %v4163_v12 = vadd.f32 %v1990_v49, %v3933_v6  ;;  %v2208_v0 = vadd.f32 %v2770_v4, %v4003_v35  ;;  %v1992_v13 = vpop.f32.mrb[91].mxu0  ;;  %v2199_v59 = vpop.f32.mrb[123].mxu1  ;;  %2445 = vst [vmem:[%s4337_s2 + $0xd0] sm:$0xff] %v2205_v20 }
 0x208   :  { %v2200_v29 = vadd.f32 %v2199_v59, %v3993_v27  ;;  %2443 = vst [vmem:[%s4337_s2 + $0xc0] sm:$0xff] %v2197_v54 }
 0x209   :  { %2446 = vst [vmem:[%s4337_s2 + $0xd8] sm:$0xff] %v2208_v0  ;;  %v4355_v0 = vld [vmem:[#allocation5_spill] sm:$0xff] }
 0x20a   :  { %2444 = vst [vmem:[%s4337_s2 + $0xc8] sm:$0xff] %v2200_v29 }
 0x20c   :  { %v1995_v61 = vpop.f32.mrb[92].mxu0  ;;  %v2773_v6 = vpop.f32.mrb[124].mxu1 }
 0x20d   :  { %v4180_v23 = vadd.f32 %v1995_v61, %v3937_v14  ;;  %v2221_v27 = vadd.f32 %v2773_v6, %v4018_v47  ;;  %v1997_v31 = vpop.f32.mrb[93].mxu0  ;;  %v2212_v35 = vpop.f32.mrb[125].mxu1 }
 0x20e   :  { %v2213_v9 = vadd.f32 %v2212_v35, %v4008_v39  ;;  %v1998_v16 = vpop.f32.mrb[94].mxu0  ;;  %v2774_v7 = vpop.f32.mrb[126].mxu1 }
 0x20f   :  { %v4185_v15 = vadd.f32 %v1998_v16, %v3941_v21  ;;  %v2224_v22 = vadd.f32 %v2774_v7, %v4023_v51  ;;  %v2000_v40 = vpop.f32.mrb[95].mxu0  ;;  %v2215_v48 = vpop.f32.mrb[127].mxu1  ;;  %2449 = vst [vmem:[%s4337_s2 + $0xf0] sm:$0xff] %v2221_v27 }
 0x210   :  { %v2216_v2 = vadd.f32 %v2215_v48, %v4013_v43  ;;  %2447 = vst [vmem:[%s4337_s2 + $0xe0] sm:$0xff] %v2213_v9 }
 0x211   :  { %2450 = vst [vmem:[%s4337_s2 + $0xf8] sm:$0xff] %v2224_v22  ;;  %v4357_v22 = vld [vmem:[#allocation7_spill] sm:$0xff] }
 0x212   :  { %2448 = vst [vmem:[%s4337_s2 + $0xe8] sm:$0xff] %v2216_v2 }
 0x214   :  { %v2003_v14 = vpop.f32.mrb[96].mxu0  ;;  %v2777_v21 = vpop.f32.mrb[128].mxu1 }
 0x215   :  { %v4202_v39 = vadd.f32 %v2003_v14, %v3945_v34  ;;  %v2237_v43 = vadd.f32 %v2777_v21, %v4048_v32  ;;  %v2005_v47 = vpop.f32.mrb[97].mxu0  ;;  %v2228_v51 = vpop.f32.mrb[129].mxu1 }
 0x216   :  { %v2229_v17 = vadd.f32 %v2228_v51, %v4026_v55  ;;  %v2006_v19 = vpop.f32.mrb[98].mxu0  ;;  %v2778_v30 = vpop.f32.mrb[130].mxu1  ;;  %v4352_v55 = vld [vmem:[#allocation2_spill] sm:$0xff] }
 0x217   :  { %v4207_v63 = vadd.f32 %v2006_v19, %v3950_v52  ;;  %v2240_v26 = vadd.f32 %v2778_v30, %v4053_v5  ;;  %v2008_v37 = vpop.f32.mrb[99].mxu0  ;;  %v2231_v60 = vpop.f32.mrb[131].mxu1  ;;  %2453 = vst [vmem:[%s4337_s2 + $0x110] sm:$0xff] %v2237_v43 }
 0x218   :  { %v2232_v18 = vadd.f32 %v2231_v60, %v4031_v8  ;;  %2451 = vst [vmem:[%s4337_s2 + $0x100] sm:$0xff] %v2229_v17 }
 0x219   :  { %2454 = vst [vmem:[%s4337_s2 + $0x118] sm:$0xff] %v2240_v26  ;;  %v4359_v26 = vld [vmem:[#allocation9_spill] sm:$0xff] }
 0x21a   :  { %2452 = vst [vmem:[%s4337_s2 + $0x108] sm:$0xff] %v2232_v18 }
 0x21c   :  { %v2011_v34 = vpop.f32.mrb[100].mxu0  ;;  %v2781_v52 = vpop.f32.mrb[132].mxu1 }
 0x21d   :  { %v2012_v8 = vadd.f32 %v2011_v34, %v4352_v55  ;;  %v2253_v32 = vadd.f32 %v2781_v52, %v4092_v28  ;;  %v2013_v5 = vpop.f32.mrb[101].mxu0  ;;  %v2244_v36 = vpop.f32.mrb[133].mxu1 }
 0x21e   :  { %v2245_v24 = vadd.f32 %v2244_v36, %v4070_v57  ;;  %v2014_v25 = vpop.f32.mrb[102].mxu0  ;;  %v2782_v33 = vpop.f32.mrb[134].mxu1 }
 0x21f   :  { %v2015_v1 = vadd.f32 %v2014_v25, %v4353_v56  ;;  %v2256_v38 = vadd.f32 %v2782_v33, %v4097_v58  ;;  %v2016_v46 = vpop.f32.mrb[103].mxu0  ;;  %v2247_v45 = vpop.f32.mrb[135].mxu1  ;;  %2457 = vst [vmem:[%s4337_s2 + $0x130] sm:$0xff] %v2253_v32  ;;  %v4354_v58 = vld [vmem:[#allocation4_spill] sm:$0xff]  ;;  %v4361_v56 = vld [vmem:[#allocation11_spill] sm:$0xff] }
 0x220   :  { %v2248_v53 = vadd.f32 %v2247_v45, %v4075_v50  ;;  %2455 = vst [vmem:[%s4337_s2 + $0x120] sm:$0xff] %v2245_v24 }
 0x221   :  { %2458 = vst [vmem:[%s4337_s2 + $0x138] sm:$0xff] %v2256_v38 }
 0x222   :  { %2456 = vst [vmem:[%s4337_s2 + $0x128] sm:$0xff] %v2248_v53 }
 0x224   :  { %v2019_v57 = vpop.f32.mrb[104].mxu0  ;;  %v2785_v28 = vpop.f32.mrb[136].mxu1 }
 0x225   :  { %v2020_v50 = vadd.f32 %v2019_v57, %v4354_v58  ;;  %v2269_v20 = vadd.f32 %v2785_v28, %v4136_v42  ;;  %v2021_v44 = vpop.f32.mrb[105].mxu0  ;;  %v2260_v11 = vpop.f32.mrb[137].mxu1  ;;  %v4362_v58 = vld [vmem:[#allocation12_spill] sm:$0xff] }
 0x226   :  { %v2261_v54 = vadd.f32 %v2260_v11, %v4114_v62  ;;  %v2022_v49 = vpop.f32.mrb[106].mxu0  ;;  %v2786_v4 = vpop.f32.mrb[138].mxu1 }
 0x227   :  { %v2023_v13 = vadd.f32 %v2022_v49, %v4355_v0  ;;  %v2272_v59 = vadd.f32 %v2786_v4, %v4141_v41  ;;  %v2024_v29 = vpop.f32.mrb[107].mxu0  ;;  %v2263_v61 = vpop.f32.mrb[139].mxu1  ;;  %2461 = vst [vmem:[%s4337_s2 + $0x150] sm:$0xff] %v2269_v20  ;;  %v4356_v41 = vld [vmem:[#allocation6_spill] sm:$0xff]  ;;  %v4363_v0 = vld [vmem:[#allocation13_spill] sm:$0xff] }
 0x228   :  { %v2264_v6 = vadd.f32 %v2263_v61, %v4119_v10  ;;  %2459 = vst [vmem:[%s4337_s2 + $0x140] sm:$0xff] %v2261_v54 }
 0x229   :  { %2462 = vst [vmem:[%s4337_s2 + $0x158] sm:$0xff] %v2272_v59 }
 0x22a   :  { %2460 = vst [vmem:[%s4337_s2 + $0x148] sm:$0xff] %v2264_v6 }
 0x22c   :  { %v2027_v62 = vpop.f32.mrb[108].mxu0  ;;  %v2789_v42 = vpop.f32.mrb[140].mxu1 }
 0x22d   :  { %v2028_v10 = vadd.f32 %v2027_v62, %v4356_v41  ;;  %v2285_v27 = vadd.f32 %v2789_v42, %v4180_v23  ;;  %v2029_v31 = vpop.f32.mrb[109].mxu0  ;;  %v2276_v35 = vpop.f32.mrb[141].mxu1  ;;  %v4364_v41 = vld [vmem:[#allocation14_spill] sm:$0xff] }
 0x22e   :  { %v2277_v9 = vadd.f32 %v2276_v35, %v4158_v3  ;;  %v2030_v16 = vpop.f32.mrb[110].mxu0  ;;  %v2790_v7 = vpop.f32.mrb[142].mxu1 }
 0x22f   :  { %v2031_v40 = vadd.f32 %v2030_v16, %v4357_v22  ;;  %v2288_v48 = vadd.f32 %v2790_v7, %v4185_v15  ;;  %v2032_v2 = vpop.f32.mrb[111].mxu0  ;;  %v2279_v14 = vpop.f32.mrb[143].mxu1  ;;  %2465 = vst [vmem:[%s4337_s2 + $0x170] sm:$0xff] %v2285_v27  ;;  %v4358_v15 = vld [vmem:[#allocation8_spill] sm:$0xff]  ;;  %v4365_v22 = vld [vmem:[#allocation15_spill] sm:$0xff] }
 0x230   :  { %v2280_v21 = vadd.f32 %v2279_v14, %v4163_v12  ;;  %2463 = vst [vmem:[%s4337_s2 + $0x160] sm:$0xff] %v2277_v9 }
 0x231   :  { %2466 = vst [vmem:[%s4337_s2 + $0x178] sm:$0xff] %v2288_v48 }
 0x232   :  { %2464 = vst [vmem:[%s4337_s2 + $0x168] sm:$0xff] %v2280_v21 }
 0x234   :  { %v2035_v3 = vpop.f32.mrb[112].mxu0  ;;  %v2793_v23 = vpop.f32.mrb[144].mxu1 }
 0x235   :  { %v2036_v12 = vadd.f32 %v2035_v3, %v4358_v15  ;;  %v2301_v43 = vadd.f32 %v2793_v23, %v2012_v8  ;;  %v2037_v47 = vpop.f32.mrb[113].mxu0  ;;  %v2292_v51 = vpop.f32.mrb[145].mxu1  ;;  %v4360_v8 = vld [vmem:[#allocation10_spill] sm:$0xff] }
 0x236   :  { %v2293_v17 = vadd.f32 %v2292_v51, %v4202_v39  ;;  %v2038_v19 = vpop.f32.mrb[114].mxu0  ;;  %v2794_v30 = vpop.f32.mrb[146].mxu1 }
 0x237   :  { %v2039_v37 = vadd.f32 %v2038_v19, %v4359_v26  ;;  %v2304_v60 = vadd.f32 %v2794_v30, %v2015_v1  ;;  %v2040_v18 = vpop.f32.mrb[115].mxu0  ;;  %v2295_v34 = vpop.f32.mrb[147].mxu1  ;;  %2469 = vst [vmem:[%s4337_s2 + $0x190] sm:$0xff] %v2301_v43 }
 0x238   :  { %v2296_v52 = vadd.f32 %v2295_v34, %v4207_v63  ;;  %2467 = vst [vmem:[%s4337_s2 + $0x180] sm:$0xff] %v2293_v17 }
 0x239   :  { %2470 = vst [vmem:[%s4337_s2 + $0x198] sm:$0xff] %v2304_v60 }
 0x23a   :  { %2468 = vst [vmem:[%s4337_s2 + $0x188] sm:$0xff] %v2296_v52 }
 0x23c   :  { %v2043_v39 = vpop.f32.mrb[116].mxu0  ;;  %v2797_v55 = vpop.f32.mrb[148].mxu1 }
 0x23d   :  { %v2044_v63 = vadd.f32 %v2043_v39, %v4360_v8  ;;  %v2317_v32 = vadd.f32 %v2797_v55, %v2028_v10  ;;  %v2045_v5 = vpop.f32.mrb[117].mxu0  ;;  %v2308_v36 = vpop.f32.mrb[149].mxu1 }
 0x23e   :  { %v2309_v24 = vadd.f32 %v2308_v36, %v2020_v50  ;;  %v2046_v25 = vpop.f32.mrb[118].mxu0  ;;  %v2798_v33 = vpop.f32.mrb[150].mxu1 }
 0x23f   :  { %v2047_v1 = vadd.f32 %v2046_v25, %v4361_v56  ;;  %v2320_v38 = vadd.f32 %v2798_v33, %v2031_v40  ;;  %v2048_v46 = vpop.f32.mrb[119].mxu0  ;;  %v2311_v45 = vpop.f32.mrb[151].mxu1  ;;  %2473 = vst [vmem:[%s4337_s2 + $0x1b0] sm:$0xff] %v2317_v32 }
 0x240   :  { %v2312_v53 = vadd.f32 %v2311_v45, %v2023_v13  ;;  %2471 = vst [vmem:[%s4337_s2 + $0x1a0] sm:$0xff] %v2309_v24 }
 0x241   :  { %2474 = vst [vmem:[%s4337_s2 + $0x1b8] sm:$0xff] %v2320_v38 }
 0x242   :  { %2472 = vst [vmem:[%s4337_s2 + $0x1a8] sm:$0xff] %v2312_v53 }
 0x244   :  { %v2051_v57 = vpop.f32.mrb[120].mxu0  ;;  %v2801_v28 = vpop.f32.mrb[152].mxu1 }
 0x245   :  { %v2052_v50 = vadd.f32 %v2051_v57, %v4362_v58  ;;  %v2333_v20 = vadd.f32 %v2801_v28, %v2044_v63  ;;  %v2053_v44 = vpop.f32.mrb[121].mxu0  ;;  %v2324_v11 = vpop.f32.mrb[153].mxu1 }
 0x246   :  { %v2325_v54 = vadd.f32 %v2324_v11, %v2036_v12  ;;  %v2054_v49 = vpop.f32.mrb[122].mxu0  ;;  %v2802_v4 = vpop.f32.mrb[154].mxu1 }
 0x247   :  { %v2055_v13 = vadd.f32 %v2054_v49, %v4363_v0  ;;  %v2336_v59 = vadd.f32 %v2802_v4, %v2047_v1  ;;  %v2056_v29 = vpop.f32.mrb[123].mxu0  ;;  %v2327_v61 = vpop.f32.mrb[155].mxu1  ;;  %2477 = vst [vmem:[%s4337_s2 + $0x1d0] sm:$0xff] %v2333_v20 }
 0x248   :  { %v2328_v6 = vadd.f32 %v2327_v61, %v2039_v37  ;;  %2475 = vst [vmem:[%s4337_s2 + $0x1c0] sm:$0xff] %v2325_v54 }
 0x249   :  { %2478 = vst [vmem:[%s4337_s2 + $0x1d8] sm:$0xff] %v2336_v59 }
 0x24a   :  { %2476 = vst [vmem:[%s4337_s2 + $0x1c8] sm:$0xff] %v2328_v6 }
 0x24c   :  { %v2059_v62 = vpop.f32.mrb[124].mxu0  ;;  %v2805_v42 = vpop.f32.mrb[156].mxu1 }
 0x24d   :  { %v2060_v10 = vadd.f32 %v2059_v62, %v4364_v41  ;;  %v2061_v27 = vpop.f32.mrb[125].mxu0  ;;  %v2340_v31 = vpop.f32.mrb[157].mxu1 }
 0x24e   :  { %v2341_v35 = vadd.f32 %v2340_v31, %v2052_v50  ;;  %v2062_v9 = vpop.f32.mrb[126].mxu0  ;;  %v2806_v16 = vpop.f32.mrb[158].mxu1 }
 0x24f   :  { %v2349_v7 = vadd.f32 %v2805_v42, %v2060_v10  ;;  %v2063_v40 = vadd.f32 %v2062_v9, %v4365_v22  ;;  %v2064_v48 = vpop.f32.mrb[127].mxu0  ;;  %v2343_v2 = vpop.f32.mrb[159].mxu1 }
 0x250   :  { %v2344_v14 = vadd.f32 %v2343_v2, %v2055_v13  ;;  %2479 = vst [vmem:[%s4337_s2 + $0x1e0] sm:$0xff] %v2341_v35 }
 0x251   :  { %v2352_v21 = vadd.f32 %v2806_v16, %v2063_v40  ;;  %2481 = vst [vmem:[%s4337_s2 + $0x1f0] sm:$0xff] %v2349_v7 }
 0x252   :  { %2480 = vst [vmem:[%s4337_s2 + $0x1e8] sm:$0xff] %v2344_v14 }
 0x253   :  { %2482 = vst [vmem:[%s4337_s2 + $0x1f8] sm:$0xff] %v2352_v21 }

// kernel: fpn1_forward.46
= control target key start
LH: loop header
LB: loop body
LE: loop exit
PB: predicated region body
PF: predicated region fallthrough
CT: control target
= control target key end

     0   :  { %s1647_s1 = inlined_call_operand.vmem [shape: bf16[640,128], index: 1, kind: input, shape index: {}]   ;;  %s1648_s0 = inlined_call_operand.vmem [shape: bf16[128,640], index: 0, kind: input, shape index: {}]   ;;  %s1649_s2 = inlined_call_operand.vmem [shape: f32[128,128], index: 2, kind: output, shape index: {}]  }
   0x1   :  { %v1224_v0 = vld [vmem:[%s1647_s1 + $0x40] sm:$0xff]   ;;  %v1228_v4 = vld [vmem:[%s1647_s1 + $0x48] sm:$0xff]   ;;  %v1232_v8 = vld [vmem:[%s1647_s1 + $0x50] sm:$0xff]  }
   0x2   :  { %v1225_v1 = vld [vmem:[%s1647_s1 + $0xc0] sm:$0xff]   ;;  %1031 = vmatprep.subr.bf16.mxu0 %v1224_v0  ;;  %v1229_v5 = vld [vmem:[%s1647_s1 + $0xc8] sm:$0xff]   ;;  %v1233_v9 = vld [vmem:[%s1647_s1 + $0xd0] sm:$0xff]  }
   0x3   :  { %v1226_v2 = vld [vmem:[%s1647_s1] sm:$0xff]   ;;  %1095 = vmatprep.subr.bf16.mxu1 %v1225_v1  ;;  %v1230_v6 = vld [vmem:[%s1647_s1 + $0x8] sm:$0xff]   ;;  %v1234_v10 = vld [vmem:[%s1647_s1 + $0x10] sm:$0xff]  }
   0x4   :  { %v1227_v3 = vld [vmem:[%s1647_s1 + $0x80] sm:$0xff]   ;;  %1032 = vmatpush3.bf16.msra.mxu0 %v1226_v2  ;;  %v1231_v7 = vld [vmem:[%s1647_s1 + $0x88] sm:$0xff]   ;;  %v1235_v11 = vld [vmem:[%s1647_s1 + $0x90] sm:$0xff]  }
   0x5   :  { %1096 = vmatpush3.bf16.msra.mxu1 %v1227_v3  ;;  %1033 = vmatprep.subr.bf16.mxu0 %v1228_v4  ;;  %v1236_v12 = vld [vmem:[%s1647_s1 + $0x58] sm:$0xff]   ;;  %v1240_v16 = vld [vmem:[%s1647_s1 + $0x60] sm:$0xff]   ;;  %v1244_v20 = vld [vmem:[%s1647_s1 + $0x68] sm:$0xff]  }
   0x6   :  { %1097 = vmatprep.subr.bf16.mxu1 %v1229_v5  ;;  %v1237_v13 = vld [vmem:[%s1647_s1 + $0xd8] sm:$0xff]   ;;  %v1241_v17 = vld [vmem:[%s1647_s1 + $0xe0] sm:$0xff]   ;;  %v1245_v21 = vld [vmem:[%s1647_s1 + $0xe8] sm:$0xff]  }
   0x7   :  { %v1238_v14 = vld [vmem:[%s1647_s1 + $0x18] sm:$0xff]   ;;  %v1242_v18 = vld [vmem:[%s1647_s1 + $0x20] sm:$0xff]   ;;  %v1246_v22 = vld [vmem:[%s1647_s1 + $0x28] sm:$0xff]  }
   0x8   :  { %1034 = vmatpush3.bf16.msra.mxu0 %v1230_v6  ;;  %v1239_v15 = vld [vmem:[%s1647_s1 + $0x98] sm:$0xff]   ;;  %v1243_v19 = vld [vmem:[%s1647_s1 + $0xa0] sm:$0xff]   ;;  %v1247_v23 = vld [vmem:[%s1647_s1 + $0xa8] sm:$0xff]  }
   0x9   :  { %1098 = vmatpush3.bf16.msra.mxu1 %v1231_v7  ;;  %1035 = vmatprep.subr.bf16.mxu0 %v1232_v8  ;;  %v1248_v24 = vld [vmem:[%s1647_s1 + $0x70] sm:$0xff]   ;;  %v1252_v28 = vld [vmem:[%s1647_s1 + $0x78] sm:$0xff]   ;;  %v1261_v35 = vld [vmem:[%s1648_s0 + $0xc] ss:$20 sps:$4 sm:$0xff]  }
   0xa   :  { %1099 = vmatprep.subr.bf16.mxu1 %v1233_v9  ;;  %v1249_v25 = vld [vmem:[%s1647_s1 + $0xf0] sm:$0xff]   ;;  %v1253_v29 = vld [vmem:[%s1647_s1 + $0xf8] sm:$0xff]   ;;  %v1262_v36 = vld [vmem:[%s1647_s1 + $0x100] sm:$0xff]   ;;  %753 = vmatprep.mubr.bf16.mxu1 %v1261_v35 }
   0xb   :  { %v1250_v26 = vld [vmem:[%s1647_s1 + $0x30] sm:$0xff]   ;;  %v1254_v30 = vld [vmem:[%s1647_s1 + $0x38] sm:$0xff]   ;;  %v1263_v37 = vld [vmem:[%s1648_s0 + $0x2c] ss:$20 sps:$4 sm:$0xff]  }
   0xc   :  { %1036 = vmatpush3.bf16.msra.mxu0 %v1234_v10  ;;  %v1251_v27 = vld [vmem:[%s1647_s1 + $0xb0] sm:$0xff]   ;;  %v1255_v31 = vld [vmem:[%s1647_s1 + $0xb8] sm:$0xff]   ;;  %v1269_v39 = vld [vmem:[%s1647_s1 + $0x108] sm:$0xff]  }
   0xd   :  { %1100 = vmatpush3.bf16.msra.mxu1 %v1235_v11  ;;  %1037 = vmatprep.subr.bf16.mxu0 %v1236_v12  ;;  %v1256_v32 = vld [vmem:[%s1648_s0] ss:$20 sps:$4 sm:$0xff]   ;;  %v1258_v33 = vld [vmem:[%s1648_s0 + $0x4] ss:$20 sps:$4 sm:$0xff]   ;;  %v1259_v34 = vld [vmem:[%s1648_s0 + $0x8] ss:$20 sps:$4 sm:$0xff]  }
   0xe   :  { %1101 = vmatprep.subr.bf16.mxu1 %v1237_v13  ;;  %656 = vmatprep.mubr.bf16.mxu0 %v1258_v33  ;;  %v1265_v38 = vld [vmem:[%s1648_s0 + $0x34] ss:$20 sps:$4 sm:$0xff]   ;;  %v1268_v41 = vld [vmem:[%s1648_s0 + $0x30] ss:$20 sps:$4 sm:$0xff]   ;;  %v1283_v45 = vld [vmem:[%s1647_s1 + $0x118] sm:$0xff]  }
   0xf   :  { %v1267_v40 = vld [vmem:[%s1648_s0 + $0x28] ss:$20 sps:$4 sm:$0xff]   ;;  %v1276_v44 = vld [vmem:[%s1647_s1 + $0x110] sm:$0xff]   ;;  %v1275_v47 = vld [vmem:[%s1648_s0 + $0x58] ss:$20 sps:$4 sm:$0xff]  }
  0x10   :  { %1038 = vmatpush3.bf16.msra.mxu0 %v1238_v14  ;;  %v1270_v42 = vld [vmem:[%s1648_s0 + $0x54] ss:$20 sps:$4 sm:$0xff]   ;;  %v1272_v43 = vld [vmem:[%s1648_s0 + $0x5c] ss:$20 sps:$4 sm:$0xff]   ;;  %v1279_v49 = vld [vmem:[%s1648_s0 + $0x84] ss:$20 sps:$4 sm:$0xff]  }
  0x11   :  { %1102 = vmatpush3.bf16.msra.mxu1 %v1239_v15  ;;  %1039 = vmatprep.subr.bf16.mxu0 %v1240_v16  ;;  %v1274_v46 = vld [vmem:[%s1648_s0 + $0x50] ss:$20 sps:$4 sm:$0xff]   ;;  %v1297_v51 = vld [vmem:[%s1647_s1 + $0x128] sm:$0xff]   ;;  %v1282_v53 = vld [vmem:[%s1648_s0 + $0x80] ss:$20 sps:$4 sm:$0xff]  }
  0x12   :  { %1103 = vmatprep.subr.bf16.mxu1 %v1241_v17  ;;  %v1277_v48 = vld [vmem:[%s1648_s0 + $0x7c] ss:$20 sps:$4 sm:$0xff]   ;;  %v1290_v50 = vld [vmem:[%s1647_s1 + $0x120] sm:$0xff]   ;;  %v1281_v52 = vld [vmem:[%s1648_s0 + $0x78] ss:$20 sps:$4 sm:$0xff]  }
  0x13   :  { %v1284_v54 = vld [vmem:[%s1648_s0 + $0xa4] ss:$20 sps:$4 sm:$0xff]   ;;  %v1304_v55 = vld [vmem:[%s1647_s1 + $0x130] sm:$0xff]   ;;  %v1286_v56 = vld [vmem:[%s1648_s0 + $0xac] ss:$20 sps:$4 sm:$0xff]  }
  0x14   :  { %1040 = vmatpush3.bf16.msra.mxu0 %v1242_v18  ;;  %v1311_v57 = vld [vmem:[%s1647_s1 + $0x138] sm:$0xff]   ;;  %v1288_v58 = vld [vmem:[%s1648_s0 + $0xa0] ss:$20 sps:$4 sm:$0xff]   ;;  %v1296_v63 = vld [vmem:[%s1648_s0 + $0xd0] ss:$20 sps:$4 sm:$0xff]  }
  0x15   :  { %1104 = vmatpush3.bf16.msra.mxu1 %v1243_v19  ;;  %1041 = vmatprep.subr.bf16.mxu0 %v1244_v20  ;;  %v1289_v59 = vld [vmem:[%s1648_s0 + $0xa8] ss:$20 sps:$4 sm:$0xff]   ;;  %v1291_v60 = vld [vmem:[%s1648_s0 + $0xcc] ss:$20 sps:$4 sm:$0xff]   ;;  %v1302_v2 = vld [vmem:[%s1648_s0 + $0xf0] ss:$20 sps:$4 sm:$0xff]  }
  0x16   :  { %1105 = vmatprep.subr.bf16.mxu1 %v1245_v21  ;;  %v1293_v61 = vld [vmem:[%s1648_s0 + $0xd4] ss:$20 sps:$4 sm:$0xff]   ;;  %v1300_v1 = vld [vmem:[%s1648_s0 + $0xfc] ss:$20 sps:$4 sm:$0xff]   ;;  %v1303_v3 = vld [vmem:[%s1648_s0 + $0xf8] ss:$20 sps:$4 sm:$0xff]  }
  0x17   :  { %v1295_v62 = vld [vmem:[%s1648_s0 + $0xc8] ss:$20 sps:$4 sm:$0xff]   ;;  %v1307_v5 = vld [vmem:[%s1648_s0 + $0x124] ss:$20 sps:$4 sm:$0xff]   ;;  %v1310_v7 = vld [vmem:[%s1648_s0 + $0x120] ss:$20 sps:$4 sm:$0xff]  }
  0x18   :  { %1042 = vmatpush3.bf16.msra.mxu0 %v1246_v22  ;;  %v1298_v0 = vld [vmem:[%s1648_s0 + $0xf4] ss:$20 sps:$4 sm:$0xff]   ;;  %v1305_v4 = vld [vmem:[%s1648_s0 + $0x11c] ss:$20 sps:$4 sm:$0xff]   ;;  %v1309_v6 = vld [vmem:[%s1648_s0 + $0x118] ss:$20 sps:$4 sm:$0xff]  }
  0x19   :  { %1106 = vmatpush3.bf16.msra.mxu1 %v1247_v23  ;;  %1043 = vmatprep.subr.bf16.mxu0 %v1248_v24  ;;  %v1312_v8 = vld [vmem:[%s1648_s0 + $0x10] ss:$20 sps:$4 sm:$0xff]   ;;  %v1314_v10 = vld [vmem:[%s1648_s0 + $0x38] ss:$20 sps:$4 sm:$0xff]   ;;  %v1316_v12 = vld [vmem:[%s1648_s0 + $0x60] ss:$20 sps:$4 sm:$0xff]  }
  0x1a   :  { %1107 = vmatprep.subr.bf16.mxu1 %v1249_v25  ;;  %v1313_v9 = vld [vmem:[%s1648_s0 + $0xb0] ss:$20 sps:$4 sm:$0xff]   ;;  %v1315_v11 = vld [vmem:[%s1648_s0 + $0xd8] ss:$20 sps:$4 sm:$0xff]   ;;  %v1317_v13 = vld [vmem:[%s1648_s0 + $0x100] ss:$20 sps:$4 sm:$0xff]  }
  0x1b   :  { %v1318_v14 = vld [vmem:[%s1648_s0 + $0x88] ss:$20 sps:$4 sm:$0xff]  }
  0x1c   :  { %1044 = vmatpush3.bf16.msra.mxu0 %v1250_v26  ;;  %v1319_v15 = vld [vmem:[%s1648_s0 + $0x128] ss:$20 sps:$4 sm:$0xff]  }
  0x1d   :  { %1108 = vmatpush3.bf16.msra.mxu1 %v1251_v27  ;;  %1045 = vmatprep.subr.bf16.mxu0 %v1252_v28 }
  0x1e   :  { %1109 = vmatprep.subr.bf16.mxu1 %v1253_v29 }
  0x20   :  { %1046 = vmatpush3.bf16.msra.mxu0 %v1254_v30 }
  0x21   :  { %1110 = vmatpush3.bf16.msra.mxu1 %v1255_v31  ;;  %1175 = vmatprep.subr.bf16.mxu0 %v1262_v36 }
  0x22   :  { %1207 = vmatprep.subr.bf16.mxu1 %v1262_v36 }
  0x23   :  { %657 = vmatmul.mubr.bf16.vlgmr.msra.gmra.mrb[0].mxu0 %v1256_v32 }
  0x24   :  { %754 = vmatmul.mubr.bf16.vlgmr.msra.gmra.mrb[0].mxu1 %v1259_v34  ;;  %1176 = vmatpush3.bf16.msra.mxu0 %v1262_v36 }
  0x25   :  { %1215 = vmatpush3.bf16.msra.mxu1 %v1262_v36  ;;  %664 = vmatprep.mubr.bf16.mxu0 %v1263_v37 }
  0x26   :  { %761 = vmatprep.mubr.bf16.mxu1 %v1265_v38  ;;  %1177 = vmatprep.subr.bf16.mxu0 %v1269_v39 }
  0x27   :  { %1208 = vmatprep.subr.bf16.mxu1 %v1269_v39 }
  0x28   :  { %1178 = vmatpush3.bf16.msra.mxu0 %v1269_v39 }
  0x29   :  { %1216 = vmatpush3.bf16.msra.mxu1 %v1269_v39  ;;  %1179 = vmatprep.subr.bf16.mxu0 %v1276_v44 }
  0x2a   :  { %1209 = vmatprep.subr.bf16.mxu1 %v1276_v44 }
  0x2b   :  { %665 = vmatmul.mubr.bf16.gmra.mrb[4].mxu0 %v1267_v40 }
  0x2c   :  { %762 = vmatmul.mubr.bf16.gmra.mrb[4].mxu1 %v1268_v41  ;;  %672 = vmatprep.mubr.bf16.mxu0 %v1270_v42 }
  0x2d   :  { %769 = vmatprep.mubr.bf16.mxu1 %v1272_v43  ;;  %1180 = vmatpush3.bf16.msra.mxu0 %v1276_v44 }
  0x2e   :  { %1217 = vmatpush3.bf16.msra.mxu1 %v1276_v44  ;;  %1181 = vmatprep.subr.bf16.mxu0 %v1283_v45 }
  0x2f   :  { %1210 = vmatprep.subr.bf16.mxu1 %v1283_v45 }
  0x31   :  { %1182 = vmatpush3.bf16.msra.mxu0 %v1283_v45 }
  0x32   :  { %1218 = vmatpush3.bf16.msra.mxu1 %v1283_v45  ;;  %1183 = vmatprep.subr.bf16.mxu0 %v1290_v50 }
  0x33   :  { %673 = vmatmul.mubr.bf16.gmra.mrb[8].mxu0 %v1274_v46  ;;  %1211 = vmatprep.subr.bf16.mxu1 %v1290_v50 }
  0x34   :  { %770 = vmatmul.mubr.bf16.gmra.mrb[8].mxu1 %v1275_v47  ;;  %680 = vmatprep.mubr.bf16.mxu0 %v1277_v48 }
  0x35   :  { %777 = vmatprep.mubr.bf16.mxu1 %v1279_v49  ;;  %1184 = vmatpush3.bf16.msra.mxu0 %v1290_v50 }
  0x36   :  { %1219 = vmatpush3.bf16.msra.mxu1 %v1290_v50  ;;  %1185 = vmatprep.subr.bf16.mxu0 %v1297_v51 }
  0x37   :  { %1212 = vmatprep.subr.bf16.mxu1 %v1297_v51 }
  0x39   :  { %1186 = vmatpush3.bf16.msra.mxu0 %v1297_v51 }
  0x3a   :  { %1220 = vmatpush3.bf16.msra.mxu1 %v1297_v51  ;;  %1187 = vmatprep.subr.bf16.mxu0 %v1304_v55 }
  0x3b   :  { %681 = vmatmul.mubr.bf16.gmra.mrb[12].mxu0 %v1281_v52  ;;  %1213 = vmatprep.subr.bf16.mxu1 %v1304_v55 }
  0x3c   :  { %778 = vmatmul.mubr.bf16.gmra.mrb[12].mxu1 %v1282_v53  ;;  %688 = vmatprep.mubr.bf16.mxu0 %v1284_v54 }
  0x3d   :  { %785 = vmatprep.mubr.bf16.mxu1 %v1286_v56  ;;  %1188 = vmatpush3.bf16.msra.mxu0 %v1304_v55 }
  0x3e   :  { %1221 = vmatpush3.bf16.msra.mxu1 %v1304_v55  ;;  %1189 = vmatprep.subr.bf16.mxu0 %v1311_v57 }
  0x3f   :  { %1214 = vmatprep.subr.bf16.mxu1 %v1311_v57 }
  0x41   :  { %1190 = vmatpush3.bf16.msra.mxu0 %v1311_v57 }
  0x42   :  { %1222 = vmatpush3.bf16.msra.mxu1 %v1311_v57 }
  0x43   :  { %689 = vmatmul.mubr.bf16.gmra.mrb[16].mxu0 %v1288_v58 }
  0x44   :  { %786 = vmatmul.mubr.bf16.gmra.mrb[16].mxu1 %v1289_v59  ;;  %696 = vmatprep.mubr.bf16.mxu0 %v1291_v60 }
  0x45   :  { %793 = vmatprep.mubr.bf16.mxu1 %v1293_v61 }
  0x4b   :  { %697 = vmatmul.mubr.bf16.gmra.mrb[20].mxu0 %v1295_v62 }
  0x4c   :  { %794 = vmatmul.mubr.bf16.gmra.mrb[20].mxu1 %v1296_v63  ;;  %704 = vmatprep.mubr.bf16.mxu0 %v1298_v0 }
  0x4d   :  { %801 = vmatprep.mubr.bf16.mxu1 %v1300_v1 }
  0x53   :  { %705 = vmatmul.mubr.bf16.gmra.mrb[24].mxu0 %v1302_v2 }
  0x54   :  { %802 = vmatmul.mubr.bf16.gmra.mrb[24].mxu1 %v1303_v3  ;;  %712 = vmatprep.mubr.bf16.mxu0 %v1305_v4 }
  0x55   :  { %809 = vmatprep.mubr.bf16.mxu1 %v1307_v5 }
  0x5b   :  { %713 = vmatmul.mubr.bf16.gmra.mrb[28].mxu0 %v1309_v6 }
  0x5c   :  { %810 = vmatmul.mubr.bf16.gmra.mrb[28].mxu1 %v1310_v7  ;;  %1191 = vmatprep.mubr.bf16.mxu0 %v1312_v8 }
  0x5d   :  { %1199 = vmatprep.mubr.bf16.mxu1 %v1313_v9 }
  0x63   :  { %1192 = vmatmul.mubr.bf16.vlgmr.msra.gmra.mrb[32].mxu0 %v1314_v10 }
  0x64   :  { %1200 = vmatmul.mubr.bf16.vlgmr.msra.gmra.mrb[32].mxu1 %v1315_v11  ;;  %1195 = vmatprep.mubr.bf16.mxu0 %v1316_v12 }
  0x65   :  { %1203 = vmatprep.mubr.bf16.mxu1 %v1317_v13 }
  0x6b   :  { %1196 = vmatmul.mubr.bf16.gmra.mrb[36].mxu0 %v1318_v14 }
  0x6c   :  { %1204 = vmatmul.mubr.bf16.gmra.mrb[36].mxu1 %v1319_v15 }
  0xf6   :  { %v1047_v16 = vpop.f32.mrb[0].mxu0 }
  0xf7   :  { %v1111_v17 = vpop.f32.mrb[0].mxu1  ;;  %v1048_v18 = vpop.f32.mrb[1].mxu0 }
  0xf8   :  { %v1049_v19 = vadd.f32 %v1048_v18, %v1047_v16  ;;  %v1112_v20 = vpop.f32.mrb[1].mxu1  ;;  %v1050_v21 = vpop.f32.mrb[2].mxu0 }
  0xf9   :  { %v1113_v22 = vadd.f32 %v1112_v20, %v1111_v17  ;;  %v1114_v23 = vpop.f32.mrb[2].mxu1  ;;  %v1051_v24 = vpop.f32.mrb[3].mxu0 }
  0xfa   :  { %v1052_v25 = vadd.f32 %v1051_v24, %v1050_v21  ;;  %v1115_v26 = vpop.f32.mrb[3].mxu1 }
  0xfb   :  { %v1116_v27 = vadd.f32 %v1115_v26, %v1114_v23  ;;  %v1575_v28 = vadd.f32 %v1113_v22, %v1049_v19 }
  0xfd   :  { %v1577_v29 = vadd.f32 %v1116_v27, %v1052_v25 }
  0xfe   :  { %v1053_v30 = vpop.f32.mrb[4].mxu0 }
  0xff   :  { %v1117_v31 = vpop.f32.mrb[4].mxu1  ;;  %v1054_v32 = vpop.f32.mrb[5].mxu0 }
 0x100   :  { %v1055_v33 = vadd.f32 %v1054_v32, %v1053_v30  ;;  %v1118_v34 = vpop.f32.mrb[5].mxu1  ;;  %v1056_v35 = vpop.f32.mrb[6].mxu0 }
 0x101   :  { %v1119_v36 = vadd.f32 %v1118_v34, %v1117_v31  ;;  %v1120_v37 = vpop.f32.mrb[6].mxu1  ;;  %v1057_v38 = vpop.f32.mrb[7].mxu0 }
 0x102   :  { %v1058_v39 = vadd.f32 %v1057_v38, %v1056_v35  ;;  %v1121_v40 = vpop.f32.mrb[7].mxu1 }
 0x103   :  { %v1122_v41 = vadd.f32 %v1121_v40, %v1120_v37  ;;  %v1579_v42 = vadd.f32 %v1119_v36, %v1055_v33 }
 0x105   :  { %v1581_v43 = vadd.f32 %v1122_v41, %v1058_v39 }
 0x106   :  { %v1059_v44 = vpop.f32.mrb[8].mxu0 }
 0x107   :  { %v1123_v45 = vpop.f32.mrb[8].mxu1  ;;  %v1060_v46 = vpop.f32.mrb[9].mxu0 }
 0x108   :  { %v1061_v47 = vadd.f32 %v1060_v46, %v1059_v44  ;;  %v1124_v48 = vpop.f32.mrb[9].mxu1  ;;  %v1062_v49 = vpop.f32.mrb[10].mxu0 }
 0x109   :  { %v1125_v50 = vadd.f32 %v1124_v48, %v1123_v45  ;;  %v1126_v51 = vpop.f32.mrb[10].mxu1  ;;  %v1063_v52 = vpop.f32.mrb[11].mxu0 }
 0x10a   :  { %v1064_v53 = vadd.f32 %v1063_v52, %v1062_v49  ;;  %v1127_v54 = vpop.f32.mrb[11].mxu1 }
 0x10b   :  { %v1128_v55 = vadd.f32 %v1127_v54, %v1126_v51  ;;  %v1583_v56 = vadd.f32 %v1125_v50, %v1061_v47 }
 0x10d   :  { %v1585_v57 = vadd.f32 %v1128_v55, %v1064_v53 }
 0x10e   :  { %v1065_v58 = vpop.f32.mrb[12].mxu0 }
 0x10f   :  { %v1129_v59 = vpop.f32.mrb[12].mxu1  ;;  %v1066_v60 = vpop.f32.mrb[13].mxu0 }
 0x110   :  { %v1067_v61 = vadd.f32 %v1066_v60, %v1065_v58  ;;  %v1130_v62 = vpop.f32.mrb[13].mxu1  ;;  %v1068_v63 = vpop.f32.mrb[14].mxu0 }
 0x111   :  { %v1131_v0 = vadd.f32 %v1130_v62, %v1129_v59  ;;  %v1132_v1 = vpop.f32.mrb[14].mxu1  ;;  %v1069_v2 = vpop.f32.mrb[15].mxu0 }
 0x112   :  { %v1070_v3 = vadd.f32 %v1069_v2, %v1068_v63  ;;  %v1133_v4 = vpop.f32.mrb[15].mxu1 }
 0x113   :  { %v1134_v5 = vadd.f32 %v1133_v4, %v1132_v1  ;;  %v1587_v6 = vadd.f32 %v1131_v0, %v1067_v61 }
 0x115   :  { %v1589_v7 = vadd.f32 %v1134_v5, %v1070_v3 }
 0x116   :  { %v1071_v8 = vpop.f32.mrb[16].mxu0 }
 0x117   :  { %v1135_v9 = vpop.f32.mrb[16].mxu1  ;;  %v1072_v10 = vpop.f32.mrb[17].mxu0 }
 0x118   :  { %v1073_v11 = vadd.f32 %v1072_v10, %v1071_v8  ;;  %v1136_v12 = vpop.f32.mrb[17].mxu1  ;;  %v1074_v13 = vpop.f32.mrb[18].mxu0 }
 0x119   :  { %v1137_v14 = vadd.f32 %v1136_v12, %v1135_v9  ;;  %v1138_v15 = vpop.f32.mrb[18].mxu1  ;;  %v1075_v16 = vpop.f32.mrb[19].mxu0 }
 0x11a   :  { %v1076_v17 = vadd.f32 %v1075_v16, %v1074_v13  ;;  %v1139_v18 = vpop.f32.mrb[19].mxu1 }
 0x11b   :  { %v1140_v19 = vadd.f32 %v1139_v18, %v1138_v15  ;;  %v788_v20 = vadd.f32 %v1137_v14, %v1073_v11 }
 0x11d   :  { %v791_v21 = vadd.f32 %v1140_v19, %v1076_v17 }
 0x11e   :  { %v1077_v22 = vpop.f32.mrb[20].mxu0 }
 0x11f   :  { %v1141_v23 = vpop.f32.mrb[20].mxu1  ;;  %v1078_v24 = vpop.f32.mrb[21].mxu0 }
 0x120   :  { %v1079_v25 = vadd.f32 %v1078_v24, %v1077_v22  ;;  %v1142_v26 = vpop.f32.mrb[21].mxu1  ;;  %v1080_v27 = vpop.f32.mrb[22].mxu0 }
 0x121   :  { %v1143_v30 = vadd.f32 %v1142_v26, %v1141_v23  ;;  %v1144_v31 = vpop.f32.mrb[22].mxu1  ;;  %v1081_v32 = vpop.f32.mrb[23].mxu0 }
 0x122   :  { %v1082_v33 = vadd.f32 %v1081_v32, %v1080_v27  ;;  %v1145_v34 = vpop.f32.mrb[23].mxu1 }
 0x123   :  { %v1146_v35 = vadd.f32 %v1145_v34, %v1144_v31  ;;  %v796_v36 = vadd.f32 %v1143_v30, %v1079_v25 }
 0x125   :  { %v799_v37 = vadd.f32 %v1146_v35, %v1082_v33 }
 0x126   :  { %v1083_v38 = vpop.f32.mrb[24].mxu0 }
 0x127   :  { %v1147_v39 = vpop.f32.mrb[24].mxu1  ;;  %v1084_v40 = vpop.f32.mrb[25].mxu0 }
 0x128   :  { %v1085_v41 = vadd.f32 %v1084_v40, %v1083_v38  ;;  %v1148_v44 = vpop.f32.mrb[25].mxu1  ;;  %v1086_v45 = vpop.f32.mrb[26].mxu0 }
 0x129   :  { %v1149_v46 = vadd.f32 %v1148_v44, %v1147_v39  ;;  %v1150_v47 = vpop.f32.mrb[26].mxu1  ;;  %v1087_v48 = vpop.f32.mrb[27].mxu0 }
 0x12a   :  { %v1088_v49 = vadd.f32 %v1087_v48, %v1086_v45  ;;  %v1151_v50 = vpop.f32.mrb[27].mxu1 }
 0x12b   :  { %v1152_v51 = vadd.f32 %v1151_v50, %v1150_v47  ;;  %v804_v52 = vadd.f32 %v1149_v46, %v1085_v41 }
 0x12d   :  { %v807_v53 = vadd.f32 %v1152_v51, %v1088_v49 }
 0x12e   :  { %v1089_v54 = vpop.f32.mrb[28].mxu0 }
 0x12f   :  { %v1153_v55 = vpop.f32.mrb[28].mxu1  ;;  %v1090_v58 = vpop.f32.mrb[29].mxu0 }
 0x130   :  { %v1091_v59 = vadd.f32 %v1090_v58, %v1089_v54  ;;  %v1154_v60 = vpop.f32.mrb[29].mxu1  ;;  %v1092_v61 = vpop.f32.mrb[30].mxu0 }
 0x131   :  { %v1155_v62 = vadd.f32 %v1154_v60, %v1153_v55  ;;  %v1156_v63 = vpop.f32.mrb[30].mxu1  ;;  %v1093_v0 = vpop.f32.mrb[31].mxu0 }
 0x132   :  { %v1094_v1 = vadd.f32 %v1093_v0, %v1092_v61  ;;  %v1157_v2 = vpop.f32.mrb[31].mxu1 }
 0x133   :  { %v1158_v3 = vadd.f32 %v1157_v2, %v1156_v63  ;;  %v812_v4 = vadd.f32 %v1155_v62, %v1091_v59 }
 0x135   :  { %v815_v5 = vadd.f32 %v1158_v3, %v1094_v1 }
 0x136   :  { %v1193_v8 = vpop.f32.mrb[32].mxu0 }
 0x137   :  { %v861_v9 = vadd.f32 %v1193_v8, %v1579_v42  ;;  %v1201_v10 = vpop.f32.mrb[32].mxu1  ;;  %v852_v11 = vpop.f32.mrb[33].mxu0 }
 0x138   :  { %v893_v12 = vadd.f32 %v1201_v10, %v796_v36  ;;  %v853_v13 = vadd.f32 %v852_v11, %v1575_v28  ;;  %v884_v14 = vpop.f32.mrb[33].mxu1  ;;  %v1194_v15 = vpop.f32.mrb[34].mxu0 }
 0x139   :  { %v885_v16 = vadd.f32 %v884_v14, %v788_v20  ;;  %v864_v17 = vadd.f32 %v1194_v15, %v1581_v43  ;;  %v1202_v18 = vpop.f32.mrb[34].mxu1  ;;  %v855_v19 = vpop.f32.mrb[35].mxu0  ;;  %933 = vst [vmem:[%s1649_s2 + $0x10] sm:$0xff] %v861_v9 }
 0x13a   :  { %v896_v22 = vadd.f32 %v1202_v18, %v799_v37  ;;  %v856_v23 = vadd.f32 %v855_v19, %v1577_v29  ;;  %v887_v24 = vpop.f32.mrb[35].mxu1  ;;  %941 = vst [vmem:[%s1649_s2 + $0x50] sm:$0xff] %v893_v12  ;;  %931 = vst [vmem:[%s1649_s2] sm:$0xff] %v853_v13 }
 0x13b   :  { %v888_v42 = vadd.f32 %v887_v24, %v791_v21  ;;  %939 = vst [vmem:[%s1649_s2 + $0x40] sm:$0xff] %v885_v16  ;;  %934 = vst [vmem:[%s1649_s2 + $0x18] sm:$0xff] %v864_v17 }
 0x13c   :  { %942 = vst [vmem:[%s1649_s2 + $0x58] sm:$0xff] %v896_v22  ;;  %932 = vst [vmem:[%s1649_s2 + $0x8] sm:$0xff] %v856_v23 }
 0x13d   :  { %940 = vst [vmem:[%s1649_s2 + $0x48] sm:$0xff] %v888_v42 }
 0x13e   :  { %v1197_v28 = vpop.f32.mrb[36].mxu0 }
 0x13f   :  { %v877_v29 = vadd.f32 %v1197_v28, %v1587_v6  ;;  %v1205_v43 = vpop.f32.mrb[36].mxu1  ;;  %v868_v20 = vpop.f32.mrb[37].mxu0 }
 0x140   :  { %v909_v21 = vadd.f32 %v1205_v43, %v812_v4  ;;  %v869_v25 = vadd.f32 %v868_v20, %v1583_v56  ;;  %v900_v26 = vpop.f32.mrb[37].mxu1  ;;  %v1198_v27 = vpop.f32.mrb[38].mxu0 }
 0x141   :  { %v901_v30 = vadd.f32 %v900_v26, %v804_v52  ;;  %v880_v31 = vadd.f32 %v1198_v27, %v1589_v7  ;;  %v1206_v32 = vpop.f32.mrb[38].mxu1  ;;  %v871_v33 = vpop.f32.mrb[39].mxu0  ;;  %937 = vst [vmem:[%s1649_s2 + $0x30] sm:$0xff] %v877_v29 }
 0x142   :  { %v912_v34 = vadd.f32 %v1206_v32, %v815_v5  ;;  %v872_v35 = vadd.f32 %v871_v33, %v1585_v57  ;;  %v903_v36 = vpop.f32.mrb[39].mxu1  ;;  %945 = vst [vmem:[%s1649_s2 + $0x70] sm:$0xff] %v909_v21  ;;  %935 = vst [vmem:[%s1649_s2 + $0x20] sm:$0xff] %v869_v25 }
 0x143   :  { %v904_v6 = vadd.f32 %v903_v36, %v807_v53  ;;  %943 = vst [vmem:[%s1649_s2 + $0x60] sm:$0xff] %v901_v30  ;;  %938 = vst [vmem:[%s1649_s2 + $0x38] sm:$0xff] %v880_v31 }
 0x144   :  { %946 = vst [vmem:[%s1649_s2 + $0x78] sm:$0xff] %v912_v34  ;;  %936 = vst [vmem:[%s1649_s2 + $0x28] sm:$0xff] %v872_v35 }
 0x145   :  { %944 = vst [vmem:[%s1649_s2 + $0x68] sm:$0xff] %v904_v6 }

// kernel: fpn1_forward.45
= control target key start
LH: loop header
LB: loop body
LE: loop exit
PB: predicated region body
PF: predicated region fallthrough
CT: control target
= control target key end

     0   :  { %s935_s1 = inlined_call_operand.vmem [shape: bf16[640,128], index: 1, kind: input, shape index: {}]   ;;  %s936_s0 = inlined_call_operand.vmem [shape: bf16[32,640], index: 0, kind: input, shape index: {}]   ;;  %s937_s2 = inlined_call_operand.vmem [shape: f32[32,128], index: 2, kind: output, shape index: {}]  }
   0x1   :  { %v704_v0 = vld [vmem:[%s935_s1 + $0x40] sm:$0xff]   ;;  %v708_v4 = vld [vmem:[%s935_s1 + $0x48] sm:$0xff]   ;;  %v712_v8 = vld [vmem:[%s935_s1 + $0x50] sm:$0xff]  }
   0x2   :  { %v705_v1 = vld [vmem:[%s935_s1 + $0xc0] sm:$0xff]   ;;  %617 = vmatprep.subr.bf16.mxu0 %v704_v0  ;;  %v709_v5 = vld [vmem:[%s935_s1 + $0xc8] sm:$0xff]   ;;  %v713_v9 = vld [vmem:[%s935_s1 + $0xd0] sm:$0xff]  }
   0x3   :  { %v706_v2 = vld [vmem:[%s935_s1] sm:$0xff]   ;;  %645 = vmatprep.subr.bf16.mxu1 %v705_v1  ;;  %v710_v6 = vld [vmem:[%s935_s1 + $0x8] sm:$0xff]   ;;  %v714_v10 = vld [vmem:[%s935_s1 + $0x10] sm:$0xff]  }
   0x4   :  { %v707_v3 = vld [vmem:[%s935_s1 + $0x80] sm:$0xff]   ;;  %618 = vmatpush3.bf16.msra.mxu0 %v706_v2  ;;  %v711_v7 = vld [vmem:[%s935_s1 + $0x88] sm:$0xff]   ;;  %v715_v11 = vld [vmem:[%s935_s1 + $0x90] sm:$0xff]  }
   0x5   :  { %646 = vmatpush3.bf16.msra.mxu1 %v707_v3  ;;  %619 = vmatprep.subr.bf16.mxu0 %v708_v4  ;;  %v716_v12 = vld [vmem:[%s935_s1 + $0x58] sm:$0xff]   ;;  %v720_v16 = vld [vmem:[%s935_s1 + $0x60] sm:$0xff]   ;;  %v724_v20 = vld [vmem:[%s935_s1 + $0x68] sm:$0xff]  }
   0x6   :  { %647 = vmatprep.subr.bf16.mxu1 %v709_v5  ;;  %v717_v13 = vld [vmem:[%s935_s1 + $0xd8] sm:$0xff]   ;;  %v721_v17 = vld [vmem:[%s935_s1 + $0xe0] sm:$0xff]   ;;  %v725_v21 = vld [vmem:[%s935_s1 + $0xe8] sm:$0xff]  }
   0x7   :  { %v718_v14 = vld [vmem:[%s935_s1 + $0x18] sm:$0xff]   ;;  %v722_v18 = vld [vmem:[%s935_s1 + $0x20] sm:$0xff]   ;;  %v726_v22 = vld [vmem:[%s935_s1 + $0x28] sm:$0xff]  }
   0x8   :  { %620 = vmatpush3.bf16.msra.mxu0 %v710_v6  ;;  %v719_v15 = vld [vmem:[%s935_s1 + $0x98] sm:$0xff]   ;;  %v723_v19 = vld [vmem:[%s935_s1 + $0xa0] sm:$0xff]   ;;  %v727_v23 = vld [vmem:[%s935_s1 + $0xa8] sm:$0xff]  }
   0x9   :  { %648 = vmatpush3.bf16.msra.mxu1 %v711_v7  ;;  %621 = vmatprep.subr.bf16.mxu0 %v712_v8  ;;  %v728_v24 = vld [vmem:[%s935_s1 + $0x70] sm:$0xff]   ;;  %v732_v28 = vld [vmem:[%s935_s1 + $0x78] sm:$0xff]   ;;  %v741_v35 = vld [vmem:[%s936_s0 + $0xc] ss:$20 sps:$4 sm:$0xff]  }
   0xa   :  { %649 = vmatprep.subr.bf16.mxu1 %v713_v9  ;;  %v729_v25 = vld [vmem:[%s935_s1 + $0xf0] sm:$0xff]   ;;  %v733_v29 = vld [vmem:[%s935_s1 + $0xf8] sm:$0xff]   ;;  %v742_v36 = vld [vmem:[%s935_s1 + $0x100] sm:$0xff]   ;;  %489 = vmatprep.mubr.bf16.mxu1 %v741_v35 }
   0xb   :  { %v730_v26 = vld [vmem:[%s935_s1 + $0x30] sm:$0xff]   ;;  %v734_v30 = vld [vmem:[%s935_s1 + $0x38] sm:$0xff]   ;;  %v743_v37 = vld [vmem:[%s935_s1 + $0x108] sm:$0xff]  }
   0xc   :  { %622 = vmatpush3.bf16.msra.mxu0 %v714_v10  ;;  %v731_v27 = vld [vmem:[%s935_s1 + $0xb0] sm:$0xff]   ;;  %v735_v31 = vld [vmem:[%s935_s1 + $0xb8] sm:$0xff]   ;;  %v747_v39 = vld [vmem:[%s936_s0 + $0x2c] ss:$20 sps:$4 sm:$0xff]  }
   0xd   :  { %650 = vmatpush3.bf16.msra.mxu1 %v715_v11  ;;  %623 = vmatprep.subr.bf16.mxu0 %v716_v12  ;;  %v736_v32 = vld [vmem:[%s936_s0] ss:$20 sps:$4 sm:$0xff]   ;;  %v738_v33 = vld [vmem:[%s936_s0 + $0x4] ss:$20 sps:$4 sm:$0xff]   ;;  %v739_v34 = vld [vmem:[%s936_s0 + $0x8] ss:$20 sps:$4 sm:$0xff]  }
   0xe   :  { %651 = vmatprep.subr.bf16.mxu1 %v717_v13  ;;  %440 = vmatprep.mubr.bf16.mxu0 %v738_v33  ;;  %v744_v38 = vld [vmem:[%s935_s1 + $0x110] sm:$0xff]   ;;  %v745_v41 = vld [vmem:[%s935_s1 + $0x118] sm:$0xff]   ;;  %v746_v45 = vld [vmem:[%s935_s1 + $0x120] sm:$0xff]  }
   0xf   :  { %v749_v40 = vld [vmem:[%s936_s0 + $0x34] ss:$20 sps:$4 sm:$0xff]   ;;  %v753_v43 = vld [vmem:[%s936_s0 + $0x30] ss:$20 sps:$4 sm:$0xff]   ;;  %v755_v48 = vld [vmem:[%s935_s1 + $0x138] sm:$0xff]  }
  0x10   :  { %624 = vmatpush3.bf16.msra.mxu0 %v718_v14  ;;  %v752_v42 = vld [vmem:[%s936_s0 + $0x28] ss:$20 sps:$4 sm:$0xff]   ;;  %v756_v44 = vld [vmem:[%s936_s0 + $0x10] ss:$20 sps:$4 sm:$0xff]   ;;  %v757_v49 = vld [vmem:[%s936_s0 + $0x38] ss:$20 sps:$4 sm:$0xff]  }
  0x11   :  { %652 = vmatpush3.bf16.msra.mxu1 %v719_v15  ;;  %625 = vmatprep.subr.bf16.mxu0 %v720_v16  ;;  %v751_v46 = vld [vmem:[%s935_s1 + $0x128] sm:$0xff]   ;;  %v754_v47 = vld [vmem:[%s935_s1 + $0x130] sm:$0xff]  }
  0x12   :  { %653 = vmatprep.subr.bf16.mxu1 %v721_v17 }
  0x14   :  { %626 = vmatpush3.bf16.msra.mxu0 %v722_v18 }
  0x15   :  { %654 = vmatpush3.bf16.msra.mxu1 %v723_v19  ;;  %627 = vmatprep.subr.bf16.mxu0 %v724_v20 }
  0x16   :  { %655 = vmatprep.subr.bf16.mxu1 %v725_v21 }
  0x18   :  { %628 = vmatpush3.bf16.msra.mxu0 %v726_v22 }
  0x19   :  { %656 = vmatpush3.bf16.msra.mxu1 %v727_v23  ;;  %629 = vmatprep.subr.bf16.mxu0 %v728_v24 }
  0x1a   :  { %657 = vmatprep.subr.bf16.mxu1 %v729_v25 }
  0x1c   :  { %630 = vmatpush3.bf16.msra.mxu0 %v730_v26 }
  0x1d   :  { %658 = vmatpush3.bf16.msra.mxu1 %v731_v27  ;;  %631 = vmatprep.subr.bf16.mxu0 %v732_v28 }
  0x1e   :  { %659 = vmatprep.subr.bf16.mxu1 %v733_v29 }
  0x20   :  { %632 = vmatpush3.bf16.msra.mxu0 %v734_v30 }
  0x21   :  { %660 = vmatpush3.bf16.msra.mxu1 %v735_v31  ;;  %683 = vmatprep.subr.bf16.mxu0 %v742_v36 }
  0x23   :  { %441 = vmatmul.mubr.bf16.vlgmr.msra.gmra.mrb[0].mxu0 %v736_v32 }
  0x24   :  { %490 = vmatmul.mubr.bf16.vlgmr.msra.gmra.mrb[0].mxu1 %v739_v34  ;;  %684 = vmatpush3.bf16.msra.mxu0 %v742_v36 }
  0x25   :  { %685 = vmatprep.subr.bf16.mxu0 %v743_v37  ;;  %448 = vmatprep.mubr.bf16.mxu0 %v747_v39 }
  0x26   :  { %497 = vmatprep.mubr.bf16.mxu1 %v749_v40 }
  0x28   :  { %686 = vmatpush3.bf16.msra.mxu0 %v743_v37 }
  0x29   :  { %687 = vmatprep.subr.bf16.mxu0 %v744_v38 }
  0x2b   :  { %449 = vmatmul.mubr.bf16.gmra.mrb[4].mxu0 %v752_v42 }
  0x2c   :  { %498 = vmatmul.mubr.bf16.gmra.mrb[4].mxu1 %v753_v43  ;;  %688 = vmatpush3.bf16.msra.mxu0 %v744_v38 }
  0x2d   :  { %689 = vmatprep.subr.bf16.mxu0 %v745_v41  ;;  %699 = vmatprep.mubr.bf16.mxu0 %v756_v44 }
  0x30   :  { %690 = vmatpush3.bf16.msra.mxu0 %v745_v41 }
  0x31   :  { %691 = vmatprep.subr.bf16.mxu0 %v746_v45 }
  0x34   :  { %692 = vmatpush3.bf16.msra.mxu0 %v746_v45 }
  0x35   :  { %693 = vmatprep.subr.bf16.mxu0 %v751_v46 }
  0x38   :  { %694 = vmatpush3.bf16.msra.mxu0 %v751_v46 }
  0x39   :  { %695 = vmatprep.subr.bf16.mxu0 %v754_v47 }
  0x3c   :  { %696 = vmatpush3.bf16.msra.mxu0 %v754_v47 }
  0x3d   :  { %697 = vmatprep.subr.bf16.mxu0 %v755_v48 }
  0x40   :  { %698 = vmatpush3.bf16.msra.mxu0 %v755_v48 }
  0x43   :  { %700 = vmatmul.mubr.bf16.vlgmr.msra.gmra.mrb[8].mxu0 %v757_v49 }
  0xf6   :  { %v633_v50 = vpop.f32.mrb[0].mxu0 }
  0xf7   :  { %v661_v51 = vpop.f32.mrb[0].mxu1  ;;  %v634_v52 = vpop.f32.mrb[1].mxu0 }
  0xf8   :  { %v635_v53 = vadd.f32 %v634_v52, %v633_v50  ;;  %v662_v54 = vpop.f32.mrb[1].mxu1  ;;  %v636_v55 = vpop.f32.mrb[2].mxu0 }
  0xf9   :  { %v663_v56 = vadd.f32 %v662_v54, %v661_v51  ;;  %v664_v57 = vpop.f32.mrb[2].mxu1  ;;  %v637_v58 = vpop.f32.mrb[3].mxu0 }
  0xfa   :  { %v638_v59 = vadd.f32 %v637_v58, %v636_v55  ;;  %v665_v60 = vpop.f32.mrb[3].mxu1 }
  0xfb   :  { %v666_v61 = vadd.f32 %v665_v60, %v664_v57  ;;  %v492_v62 = vadd.f32 %v663_v56, %v635_v53 }
  0xfd   :  { %v495_v63 = vadd.f32 %v666_v61, %v638_v59 }
  0xfe   :  { %v639_v0 = vpop.f32.mrb[4].mxu0 }
  0xff   :  { %v667_v1 = vpop.f32.mrb[4].mxu1  ;;  %v640_v2 = vpop.f32.mrb[5].mxu0 }
 0x100   :  { %v641_v3 = vadd.f32 %v640_v2, %v639_v0  ;;  %v668_v4 = vpop.f32.mrb[5].mxu1  ;;  %v642_v5 = vpop.f32.mrb[6].mxu0 }
 0x101   :  { %v669_v6 = vadd.f32 %v668_v4, %v667_v1  ;;  %v670_v7 = vpop.f32.mrb[6].mxu1  ;;  %v643_v8 = vpop.f32.mrb[7].mxu0 }
 0x102   :  { %v644_v9 = vadd.f32 %v643_v8, %v642_v5  ;;  %v671_v10 = vpop.f32.mrb[7].mxu1 }
 0x103   :  { %v672_v11 = vadd.f32 %v671_v10, %v670_v7  ;;  %v500_v12 = vadd.f32 %v669_v6, %v641_v3 }
 0x105   :  { %v503_v13 = vadd.f32 %v672_v11, %v644_v9 }
 0x116   :  { %v701_v14 = vpop.f32.mrb[8].mxu0 }
 0x117   :  { %v549_v15 = vadd.f32 %v701_v14, %v500_v12  ;;  %v540_v16 = vpop.f32.mrb[9].mxu0 }
 0x118   :  { %v541_v17 = vadd.f32 %v540_v16, %v492_v62  ;;  %v702_v18 = vpop.f32.mrb[10].mxu0 }
 0x119   :  { %v552_v19 = vadd.f32 %v702_v18, %v503_v13  ;;  %v543_v20 = vpop.f32.mrb[11].mxu0  ;;  %561 = vst [vmem:[%s937_s2 + $0x10] sm:$0xff] %v549_v15 }
 0x11a   :  { %v544_v21 = vadd.f32 %v543_v20, %v495_v63  ;;  %559 = vst [vmem:[%s937_s2] sm:$0xff] %v541_v17 }
 0x11b   :  { %562 = vst [vmem:[%s937_s2 + $0x18] sm:$0xff] %v552_v19 }
 0x11c   :  { %560 = vst [vmem:[%s937_s2 + $0x8] sm:$0xff] %v544_v21 }

// kernel: fpn1_forward.44
= control target key start
LH: loop header
LB: loop body
LE: loop exit
PB: predicated region body
PF: predicated region fallthrough
CT: control target
= control target key end

     0   :  { %v686_v39 = vmov 0.0   ;;  %vm687_vm0 = vmmov 0   ;;  %s845_s0 = inlined_call_operand.vmem [shape: bf16[8,640], index: 0, kind: input, shape index: {}]   ;;  %s846_s1 = inlined_call_operand.vmem [shape: bf16[640,128], index: 1, kind: input, shape index: {}]   ;;  %s847_s2 = inlined_call_operand.hbm [shape: f32[8,128], index: 2, kind: output, shape index: {}]  }
   0x1   :  { %v617_v0 = vld [vmem:[%s846_s1 + $0x40] sm:$0xff]   ;;  %v621_v4 = vld [vmem:[%s846_s1 + $0x48] sm:$0xff]   ;;  %v625_v8 = vld [vmem:[%s846_s1 + $0x50] sm:$0xff]  }
   0x2   :  { %v618_v1 = vld [vmem:[%s846_s1 + $0xc0] sm:$0xff]   ;;  %541 = vmatprep.subr.bf16.mxu0 %v617_v0  ;;  %v622_v5 = vld [vmem:[%s846_s1 + $0xc8] sm:$0xff]   ;;  %v626_v9 = vld [vmem:[%s846_s1 + $0xd0] sm:$0xff]  }
   0x3   :  { %v619_v2 = vld [vmem:[%s846_s1] sm:$0xff]   ;;  %563 = vmatprep.subr.bf16.mxu1 %v618_v1  ;;  %v623_v6 = vld [vmem:[%s846_s1 + $0x8] sm:$0xff]   ;;  %v627_v10 = vld [vmem:[%s846_s1 + $0x10] sm:$0xff]  }
   0x4   :  { %v620_v3 = vld [vmem:[%s846_s1 + $0x80] sm:$0xff]   ;;  %542 = vmatpush3.bf16.msra.mxu0 %v619_v2  ;;  %v624_v7 = vld [vmem:[%s846_s1 + $0x88] sm:$0xff]   ;;  %v628_v11 = vld [vmem:[%s846_s1 + $0x90] sm:$0xff]  }
   0x5   :  { %564 = vmatpush3.bf16.msra.mxu1 %v620_v3  ;;  %543 = vmatprep.subr.bf16.mxu0 %v621_v4  ;;  %v629_v12 = vld [vmem:[%s846_s1 + $0x58] sm:$0xff]   ;;  %v633_v16 = vld [vmem:[%s846_s1 + $0x60] sm:$0xff]   ;;  %v637_v20 = vld [vmem:[%s846_s1 + $0x68] sm:$0xff]  }
   0x6   :  { %565 = vmatprep.subr.bf16.mxu1 %v622_v5  ;;  %v630_v13 = vld [vmem:[%s846_s1 + $0xd8] sm:$0xff]   ;;  %v634_v17 = vld [vmem:[%s846_s1 + $0xe0] sm:$0xff]   ;;  %v638_v21 = vld [vmem:[%s846_s1 + $0xe8] sm:$0xff]  }
   0x7   :  { %v631_v14 = vld [vmem:[%s846_s1 + $0x18] sm:$0xff]   ;;  %v635_v18 = vld [vmem:[%s846_s1 + $0x20] sm:$0xff]   ;;  %v639_v22 = vld [vmem:[%s846_s1 + $0x28] sm:$0xff]  }
   0x8   :  { %544 = vmatpush3.bf16.msra.mxu0 %v623_v6  ;;  %v632_v15 = vld [vmem:[%s846_s1 + $0x98] sm:$0xff]   ;;  %v636_v19 = vld [vmem:[%s846_s1 + $0xa0] sm:$0xff]   ;;  %v640_v23 = vld [vmem:[%s846_s1 + $0xa8] sm:$0xff]  }
   0x9   :  { %566 = vmatpush3.bf16.msra.mxu1 %v624_v7  ;;  %545 = vmatprep.subr.bf16.mxu0 %v625_v8  ;;  %v641_v24 = vld [vmem:[%s846_s1 + $0x70] sm:$0xff]   ;;  %v645_v28 = vld [vmem:[%s846_s1 + $0x78] sm:$0xff]   ;;  %v19_v32 = vld [vmem:[%s845_s0] sm:$0xff] }
   0xa   :  { %567 = vmatprep.subr.bf16.mxu1 %v626_v9  ;;  %v642_v25 = vld [vmem:[%s846_s1 + $0xf0] sm:$0xff]   ;;  %v646_v29 = vld [vmem:[%s846_s1 + $0xf8] sm:$0xff]   ;;  %v20_v33 = vld [vmem:[%s845_s0 + $0x8] sm:$0xff]  ;;  %v496_v34 = vcombine.low %v19_v32, %v19_v32  ;;  %v497_v35 = vcombine.high %v19_v32, %v19_v32 }
   0xb   :  { %v643_v26 = vld [vmem:[%s846_s1 + $0x30] sm:$0xff]   ;;  %v647_v30 = vld [vmem:[%s846_s1 + $0x38] sm:$0xff]   ;;  %v498_v36 = vcombine.low %v20_v33, %v20_v33  ;;  %v499_v37 = vcombine.high %v20_v33, %v20_v33  ;;  %v653_v38 = vld [vmem:[%s846_s1 + $0x100] sm:$0xff]  }
   0xc   :  { %546 = vmatpush3.bf16.msra.mxu0 %v627_v10  ;;  %v644_v27 = vld [vmem:[%s846_s1 + $0xb0] sm:$0xff]   ;;  %v648_v31 = vld [vmem:[%s846_s1 + $0xb8] sm:$0xff]   ;;  %392 = vmatprep.mubr.bf16.mxu0 %v497_v35  ;;  %v654_v40 = vld [vmem:[%s846_s1 + $0x108] sm:$0xff]  }
   0xd   :  { %568 = vmatpush3.bf16.msra.mxu1 %v628_v11  ;;  %547 = vmatprep.subr.bf16.mxu0 %v629_v12  ;;  %v655_v41 = vld [vmem:[%s846_s1 + $0x110] sm:$0xff]  }
   0xe   :  { %569 = vmatprep.subr.bf16.mxu1 %v630_v13  ;;  %432 = vmatprep.mubr.bf16.mxu1 %v499_v37 }
  0x10   :  { %548 = vmatpush3.bf16.msra.mxu0 %v631_v14 }
  0x11   :  { %570 = vmatpush3.bf16.msra.mxu1 %v632_v15  ;;  %549 = vmatprep.subr.bf16.mxu0 %v633_v16 }
  0x12   :  { %571 = vmatprep.subr.bf16.mxu1 %v634_v17 }
  0x14   :  { %550 = vmatpush3.bf16.msra.mxu0 %v635_v18 }
  0x15   :  { %572 = vmatpush3.bf16.msra.mxu1 %v636_v19  ;;  %551 = vmatprep.subr.bf16.mxu0 %v637_v20 }
  0x16   :  { %573 = vmatprep.subr.bf16.mxu1 %v638_v21 }
  0x18   :  { %552 = vmatpush3.bf16.msra.mxu0 %v639_v22 }
  0x19   :  { %574 = vmatpush3.bf16.msra.mxu1 %v640_v23  ;;  %553 = vmatprep.subr.bf16.mxu0 %v641_v24 }
  0x1a   :  { %575 = vmatprep.subr.bf16.mxu1 %v642_v25 }
  0x1c   :  { %554 = vmatpush3.bf16.msra.mxu0 %v643_v26 }
  0x1d   :  { %576 = vmatpush3.bf16.msra.mxu1 %v644_v27  ;;  %555 = vmatprep.subr.bf16.mxu0 %v645_v28 }
  0x1e   :  { %577 = vmatprep.subr.bf16.mxu1 %v646_v29 }
  0x20   :  { %556 = vmatpush3.bf16.msra.mxu0 %v647_v30 }
  0x21   :  { %578 = vmatpush3.bf16.msra.mxu1 %v648_v31  ;;  %594 = vmatprep.subr.bf16.mxu0 %v686_v39 }
  0x23   :  { %393 = vmatmul.mubr.bf16.vlgmr.msra.gmra.mrb[0].mxu0 %v496_v34 }
  0x24   :  { %433 = vmatmul.mubr.bf16.vlgmr.msra.gmra.mrb[0].mxu1 %v498_v36  ;;  %595 = vmatpush3.bf16.msra.mxu0 %v653_v38 }
  0x25   :  { %610 = vmatprep.mubr.msk.bf16.mxu0 %vm687_vm0, %v686_v39  ;;  %596 = vmatprep.subr.bf16.mxu0 %v686_v39 }
  0x28   :  { %597 = vmatpush3.bf16.msra.mxu0 %v654_v40 }
  0x29   :  { %7 = vsyncpa [#allocation3], 0  ;;  %598 = vmatprep.subr.bf16.mxu0 %v686_v39  ;;  %v656_v42 = vld [vmem:[%s846_s1 + $0x118] sm:$0xff]   ;;  %v657_v43 = vld [vmem:[%s846_s1 + $0x120] sm:$0xff]  }
  0x2a   :  { %v658_v44 = vld [vmem:[%s846_s1 + $0x128] sm:$0xff]   ;;  %v659_v45 = vld [vmem:[%s846_s1 + $0x130] sm:$0xff]   ;;  %v660_v46 = vld [vmem:[%s846_s1 + $0x138] sm:$0xff]   ;;  %s688_s1 = smov [#allocation2]  }
  0x2b   :  { %v661_v47 = vld [vmem:[%s845_s0 + $0x10] ss:$0 sps:$4 sm:$0xff]   ;;  %s488_s11 = sshll.u32 %s688_s1, 4  ;;  %s489_s11 = int_to_ptr.vmem [resolvable:$true] %s488_s11 }
  0x2c   :  { %599 = vmatpush3.bf16.msra.mxu0 %v655_v41  ;;  %s662_s0 = scalar_lea.vmem %s489_s11, 128  ;;  %p667_p1 = scmp.lt.s32.totalorder %s489_s11, %s489_s11 }
  0x2d   :  { %600 = vmatprep.subr.bf16.mxu0 %v686_v39  ;;  %p663_p0 = scmp.ne.s32.totalorder %s489_s11, %s662_s0  ;;  %p668_p2 = scmp.lt.s32.totalorder %s662_s0, %s662_s0 }
  0x2f   :  { %p669_p3 = por %p668_p2, %p667_p1 }
  0x30   :  { %601 = vmatpush3.bf16.msra.mxu0 %v656_v42 }
  0x31   :  { %602 = vmatprep.subr.bf16.mxu0 %v686_v39  ;;  %p670_p4 = pnand %p669_p3, %p663_p0 }
  0x34   :  { %603 = vmatpush3.bf16.msra.mxu0 %v657_v43 }
  0x35   :  { %604 = vmatprep.subr.bf16.mxu0 %v686_v39 }
  0x38   :  { %605 = vmatpush3.bf16.msra.mxu0 %v658_v44 }
  0x39   :  { %606 = vmatprep.subr.bf16.mxu0 %v686_v39 }
  0x3c   :  { %607 = vmatpush3.bf16.msra.mxu0 %v659_v45 }
  0x3d   :  { %608 = vmatprep.subr.bf16.mxu0 %v686_v39 }
  0x40   :  { %609 = vmatpush3.bf16.msra.mxu0 %v660_v46 }
  0x43   :  { %611 = vmatmul.mubr.bf16.vlgmr.msra.gmra.mrb[4].mxu0 %v661_v47 }
  0xf6   :  { %v557_v48 = vpop.f32.mrb[0].mxu0 }
  0xf7   :  { %v579_v49 = vpop.f32.mrb[0].mxu1  ;;  %v558_v50 = vpop.f32.mrb[1].mxu0 }
  0xf8   :  { %v580_v51 = vpop.f32.mrb[1].mxu1  ;;  %v559_v52 = vadd.f32 %v558_v50, %v557_v48  ;;  %v560_v54 = vpop.f32.mrb[2].mxu0 }
  0xf9   :  { %v581_v53 = vadd.f32 %v580_v51, %v579_v49  ;;  %v582_v55 = vpop.f32.mrb[2].mxu1  ;;  %v561_v56 = vpop.f32.mrb[3].mxu0 }
  0xfa   :  { %v583_v57 = vpop.f32.mrb[3].mxu1 }
  0xfb   :  { %v435_v58 = vadd.f32 %v581_v53, %v559_v52 }
 0x116   :  { %v474_v59 = vpop.f32.mrb[4].mxu0 }
 0x117   :  { %v475_v60 = vadd.f32 %v474_v59, %v435_v58  ;;  %v612_v61 = vpop.f32.mrb[5].mxu0 }
 0x118   :  { %v477_v62 = vpop.f32.mrb[6].mxu0 }
 0x119   :  { %v613_v63 = vpop.f32.mrb[7].mxu0  ;;  %481 = vst [vmem:[#allocation2] sm:$0xff] %v475_v60 }
 0x11a   :  { %673 = shalt.err (!%p670_p4)
}
 0x11b   :  { %s674_s14 = scalar_lea.hbm %s847_s2, 128 }
 0x11c   :  { %p675_p5 = scmp.ne.s32.totalorder %s847_s2, %s674_s14  ;;  %p678_p6 = scmp.lt.u32.totalorder %s674_s14, %s847_s2 }
 0x11e   :  { %p680_p7 = pnand %p678_p6, %p675_p5 }
 0x120   :  { %683 = shalt.err (!%p680_p7)
}
 0x121   :  { %491 = dma.vmem_to_hbm [thread:$0]  %s489_s11, 128, %s847_s2, [#allocation3]  }
 0x122   :  { %684 = dma.done.wait [#allocation3], 128  }
 0x123   :  { %685 = vsyncadd [#allocation3], 4294967168 }
 0x124   :  { %495 = vsyncpa [#allocation3], 1 }

</bundles_post_ra>
